<compile_context>
chip_gen: v5e
topology: v5e:2x2
jax: 0.10.0
libtpu: 0.0.40
codegen_flags: <defaults>
</compile_context>

<pallas_src>
import numpy as np
import jax
import jax.numpy as jnp
from jax.experimental import pallas as pl
from jax.experimental.pallas import tpu as pltpu

K_NEIGHBORS = 16
GN_EPS = 1e-5
NEG_SLOPE = 0.2
NUM_LABELS = 7       # input has 10 channels = 3 xyz + 7 one-hot label channels
GROUPS = 4
CPAD = 128           # lane-dense padded channel width for every edge-layer output


# ----------------------------- Pallas fused edge kernel -----------------------------

def _group_allreduce(v, cg):
    """v: (1, C) f32.  Every lane gets the sum of its aligned, contiguous cg-sized chunk
    (cg a power of two dividing C).  log2(cg) roll+select butterfly: XLU/VPU only."""
    C = v.shape[-1]
    lane = jax.lax.broadcasted_iota(jnp.int32, (1, C), 1)
    s = 1
    while s < cg:
        fwd = pltpu.roll(v, shift=C - s, axis=1)   # fwd[c] = v[(c + s) % C]
        bwd = pltpu.roll(v, shift=s, axis=1)       # bwd[c] = v[(c - s) % C]
        v = v + jnp.where((lane & s) == 0, fwd, bwd)
        s *= 2
    return v


def _make_edge_kernel(cg, inv_cnt):
    def kernel(xkg_ref, xq_ref, m_ref, wd_ref, wc_ref, g_ref, b_ref, o_ref,
               sum_ref, sumsq_ref, ymax_ref, ymin_ref):
        # xkg: (TN, K, Cin_k) bf16  gathered neighbour features (real channel slab, unmasked)
        # xq : (TN, Cin_q)    bf16  per-point features
        # m  : (TN, 1)        f32   query-row validity mask (applied to y in-kernel)
        # wd : (Cin_k, C)     bf16  "diff" weights
        # wc : (Cin_q, C)     bf16  "center - diff" weights (+ folded bias row for stage 1)
        # g,b: (1, C)         f32   GroupNorm affine (zero past the real Cout)
        # o  : (Nq, C)              written once on the last N-tile
        t = pl.program_id(1)
        TN, K, _ = xkg_ref.shape
        C = wd_ref.shape[-1]

        @pl.when(t == 0)
        def _():
            sum_ref[...] = jnp.zeros_like(sum_ref)
            sumsq_ref[...] = jnp.zeros_like(sumsq_ref)

        # conv1x1 on this N-tile.  K=16 is a multiple of the bf16 (16) / f32 (8) sublane
        # packs, so the (TN,K,*) <-> (TN*K,*) reshapes are layout-free.
        xkg = xkg_ref[...].reshape(TN * K, xkg_ref.shape[-1])
        yk = jnp.dot(xkg, wd_ref[...], preferred_element_type=jnp.float32).reshape(TN, K, C)
        yq = jnp.dot(xq_ref[...], wc_ref[...], preferred_element_type=jnp.float32)  # (TN, C)
        y = (yk + yq[:, None, :]) * m_ref[...][:, None, :]   # mask invalid query rows -> 0

        # one-pass GroupNorm statistics (accumulated across N-tiles in VMEM scratch)
        yf = y.reshape(TN * K, C)
        sum_ref[...] += jnp.sum(yf, axis=0, keepdims=True)
        sumsq_ref[...] += jnp.sum(yf * yf, axis=0, keepdims=True)

        # running per-(n, c) extrema over K (disjoint tile regions of the scratch)
        off = pl.multiple_of(t * TN, 8)
        ymax_ref[pl.ds(off, TN), :] = jnp.max(y, axis=1)
        ymin_ref[pl.ds(off, TN), :] = jnp.min(y, axis=1)

        @pl.when(t == pl.num_programs(1) - 1)
        def _():
            mean = _group_allreduce(sum_ref[...], cg) * inv_cnt
            ex2 = _group_allreduce(sumsq_ref[...], cg) * inv_cnt
            var = jnp.maximum(ex2 - mean * mean, 0.0)            # clamp: pad groups stay 0
            scale = jax.lax.rsqrt(var + GN_EPS) * g_ref[...]     # (1, C)
            shift = b_ref[...] - mean * scale
            # GroupNorm affine is monotone per channel; sign(gamma) picks whether the K-max
            # of the normalized value comes from the running max or min of the raw output.
            y_ext = jnp.where(scale >= 0.0, ymax_ref[...], ymin_ref[...])  # (Nq, C)
            yn = y_ext * scale + shift
            act = jnp.where(yn > 0, yn, NEG_SLOPE * yn)          # LeakyReLU on K-reduced slab
            o_ref[...] = act.astype(o_ref.dtype)
    return kernel


def _pick_tile(nq):
    """Largest N-tile <= 512 that divides Nq (keeps the xkg tile around 2-4 MiB)."""
    if nq <= 512:
        return nq
    for tn in (512, 256, 128, 64, 32, 16, 8):
        if nq % tn == 0:
            return tn
    return nq


def edge_layer(x_kg, x_q, msk, wd, wc, gamma, beta, *, cg, out_dtype=jnp.bfloat16):
    B, Nq, K, Cink = x_kg.shape
    Cinq = x_q.shape[-1]
    C = wd.shape[-1]
    # K must stay a multiple of the bf16 sublane pack so the in-kernel reshape is free.
    assert K % 16 == 0, "K_NEIGHBORS must be a multiple of 16"
    tn = _pick_tile(Nq)
    nt = Nq // tn

    out_bytes = B * Nq * C * (4 if out_dtype == jnp.float32 else 2)
    cost = pl.CostEstimate(
        flops=2 * B * Nq * K * Cink * C + 2 * B * Nq * Cinq * C,
        transcendentals=0,
        bytes_accessed=int(x_kg.size * x_kg.dtype.itemsize + x_q.size * x_q.dtype.itemsize
                           + msk.size * msk.dtype.itemsize + out_bytes))

    # Per-step working set: double-buffered bf16 inputs + a few f32 (tn*K, C) temporaries +
    # the (Nq, C) scratch.  Only raise the scoped-VMEM limit when the default would be tight
    # (and cap below v7x's 64 MiB physical VMEM).
    work_bytes = (2 * (tn * K * Cink + tn * Cinq) * x_kg.dtype.itemsize
                  + 4 * tn * K * C * 4 + 2 * Nq * C * 4 + (2 << 20))
    vmem_limit = None
    if work_bytes > (16 << 20):
        vmem_limit = min(int(work_bytes * 1.5), 48 << 20)

    return pl.pallas_call(
        _make_edge_kernel(cg, 1.0 / float(Nq * K * cg)),
        out_shape=jax.ShapeDtypeStruct((B, Nq, C), out_dtype),
        grid=(B, nt),
        in_specs=[
            # xkg is the dominant HBM stream; pipeline_mode=pl.Buffered(3) is the next knob
            # to try if its per-tile DMA is still exposed after tiling.
            pl.BlockSpec((None, tn, K, Cink), lambda b, t: (b, t, 0, 0)),
            pl.BlockSpec((None, tn, Cinq), lambda b, t: (b, t, 0)),
            pl.BlockSpec((None, tn, 1), lambda b, t: (b, t, 0)),
            pl.BlockSpec((Cink, C), lambda b, t: (0, 0)),
            pl.BlockSpec((Cinq, C), lambda b, t: (0, 0)),
            pl.BlockSpec((1, C), lambda b, t: (0, 0)),
            pl.BlockSpec((1, C), lambda b, t: (0, 0)),
        ],
        out_specs=pl.BlockSpec((None, Nq, C), lambda b, t: (b, 0, 0)),
        scratch_shapes=[
            pltpu.VMEM((1, C), jnp.float32),      # per-group sum accumulator
            pltpu.VMEM((1, C), jnp.float32),      # per-group sum-of-squares accumulator
            pltpu.VMEM((Nq, C), jnp.float32),     # running max over K
            pltpu.VMEM((Nq, C), jnp.float32),     # running min over K
        ],
        compiler_params=pltpu.CompilerParams(
            dimension_semantics=("parallel", "arbitrary"),
            vmem_limit_bytes=vmem_limit),
        cost_estimate=cost,
    )(x_kg, x_q, msk, wd, wc, gamma, beta)


def edge_layer_jax_ref(x_kg, x_q, msk, wd, wc, gamma, beta, *, cg, out_dtype=jnp.bfloat16):
    """Pure-JAX reference of the fused edge layer at matched (bf16 operand) precision."""
    B, N, K, _ = x_kg.shape
    C = wd.shape[-1]
    yk = jnp.einsum("bnkc,cd->bnkd", x_kg, wd, preferred_element_type=jnp.float32)
    yq = jnp.einsum("bnc,cd->bnd", x_q, wc, preferred_element_type=jnp.float32)
    y = (yk + yq[:, :, None, :]) * msk[:, :, :, None]
    yg = y.reshape(B, N, K, C // cg, cg)
    mean = yg.mean(axis=(1, 2, 4), keepdims=True)
    var = jnp.maximum((yg * yg).mean(axis=(1, 2, 4), keepdims=True) - mean * mean, 0.0)
    yn = ((yg - mean) * jax.lax.rsqrt(var + GN_EPS)).reshape(B, N, K, C)
    yn = yn * gamma[0] + beta[0]
    act = jnp.where(yn > 0, yn, NEG_SLOPE * yn)
    return jnp.max(act, axis=2).astype(out_dtype)


# ----------------------------- parameter preparation -----------------------------

def init_params(key):
    ks = jax.random.split(key, 14)

    def w(k, shape, scale=0.1):
        return (scale * jax.random.normal(k, shape)).astype(jnp.float32)

    p = {}
    p["w_in"] = w(ks[0], (10, 10));   p["b_in"] = w(ks[1], (1, 10))
    p["w1"] = w(ks[2], (20, 32));     p["g1"] = 1.0 + w(ks[3], (1, 32));   p["bb1"] = w(ks[4], (1, 32))
    p["w2"] = w(ks[5], (64, 64));     p["g2"] = 1.0 + w(ks[6], (1, 64));   p["bb2"] = w(ks[7], (1, 64))
    p["w3"] = w(ks[8], (128, 64));    p["g3"] = 1.0 + w(ks[9], (1, 64));   p["bb3"] = w(ks[10], (1, 64))
    p["w4"] = w(ks[11], (128, 128));  p["g4"] = 1.0 + w(ks[12], (1, 128)); p["bb4"] = w(ks[13], (1, 128))
    return p


def prepare_params(params):
    """Fold input_trans into layer-1, split W into diff / (center - diff).
    Output channels are padded to 128 lanes; contraction rows stay at the REAL Cin."""
    def pad_out(w):
        cin, cout = w.shape
        out = np.zeros((cin, CPAD), np.float32); out[:, :cout] = w; return out

    def pad_vec(v):
        out = np.zeros((1, CPAD), np.float32); out[:, :v.shape[1]] = v; return out

    w_in = np.asarray(params["w_in"], np.float32)      # (10, 10)  used as x_cl @ w_in
    b_in = np.asarray(params["b_in"], np.float32)      # (1, 10)

    prep = {}
    # layer 1 (input_trans folded; bias carried via an appended constant-1 input channel)
    w1 = np.asarray(params["w1"], np.float32)          # (20, 32): rows 0..9 diff, 10..19 center
    wd1 = w_in @ w1[:10]                               # (10, 32)
    wc1 = w_in @ (w1[10:] - w1[:10])                   # (10, 32)
    bias1 = b_in @ w1[10:]                             # (1, 32)
    wd1a = np.concatenate([wd1, np.zeros((1, 32), np.float32)], axis=0)   # (11, 32)
    wc1a = np.concatenate([wc1, bias1], axis=0)                            # (11, 32)
    prep["wd1"] = jnp.asarray(pad_out(wd1a), jnp.bfloat16)
    prep["wc1"] = jnp.asarray(pad_out(wc1a), jnp.bfloat16)
    prep["g1"] = jnp.asarray(pad_vec(np.asarray(params["g1"], np.float32)))
    prep["b1"] = jnp.asarray(pad_vec(np.asarray(params["bb1"], np.float32)))

    # layers 2..4 (bias-free convs); real Cin, 128-lane padded Cout
    for li, (wk, gk, bk, cprev) in enumerate(
            [("w2", "g2", "bb2", 32), ("w3", "g3", "bb3", 64), ("w4", "g4", "bb4", 64)], start=2):
        W = np.asarray(params[wk], np.float32)         # (2*cprev, Cout)
        wd = W[:cprev]
        wc = W[cprev:] - W[:cprev]
        prep[f"wd{li}"] = jnp.asarray(pad_out(wd), jnp.bfloat16)
        prep[f"wc{li}"] = jnp.asarray(pad_out(wc), jnp.bfloat16)
        prep[f"g{li}"] = jnp.asarray(pad_vec(np.asarray(params[gk], np.float32)))
        prep[f"b{li}"] = jnp.asarray(pad_vec(np.asarray(params[bk], np.float32)))
    return prep


# ----------------------------- on-device forward (single jit) -----------------------------

@jax.jit
def device_forward(x, prep, idxs, msks, fps1, fps2):
    B, _, N = x.shape
    x_cl = jnp.transpose(x, (0, 2, 1))                                        # (B, N, 10)
    xa = jnp.concatenate([x_cl, jnp.ones((B, N, 1), x.dtype)], axis=-1).astype(jnp.bfloat16)

    def gat(f, i):                                                            # row gather (XLA)
        return jax.vmap(lambda fb, ib: fb[ib])(f, i)

    def stage(feats_k, feats_q, idx, msk, wd, wc, g, b, cg, out_dtype=jnp.bfloat16):
        xkg = gat(feats_k, idx)                            # (B, Nq, K, Creal) -- real slab only
        m = msk[..., None].astype(jnp.float32)             # mask applied inside the kernel
        return edge_layer(xkg, feats_q, m, wd, wc, g, b, cg=cg, out_dtype=out_dtype)

    f1 = stage(xa, xa, idxs[0], msks[0],
               prep["wd1"], prep["wc1"], prep["g1"], prep["b1"], 8)[..., :32]
    fq1 = gat(f1, fps1)
    f2 = stage(f1, fq1, idxs[1], msks[1],
               prep["wd2"], prep["wc2"], prep["g2"], prep["b2"], 16)[..., :64]
    f3 = stage(f2, f2, idxs[2], msks[2],
               prep["wd3"], prep["wc3"], prep["g3"], prep["b3"], 16)[..., :64]
    fq3 = gat(f3, fps2)
    f4 = stage(f3, fq3, idxs[3], msks[3],
               prep["wd4"], prep["wc4"], prep["g4"], prep["b4"], 32, out_dtype=jnp.float32)

    coor1 = gat(x_cl, fps1)
    coor2 = gat(coor1, fps2)
    return jnp.transpose(coor2, (0, 2, 1)), jnp.transpose(f4, (0, 2, 1))


# ----------------------------- host-side index precompute -----------------------------

def knn_label_idx_np(coor_q, coor_k, k=K_NEIGHBORS):
    """Label-masked KNN.  Returns global index table (B, Nq, k) int32 and validity mask (B, Nq)."""
    B, _, Nq = coor_q.shape
    idx = np.zeros((B, Nq, k), dtype=np.int32)
    mask = np.zeros((B, Nq), dtype=np.float32)
    labels_q = coor_q[:, 3:, :]
    labels_k = coor_k[:, 3:, :]
    for b in range(B):
        active = np.where(np.any(labels_q[b] != 0, axis=1))[0]
        for label in active:
            mq = labels_q[b][label] != 0
            mk = labels_k[b][label] != 0
            cq = coor_q[b][:3][:, mq]                                     # (3, nq)
            ck = coor_k[b][:3][:, mk]                                     # (3, nk)
            nk_l, nq_l = ck.shape[1], cq.shape[1]
            k_glob = np.where(mk)[0]
            if nk_l >= k:
                d2 = np.sum((cq[:, None, :] - ck[:, :, None]) ** 2, axis=0)   # (nk, nq)
                idx_knn = np.argsort(d2, axis=0, kind="stable")[:k, :]        # (k, nq)
            else:
                rep = k // nk_l + 1
                ii = np.tile(np.arange(nk_l), rep)[:k]
                idx_knn = np.repeat(ii[:, None], nq_l, axis=1)
            idx[b][mq, :] = k_glob[idx_knn].T
            mask[b][mq] = 1.0
    return idx, mask


def _fps_np(xyz, npoint):
    n = xyz.shape[0]
    out = np.zeros(npoint, dtype=np.int64)
    dist = np.full(n, 1e10, dtype=np.float64)
    far = 0
    for i in range(npoint):
        out[i] = far
        d = np.sum((xyz - xyz[far]) ** 2, axis=1)
        dist = np.minimum(dist, d)
        far = int(np.argmax(dist))
    return out


def fps_label_idx_np(coor, num):
    """Label-stratified FPS indices (B, num) int32; depends only on coords + labels."""
    B = coor.shape[0]
    pc_label = coor.transpose(0, 2, 1)                                    # (B, Npts, 10)
    encoded = pc_label[:, :, 3:]
    counts = encoded.sum(axis=1)
    ratio = counts / counts.sum(axis=1, keepdims=True)
    init_counts = np.ceil(ratio * num).astype(np.int32)
    diff = init_counts.sum(axis=1) - num
    reduction = np.minimum(diff, init_counts[:, 0] - 1)
    init_counts[:, 0] -= reduction
    L = encoded.shape[2]
    all_idx = []
    for b in range(B):
        per = []
        for label in range(L):
            mask = encoded[b][:, label] != 0
            ns = int(init_counts[b, label])
            if ns > 0 and mask.sum() > 0:
                fps_idx = _fps_np(pc_label[b][mask][:, :3], ns)
                per.append(np.where(mask)[0][fps_idx])
        all_idx.append(np.concatenate(per))
    return np.stack(all_idx).astype(np.int32)


def precompute_host_indices(x_np, num_center):
    B = x_np.shape[0]
    fps1 = fps_label_idx_np(x_np, num_center[0])
    coor1 = np.stack([x_np[b][:, fps1[b]] for b in range(B)])
    fps2 = fps_label_idx_np(coor1, num_center[1])
    coor2 = np.stack([coor1[b][:, fps2[b]] for b in range(B)])
    knn = [knn_label_idx_np(x_np, x_np),
           knn_label_idx_np(coor1, x_np),
           knn_label_idx_np(coor1, coor1),
           knn_label_idx_np(coor2, coor1)]
    return {"fps1": fps1, "fps2": fps2, "coor1": coor1, "coor2": coor2,
            "idx": [i for i, _ in knn], "msk": [m for _, m in knn]}


def dgcnn_fape_forward(x, params, num_center):
    """Full DGCNN_FAPE forward.  x: (B, 10, N) f32.  Returns (coor, f, (fps_idx_1, fps_idx_2))."""
    host = precompute_host_indices(np.asarray(x), num_center)
    prep = prepare_params(params)
    coor_out, f_out = device_forward(
        x, prep,
        tuple(jnp.asarray(i) for i in host["idx"]),
        tuple(jnp.asarray(m) for m in host["msk"]),
        jnp.asarray(host["fps1"]), jnp.asarray(host["fps2"]))
    return coor_out, f_out, (jnp.asarray(host["fps1"]), jnp.asarray(host["fps2"]))


# ----------------------------- float32, PyTorch-faithful reference -----------------------------

def reference_forward_np(x, params, idxs, msks, fps1, fps2):
    p = {k: np.asarray(v, np.float32) for k, v in params.items()}
    B = x.shape[0]

    def gather_cf(f, idx):
        return np.stack([f[b][:, idx[b]] for b in range(B)])

    def edge_feat(f_q, f_k, idx, msk):
        C = f_q.shape[1]
        Nq, K = idx.shape[1], idx.shape[2]
        out = np.zeros((B, 2 * C, Nq, K), np.float32)
        for b in range(B):
            g = f_k[b][:, idx[b]]                                         # (C, Nq, K)
            xd = g - f_q[b][:, :, None]
            xc = np.broadcast_to(f_q[b][:, :, None], xd.shape)
            out[b] = np.concatenate([xd, xc], axis=0) * msk[b][None, :, None]
        return out

    def layer(feat, W, gamma, beta):
        Bc, _, Nn, K = feat.shape
        Cout = W.shape[1]
        y = np.einsum("bcnk,cd->bdnk", feat, W)
        yg = y.reshape(Bc, GROUPS, Cout // GROUPS, Nn, K)
        mean = yg.mean(axis=(2, 3, 4), keepdims=True)
        var = ((yg - mean) ** 2).mean(axis=(2, 3, 4), keepdims=True)
        yn = ((yg - mean) / np.sqrt(var + GN_EPS)).reshape(Bc, Cout, Nn, K)
        yn = yn * gamma[0][None, :, None, None] + beta[0][None, :, None, None]
        act = np.where(yn > 0, yn, NEG_SLOPE * yn)
        return act.max(axis=-1)

    f = np.einsum("bcn,co->bon", x, p["w_in"]) + p["b_in"][0][None, :, None]
    f = layer(edge_feat(f, f, idxs[0], msks[0]), p["w1"], p["g1"], p["bb1"])
    f_q = gather_cf(f, fps1)
    f2 = layer(edge_feat(f_q, f, idxs[1], msks[1]), p["w2"], p["g2"], p["bb2"])
    f3 = layer(edge_feat(f2, f2, idxs[2], msks[2]), p["w3"], p["g3"], p["bb3"])
    f_q3 = gather_cf(f3, fps2)
    f4 = layer(edge_feat(f_q3, f3, idxs[3], msks[3]), p["w4"], p["g4"], p["bb4"])
    return f4


# ----------------------------- main -----------------------------

if __name__ == "__main__":
    B, N = 2, 64
    num_center = (32, 16)   # DGCNN_FAPE(num_center=[32, 16])

    key = jax.random.PRNGKey(0)
    k_params, k_coords, k_labels = jax.random.split(key, 3)
    params = init_params(k_params)

    coords = jax.random.normal(k_coords, (B, 3, N), dtype=jnp.float32)
    base = np.array([0] * (N // 2) + [1] * (N // 2), dtype=np.int32)
    lab = np.stack([np.asarray(jax.random.permutation(kb, jnp.asarray(base)))
                    for kb in jax.random.split(k_labels, B)])
    onehot = (lab[:, :, None] == np.arange(NUM_LABELS)[None, None, :]).astype(np.float32)
    x = jnp.concatenate([coords, jnp.asarray(onehot.transpose(0, 2, 1))], axis=1)   # (B, 10, N)
    x_np = np.asarray(x)

    host = precompute_host_indices(x_np, num_center)
    prep = prepare_params(params)

    # ---- full forward (indices on host, everything else one device program) ----
    coor_out, f_out, (fps1_j, fps2_j) = dgcnn_fape_forward(x, params, num_center)
    jax.block_until_ready((coor_out, f_out))

    # ---- tight structural check: stage-1 Pallas kernel vs pure-JAX at matched precision ----
    x_cl = jnp.transpose(x, (0, 2, 1))
    xa = jnp.concatenate([x_cl, jnp.ones((B, N, 1), x.dtype)], axis=-1).astype(jnp.bfloat16)
    idx1 = jnp.asarray(host["idx"][0])
    m1 = jnp.asarray(host["msk"][0])[..., None].astype(jnp.float32)
    xkg1 = jax.vmap(lambda fb, ib: fb[ib])(xa, idx1)
    got = edge_layer(xkg1, xa, m1, prep["wd1"], prep["wc1"], prep["g1"], prep["b1"], cg=8)
    ref1 = edge_layer_jax_ref(xkg1, xa, m1, prep["wd1"], prep["wc1"], prep["g1"], prep["b1"], cg=8)
    assert np.allclose(np.asarray(got).astype(np.float32),
                       np.asarray(ref1).astype(np.float32), rtol=1e-2, atol=1e-2)

    # ---- loose end-to-end check vs the float32 PyTorch-faithful reference ----
    ref_f = reference_forward_np(x_np, params, host["idx"], host["msk"], host["fps1"], host["fps2"])
    f_np = np.asarray(f_out)
    rel_err = np.linalg.norm(f_np - ref_f) / (np.linalg.norm(ref_f) + 1e-12)
    assert rel_err < 0.08, f"end-to-end relative L2 error too large: {rel_err}"
    assert np.allclose(np.asarray(coor_out), host["coor2"], rtol=1e-5, atol=1e-5)

    assert coor_out.shape == (B, 10, num_center[1])
    assert f_out.shape == (B, 128, num_center[1])
    assert fps1_j.shape == (B, num_center[0]) and fps2_j.shape == (B, num_center[1])
    assert bool(jnp.all(jnp.isfinite(f_out)))

    print("KERNEL_OK")
</pallas_src>

<mosaic_0001>
module attributes {stable_mosaic.version = 11 : i64} {
  func.func @kernel(%arg0: i32, %arg1: i32, %arg2: memref<1x64x16x11xbf16, #tpu.memory_space<vmem>>, %arg3: memref<1x64x11xbf16, #tpu.memory_space<vmem>>, %arg4: memref<1x64x1xf32, #tpu.memory_space<vmem>>, %arg5: memref<11x128xbf16, #tpu.memory_space<vmem>>, %arg6: memref<11x128xbf16, #tpu.memory_space<vmem>>, %arg7: memref<1x128xf32, #tpu.memory_space<vmem>>, %arg8: memref<1x128xf32, #tpu.memory_space<vmem>>, %arg9: memref<1x64x128xbf16, #tpu.memory_space<vmem>>, %arg10: memref<1x128xf32, #tpu.memory_space<vmem>>, %arg11: memref<1x128xf32, #tpu.memory_space<vmem>>, %arg12: memref<64x128xf32, #tpu.memory_space<vmem>>, %arg13: memref<64x128xf32, #tpu.memory_space<vmem>>) attributes {dimension_semantics = [#tpu.dimension_semantics<parallel>, #tpu.dimension_semantics<arbitrary>], iteration_bounds = array<i64: 2, 1>, scalar_prefetch = 0 : i64, scratch_operands = 4 : i64, tpu.core_type = #tpu.core_type<tc>, window_params = [{transform_indices = @transform_0, window_bounds = array<i64: 1, 64, 16, 11>}, {transform_indices = @transform_1, window_bounds = array<i64: 1, 64, 11>}, {transform_indices = @transform_2, window_bounds = array<i64: 1, 64, 1>}, {pipeline_mode = #tpu.pipeline_mode<synchronous>, transform_indices = @transform_3, window_bounds = array<i64: 11, 128>}, {pipeline_mode = #tpu.pipeline_mode<synchronous>, transform_indices = @transform_4, window_bounds = array<i64: 11, 128>}, {pipeline_mode = #tpu.pipeline_mode<synchronous>, transform_indices = @transform_5, window_bounds = array<i64: 1, 128>}, {pipeline_mode = #tpu.pipeline_mode<synchronous>, transform_indices = @transform_6, window_bounds = array<i64: 1, 128>}, {transform_indices = @transform_7, window_bounds = array<i64: 1, 64, 128>}]} {
    %c0_i32 = arith.constant 0 : i32
    %0 = arith.cmpi eq, %arg1, %c0_i32 : i32
    %1 = arith.extui %0 : i1 to i32
    %c0_i32_0 = arith.constant 0 : i32
    %2 = arith.cmpi ne, %1, %c0_i32_0 : i32
    scf.if %2 {
      %cst_31 = arith.constant 0.000000e+00 : f32
      %44 = vector.broadcast %cst_31 : f32 to vector<1x128xf32>
      %c0_32 = arith.constant 0 : index
      %c0_33 = arith.constant 0 : index
      %45 = vector.load %arg10[%c0_32, %c0_33] : memref<1x128xf32, #tpu.memory_space<vmem>>, vector<1x128xf32>
      tpu.vector_store %arg10[%c0_32, %c0_33], %44 {strides = array<i32>} : memref<1x128xf32, #tpu.memory_space<vmem>>, vector<1x128xf32>,
      %cst_34 = arith.constant 0.000000e+00 : f32
      %46 = vector.broadcast %cst_34 : f32 to vector<1x128xf32>
      %c0_35 = arith.constant 0 : index
      %c0_36 = arith.constant 0 : index
      %47 = vector.load %arg11[%c0_35, %c0_36] : memref<1x128xf32, #tpu.memory_space<vmem>>, vector<1x128xf32>
      tpu.vector_store %arg11[%c0_35, %c0_36], %46 {strides = array<i32>} : memref<1x128xf32, #tpu.memory_space<vmem>>, vector<1x128xf32>,
    } else {
    }
    %c0 = arith.constant 0 : index
    %c0_1 = arith.constant 0 : index
    %c0_2 = arith.constant 0 : index
    %c0_3 = arith.constant 0 : index
    %3 = vector.load %arg2[%c0, %c0_1, %c0_2, %c0_3] : memref<1x64x16x11xbf16, #tpu.memory_space<vmem>>, vector<1x64x16x11xbf16>
    %4 = vector.shape_cast %3 : vector<1x64x16x11xbf16> to vector<64x16x11xbf16>
    %5 = vector.shape_cast %4 : vector<64x16x11xbf16> to vector<1024x11xbf16>
    %c0_4 = arith.constant 0 : index
    %c0_5 = arith.constant 0 : index
    %6 = vector.load %arg5[%c0_4, %c0_5] : memref<11x128xbf16, #tpu.memory_space<vmem>>, vector<11x128xbf16>
    %cst = arith.constant dense<0.000000e+00> : vector<1024x128xf32>
    %7 = tpu.matmul %5, %6, %cst {dimension_numbers = #tpu.dot_dimension_numbers<[1], [0], [0], [1], [0, 0, 1, 1], [], []>} : vector<1024x11xbf16>, vector<11x128xbf16>, vector<1024x128xf32> -> vector<1024x128xf32>
    %8 = vector.shape_cast %7 : vector<1024x128xf32> to vector<64x16x128xf32>
    %c0_6 = arith.constant 0 : index
    %c0_7 = arith.constant 0 : index
    %c0_8 = arith.constant 0 : index
    %9 = vector.load %arg3[%c0_6, %c0_7, %c0_8] : memref<1x64x11xbf16, #tpu.memory_space<vmem>>, vector<1x64x11xbf16>
    %10 = vector.shape_cast %9 : vector<1x64x11xbf16> to vector<64x11xbf16>
    %c0_9 = arith.constant 0 : index
    %c0_10 = arith.constant 0 : index
    %11 = vector.load %arg6[%c0_9, %c0_10] : memref<11x128xbf16, #tpu.memory_space<vmem>>, vector<11x128xbf16>
    %cst_11 = arith.constant dense<0.000000e+00> : vector<64x128xf32>
    %12 = tpu.matmul %10, %11, %cst_11 {dimension_numbers = #tpu.dot_dimension_numbers<[1], [0], [0], [1], [0, 0, 1, 1], [], []>} : vector<64x11xbf16>, vector<11x128xbf16>, vector<64x128xf32> -> vector<64x128xf32>
    %13 = vector.shape_cast %12 : vector<64x128xf32> to vector<64x1x128xf32>
    %14 = vector.broadcast %13 : vector<64x1x128xf32> to vector<64x16x128xf32>
    %15 = arith.addf %8, %14 : vector<64x16x128xf32>
    %c0_12 = arith.constant 0 : index
    %c0_13 = arith.constant 0 : index
    %c0_14 = arith.constant 0 : index
    %16 = vector.load %arg4[%c0_12, %c0_13, %c0_14] : memref<1x64x1xf32, #tpu.memory_space<vmem>>, vector<1x64x1xf32>
    %17 = vector.shape_cast %16 : vector<1x64x1xf32> to vector<64x1xf32>
    %18 = vector.shape_cast %17 : vector<64x1xf32> to vector<64x1x1xf32>
    %19 = vector.broadcast %18 : vector<64x1x1xf32> to vector<64x16x128xf32>
    %20 = arith.mulf %15, %19 : vector<64x16x128xf32>
    %21 = vector.shape_cast %20 : vector<64x16x128xf32> to vector<1024x128xf32>
    %c0_15 = arith.constant 0 : index
    %c0_16 = arith.constant 0 : index
    %22 = vector.load %arg10[%c0_15, %c0_16] : memref<1x128xf32, #tpu.memory_space<vmem>>, vector<1x128xf32>
    %cst_17 = arith.constant dense<0.000000e+00> : vector<128xf32>
    %23 = vector.multi_reduction <add>, %21, %cst_17 [0] : vector<1024x128xf32> to vector<128xf32>
    %24 = vector.shape_cast %23 : vector<128xf32> to vector<1x128xf32>
    %25 = arith.addf %22, %24 : vector<1x128xf32>
    %c0_18 = arith.constant 0 : index
    %c0_19 = arith.constant 0 : index
    %26 = vector.load %arg10[%c0_18, %c0_19] : memref<1x128xf32, #tpu.memory_space<vmem>>, vector<1x128xf32>
    tpu.vector_store %arg10[%c0_18, %c0_19], %25 {strides = array<i32>} : memref<1x128xf32, #tpu.memory_space<vmem>>, vector<1x128xf32>,
    %c0_20 = arith.constant 0 : index
    %c0_21 = arith.constant 0 : index
    %27 = vector.load %arg11[%c0_20, %c0_21] : memref<1x128xf32, #tpu.memory_space<vmem>>, vector<1x128xf32>
    %28 = arith.mulf %21, %21 : vector<1024x128xf32>
    %cst_22 = arith.constant dense<0.000000e+00> : vector<128xf32>
    %29 = vector.multi_reduction <add>, %28, %cst_22 [0] : vector<1024x128xf32> to vector<128xf32>
    %30 = vector.shape_cast %29 : vector<128xf32> to vector<1x128xf32>
    %31 = arith.addf %27, %30 : vector<1x128xf32>
    %c0_23 = arith.constant 0 : index
    %c0_24 = arith.constant 0 : index
    %32 = vector.load %arg11[%c0_23, %c0_24] : memref<1x128xf32, #tpu.memory_space<vmem>>, vector<1x128xf32>
    tpu.vector_store %arg11[%c0_23, %c0_24], %31 {strides = array<i32>} : memref<1x128xf32, #tpu.memory_space<vmem>>, vector<1x128xf32>,
    %c64_i32 = arith.constant 64 : i32
    %33 = arith.muli %arg1, %c64_i32 : i32
    %34 = tpu.assume_multiple %33, 8 : i32
    %cst_25 = arith.constant dense<0xFF800000> : vector<64x128xf32>
    %35 = vector.multi_reduction <maximumf>, %20, %cst_25 [1] : vector<64x16x128xf32> to vector<64x128xf32>
    %36 = arith.index_cast %34 : i32 to index
    %c0_26 = arith.constant 0 : index
    %37 = vector.load %arg12[%36, %c0_26] : memref<64x128xf32, #tpu.memory_space<vmem>>, vector<64x128xf32>
    tpu.vector_store %arg12[%36, %c0_26], %35 {strides = array<i32>} : memref<64x128xf32, #tpu.memory_space<vmem>>, vector<64x128xf32>,
    %cst_27 = arith.constant dense<0x7F800000> : vector<64x128xf32>
    %38 = vector.multi_reduction <minimumf>, %20, %cst_27 [1] : vector<64x16x128xf32> to vector<64x128xf32>
    %39 = arith.index_cast %34 : i32 to index
    %c0_28 = arith.constant 0 : index
    %40 = vector.load %arg13[%39, %c0_28] : memref<64x128xf32, #tpu.memory_space<vmem>>, vector<64x128xf32>
    tpu.vector_store %arg13[%39, %c0_28], %38 {strides = array<i32>} : memref<64x128xf32, #tpu.memory_space<vmem>>, vector<64x128xf32>,
    %c0_i32_29 = arith.constant 0 : i32
    %41 = arith.cmpi eq, %arg1, %c0_i32_29 : i32
    %42 = arith.extui %41 : i1 to i32
    %c0_i32_30 = arith.constant 0 : i32
    %43 = arith.cmpi ne, %42, %c0_i32_30 : i32
    scf.if %43 {
      %c0_31 = arith.constant 0 : index
      %c0_32 = arith.constant 0 : index
      %44 = vector.load %arg10[%c0_31, %c0_32] : memref<1x128xf32, #tpu.memory_space<vmem>>, vector<1x128xf32>
      %45 = tpu.iota {dimensions = array<i32: 1>} : vector<1x128xi32>
      %c127_i32 = arith.constant 127 : i32
      %46 = tpu.dynamic_rotate %44 by %c127_i32 dim 1 : vector<1x128xf32>, i32 -> vector<1x128xf32>
      %c1_i32 = arith.constant 1 : i32
      %47 = tpu.dynamic_rotate %44 by %c1_i32 dim 1 : vector<1x128xf32>, i32 -> vector<1x128xf32>
      %c1_i32_33 = arith.constant 1 : i32
      %48 = vector.broadcast %c1_i32_33 : i32 to vector<1x128xi32>
      %49 = arith.andi %45, %48 : vector<1x128xi32>
      %c0_i32_34 = arith.constant 0 : i32
      %50 = vector.broadcast %c0_i32_34 : i32 to vector<1x128xi32>
      %51 = arith.cmpi eq, %49, %50 : vector<1x128xi32>
      %52 = arith.select %51, %46, %47 : vector<1x128xi1>, vector<1x128xf32>
      %53 = arith.addf %44, %52 : vector<1x128xf32>
      %c126_i32 = arith.constant 126 : i32
      %54 = tpu.dynamic_rotate %53 by %c126_i32 dim 1 : vector<1x128xf32>, i32 -> vector<1x128xf32>
      %c2_i32 = arith.constant 2 : i32
      %55 = tpu.dynamic_rotate %53 by %c2_i32 dim 1 : vector<1x128xf32>, i32 -> vector<1x128xf32>
      %c2_i32_35 = arith.constant 2 : i32
      %56 = vector.broadcast %c2_i32_35 : i32 to vector<1x128xi32>
      %57 = arith.andi %45, %56 : vector<1x128xi32>
      %c0_i32_36 = arith.constant 0 : i32
      %58 = vector.broadcast %c0_i32_36 : i32 to vector<1x128xi32>
      %59 = arith.cmpi eq, %57, %58 : vector<1x128xi32>
      %60 = arith.select %59, %54, %55 : vector<1x128xi1>, vector<1x128xf32>
      %61 = arith.addf %53, %60 : vector<1x128xf32>
      %c124_i32 = arith.constant 124 : i32
      %62 = tpu.dynamic_rotate %61 by %c124_i32 dim 1 : vector<1x128xf32>, i32 -> vector<1x128xf32>
      %c4_i32 = arith.constant 4 : i32
      %63 = tpu.dynamic_rotate %61 by %c4_i32 dim 1 : vector<1x128xf32>, i32 -> vector<1x128xf32>
      %c4_i32_37 = arith.constant 4 : i32
      %64 = vector.broadcast %c4_i32_37 : i32 to vector<1x128xi32>
      %65 = arith.andi %45, %64 : vector<1x128xi32>
      %c0_i32_38 = arith.constant 0 : i32
      %66 = vector.broadcast %c0_i32_38 : i32 to vector<1x128xi32>
      %67 = arith.cmpi eq, %65, %66 : vector<1x128xi32>
      %68 = arith.select %67, %62, %63 : vector<1x128xi1>, vector<1x128xf32>
      %69 = arith.addf %61, %68 : vector<1x128xf32>
      %cst_39 = arith.constant 1.22070313E-4 : f32
      %70 = vector.broadcast %cst_39 : f32 to vector<1x128xf32>
      %71 = arith.mulf %69, %70 : vector<1x128xf32>
      %c0_40 = arith.constant 0 : index
      %c0_41 = arith.constant 0 : index
      %72 = vector.load %arg11[%c0_40, %c0_41] : memref<1x128xf32, #tpu.memory_space<vmem>>, vector<1x128xf32>
      %73 = tpu.iota {dimensions = array<i32: 1>} : vector<1x128xi32>
      %c127_i32_42 = arith.constant 127 : i32
      %74 = tpu.dynamic_rotate %72 by %c127_i32_42 dim 1 : vector<1x128xf32>, i32 -> vector<1x128xf32>
      %c1_i32_43 = arith.constant 1 : i32
      %75 = tpu.dynamic_rotate %72 by %c1_i32_43 dim 1 : vector<1x128xf32>, i32 -> vector<1x128xf32>
      %c1_i32_44 = arith.constant 1 : i32
      %76 = vector.broadcast %c1_i32_44 : i32 to vector<1x128xi32>
      %77 = arith.andi %73, %76 : vector<1x128xi32>
      %c0_i32_45 = arith.constant 0 : i32
      %78 = vector.broadcast %c0_i32_45 : i32 to vector<1x128xi32>
      %79 = arith.cmpi eq, %77, %78 : vector<1x128xi32>
      %80 = arith.select %79, %74, %75 : vector<1x128xi1>, vector<1x128xf32>
      %81 = arith.addf %72, %80 : vector<1x128xf32>
      %c126_i32_46 = arith.constant 126 : i32
      %82 = tpu.dynamic_rotate %81 by %c126_i32_46 dim 1 : vector<1x128xf32>, i32 -> vector<1x128xf32>
      %c2_i32_47 = arith.constant 2 : i32
      %83 = tpu.dynamic_rotate %81 by %c2_i32_47 dim 1 : vector<1x128xf32>, i32 -> vector<1x128xf32>
      %c2_i32_48 = arith.constant 2 : i32
      %84 = vector.broadcast %c2_i32_48 : i32 to vector<1x128xi32>
      %85 = arith.andi %73, %84 : vector<1x128xi32>
      %c0_i32_49 = arith.constant 0 : i32
      %86 = vector.broadcast %c0_i32_49 : i32 to vector<1x128xi32>
      %87 = arith.cmpi eq, %85, %86 : vector<1x128xi32>
      %88 = arith.select %87, %82, %83 : vector<1x128xi1>, vector<1x128xf32>
      %89 = arith.addf %81, %88 : vector<1x128xf32>
      %c124_i32_50 = arith.constant 124 : i32
      %90 = tpu.dynamic_rotate %89 by %c124_i32_50 dim 1 : vector<1x128xf32>, i32 -> vector<1x128xf32>
      %c4_i32_51 = arith.constant 4 : i32
      %91 = tpu.dynamic_rotate %89 by %c4_i32_51 dim 1 : vector<1x128xf32>, i32 -> vector<1x128xf32>
      %c4_i32_52 = arith.constant 4 : i32
      %92 = vector.broadcast %c4_i32_52 : i32 to vector<1x128xi32>
      %93 = arith.andi %73, %92 : vector<1x128xi32>
      %c0_i32_53 = arith.constant 0 : i32
      %94 = vector.broadcast %c0_i32_53 : i32 to vector<1x128xi32>
      %95 = arith.cmpi eq, %93, %94 : vector<1x128xi32>
      %96 = arith.select %95, %90, %91 : vector<1x128xi1>, vector<1x128xf32>
      %97 = arith.addf %89, %96 : vector<1x128xf32>
      %cst_54 = arith.constant 1.22070313E-4 : f32
      %98 = vector.broadcast %cst_54 : f32 to vector<1x128xf32>
      %99 = arith.mulf %97, %98 : vector<1x128xf32>
      %100 = arith.mulf %71, %71 : vector<1x128xf32>
      %101 = arith.subf %99, %100 : vector<1x128xf32>
      %cst_55 = arith.constant 0.000000e+00 : f32
      %102 = vector.broadcast %cst_55 : f32 to vector<1x128xf32>
      %103 = arith.maximumf %101, %102 : vector<1x128xf32>
      %cst_56 = arith.constant 9.99999974E-6 : f32
      %104 = vector.broadcast %cst_56 : f32 to vector<1x128xf32>
      %105 = arith.addf %103, %104 : vector<1x128xf32>
      %106 = math.rsqrt %105 : vector<1x128xf32>
      %c0_57 = arith.constant 0 : index
      %c0_58 = arith.constant 0 : index
      %107 = vector.load %arg7[%c0_57, %c0_58] : memref<1x128xf32, #tpu.memory_space<vmem>>, vector<1x128xf32>
      %108 = arith.mulf %106, %107 : vector<1x128xf32>
      %c0_59 = arith.constant 0 : index
      %c0_60 = arith.constant 0 : index
      %109 = vector.load %arg8[%c0_59, %c0_60] : memref<1x128xf32, #tpu.memory_space<vmem>>, vector<1x128xf32>
      %110 = arith.mulf %71, %108 : vector<1x128xf32>
      %111 = arith.subf %109, %110 : vector<1x128xf32>
      %cst_61 = arith.constant 0.000000e+00 : f32
      %112 = vector.broadcast %cst_61 : f32 to vector<1x128xf32>
      %113 = arith.cmpf oge, %108, %112 : vector<1x128xf32>
      %c0_62 = arith.constant 0 : index
      %c0_63 = arith.constant 0 : index
      %114 = vector.load %arg12[%c0_62, %c0_63] : memref<64x128xf32, #tpu.memory_space<vmem>>, vector<64x128xf32>
      %c0_64 = arith.constant 0 : index
      %c0_65 = arith.constant 0 : index
      %115 = vector.load %arg13[%c0_64, %c0_65] : memref<64x128xf32, #tpu.memory_space<vmem>>, vector<64x128xf32>
      %116 = vector.shape_cast %113 : vector<1x128xi1> to vector<1x128xi1>
      %117 = vector.broadcast %116 : vector<1x128xi1> to vector<64x128xi1>
      %118 = arith.select %117, %114, %115 : vector<64x128xi1>, vector<64x128xf32>
      %119 = vector.broadcast %108 : vector<1x128xf32> to vector<64x128xf32>
      %120 = arith.mulf %118, %119 : vector<64x128xf32>
      %121 = vector.broadcast %111 : vector<1x128xf32> to vector<64x128xf32>
      %122 = arith.addf %120, %121 : vector<64x128xf32>
      %cst_66 = arith.constant 0.000000e+00 : f32
      %123 = vector.broadcast %cst_66 : f32 to vector<64x128xf32>
      %124 = arith.cmpf ogt, %122, %123 : vector<64x128xf32>
      %cst_67 = arith.constant 2.000000e-01 : f32
      %125 = vector.broadcast %cst_67 : f32 to vector<64x128xf32>
      %126 = arith.mulf %125, %122 : vector<64x128xf32>
      %127 = arith.select %124, %122, %126 : vector<64x128xi1>, vector<64x128xf32>
      %128 = arith.truncf %127 : vector<64x128xf32> to vector<64x128xbf16>
      %c0_68 = arith.constant 0 : index
      %c0_69 = arith.constant 0 : index
      %c0_70 = arith.constant 0 : index
      %129 = vector.load %arg9[%c0_68, %c0_69, %c0_70] : memref<1x64x128xbf16, #tpu.memory_space<vmem>>, vector<1x64x128xbf16>
      %130 = vector.shape_cast %129 : vector<1x64x128xbf16> to vector<64x128xbf16>
      %131 = vector.shape_cast %128 : vector<64x128xbf16> to vector<1x64x128xbf16>
      tpu.vector_store %arg9[%c0_68, %c0_69, %c0_70], %131 {strides = array<i32>} : memref<1x64x128xbf16, #tpu.memory_space<vmem>>, vector<1x64x128xbf16>,
    } else {
    }
    return
  }
  func.func @transform_0(%arg0: i32, %arg1: i32) -> (i32, i32, i32, i32) {
    %c0_i32 = arith.constant 0 : i32
    %c0_i32_0 = arith.constant 0 : i32
    %c0_i32_1 = arith.constant 0 : i32
    return %arg0, %arg1, %c0_i32, %c0_i32_0 : i32, i32, i32, i32
  }
  func.func @transform_1(%arg0: i32, %arg1: i32) -> (i32, i32, i32) {
    %c0_i32 = arith.constant 0 : i32
    %c0_i32_0 = arith.constant 0 : i32
    return %arg0, %arg1, %c0_i32 : i32, i32, i32
  }
  func.func @transform_2(%arg0: i32, %arg1: i32) -> (i32, i32, i32) {
    %c0_i32 = arith.constant 0 : i32
    %c0_i32_0 = arith.constant 0 : i32
    return %arg0, %arg1, %c0_i32 : i32, i32, i32
  }
  func.func @transform_3(%arg0: i32, %arg1: i32) -> (i32, i32) {
    %c0_i32 = arith.constant 0 : i32
    %c0_i32_0 = arith.constant 0 : i32
    %c0_i32_1 = arith.constant 0 : i32
    return %c0_i32, %c0_i32_0 : i32, i32
  }
  func.func @transform_4(%arg0: i32, %arg1: i32) -> (i32, i32) {
    %c0_i32 = arith.constant 0 : i32
    %c0_i32_0 = arith.constant 0 : i32
    %c0_i32_1 = arith.constant 0 : i32
    return %c0_i32, %c0_i32_0 : i32, i32
  }
  func.func @transform_5(%arg0: i32, %arg1: i32) -> (i32, i32) {
    %c0_i32 = arith.constant 0 : i32
    %c0_i32_0 = arith.constant 0 : i32
    %c0_i32_1 = arith.constant 0 : i32
    return %c0_i32, %c0_i32_0 : i32, i32
  }
  func.func @transform_6(%arg0: i32, %arg1: i32) -> (i32, i32) {
    %c0_i32 = arith.constant 0 : i32
    %c0_i32_0 = arith.constant 0 : i32
    %c0_i32_1 = arith.constant 0 : i32
    return %c0_i32, %c0_i32_0 : i32, i32
  }
  func.func @transform_7(%arg0: i32, %arg1: i32) -> (i32, i32, i32) {
    %c0_i32 = arith.constant 0 : i32
    %c0_i32_0 = arith.constant 0 : i32
    %c0_i32_1 = arith.constant 0 : i32
    return %arg0, %c0_i32, %c0_i32_0 : i32, i32, i32
  }
}

module attributes {stable_mosaic.version = 11 : i64} {
  func.func @kernel(%arg0: i32, %arg1: i32, %arg2: memref<1x32x16x32xbf16, #tpu.memory_space<vmem>>, %arg3: memref<1x32x32xbf16, #tpu.memory_space<vmem>>, %arg4: memref<1x32x1xf32, #tpu.memory_space<vmem>>, %arg5: memref<32x128xbf16, #tpu.memory_space<vmem>>, %arg6: memref<32x128xbf16, #tpu.memory_space<vmem>>, %arg7: memref<1x128xf32, #tpu.memory_space<vmem>>, %arg8: memref<1x128xf32, #tpu.memory_space<vmem>>, %arg9: memref<1x32x128xbf16, #tpu.memory_space<vmem>>, %arg10: memref<1x128xf32, #tpu.memory_space<vmem>>, %arg11: memref<1x128xf32, #tpu.memory_space<vmem>>, %arg12: memref<32x128xf32, #tpu.memory_space<vmem>>, %arg13: memref<32x128xf32, #tpu.memory_space<vmem>>) attributes {dimension_semantics = [#tpu.dimension_semantics<parallel>, #tpu.dimension_semantics<arbitrary>], iteration_bounds = array<i64: 2, 1>, scalar_prefetch = 0 : i64, scratch_operands = 4 : i64, tpu.core_type = #tpu.core_type<tc>, window_params = [{transform_indices = @transform_0, window_bounds = array<i64: 1, 32, 16, 32>}, {transform_indices = @transform_1, window_bounds = array<i64: 1, 32, 32>}, {transform_indices = @transform_2, window_bounds = array<i64: 1, 32, 1>}, {pipeline_mode = #tpu.pipeline_mode<synchronous>, transform_indices = @transform_3, window_bounds = array<i64: 32, 128>}, {pipeline_mode = #tpu.pipeline_mode<synchronous>, transform_indices = @transform_4, window_bounds = array<i64: 32, 128>}, {pipeline_mode = #tpu.pipeline_mode<synchronous>, transform_indices = @transform_5, window_bounds = array<i64: 1, 128>}, {pipeline_mode = #tpu.pipeline_mode<synchronous>, transform_indices = @transform_6, window_bounds = array<i64: 1, 128>}, {transform_indices = @transform_7, window_bounds = array<i64: 1, 32, 128>}]} {
    %c0_i32 = arith.constant 0 : i32
    %0 = arith.cmpi eq, %arg1, %c0_i32 : i32
    %1 = arith.extui %0 : i1 to i32
    %c0_i32_0 = arith.constant 0 : i32
    %2 = arith.cmpi ne, %1, %c0_i32_0 : i32
    scf.if %2 {
      %cst_31 = arith.constant 0.000000e+00 : f32
      %44 = vector.broadcast %cst_31 : f32 to vector<1x128xf32>
      %c0_32 = arith.constant 0 : index
      %c0_33 = arith.constant 0 : index
      %45 = vector.load %arg10[%c0_32, %c0_33] : memref<1x128xf32, #tpu.memory_space<vmem>>, vector<1x128xf32>
      tpu.vector_store %arg10[%c0_32, %c0_33], %44 {strides = array<i32>} : memref<1x128xf32, #tpu.memory_space<vmem>>, vector<1x128xf32>,
      %cst_34 = arith.constant 0.000000e+00 : f32
      %46 = vector.broadcast %cst_34 : f32 to vector<1x128xf32>
      %c0_35 = arith.constant 0 : index
      %c0_36 = arith.constant 0 : index
      %47 = vector.load %arg11[%c0_35, %c0_36] : memref<1x128xf32, #tpu.memory_space<vmem>>, vector<1x128xf32>
      tpu.vector_store %arg11[%c0_35, %c0_36], %46 {strides = array<i32>} : memref<1x128xf32, #tpu.memory_space<vmem>>, vector<1x128xf32>,
    } else {
    }
    %c0 = arith.constant 0 : index
    %c0_1 = arith.constant 0 : index
    %c0_2 = arith.constant 0 : index
    %c0_3 = arith.constant 0 : index
    %3 = vector.load %arg2[%c0, %c0_1, %c0_2, %c0_3] : memref<1x32x16x32xbf16, #tpu.memory_space<vmem>>, vector<1x32x16x32xbf16>
    %4 = vector.shape_cast %3 : vector<1x32x16x32xbf16> to vector<32x16x32xbf16>
    %5 = vector.shape_cast %4 : vector<32x16x32xbf16> to vector<512x32xbf16>
    %c0_4 = arith.constant 0 : index
    %c0_5 = arith.constant 0 : index
    %6 = vector.load %arg5[%c0_4, %c0_5] : memref<32x128xbf16, #tpu.memory_space<vmem>>, vector<32x128xbf16>
    %cst = arith.constant dense<0.000000e+00> : vector<512x128xf32>
    %7 = tpu.matmul %5, %6, %cst {dimension_numbers = #tpu.dot_dimension_numbers<[1], [0], [0], [1], [0, 0, 1, 1], [], []>} : vector<512x32xbf16>, vector<32x128xbf16>, vector<512x128xf32> -> vector<512x128xf32>
    %8 = vector.shape_cast %7 : vector<512x128xf32> to vector<32x16x128xf32>
    %c0_6 = arith.constant 0 : index
    %c0_7 = arith.constant 0 : index
    %c0_8 = arith.constant 0 : index
    %9 = vector.load %arg3[%c0_6, %c0_7, %c0_8] : memref<1x32x32xbf16, #tpu.memory_space<vmem>>, vector<1x32x32xbf16>
    %10 = vector.shape_cast %9 : vector<1x32x32xbf16> to vector<32x32xbf16>
    %c0_9 = arith.constant 0 : index
    %c0_10 = arith.constant 0 : index
    %11 = vector.load %arg6[%c0_9, %c0_10] : memref<32x128xbf16, #tpu.memory_space<vmem>>, vector<32x128xbf16>
    %cst_11 = arith.constant dense<0.000000e+00> : vector<32x128xf32>
    %12 = tpu.matmul %10, %11, %cst_11 {dimension_numbers = #tpu.dot_dimension_numbers<[1], [0], [0], [1], [0, 0, 1, 1], [], []>} : vector<32x32xbf16>, vector<32x128xbf16>, vector<32x128xf32> -> vector<32x128xf32>
    %13 = vector.shape_cast %12 : vector<32x128xf32> to vector<32x1x128xf32>
    %14 = vector.broadcast %13 : vector<32x1x128xf32> to vector<32x16x128xf32>
    %15 = arith.addf %8, %14 : vector<32x16x128xf32>
    %c0_12 = arith.constant 0 : index
    %c0_13 = arith.constant 0 : index
    %c0_14 = arith.constant 0 : index
    %16 = vector.load %arg4[%c0_12, %c0_13, %c0_14] : memref<1x32x1xf32, #tpu.memory_space<vmem>>, vector<1x32x1xf32>
    %17 = vector.shape_cast %16 : vector<1x32x1xf32> to vector<32x1xf32>
    %18 = vector.shape_cast %17 : vector<32x1xf32> to vector<32x1x1xf32>
    %19 = vector.broadcast %18 : vector<32x1x1xf32> to vector<32x16x128xf32>
    %20 = arith.mulf %15, %19 : vector<32x16x128xf32>
    %21 = vector.shape_cast %20 : vector<32x16x128xf32> to vector<512x128xf32>
    %c0_15 = arith.constant 0 : index
    %c0_16 = arith.constant 0 : index
    %22 = vector.load %arg10[%c0_15, %c0_16] : memref<1x128xf32, #tpu.memory_space<vmem>>, vector<1x128xf32>
    %cst_17 = arith.constant dense<0.000000e+00> : vector<128xf32>
    %23 = vector.multi_reduction <add>, %21, %cst_17 [0] : vector<512x128xf32> to vector<128xf32>
    %24 = vector.shape_cast %23 : vector<128xf32> to vector<1x128xf32>
    %25 = arith.addf %22, %24 : vector<1x128xf32>
    %c0_18 = arith.constant 0 : index
    %c0_19 = arith.constant 0 : index
    %26 = vector.load %arg10[%c0_18, %c0_19] : memref<1x128xf32, #tpu.memory_space<vmem>>, vector<1x128xf32>
    tpu.vector_store %arg10[%c0_18, %c0_19], %25 {strides = array<i32>} : memref<1x128xf32, #tpu.memory_space<vmem>>, vector<1x128xf32>,
    %c0_20 = arith.constant 0 : index
    %c0_21 = arith.constant 0 : index
    %27 = vector.load %arg11[%c0_20, %c0_21] : memref<1x128xf32, #tpu.memory_space<vmem>>, vector<1x128xf32>
    %28 = arith.mulf %21, %21 : vector<512x128xf32>
    %cst_22 = arith.constant dense<0.000000e+00> : vector<128xf32>
    %29 = vector.multi_reduction <add>, %28, %cst_22 [0] : vector<512x128xf32> to vector<128xf32>
    %30 = vector.shape_cast %29 : vector<128xf32> to vector<1x128xf32>
    %31 = arith.addf %27, %30 : vector<1x128xf32>
    %c0_23 = arith.constant 0 : index
    %c0_24 = arith.constant 0 : index
    %32 = vector.load %arg11[%c0_23, %c0_24] : memref<1x128xf32, #tpu.memory_space<vmem>>, vector<1x128xf32>
    tpu.vector_store %arg11[%c0_23, %c0_24], %31 {strides = array<i32>} : memref<1x128xf32, #tpu.memory_space<vmem>>, vector<1x128xf32>,
    %c32_i32 = arith.constant 32 : i32
    %33 = arith.muli %arg1, %c32_i32 : i32
    %34 = tpu.assume_multiple %33, 8 : i32
    %cst_25 = arith.constant dense<0xFF800000> : vector<32x128xf32>
    %35 = vector.multi_reduction <maximumf>, %20, %cst_25 [1] : vector<32x16x128xf32> to vector<32x128xf32>
    %36 = arith.index_cast %34 : i32 to index
    %c0_26 = arith.constant 0 : index
    %37 = vector.load %arg12[%36, %c0_26] : memref<32x128xf32, #tpu.memory_space<vmem>>, vector<32x128xf32>
    tpu.vector_store %arg12[%36, %c0_26], %35 {strides = array<i32>} : memref<32x128xf32, #tpu.memory_space<vmem>>, vector<32x128xf32>,
    %cst_27 = arith.constant dense<0x7F800000> : vector<32x128xf32>
    %38 = vector.multi_reduction <minimumf>, %20, %cst_27 [1] : vector<32x16x128xf32> to vector<32x128xf32>
    %39 = arith.index_cast %34 : i32 to index
    %c0_28 = arith.constant 0 : index
    %40 = vector.load %arg13[%39, %c0_28] : memref<32x128xf32, #tpu.memory_space<vmem>>, vector<32x128xf32>
    tpu.vector_store %arg13[%39, %c0_28], %38 {strides = array<i32>} : memref<32x128xf32, #tpu.memory_space<vmem>>, vector<32x128xf32>,
    %c0_i32_29 = arith.constant 0 : i32
    %41 = arith.cmpi eq, %arg1, %c0_i32_29 : i32
    %42 = arith.extui %41 : i1 to i32
    %c0_i32_30 = arith.constant 0 : i32
    %43 = arith.cmpi ne, %42, %c0_i32_30 : i32
    scf.if %43 {
      %c0_31 = arith.constant 0 : index
      %c0_32 = arith.constant 0 : index
      %44 = vector.load %arg10[%c0_31, %c0_32] : memref<1x128xf32, #tpu.memory_space<vmem>>, vector<1x128xf32>
      %45 = tpu.iota {dimensions = array<i32: 1>} : vector<1x128xi32>
      %c127_i32 = arith.constant 127 : i32
      %46 = tpu.dynamic_rotate %44 by %c127_i32 dim 1 : vector<1x128xf32>, i32 -> vector<1x128xf32>
      %c1_i32 = arith.constant 1 : i32
      %47 = tpu.dynamic_rotate %44 by %c1_i32 dim 1 : vector<1x128xf32>, i32 -> vector<1x128xf32>
      %c1_i32_33 = arith.constant 1 : i32
      %48 = vector.broadcast %c1_i32_33 : i32 to vector<1x128xi32>
      %49 = arith.andi %45, %48 : vector<1x128xi32>
      %c0_i32_34 = arith.constant 0 : i32
      %50 = vector.broadcast %c0_i32_34 : i32 to vector<1x128xi32>
      %51 = arith.cmpi eq, %49, %50 : vector<1x128xi32>
      %52 = arith.select %51, %46, %47 : vector<1x128xi1>, vector<1x128xf32>
      %53 = arith.addf %44, %52 : vector<1x128xf32>
      %c126_i32 = arith.constant 126 : i32
      %54 = tpu.dynamic_rotate %53 by %c126_i32 dim 1 : vector<1x128xf32>, i32 -> vector<1x128xf32>
      %c2_i32 = arith.constant 2 : i32
      %55 = tpu.dynamic_rotate %53 by %c2_i32 dim 1 : vector<1x128xf32>, i32 -> vector<1x128xf32>
      %c2_i32_35 = arith.constant 2 : i32
      %56 = vector.broadcast %c2_i32_35 : i32 to vector<1x128xi32>
      %57 = arith.andi %45, %56 : vector<1x128xi32>
      %c0_i32_36 = arith.constant 0 : i32
      %58 = vector.broadcast %c0_i32_36 : i32 to vector<1x128xi32>
      %59 = arith.cmpi eq, %57, %58 : vector<1x128xi32>
      %60 = arith.select %59, %54, %55 : vector<1x128xi1>, vector<1x128xf32>
      %61 = arith.addf %53, %60 : vector<1x128xf32>
      %c124_i32 = arith.constant 124 : i32
      %62 = tpu.dynamic_rotate %61 by %c124_i32 dim 1 : vector<1x128xf32>, i32 -> vector<1x128xf32>
      %c4_i32 = arith.constant 4 : i32
      %63 = tpu.dynamic_rotate %61 by %c4_i32 dim 1 : vector<1x128xf32>, i32 -> vector<1x128xf32>
      %c4_i32_37 = arith.constant 4 : i32
      %64 = vector.broadcast %c4_i32_37 : i32 to vector<1x128xi32>
      %65 = arith.andi %45, %64 : vector<1x128xi32>
      %c0_i32_38 = arith.constant 0 : i32
      %66 = vector.broadcast %c0_i32_38 : i32 to vector<1x128xi32>
      %67 = arith.cmpi eq, %65, %66 : vector<1x128xi32>
      %68 = arith.select %67, %62, %63 : vector<1x128xi1>, vector<1x128xf32>
      %69 = arith.addf %61, %68 : vector<1x128xf32>
      %c120_i32 = arith.constant 120 : i32
      %70 = tpu.dynamic_rotate %69 by %c120_i32 dim 1 : vector<1x128xf32>, i32 -> vector<1x128xf32>
      %c8_i32 = arith.constant 8 : i32
      %71 = tpu.dynamic_rotate %69 by %c8_i32 dim 1 : vector<1x128xf32>, i32 -> vector<1x128xf32>
      %c8_i32_39 = arith.constant 8 : i32
      %72 = vector.broadcast %c8_i32_39 : i32 to vector<1x128xi32>
      %73 = arith.andi %45, %72 : vector<1x128xi32>
      %c0_i32_40 = arith.constant 0 : i32
      %74 = vector.broadcast %c0_i32_40 : i32 to vector<1x128xi32>
      %75 = arith.cmpi eq, %73, %74 : vector<1x128xi32>
      %76 = arith.select %75, %70, %71 : vector<1x128xi1>, vector<1x128xf32>
      %77 = arith.addf %69, %76 : vector<1x128xf32>
      %cst_41 = arith.constant 1.22070313E-4 : f32
      %78 = vector.broadcast %cst_41 : f32 to vector<1x128xf32>
      %79 = arith.mulf %77, %78 : vector<1x128xf32>
      %c0_42 = arith.constant 0 : index
      %c0_43 = arith.constant 0 : index
      %80 = vector.load %arg11[%c0_42, %c0_43] : memref<1x128xf32, #tpu.memory_space<vmem>>, vector<1x128xf32>
      %81 = tpu.iota {dimensions = array<i32: 1>} : vector<1x128xi32>
      %c127_i32_44 = arith.constant 127 : i32
      %82 = tpu.dynamic_rotate %80 by %c127_i32_44 dim 1 : vector<1x128xf32>, i32 -> vector<1x128xf32>
      %c1_i32_45 = arith.constant 1 : i32
      %83 = tpu.dynamic_rotate %80 by %c1_i32_45 dim 1 : vector<1x128xf32>, i32 -> vector<1x128xf32>
      %c1_i32_46 = arith.constant 1 : i32
      %84 = vector.broadcast %c1_i32_46 : i32 to vector<1x128xi32>
      %85 = arith.andi %81, %84 : vector<1x128xi32>
      %c0_i32_47 = arith.constant 0 : i32
      %86 = vector.broadcast %c0_i32_47 : i32 to vector<1x128xi32>
      %87 = arith.cmpi eq, %85, %86 : vector<1x128xi32>
      %88 = arith.select %87, %82, %83 : vector<1x128xi1>, vector<1x128xf32>
      %89 = arith.addf %80, %88 : vector<1x128xf32>
      %c126_i32_48 = arith.constant 126 : i32
      %90 = tpu.dynamic_rotate %89 by %c126_i32_48 dim 1 : vector<1x128xf32>, i32 -> vector<1x128xf32>
      %c2_i32_49 = arith.constant 2 : i32
      %91 = tpu.dynamic_rotate %89 by %c2_i32_49 dim 1 : vector<1x128xf32>, i32 -> vector<1x128xf32>
      %c2_i32_50 = arith.constant 2 : i32
      %92 = vector.broadcast %c2_i32_50 : i32 to vector<1x128xi32>
      %93 = arith.andi %81, %92 : vector<1x128xi32>
      %c0_i32_51 = arith.constant 0 : i32
      %94 = vector.broadcast %c0_i32_51 : i32 to vector<1x128xi32>
      %95 = arith.cmpi eq, %93, %94 : vector<1x128xi32>
      %96 = arith.select %95, %90, %91 : vector<1x128xi1>, vector<1x128xf32>
      %97 = arith.addf %89, %96 : vector<1x128xf32>
      %c124_i32_52 = arith.constant 124 : i32
      %98 = tpu.dynamic_rotate %97 by %c124_i32_52 dim 1 : vector<1x128xf32>, i32 -> vector<1x128xf32>
      %c4_i32_53 = arith.constant 4 : i32
      %99 = tpu.dynamic_rotate %97 by %c4_i32_53 dim 1 : vector<1x128xf32>, i32 -> vector<1x128xf32>
      %c4_i32_54 = arith.constant 4 : i32
      %100 = vector.broadcast %c4_i32_54 : i32 to vector<1x128xi32>
      %101 = arith.andi %81, %100 : vector<1x128xi32>
      %c0_i32_55 = arith.constant 0 : i32
      %102 = vector.broadcast %c0_i32_55 : i32 to vector<1x128xi32>
      %103 = arith.cmpi eq, %101, %102 : vector<1x128xi32>
      %104 = arith.select %103, %98, %99 : vector<1x128xi1>, vector<1x128xf32>
      %105 = arith.addf %97, %104 : vector<1x128xf32>
      %c120_i32_56 = arith.constant 120 : i32
      %106 = tpu.dynamic_rotate %105 by %c120_i32_56 dim 1 : vector<1x128xf32>, i32 -> vector<1x128xf32>
      %c8_i32_57 = arith.constant 8 : i32
      %107 = tpu.dynamic_rotate %105 by %c8_i32_57 dim 1 : vector<1x128xf32>, i32 -> vector<1x128xf32>
      %c8_i32_58 = arith.constant 8 : i32
      %108 = vector.broadcast %c8_i32_58 : i32 to vector<1x128xi32>
      %109 = arith.andi %81, %108 : vector<1x128xi32>
      %c0_i32_59 = arith.constant 0 : i32
      %110 = vector.broadcast %c0_i32_59 : i32 to vector<1x128xi32>
      %111 = arith.cmpi eq, %109, %110 : vector<1x128xi32>
      %112 = arith.select %111, %106, %107 : vector<1x128xi1>, vector<1x128xf32>
      %113 = arith.addf %105, %112 : vector<1x128xf32>
      %cst_60 = arith.constant 1.22070313E-4 : f32
      %114 = vector.broadcast %cst_60 : f32 to vector<1x128xf32>
      %115 = arith.mulf %113, %114 : vector<1x128xf32>
      %116 = arith.mulf %79, %79 : vector<1x128xf32>
      %117 = arith.subf %115, %116 : vector<1x128xf32>
      %cst_61 = arith.constant 0.000000e+00 : f32
      %118 = vector.broadcast %cst_61 : f32 to vector<1x128xf32>
      %119 = arith.maximumf %117, %118 : vector<1x128xf32>
      %cst_62 = arith.constant 9.99999974E-6 : f32
      %120 = vector.broadcast %cst_62 : f32 to vector<1x128xf32>
      %121 = arith.addf %119, %120 : vector<1x128xf32>
      %122 = math.rsqrt %121 : vector<1x128xf32>
      %c0_63 = arith.constant 0 : index
      %c0_64 = arith.constant 0 : index
      %123 = vector.load %arg7[%c0_63, %c0_64] : memref<1x128xf32, #tpu.memory_space<vmem>>, vector<1x128xf32>
      %124 = arith.mulf %122, %123 : vector<1x128xf32>
      %c0_65 = arith.constant 0 : index
      %c0_66 = arith.constant 0 : index
      %125 = vector.load %arg8[%c0_65, %c0_66] : memref<1x128xf32, #tpu.memory_space<vmem>>, vector<1x128xf32>
      %126 = arith.mulf %79, %124 : vector<1x128xf32>
      %127 = arith.subf %125, %126 : vector<1x128xf32>
      %cst_67 = arith.constant 0.000000e+00 : f32
      %128 = vector.broadcast %cst_67 : f32 to vector<1x128xf32>
      %129 = arith.cmpf oge, %124, %128 : vector<1x128xf32>
      %c0_68 = arith.constant 0 : index
      %c0_69 = arith.constant 0 : index
      %130 = vector.load %arg12[%c0_68, %c0_69] : memref<32x128xf32, #tpu.memory_space<vmem>>, vector<32x128xf32>
      %c0_70 = arith.constant 0 : index
      %c0_71 = arith.constant 0 : index
      %131 = vector.load %arg13[%c0_70, %c0_71] : memref<32x128xf32, #tpu.memory_space<vmem>>, vector<32x128xf32>
      %132 = vector.shape_cast %129 : vector<1x128xi1> to vector<1x128xi1>
      %133 = vector.broadcast %132 : vector<1x128xi1> to vector<32x128xi1>
      %134 = arith.select %133, %130, %131 : vector<32x128xi1>, vector<32x128xf32>
      %135 = vector.broadcast %124 : vector<1x128xf32> to vector<32x128xf32>
      %136 = arith.mulf %134, %135 : vector<32x128xf32>
      %137 = vector.broadcast %127 : vector<1x128xf32> to vector<32x128xf32>
      %138 = arith.addf %136, %137 : vector<32x128xf32>
      %cst_72 = arith.constant 0.000000e+00 : f32
      %139 = vector.broadcast %cst_72 : f32 to vector<32x128xf32>
      %140 = arith.cmpf ogt, %138, %139 : vector<32x128xf32>
      %cst_73 = arith.constant 2.000000e-01 : f32
      %141 = vector.broadcast %cst_73 : f32 to vector<32x128xf32>
      %142 = arith.mulf %141, %138 : vector<32x128xf32>
      %143 = arith.select %140, %138, %142 : vector<32x128xi1>, vector<32x128xf32>
      %144 = arith.truncf %143 : vector<32x128xf32> to vector<32x128xbf16>
      %c0_74 = arith.constant 0 : index
      %c0_75 = arith.constant 0 : index
      %c0_76 = arith.constant 0 : index
      %145 = vector.load %arg9[%c0_74, %c0_75, %c0_76] : memref<1x32x128xbf16, #tpu.memory_space<vmem>>, vector<1x32x128xbf16>
      %146 = vector.shape_cast %145 : vector<1x32x128xbf16> to vector<32x128xbf16>
      %147 = vector.shape_cast %144 : vector<32x128xbf16> to vector<1x32x128xbf16>
      tpu.vector_store %arg9[%c0_74, %c0_75, %c0_76], %147 {strides = array<i32>} : memref<1x32x128xbf16, #tpu.memory_space<vmem>>, vector<1x32x128xbf16>,
    } else {
    }
    return
  }
  func.func @transform_0(%arg0: i32, %arg1: i32) -> (i32, i32, i32, i32) {
    %c0_i32 = arith.constant 0 : i32
    %c0_i32_0 = arith.constant 0 : i32
    %c0_i32_1 = arith.constant 0 : i32
    return %arg0, %arg1, %c0_i32, %c0_i32_0 : i32, i32, i32, i32
  }
  func.func @transform_1(%arg0: i32, %arg1: i32) -> (i32, i32, i32) {
    %c0_i32 = arith.constant 0 : i32
    %c0_i32_0 = arith.constant 0 : i32
    return %arg0, %arg1, %c0_i32 : i32, i32, i32
  }
  func.func @transform_2(%arg0: i32, %arg1: i32) -> (i32, i32, i32) {
    %c0_i32 = arith.constant 0 : i32
    %c0_i32_0 = arith.constant 0 : i32
    return %arg0, %arg1, %c0_i32 : i32, i32, i32
  }
  func.func @transform_3(%arg0: i32, %arg1: i32) -> (i32, i32) {
    %c0_i32 = arith.constant 0 : i32
    %c0_i32_0 = arith.constant 0 : i32
    %c0_i32_1 = arith.constant 0 : i32
    return %c0_i32, %c0_i32_0 : i32, i32
  }
  func.func @transform_4(%arg0: i32, %arg1: i32) -> (i32, i32) {
    %c0_i32 = arith.constant 0 : i32
    %c0_i32_0 = arith.constant 0 : i32
    %c0_i32_1 = arith.constant 0 : i32
    return %c0_i32, %c0_i32_0 : i32, i32
  }
  func.func @transform_5(%arg0: i32, %arg1: i32) -> (i32, i32) {
    %c0_i32 = arith.constant 0 : i32
    %c0_i32_0 = arith.constant 0 : i32
    %c0_i32_1 = arith.constant 0 : i32
    return %c0_i32, %c0_i32_0 : i32, i32
  }
  func.func @transform_6(%arg0: i32, %arg1: i32) -> (i32, i32) {
    %c0_i32 = arith.constant 0 : i32
    %c0_i32_0 = arith.constant 0 : i32
    %c0_i32_1 = arith.constant 0 : i32
    return %c0_i32, %c0_i32_0 : i32, i32
  }
  func.func @transform_7(%arg0: i32, %arg1: i32) -> (i32, i32, i32) {
    %c0_i32 = arith.constant 0 : i32
    %c0_i32_0 = arith.constant 0 : i32
    %c0_i32_1 = arith.constant 0 : i32
    return %arg0, %c0_i32, %c0_i32_0 : i32, i32, i32
  }
}

module attributes {stable_mosaic.version = 11 : i64} {
  func.func @kernel(%arg0: i32, %arg1: i32, %arg2: memref<1x32x16x64xbf16, #tpu.memory_space<vmem>>, %arg3: memref<1x32x64xbf16, #tpu.memory_space<vmem>>, %arg4: memref<1x32x1xf32, #tpu.memory_space<vmem>>, %arg5: memref<64x128xbf16, #tpu.memory_space<vmem>>, %arg6: memref<64x128xbf16, #tpu.memory_space<vmem>>, %arg7: memref<1x128xf32, #tpu.memory_space<vmem>>, %arg8: memref<1x128xf32, #tpu.memory_space<vmem>>, %arg9: memref<1x32x128xbf16, #tpu.memory_space<vmem>>, %arg10: memref<1x128xf32, #tpu.memory_space<vmem>>, %arg11: memref<1x128xf32, #tpu.memory_space<vmem>>, %arg12: memref<32x128xf32, #tpu.memory_space<vmem>>, %arg13: memref<32x128xf32, #tpu.memory_space<vmem>>) attributes {dimension_semantics = [#tpu.dimension_semantics<parallel>, #tpu.dimension_semantics<arbitrary>], iteration_bounds = array<i64: 2, 1>, scalar_prefetch = 0 : i64, scratch_operands = 4 : i64, tpu.core_type = #tpu.core_type<tc>, window_params = [{transform_indices = @transform_0, window_bounds = array<i64: 1, 32, 16, 64>}, {transform_indices = @transform_1, window_bounds = array<i64: 1, 32, 64>}, {transform_indices = @transform_2, window_bounds = array<i64: 1, 32, 1>}, {pipeline_mode = #tpu.pipeline_mode<synchronous>, transform_indices = @transform_3, window_bounds = array<i64: 64, 128>}, {pipeline_mode = #tpu.pipeline_mode<synchronous>, transform_indices = @transform_4, window_bounds = array<i64: 64, 128>}, {pipeline_mode = #tpu.pipeline_mode<synchronous>, transform_indices = @transform_5, window_bounds = array<i64: 1, 128>}, {pipeline_mode = #tpu.pipeline_mode<synchronous>, transform_indices = @transform_6, window_bounds = array<i64: 1, 128>}, {transform_indices = @transform_7, window_bounds = array<i64: 1, 32, 128>}]} {
    %c0_i32 = arith.constant 0 : i32
    %0 = arith.cmpi eq, %arg1, %c0_i32 : i32
    %1 = arith.extui %0 : i1 to i32
    %c0_i32_0 = arith.constant 0 : i32
    %2 = arith.cmpi ne, %1, %c0_i32_0 : i32
    scf.if %2 {
      %cst_31 = arith.constant 0.000000e+00 : f32
      %44 = vector.broadcast %cst_31 : f32 to vector<1x128xf32>
      %c0_32 = arith.constant 0 : index
      %c0_33 = arith.constant 0 : index
      %45 = vector.load %arg10[%c0_32, %c0_33] : memref<1x128xf32, #tpu.memory_space<vmem>>, vector<1x128xf32>
      tpu.vector_store %arg10[%c0_32, %c0_33], %44 {strides = array<i32>} : memref<1x128xf32, #tpu.memory_space<vmem>>, vector<1x128xf32>,
      %cst_34 = arith.constant 0.000000e+00 : f32
      %46 = vector.broadcast %cst_34 : f32 to vector<1x128xf32>
      %c0_35 = arith.constant 0 : index
      %c0_36 = arith.constant 0 : index
      %47 = vector.load %arg11[%c0_35, %c0_36] : memref<1x128xf32, #tpu.memory_space<vmem>>, vector<1x128xf32>
      tpu.vector_store %arg11[%c0_35, %c0_36], %46 {strides = array<i32>} : memref<1x128xf32, #tpu.memory_space<vmem>>, vector<1x128xf32>,
    } else {
    }
    %c0 = arith.constant 0 : index
    %c0_1 = arith.constant 0 : index
    %c0_2 = arith.constant 0 : index
    %c0_3 = arith.constant 0 : index
    %3 = vector.load %arg2[%c0, %c0_1, %c0_2, %c0_3] : memref<1x32x16x64xbf16, #tpu.memory_space<vmem>>, vector<1x32x16x64xbf16>
    %4 = vector.shape_cast %3 : vector<1x32x16x64xbf16> to vector<32x16x64xbf16>
    %5 = vector.shape_cast %4 : vector<32x16x64xbf16> to vector<512x64xbf16>
    %c0_4 = arith.constant 0 : index
    %c0_5 = arith.constant 0 : index
    %6 = vector.load %arg5[%c0_4, %c0_5] : memref<64x128xbf16, #tpu.memory_space<vmem>>, vector<64x128xbf16>
    %cst = arith.constant dense<0.000000e+00> : vector<512x128xf32>
    %7 = tpu.matmul %5, %6, %cst {dimension_numbers = #tpu.dot_dimension_numbers<[1], [0], [0], [1], [0, 0, 1, 1], [], []>} : vector<512x64xbf16>, vector<64x128xbf16>, vector<512x128xf32> -> vector<512x128xf32>
    %8 = vector.shape_cast %7 : vector<512x128xf32> to vector<32x16x128xf32>
    %c0_6 = arith.constant 0 : index
    %c0_7 = arith.constant 0 : index
    %c0_8 = arith.constant 0 : index
    %9 = vector.load %arg3[%c0_6, %c0_7, %c0_8] : memref<1x32x64xbf16, #tpu.memory_space<vmem>>, vector<1x32x64xbf16>
    %10 = vector.shape_cast %9 : vector<1x32x64xbf16> to vector<32x64xbf16>
    %c0_9 = arith.constant 0 : index
    %c0_10 = arith.constant 0 : index
    %11 = vector.load %arg6[%c0_9, %c0_10] : memref<64x128xbf16, #tpu.memory_space<vmem>>, vector<64x128xbf16>
    %cst_11 = arith.constant dense<0.000000e+00> : vector<32x128xf32>
    %12 = tpu.matmul %10, %11, %cst_11 {dimension_numbers = #tpu.dot_dimension_numbers<[1], [0], [0], [1], [0, 0, 1, 1], [], []>} : vector<32x64xbf16>, vector<64x128xbf16>, vector<32x128xf32> -> vector<32x128xf32>
    %13 = vector.shape_cast %12 : vector<32x128xf32> to vector<32x1x128xf32>
    %14 = vector.broadcast %13 : vector<32x1x128xf32> to vector<32x16x128xf32>
    %15 = arith.addf %8, %14 : vector<32x16x128xf32>
    %c0_12 = arith.constant 0 : index
    %c0_13 = arith.constant 0 : index
    %c0_14 = arith.constant 0 : index
    %16 = vector.load %arg4[%c0_12, %c0_13, %c0_14] : memref<1x32x1xf32, #tpu.memory_space<vmem>>, vector<1x32x1xf32>
    %17 = vector.shape_cast %16 : vector<1x32x1xf32> to vector<32x1xf32>
    %18 = vector.shape_cast %17 : vector<32x1xf32> to vector<32x1x1xf32>
    %19 = vector.broadcast %18 : vector<32x1x1xf32> to vector<32x16x128xf32>
    %20 = arith.mulf %15, %19 : vector<32x16x128xf32>
    %21 = vector.shape_cast %20 : vector<32x16x128xf32> to vector<512x128xf32>
    %c0_15 = arith.constant 0 : index
    %c0_16 = arith.constant 0 : index
    %22 = vector.load %arg10[%c0_15, %c0_16] : memref<1x128xf32, #tpu.memory_space<vmem>>, vector<1x128xf32>
    %cst_17 = arith.constant dense<0.000000e+00> : vector<128xf32>
    %23 = vector.multi_reduction <add>, %21, %cst_17 [0] : vector<512x128xf32> to vector<128xf32>
    %24 = vector.shape_cast %23 : vector<128xf32> to vector<1x128xf32>
    %25 = arith.addf %22, %24 : vector<1x128xf32>
    %c0_18 = arith.constant 0 : index
    %c0_19 = arith.constant 0 : index
    %26 = vector.load %arg10[%c0_18, %c0_19] : memref<1x128xf32, #tpu.memory_space<vmem>>, vector<1x128xf32>
    tpu.vector_store %arg10[%c0_18, %c0_19], %25 {strides = array<i32>} : memref<1x128xf32, #tpu.memory_space<vmem>>, vector<1x128xf32>,
    %c0_20 = arith.constant 0 : index
    %c0_21 = arith.constant 0 : index
    %27 = vector.load %arg11[%c0_20, %c0_21] : memref<1x128xf32, #tpu.memory_space<vmem>>, vector<1x128xf32>
    %28 = arith.mulf %21, %21 : vector<512x128xf32>
    %cst_22 = arith.constant dense<0.000000e+00> : vector<128xf32>
    %29 = vector.multi_reduction <add>, %28, %cst_22 [0] : vector<512x128xf32> to vector<128xf32>
    %30 = vector.shape_cast %29 : vector<128xf32> to vector<1x128xf32>
    %31 = arith.addf %27, %30 : vector<1x128xf32>
    %c0_23 = arith.constant 0 : index
    %c0_24 = arith.constant 0 : index
    %32 = vector.load %arg11[%c0_23, %c0_24] : memref<1x128xf32, #tpu.memory_space<vmem>>, vector<1x128xf32>
    tpu.vector_store %arg11[%c0_23, %c0_24], %31 {strides = array<i32>} : memref<1x128xf32, #tpu.memory_space<vmem>>, vector<1x128xf32>,
    %c32_i32 = arith.constant 32 : i32
    %33 = arith.muli %arg1, %c32_i32 : i32
    %34 = tpu.assume_multiple %33, 8 : i32
    %cst_25 = arith.constant dense<0xFF800000> : vector<32x128xf32>
    %35 = vector.multi_reduction <maximumf>, %20, %cst_25 [1] : vector<32x16x128xf32> to vector<32x128xf32>
    %36 = arith.index_cast %34 : i32 to index
    %c0_26 = arith.constant 0 : index
    %37 = vector.load %arg12[%36, %c0_26] : memref<32x128xf32, #tpu.memory_space<vmem>>, vector<32x128xf32>
    tpu.vector_store %arg12[%36, %c0_26], %35 {strides = array<i32>} : memref<32x128xf32, #tpu.memory_space<vmem>>, vector<32x128xf32>,
    %cst_27 = arith.constant dense<0x7F800000> : vector<32x128xf32>
    %38 = vector.multi_reduction <minimumf>, %20, %cst_27 [1] : vector<32x16x128xf32> to vector<32x128xf32>
    %39 = arith.index_cast %34 : i32 to index
    %c0_28 = arith.constant 0 : index
    %40 = vector.load %arg13[%39, %c0_28] : memref<32x128xf32, #tpu.memory_space<vmem>>, vector<32x128xf32>
    tpu.vector_store %arg13[%39, %c0_28], %38 {strides = array<i32>} : memref<32x128xf32, #tpu.memory_space<vmem>>, vector<32x128xf32>,
    %c0_i32_29 = arith.constant 0 : i32
    %41 = arith.cmpi eq, %arg1, %c0_i32_29 : i32
    %42 = arith.extui %41 : i1 to i32
    %c0_i32_30 = arith.constant 0 : i32
    %43 = arith.cmpi ne, %42, %c0_i32_30 : i32
    scf.if %43 {
      %c0_31 = arith.constant 0 : index
      %c0_32 = arith.constant 0 : index
      %44 = vector.load %arg10[%c0_31, %c0_32] : memref<1x128xf32, #tpu.memory_space<vmem>>, vector<1x128xf32>
      %45 = tpu.iota {dimensions = array<i32: 1>} : vector<1x128xi32>
      %c127_i32 = arith.constant 127 : i32
      %46 = tpu.dynamic_rotate %44 by %c127_i32 dim 1 : vector<1x128xf32>, i32 -> vector<1x128xf32>
      %c1_i32 = arith.constant 1 : i32
      %47 = tpu.dynamic_rotate %44 by %c1_i32 dim 1 : vector<1x128xf32>, i32 -> vector<1x128xf32>
      %c1_i32_33 = arith.constant 1 : i32
      %48 = vector.broadcast %c1_i32_33 : i32 to vector<1x128xi32>
      %49 = arith.andi %45, %48 : vector<1x128xi32>
      %c0_i32_34 = arith.constant 0 : i32
      %50 = vector.broadcast %c0_i32_34 : i32 to vector<1x128xi32>
      %51 = arith.cmpi eq, %49, %50 : vector<1x128xi32>
      %52 = arith.select %51, %46, %47 : vector<1x128xi1>, vector<1x128xf32>
      %53 = arith.addf %44, %52 : vector<1x128xf32>
      %c126_i32 = arith.constant 126 : i32
      %54 = tpu.dynamic_rotate %53 by %c126_i32 dim 1 : vector<1x128xf32>, i32 -> vector<1x128xf32>
      %c2_i32 = arith.constant 2 : i32
      %55 = tpu.dynamic_rotate %53 by %c2_i32 dim 1 : vector<1x128xf32>, i32 -> vector<1x128xf32>
      %c2_i32_35 = arith.constant 2 : i32
      %56 = vector.broadcast %c2_i32_35 : i32 to vector<1x128xi32>
      %57 = arith.andi %45, %56 : vector<1x128xi32>
      %c0_i32_36 = arith.constant 0 : i32
      %58 = vector.broadcast %c0_i32_36 : i32 to vector<1x128xi32>
      %59 = arith.cmpi eq, %57, %58 : vector<1x128xi32>
      %60 = arith.select %59, %54, %55 : vector<1x128xi1>, vector<1x128xf32>
      %61 = arith.addf %53, %60 : vector<1x128xf32>
      %c124_i32 = arith.constant 124 : i32
      %62 = tpu.dynamic_rotate %61 by %c124_i32 dim 1 : vector<1x128xf32>, i32 -> vector<1x128xf32>
      %c4_i32 = arith.constant 4 : i32
      %63 = tpu.dynamic_rotate %61 by %c4_i32 dim 1 : vector<1x128xf32>, i32 -> vector<1x128xf32>
      %c4_i32_37 = arith.constant 4 : i32
      %64 = vector.broadcast %c4_i32_37 : i32 to vector<1x128xi32>
      %65 = arith.andi %45, %64 : vector<1x128xi32>
      %c0_i32_38 = arith.constant 0 : i32
      %66 = vector.broadcast %c0_i32_38 : i32 to vector<1x128xi32>
      %67 = arith.cmpi eq, %65, %66 : vector<1x128xi32>
      %68 = arith.select %67, %62, %63 : vector<1x128xi1>, vector<1x128xf32>
      %69 = arith.addf %61, %68 : vector<1x128xf32>
      %c120_i32 = arith.constant 120 : i32
      %70 = tpu.dynamic_rotate %69 by %c120_i32 dim 1 : vector<1x128xf32>, i32 -> vector<1x128xf32>
      %c8_i32 = arith.constant 8 : i32
      %71 = tpu.dynamic_rotate %69 by %c8_i32 dim 1 : vector<1x128xf32>, i32 -> vector<1x128xf32>
      %c8_i32_39 = arith.constant 8 : i32
      %72 = vector.broadcast %c8_i32_39 : i32 to vector<1x128xi32>
      %73 = arith.andi %45, %72 : vector<1x128xi32>
      %c0_i32_40 = arith.constant 0 : i32
      %74 = vector.broadcast %c0_i32_40 : i32 to vector<1x128xi32>
      %75 = arith.cmpi eq, %73, %74 : vector<1x128xi32>
      %76 = arith.select %75, %70, %71 : vector<1x128xi1>, vector<1x128xf32>
      %77 = arith.addf %69, %76 : vector<1x128xf32>
      %cst_41 = arith.constant 1.22070313E-4 : f32
      %78 = vector.broadcast %cst_41 : f32 to vector<1x128xf32>
      %79 = arith.mulf %77, %78 : vector<1x128xf32>
      %c0_42 = arith.constant 0 : index
      %c0_43 = arith.constant 0 : index
      %80 = vector.load %arg11[%c0_42, %c0_43] : memref<1x128xf32, #tpu.memory_space<vmem>>, vector<1x128xf32>
      %81 = tpu.iota {dimensions = array<i32: 1>} : vector<1x128xi32>
      %c127_i32_44 = arith.constant 127 : i32
      %82 = tpu.dynamic_rotate %80 by %c127_i32_44 dim 1 : vector<1x128xf32>, i32 -> vector<1x128xf32>
      %c1_i32_45 = arith.constant 1 : i32
      %83 = tpu.dynamic_rotate %80 by %c1_i32_45 dim 1 : vector<1x128xf32>, i32 -> vector<1x128xf32>
      %c1_i32_46 = arith.constant 1 : i32
      %84 = vector.broadcast %c1_i32_46 : i32 to vector<1x128xi32>
      %85 = arith.andi %81, %84 : vector<1x128xi32>
      %c0_i32_47 = arith.constant 0 : i32
      %86 = vector.broadcast %c0_i32_47 : i32 to vector<1x128xi32>
      %87 = arith.cmpi eq, %85, %86 : vector<1x128xi32>
      %88 = arith.select %87, %82, %83 : vector<1x128xi1>, vector<1x128xf32>
      %89 = arith.addf %80, %88 : vector<1x128xf32>
      %c126_i32_48 = arith.constant 126 : i32
      %90 = tpu.dynamic_rotate %89 by %c126_i32_48 dim 1 : vector<1x128xf32>, i32 -> vector<1x128xf32>
      %c2_i32_49 = arith.constant 2 : i32
      %91 = tpu.dynamic_rotate %89 by %c2_i32_49 dim 1 : vector<1x128xf32>, i32 -> vector<1x128xf32>
      %c2_i32_50 = arith.constant 2 : i32
      %92 = vector.broadcast %c2_i32_50 : i32 to vector<1x128xi32>
      %93 = arith.andi %81, %92 : vector<1x128xi32>
      %c0_i32_51 = arith.constant 0 : i32
      %94 = vector.broadcast %c0_i32_51 : i32 to vector<1x128xi32>
      %95 = arith.cmpi eq, %93, %94 : vector<1x128xi32>
      %96 = arith.select %95, %90, %91 : vector<1x128xi1>, vector<1x128xf32>
      %97 = arith.addf %89, %96 : vector<1x128xf32>
      %c124_i32_52 = arith.constant 124 : i32
      %98 = tpu.dynamic_rotate %97 by %c124_i32_52 dim 1 : vector<1x128xf32>, i32 -> vector<1x128xf32>
      %c4_i32_53 = arith.constant 4 : i32
      %99 = tpu.dynamic_rotate %97 by %c4_i32_53 dim 1 : vector<1x128xf32>, i32 -> vector<1x128xf32>
      %c4_i32_54 = arith.constant 4 : i32
      %100 = vector.broadcast %c4_i32_54 : i32 to vector<1x128xi32>
      %101 = arith.andi %81, %100 : vector<1x128xi32>
      %c0_i32_55 = arith.constant 0 : i32
      %102 = vector.broadcast %c0_i32_55 : i32 to vector<1x128xi32>
      %103 = arith.cmpi eq, %101, %102 : vector<1x128xi32>
      %104 = arith.select %103, %98, %99 : vector<1x128xi1>, vector<1x128xf32>
      %105 = arith.addf %97, %104 : vector<1x128xf32>
      %c120_i32_56 = arith.constant 120 : i32
      %106 = tpu.dynamic_rotate %105 by %c120_i32_56 dim 1 : vector<1x128xf32>, i32 -> vector<1x128xf32>
      %c8_i32_57 = arith.constant 8 : i32
      %107 = tpu.dynamic_rotate %105 by %c8_i32_57 dim 1 : vector<1x128xf32>, i32 -> vector<1x128xf32>
      %c8_i32_58 = arith.constant 8 : i32
      %108 = vector.broadcast %c8_i32_58 : i32 to vector<1x128xi32>
      %109 = arith.andi %81, %108 : vector<1x128xi32>
      %c0_i32_59 = arith.constant 0 : i32
      %110 = vector.broadcast %c0_i32_59 : i32 to vector<1x128xi32>
      %111 = arith.cmpi eq, %109, %110 : vector<1x128xi32>
      %112 = arith.select %111, %106, %107 : vector<1x128xi1>, vector<1x128xf32>
      %113 = arith.addf %105, %112 : vector<1x128xf32>
      %cst_60 = arith.constant 1.22070313E-4 : f32
      %114 = vector.broadcast %cst_60 : f32 to vector<1x128xf32>
      %115 = arith.mulf %113, %114 : vector<1x128xf32>
      %116 = arith.mulf %79, %79 : vector<1x128xf32>
      %117 = arith.subf %115, %116 : vector<1x128xf32>
      %cst_61 = arith.constant 0.000000e+00 : f32
      %118 = vector.broadcast %cst_61 : f32 to vector<1x128xf32>
      %119 = arith.maximumf %117, %118 : vector<1x128xf32>
      %cst_62 = arith.constant 9.99999974E-6 : f32
      %120 = vector.broadcast %cst_62 : f32 to vector<1x128xf32>
      %121 = arith.addf %119, %120 : vector<1x128xf32>
      %122 = math.rsqrt %121 : vector<1x128xf32>
      %c0_63 = arith.constant 0 : index
      %c0_64 = arith.constant 0 : index
      %123 = vector.load %arg7[%c0_63, %c0_64] : memref<1x128xf32, #tpu.memory_space<vmem>>, vector<1x128xf32>
      %124 = arith.mulf %122, %123 : vector<1x128xf32>
      %c0_65 = arith.constant 0 : index
      %c0_66 = arith.constant 0 : index
      %125 = vector.load %arg8[%c0_65, %c0_66] : memref<1x128xf32, #tpu.memory_space<vmem>>, vector<1x128xf32>
      %126 = arith.mulf %79, %124 : vector<1x128xf32>
      %127 = arith.subf %125, %126 : vector<1x128xf32>
      %cst_67 = arith.constant 0.000000e+00 : f32
      %128 = vector.broadcast %cst_67 : f32 to vector<1x128xf32>
      %129 = arith.cmpf oge, %124, %128 : vector<1x128xf32>
      %c0_68 = arith.constant 0 : index
      %c0_69 = arith.constant 0 : index
      %130 = vector.load %arg12[%c0_68, %c0_69] : memref<32x128xf32, #tpu.memory_space<vmem>>, vector<32x128xf32>
      %c0_70 = arith.constant 0 : index
      %c0_71 = arith.constant 0 : index
      %131 = vector.load %arg13[%c0_70, %c0_71] : memref<32x128xf32, #tpu.memory_space<vmem>>, vector<32x128xf32>
      %132 = vector.shape_cast %129 : vector<1x128xi1> to vector<1x128xi1>
      %133 = vector.broadcast %132 : vector<1x128xi1> to vector<32x128xi1>
      %134 = arith.select %133, %130, %131 : vector<32x128xi1>, vector<32x128xf32>
      %135 = vector.broadcast %124 : vector<1x128xf32> to vector<32x128xf32>
      %136 = arith.mulf %134, %135 : vector<32x128xf32>
      %137 = vector.broadcast %127 : vector<1x128xf32> to vector<32x128xf32>
      %138 = arith.addf %136, %137 : vector<32x128xf32>
      %cst_72 = arith.constant 0.000000e+00 : f32
      %139 = vector.broadcast %cst_72 : f32 to vector<32x128xf32>
      %140 = arith.cmpf ogt, %138, %139 : vector<32x128xf32>
      %cst_73 = arith.constant 2.000000e-01 : f32
      %141 = vector.broadcast %cst_73 : f32 to vector<32x128xf32>
      %142 = arith.mulf %141, %138 : vector<32x128xf32>
      %143 = arith.select %140, %138, %142 : vector<32x128xi1>, vector<32x128xf32>
      %144 = arith.truncf %143 : vector<32x128xf32> to vector<32x128xbf16>
      %c0_74 = arith.constant 0 : index
      %c0_75 = arith.constant 0 : index
      %c0_76 = arith.constant 0 : index
      %145 = vector.load %arg9[%c0_74, %c0_75, %c0_76] : memref<1x32x128xbf16, #tpu.memory_space<vmem>>, vector<1x32x128xbf16>
      %146 = vector.shape_cast %145 : vector<1x32x128xbf16> to vector<32x128xbf16>
      %147 = vector.shape_cast %144 : vector<32x128xbf16> to vector<1x32x128xbf16>
      tpu.vector_store %arg9[%c0_74, %c0_75, %c0_76], %147 {strides = array<i32>} : memref<1x32x128xbf16, #tpu.memory_space<vmem>>, vector<1x32x128xbf16>,
    } else {
    }
    return
  }
  func.func @transform_0(%arg0: i32, %arg1: i32) -> (i32, i32, i32, i32) {
    %c0_i32 = arith.constant 0 : i32
    %c0_i32_0 = arith.constant 0 : i32
    %c0_i32_1 = arith.constant 0 : i32
    return %arg0, %arg1, %c0_i32, %c0_i32_0 : i32, i32, i32, i32
  }
  func.func @transform_1(%arg0: i32, %arg1: i32) -> (i32, i32, i32) {
    %c0_i32 = arith.constant 0 : i32
    %c0_i32_0 = arith.constant 0 : i32
    return %arg0, %arg1, %c0_i32 : i32, i32, i32
  }
  func.func @transform_2(%arg0: i32, %arg1: i32) -> (i32, i32, i32) {
    %c0_i32 = arith.constant 0 : i32
    %c0_i32_0 = arith.constant 0 : i32
    return %arg0, %arg1, %c0_i32 : i32, i32, i32
  }
  func.func @transform_3(%arg0: i32, %arg1: i32) -> (i32, i32) {
    %c0_i32 = arith.constant 0 : i32
    %c0_i32_0 = arith.constant 0 : i32
    %c0_i32_1 = arith.constant 0 : i32
    return %c0_i32, %c0_i32_0 : i32, i32
  }
  func.func @transform_4(%arg0: i32, %arg1: i32) -> (i32, i32) {
    %c0_i32 = arith.constant 0 : i32
    %c0_i32_0 = arith.constant 0 : i32
    %c0_i32_1 = arith.constant 0 : i32
    return %c0_i32, %c0_i32_0 : i32, i32
  }
  func.func @transform_5(%arg0: i32, %arg1: i32) -> (i32, i32) {
    %c0_i32 = arith.constant 0 : i32
    %c0_i32_0 = arith.constant 0 : i32
    %c0_i32_1 = arith.constant 0 : i32
    return %c0_i32, %c0_i32_0 : i32, i32
  }
  func.func @transform_6(%arg0: i32, %arg1: i32) -> (i32, i32) {
    %c0_i32 = arith.constant 0 : i32
    %c0_i32_0 = arith.constant 0 : i32
    %c0_i32_1 = arith.constant 0 : i32
    return %c0_i32, %c0_i32_0 : i32, i32
  }
  func.func @transform_7(%arg0: i32, %arg1: i32) -> (i32, i32, i32) {
    %c0_i32 = arith.constant 0 : i32
    %c0_i32_0 = arith.constant 0 : i32
    %c0_i32_1 = arith.constant 0 : i32
    return %arg0, %c0_i32, %c0_i32_0 : i32, i32, i32
  }
}

module attributes {stable_mosaic.version = 11 : i64} {
  func.func @kernel(%arg0: i32, %arg1: i32, %arg2: memref<1x16x16x64xbf16, #tpu.memory_space<vmem>>, %arg3: memref<1x16x64xbf16, #tpu.memory_space<vmem>>, %arg4: memref<1x16x1xf32, #tpu.memory_space<vmem>>, %arg5: memref<64x128xbf16, #tpu.memory_space<vmem>>, %arg6: memref<64x128xbf16, #tpu.memory_space<vmem>>, %arg7: memref<1x128xf32, #tpu.memory_space<vmem>>, %arg8: memref<1x128xf32, #tpu.memory_space<vmem>>, %arg9: memref<1x16x128xf32, #tpu.memory_space<vmem>>, %arg10: memref<1x128xf32, #tpu.memory_space<vmem>>, %arg11: memref<1x128xf32, #tpu.memory_space<vmem>>, %arg12: memref<16x128xf32, #tpu.memory_space<vmem>>, %arg13: memref<16x128xf32, #tpu.memory_space<vmem>>) attributes {dimension_semantics = [#tpu.dimension_semantics<parallel>, #tpu.dimension_semantics<arbitrary>], iteration_bounds = array<i64: 2, 1>, scalar_prefetch = 0 : i64, scratch_operands = 4 : i64, tpu.core_type = #tpu.core_type<tc>, window_params = [{transform_indices = @transform_0, window_bounds = array<i64: 1, 16, 16, 64>}, {transform_indices = @transform_1, window_bounds = array<i64: 1, 16, 64>}, {transform_indices = @transform_2, window_bounds = array<i64: 1, 16, 1>}, {pipeline_mode = #tpu.pipeline_mode<synchronous>, transform_indices = @transform_3, window_bounds = array<i64: 64, 128>}, {pipeline_mode = #tpu.pipeline_mode<synchronous>, transform_indices = @transform_4, window_bounds = array<i64: 64, 128>}, {pipeline_mode = #tpu.pipeline_mode<synchronous>, transform_indices = @transform_5, window_bounds = array<i64: 1, 128>}, {pipeline_mode = #tpu.pipeline_mode<synchronous>, transform_indices = @transform_6, window_bounds = array<i64: 1, 128>}, {transform_indices = @transform_7, window_bounds = array<i64: 1, 16, 128>}]} {
    %c0_i32 = arith.constant 0 : i32
    %0 = arith.cmpi eq, %arg1, %c0_i32 : i32
    %1 = arith.extui %0 : i1 to i32
    %c0_i32_0 = arith.constant 0 : i32
    %2 = arith.cmpi ne, %1, %c0_i32_0 : i32
    scf.if %2 {
      %cst_31 = arith.constant 0.000000e+00 : f32
      %44 = vector.broadcast %cst_31 : f32 to vector<1x128xf32>
      %c0_32 = arith.constant 0 : index
      %c0_33 = arith.constant 0 : index
      %45 = vector.load %arg10[%c0_32, %c0_33] : memref<1x128xf32, #tpu.memory_space<vmem>>, vector<1x128xf32>
      tpu.vector_store %arg10[%c0_32, %c0_33], %44 {strides = array<i32>} : memref<1x128xf32, #tpu.memory_space<vmem>>, vector<1x128xf32>,
      %cst_34 = arith.constant 0.000000e+00 : f32
      %46 = vector.broadcast %cst_34 : f32 to vector<1x128xf32>
      %c0_35 = arith.constant 0 : index
      %c0_36 = arith.constant 0 : index
      %47 = vector.load %arg11[%c0_35, %c0_36] : memref<1x128xf32, #tpu.memory_space<vmem>>, vector<1x128xf32>
      tpu.vector_store %arg11[%c0_35, %c0_36], %46 {strides = array<i32>} : memref<1x128xf32, #tpu.memory_space<vmem>>, vector<1x128xf32>,
    } else {
    }
    %c0 = arith.constant 0 : index
    %c0_1 = arith.constant 0 : index
    %c0_2 = arith.constant 0 : index
    %c0_3 = arith.constant 0 : index
    %3 = vector.load %arg2[%c0, %c0_1, %c0_2, %c0_3] : memref<1x16x16x64xbf16, #tpu.memory_space<vmem>>, vector<1x16x16x64xbf16>
    %4 = vector.shape_cast %3 : vector<1x16x16x64xbf16> to vector<16x16x64xbf16>
    %5 = vector.shape_cast %4 : vector<16x16x64xbf16> to vector<256x64xbf16>
    %c0_4 = arith.constant 0 : index
    %c0_5 = arith.constant 0 : index
    %6 = vector.load %arg5[%c0_4, %c0_5] : memref<64x128xbf16, #tpu.memory_space<vmem>>, vector<64x128xbf16>
    %cst = arith.constant dense<0.000000e+00> : vector<256x128xf32>
    %7 = tpu.matmul %5, %6, %cst {dimension_numbers = #tpu.dot_dimension_numbers<[1], [0], [0], [1], [0, 0, 1, 1], [], []>} : vector<256x64xbf16>, vector<64x128xbf16>, vector<256x128xf32> -> vector<256x128xf32>
    %8 = vector.shape_cast %7 : vector<256x128xf32> to vector<16x16x128xf32>
    %c0_6 = arith.constant 0 : index
    %c0_7 = arith.constant 0 : index
    %c0_8 = arith.constant 0 : index
    %9 = vector.load %arg3[%c0_6, %c0_7, %c0_8] : memref<1x16x64xbf16, #tpu.memory_space<vmem>>, vector<1x16x64xbf16>
    %10 = vector.shape_cast %9 : vector<1x16x64xbf16> to vector<16x64xbf16>
    %c0_9 = arith.constant 0 : index
    %c0_10 = arith.constant 0 : index
    %11 = vector.load %arg6[%c0_9, %c0_10] : memref<64x128xbf16, #tpu.memory_space<vmem>>, vector<64x128xbf16>
    %cst_11 = arith.constant dense<0.000000e+00> : vector<16x128xf32>
    %12 = tpu.matmul %10, %11, %cst_11 {dimension_numbers = #tpu.dot_dimension_numbers<[1], [0], [0], [1], [0, 0, 1, 1], [], []>} : vector<16x64xbf16>, vector<64x128xbf16>, vector<16x128xf32> -> vector<16x128xf32>
    %13 = vector.shape_cast %12 : vector<16x128xf32> to vector<16x1x128xf32>
    %14 = vector.broadcast %13 : vector<16x1x128xf32> to vector<16x16x128xf32>
    %15 = arith.addf %8, %14 : vector<16x16x128xf32>
    %c0_12 = arith.constant 0 : index
    %c0_13 = arith.constant 0 : index
    %c0_14 = arith.constant 0 : index
    %16 = vector.load %arg4[%c0_12, %c0_13, %c0_14] : memref<1x16x1xf32, #tpu.memory_space<vmem>>, vector<1x16x1xf32>
    %17 = vector.shape_cast %16 : vector<1x16x1xf32> to vector<16x1xf32>
    %18 = vector.shape_cast %17 : vector<16x1xf32> to vector<16x1x1xf32>
    %19 = vector.broadcast %18 : vector<16x1x1xf32> to vector<16x16x128xf32>
    %20 = arith.mulf %15, %19 : vector<16x16x128xf32>
    %21 = vector.shape_cast %20 : vector<16x16x128xf32> to vector<256x128xf32>
    %c0_15 = arith.constant 0 : index
    %c0_16 = arith.constant 0 : index
    %22 = vector.load %arg10[%c0_15, %c0_16] : memref<1x128xf32, #tpu.memory_space<vmem>>, vector<1x128xf32>
    %cst_17 = arith.constant dense<0.000000e+00> : vector<128xf32>
    %23 = vector.multi_reduction <add>, %21, %cst_17 [0] : vector<256x128xf32> to vector<128xf32>
    %24 = vector.shape_cast %23 : vector<128xf32> to vector<1x128xf32>
    %25 = arith.addf %22, %24 : vector<1x128xf32>
    %c0_18 = arith.constant 0 : index
    %c0_19 = arith.constant 0 : index
    %26 = vector.load %arg10[%c0_18, %c0_19] : memref<1x128xf32, #tpu.memory_space<vmem>>, vector<1x128xf32>
    tpu.vector_store %arg10[%c0_18, %c0_19], %25 {strides = array<i32>} : memref<1x128xf32, #tpu.memory_space<vmem>>, vector<1x128xf32>,
    %c0_20 = arith.constant 0 : index
    %c0_21 = arith.constant 0 : index
    %27 = vector.load %arg11[%c0_20, %c0_21] : memref<1x128xf32, #tpu.memory_space<vmem>>, vector<1x128xf32>
    %28 = arith.mulf %21, %21 : vector<256x128xf32>
    %cst_22 = arith.constant dense<0.000000e+00> : vector<128xf32>
    %29 = vector.multi_reduction <add>, %28, %cst_22 [0] : vector<256x128xf32> to vector<128xf32>
    %30 = vector.shape_cast %29 : vector<128xf32> to vector<1x128xf32>
    %31 = arith.addf %27, %30 : vector<1x128xf32>
    %c0_23 = arith.constant 0 : index
    %c0_24 = arith.constant 0 : index
    %32 = vector.load %arg11[%c0_23, %c0_24] : memref<1x128xf32, #tpu.memory_space<vmem>>, vector<1x128xf32>
    tpu.vector_store %arg11[%c0_23, %c0_24], %31 {strides = array<i32>} : memref<1x128xf32, #tpu.memory_space<vmem>>, vector<1x128xf32>,
    %c16_i32 = arith.constant 16 : i32
    %33 = arith.muli %arg1, %c16_i32 : i32
    %34 = tpu.assume_multiple %33, 8 : i32
    %cst_25 = arith.constant dense<0xFF800000> : vector<16x128xf32>
    %35 = vector.multi_reduction <maximumf>, %20, %cst_25 [1] : vector<16x16x128xf32> to vector<16x128xf32>
    %36 = arith.index_cast %34 : i32 to index
    %c0_26 = arith.constant 0 : index
    %37 = vector.load %arg12[%36, %c0_26] : memref<16x128xf32, #tpu.memory_space<vmem>>, vector<16x128xf32>
    tpu.vector_store %arg12[%36, %c0_26], %35 {strides = array<i32>} : memref<16x128xf32, #tpu.memory_space<vmem>>, vector<16x128xf32>,
    %cst_27 = arith.constant dense<0x7F800000> : vector<16x128xf32>
    %38 = vector.multi_reduction <minimumf>, %20, %cst_27 [1] : vector<16x16x128xf32> to vector<16x128xf32>
    %39 = arith.index_cast %34 : i32 to index
    %c0_28 = arith.constant 0 : index
    %40 = vector.load %arg13[%39, %c0_28] : memref<16x128xf32, #tpu.memory_space<vmem>>, vector<16x128xf32>
    tpu.vector_store %arg13[%39, %c0_28], %38 {strides = array<i32>} : memref<16x128xf32, #tpu.memory_space<vmem>>, vector<16x128xf32>,
    %c0_i32_29 = arith.constant 0 : i32
    %41 = arith.cmpi eq, %arg1, %c0_i32_29 : i32
    %42 = arith.extui %41 : i1 to i32
    %c0_i32_30 = arith.constant 0 : i32
    %43 = arith.cmpi ne, %42, %c0_i32_30 : i32
    scf.if %43 {
      %c0_31 = arith.constant 0 : index
      %c0_32 = arith.constant 0 : index
      %44 = vector.load %arg10[%c0_31, %c0_32] : memref<1x128xf32, #tpu.memory_space<vmem>>, vector<1x128xf32>
      %45 = tpu.iota {dimensions = array<i32: 1>} : vector<1x128xi32>
      %c127_i32 = arith.constant 127 : i32
      %46 = tpu.dynamic_rotate %44 by %c127_i32 dim 1 : vector<1x128xf32>, i32 -> vector<1x128xf32>
      %c1_i32 = arith.constant 1 : i32
      %47 = tpu.dynamic_rotate %44 by %c1_i32 dim 1 : vector<1x128xf32>, i32 -> vector<1x128xf32>
      %c1_i32_33 = arith.constant 1 : i32
      %48 = vector.broadcast %c1_i32_33 : i32 to vector<1x128xi32>
      %49 = arith.andi %45, %48 : vector<1x128xi32>
      %c0_i32_34 = arith.constant 0 : i32
      %50 = vector.broadcast %c0_i32_34 : i32 to vector<1x128xi32>
      %51 = arith.cmpi eq, %49, %50 : vector<1x128xi32>
      %52 = arith.select %51, %46, %47 : vector<1x128xi1>, vector<1x128xf32>
      %53 = arith.addf %44, %52 : vector<1x128xf32>
      %c126_i32 = arith.constant 126 : i32
      %54 = tpu.dynamic_rotate %53 by %c126_i32 dim 1 : vector<1x128xf32>, i32 -> vector<1x128xf32>
      %c2_i32 = arith.constant 2 : i32
      %55 = tpu.dynamic_rotate %53 by %c2_i32 dim 1 : vector<1x128xf32>, i32 -> vector<1x128xf32>
      %c2_i32_35 = arith.constant 2 : i32
      %56 = vector.broadcast %c2_i32_35 : i32 to vector<1x128xi32>
      %57 = arith.andi %45, %56 : vector<1x128xi32>
      %c0_i32_36 = arith.constant 0 : i32
      %58 = vector.broadcast %c0_i32_36 : i32 to vector<1x128xi32>
      %59 = arith.cmpi eq, %57, %58 : vector<1x128xi32>
      %60 = arith.select %59, %54, %55 : vector<1x128xi1>, vector<1x128xf32>
      %61 = arith.addf %53, %60 : vector<1x128xf32>
      %c124_i32 = arith.constant 124 : i32
      %62 = tpu.dynamic_rotate %61 by %c124_i32 dim 1 : vector<1x128xf32>, i32 -> vector<1x128xf32>
      %c4_i32 = arith.constant 4 : i32
      %63 = tpu.dynamic_rotate %61 by %c4_i32 dim 1 : vector<1x128xf32>, i32 -> vector<1x128xf32>
      %c4_i32_37 = arith.constant 4 : i32
      %64 = vector.broadcast %c4_i32_37 : i32 to vector<1x128xi32>
      %65 = arith.andi %45, %64 : vector<1x128xi32>
      %c0_i32_38 = arith.constant 0 : i32
      %66 = vector.broadcast %c0_i32_38 : i32 to vector<1x128xi32>
      %67 = arith.cmpi eq, %65, %66 : vector<1x128xi32>
      %68 = arith.select %67, %62, %63 : vector<1x128xi1>, vector<1x128xf32>
      %69 = arith.addf %61, %68 : vector<1x128xf32>
      %c120_i32 = arith.constant 120 : i32
      %70 = tpu.dynamic_rotate %69 by %c120_i32 dim 1 : vector<1x128xf32>, i32 -> vector<1x128xf32>
      %c8_i32 = arith.constant 8 : i32
      %71 = tpu.dynamic_rotate %69 by %c8_i32 dim 1 : vector<1x128xf32>, i32 -> vector<1x128xf32>
      %c8_i32_39 = arith.constant 8 : i32
      %72 = vector.broadcast %c8_i32_39 : i32 to vector<1x128xi32>
      %73 = arith.andi %45, %72 : vector<1x128xi32>
      %c0_i32_40 = arith.constant 0 : i32
      %74 = vector.broadcast %c0_i32_40 : i32 to vector<1x128xi32>
      %75 = arith.cmpi eq, %73, %74 : vector<1x128xi32>
      %76 = arith.select %75, %70, %71 : vector<1x128xi1>, vector<1x128xf32>
      %77 = arith.addf %69, %76 : vector<1x128xf32>
      %c112_i32 = arith.constant 112 : i32
      %78 = tpu.dynamic_rotate %77 by %c112_i32 dim 1 : vector<1x128xf32>, i32 -> vector<1x128xf32>
      %c16_i32_41 = arith.constant 16 : i32
      %79 = tpu.dynamic_rotate %77 by %c16_i32_41 dim 1 : vector<1x128xf32>, i32 -> vector<1x128xf32>
      %c16_i32_42 = arith.constant 16 : i32
      %80 = vector.broadcast %c16_i32_42 : i32 to vector<1x128xi32>
      %81 = arith.andi %45, %80 : vector<1x128xi32>
      %c0_i32_43 = arith.constant 0 : i32
      %82 = vector.broadcast %c0_i32_43 : i32 to vector<1x128xi32>
      %83 = arith.cmpi eq, %81, %82 : vector<1x128xi32>
      %84 = arith.select %83, %78, %79 : vector<1x128xi1>, vector<1x128xf32>
      %85 = arith.addf %77, %84 : vector<1x128xf32>
      %cst_44 = arith.constant 1.22070313E-4 : f32
      %86 = vector.broadcast %cst_44 : f32 to vector<1x128xf32>
      %87 = arith.mulf %85, %86 : vector<1x128xf32>
      %c0_45 = arith.constant 0 : index
      %c0_46 = arith.constant 0 : index
      %88 = vector.load %arg11[%c0_45, %c0_46] : memref<1x128xf32, #tpu.memory_space<vmem>>, vector<1x128xf32>
      %89 = tpu.iota {dimensions = array<i32: 1>} : vector<1x128xi32>
      %c127_i32_47 = arith.constant 127 : i32
      %90 = tpu.dynamic_rotate %88 by %c127_i32_47 dim 1 : vector<1x128xf32>, i32 -> vector<1x128xf32>
      %c1_i32_48 = arith.constant 1 : i32
      %91 = tpu.dynamic_rotate %88 by %c1_i32_48 dim 1 : vector<1x128xf32>, i32 -> vector<1x128xf32>
      %c1_i32_49 = arith.constant 1 : i32
      %92 = vector.broadcast %c1_i32_49 : i32 to vector<1x128xi32>
      %93 = arith.andi %89, %92 : vector<1x128xi32>
      %c0_i32_50 = arith.constant 0 : i32
      %94 = vector.broadcast %c0_i32_50 : i32 to vector<1x128xi32>
      %95 = arith.cmpi eq, %93, %94 : vector<1x128xi32>
      %96 = arith.select %95, %90, %91 : vector<1x128xi1>, vector<1x128xf32>
      %97 = arith.addf %88, %96 : vector<1x128xf32>
      %c126_i32_51 = arith.constant 126 : i32
      %98 = tpu.dynamic_rotate %97 by %c126_i32_51 dim 1 : vector<1x128xf32>, i32 -> vector<1x128xf32>
      %c2_i32_52 = arith.constant 2 : i32
      %99 = tpu.dynamic_rotate %97 by %c2_i32_52 dim 1 : vector<1x128xf32>, i32 -> vector<1x128xf32>
      %c2_i32_53 = arith.constant 2 : i32
      %100 = vector.broadcast %c2_i32_53 : i32 to vector<1x128xi32>
      %101 = arith.andi %89, %100 : vector<1x128xi32>
      %c0_i32_54 = arith.constant 0 : i32
      %102 = vector.broadcast %c0_i32_54 : i32 to vector<1x128xi32>
      %103 = arith.cmpi eq, %101, %102 : vector<1x128xi32>
      %104 = arith.select %103, %98, %99 : vector<1x128xi1>, vector<1x128xf32>
      %105 = arith.addf %97, %104 : vector<1x128xf32>
      %c124_i32_55 = arith.constant 124 : i32
      %106 = tpu.dynamic_rotate %105 by %c124_i32_55 dim 1 : vector<1x128xf32>, i32 -> vector<1x128xf32>
      %c4_i32_56 = arith.constant 4 : i32
      %107 = tpu.dynamic_rotate %105 by %c4_i32_56 dim 1 : vector<1x128xf32>, i32 -> vector<1x128xf32>
      %c4_i32_57 = arith.constant 4 : i32
      %108 = vector.broadcast %c4_i32_57 : i32 to vector<1x128xi32>
      %109 = arith.andi %89, %108 : vector<1x128xi32>
      %c0_i32_58 = arith.constant 0 : i32
      %110 = vector.broadcast %c0_i32_58 : i32 to vector<1x128xi32>
      %111 = arith.cmpi eq, %109, %110 : vector<1x128xi32>
      %112 = arith.select %111, %106, %107 : vector<1x128xi1>, vector<1x128xf32>
      %113 = arith.addf %105, %112 : vector<1x128xf32>
      %c120_i32_59 = arith.constant 120 : i32
      %114 = tpu.dynamic_rotate %113 by %c120_i32_59 dim 1 : vector<1x128xf32>, i32 -> vector<1x128xf32>
      %c8_i32_60 = arith.constant 8 : i32
      %115 = tpu.dynamic_rotate %113 by %c8_i32_60 dim 1 : vector<1x128xf32>, i32 -> vector<1x128xf32>
      %c8_i32_61 = arith.constant 8 : i32
      %116 = vector.broadcast %c8_i32_61 : i32 to vector<1x128xi32>
      %117 = arith.andi %89, %116 : vector<1x128xi32>
      %c0_i32_62 = arith.constant 0 : i32
      %118 = vector.broadcast %c0_i32_62 : i32 to vector<1x128xi32>
      %119 = arith.cmpi eq, %117, %118 : vector<1x128xi32>
      %120 = arith.select %119, %114, %115 : vector<1x128xi1>, vector<1x128xf32>
      %121 = arith.addf %113, %120 : vector<1x128xf32>
      %c112_i32_63 = arith.constant 112 : i32
      %122 = tpu.dynamic_rotate %121 by %c112_i32_63 dim 1 : vector<1x128xf32>, i32 -> vector<1x128xf32>
      %c16_i32_64 = arith.constant 16 : i32
      %123 = tpu.dynamic_rotate %121 by %c16_i32_64 dim 1 : vector<1x128xf32>, i32 -> vector<1x128xf32>
      %c16_i32_65 = arith.constant 16 : i32
      %124 = vector.broadcast %c16_i32_65 : i32 to vector<1x128xi32>
      %125 = arith.andi %89, %124 : vector<1x128xi32>
      %c0_i32_66 = arith.constant 0 : i32
      %126 = vector.broadcast %c0_i32_66 : i32 to vector<1x128xi32>
      %127 = arith.cmpi eq, %125, %126 : vector<1x128xi32>
      %128 = arith.select %127, %122, %123 : vector<1x128xi1>, vector<1x128xf32>
      %129 = arith.addf %121, %128 : vector<1x128xf32>
      %cst_67 = arith.constant 1.22070313E-4 : f32
      %130 = vector.broadcast %cst_67 : f32 to vector<1x128xf32>
      %131 = arith.mulf %129, %130 : vector<1x128xf32>
      %132 = arith.mulf %87, %87 : vector<1x128xf32>
      %133 = arith.subf %131, %132 : vector<1x128xf32>
      %cst_68 = arith.constant 0.000000e+00 : f32
      %134 = vector.broadcast %cst_68 : f32 to vector<1x128xf32>
      %135 = arith.maximumf %133, %134 : vector<1x128xf32>
      %cst_69 = arith.constant 9.99999974E-6 : f32
      %136 = vector.broadcast %cst_69 : f32 to vector<1x128xf32>
      %137 = arith.addf %135, %136 : vector<1x128xf32>
      %138 = math.rsqrt %137 : vector<1x128xf32>
      %c0_70 = arith.constant 0 : index
      %c0_71 = arith.constant 0 : index
      %139 = vector.load %arg7[%c0_70, %c0_71] : memref<1x128xf32, #tpu.memory_space<vmem>>, vector<1x128xf32>
      %140 = arith.mulf %138, %139 : vector<1x128xf32>
      %c0_72 = arith.constant 0 : index
      %c0_73 = arith.constant 0 : index
      %141 = vector.load %arg8[%c0_72, %c0_73] : memref<1x128xf32, #tpu.memory_space<vmem>>, vector<1x128xf32>
      %142 = arith.mulf %87, %140 : vector<1x128xf32>
      %143 = arith.subf %141, %142 : vector<1x128xf32>
      %cst_74 = arith.constant 0.000000e+00 : f32
      %144 = vector.broadcast %cst_74 : f32 to vector<1x128xf32>
      %145 = arith.cmpf oge, %140, %144 : vector<1x128xf32>
      %c0_75 = arith.constant 0 : index
      %c0_76 = arith.constant 0 : index
      %146 = vector.load %arg12[%c0_75, %c0_76] : memref<16x128xf32, #tpu.memory_space<vmem>>, vector<16x128xf32>
      %c0_77 = arith.constant 0 : index
      %c0_78 = arith.constant 0 : index
      %147 = vector.load %arg13[%c0_77, %c0_78] : memref<16x128xf32, #tpu.memory_space<vmem>>, vector<16x128xf32>
      %148 = vector.shape_cast %145 : vector<1x128xi1> to vector<1x128xi1>
      %149 = vector.broadcast %148 : vector<1x128xi1> to vector<16x128xi1>
      %150 = arith.select %149, %146, %147 : vector<16x128xi1>, vector<16x128xf32>
      %151 = vector.broadcast %140 : vector<1x128xf32> to vector<16x128xf32>
      %152 = arith.mulf %150, %151 : vector<16x128xf32>
      %153 = vector.broadcast %143 : vector<1x128xf32> to vector<16x128xf32>
      %154 = arith.addf %152, %153 : vector<16x128xf32>
      %cst_79 = arith.constant 0.000000e+00 : f32
      %155 = vector.broadcast %cst_79 : f32 to vector<16x128xf32>
      %156 = arith.cmpf ogt, %154, %155 : vector<16x128xf32>
      %cst_80 = arith.constant 2.000000e-01 : f32
      %157 = vector.broadcast %cst_80 : f32 to vector<16x128xf32>
      %158 = arith.mulf %157, %154 : vector<16x128xf32>
      %159 = arith.select %156, %154, %158 : vector<16x128xi1>, vector<16x128xf32>
      %c0_81 = arith.constant 0 : index
      %c0_82 = arith.constant 0 : index
      %c0_83 = arith.constant 0 : index
      %160 = vector.load %arg9[%c0_81, %c0_82, %c0_83] : memref<1x16x128xf32, #tpu.memory_space<vmem>>, vector<1x16x128xf32>
      %161 = vector.shape_cast %160 : vector<1x16x128xf32> to vector<16x128xf32>
      %162 = vector.shape_cast %159 : vector<16x128xf32> to vector<1x16x128xf32>
      tpu.vector_store %arg9[%c0_81, %c0_82, %c0_83], %162 {strides = array<i32>} : memref<1x16x128xf32, #tpu.memory_space<vmem>>, vector<1x16x128xf32>,
    } else {
    }
    return
  }
  func.func @transform_0(%arg0: i32, %arg1: i32) -> (i32, i32, i32, i32) {
    %c0_i32 = arith.constant 0 : i32
    %c0_i32_0 = arith.constant 0 : i32
    %c0_i32_1 = arith.constant 0 : i32
    return %arg0, %arg1, %c0_i32, %c0_i32_0 : i32, i32, i32, i32
  }
  func.func @transform_1(%arg0: i32, %arg1: i32) -> (i32, i32, i32) {
    %c0_i32 = arith.constant 0 : i32
    %c0_i32_0 = arith.constant 0 : i32
    return %arg0, %arg1, %c0_i32 : i32, i32, i32
  }
  func.func @transform_2(%arg0: i32, %arg1: i32) -> (i32, i32, i32) {
    %c0_i32 = arith.constant 0 : i32
    %c0_i32_0 = arith.constant 0 : i32
    return %arg0, %arg1, %c0_i32 : i32, i32, i32
  }
  func.func @transform_3(%arg0: i32, %arg1: i32) -> (i32, i32) {
    %c0_i32 = arith.constant 0 : i32
    %c0_i32_0 = arith.constant 0 : i32
    %c0_i32_1 = arith.constant 0 : i32
    return %c0_i32, %c0_i32_0 : i32, i32
  }
  func.func @transform_4(%arg0: i32, %arg1: i32) -> (i32, i32) {
    %c0_i32 = arith.constant 0 : i32
    %c0_i32_0 = arith.constant 0 : i32
    %c0_i32_1 = arith.constant 0 : i32
    return %c0_i32, %c0_i32_0 : i32, i32
  }
  func.func @transform_5(%arg0: i32, %arg1: i32) -> (i32, i32) {
    %c0_i32 = arith.constant 0 : i32
    %c0_i32_0 = arith.constant 0 : i32
    %c0_i32_1 = arith.constant 0 : i32
    return %c0_i32, %c0_i32_0 : i32, i32
  }
  func.func @transform_6(%arg0: i32, %arg1: i32) -> (i32, i32) {
    %c0_i32 = arith.constant 0 : i32
    %c0_i32_0 = arith.constant 0 : i32
    %c0_i32_1 = arith.constant 0 : i32
    return %c0_i32, %c0_i32_0 : i32, i32
  }
  func.func @transform_7(%arg0: i32, %arg1: i32) -> (i32, i32, i32) {
    %c0_i32 = arith.constant 0 : i32
    %c0_i32_0 = arith.constant 0 : i32
    %c0_i32_1 = arith.constant 0 : i32
    return %arg0, %c0_i32, %c0_i32_0 : i32, i32, i32
  }
}

</mosaic_0001>

<bundles_post_ra>
// kernel: device_forward.4
= control target key start
LH: loop header
LB: loop body
LE: loop exit
PB: predicated region body
PF: predicated region fallthrough
CT: control target
= control target key end

     0   :  { %s4716_s24 = smov 0   ;;  %s4718_s25 = smov 0   ;;  %s6869_s0 = inlined_call_operand.vmem [shape: bf16[2,64,16,11], index: 0, kind: input, shape index: {}]   ;;  %s6870_s1 = inlined_call_operand.vmem [shape: bf16[2,64,11], index: 1, kind: input, shape index: {}]   ;;  %s6871_s2 = inlined_call_operand.vmem [shape: f32[2,64,1], index: 2, kind: input, shape index: {}]   ;;  %s6872_s3 = inlined_call_operand.vmem [shape: bf16[11,128], index: 3, kind: input, shape index: {}]   ;;  %s6873_s4 = inlined_call_operand.vmem [shape: bf16[11,128], index: 4, kind: input, shape index: {}]   ;;  %s6874_s5 = inlined_call_operand.vmem [shape: f32[1,128], index: 5, kind: input, shape index: {}]   ;;  %s6875_s6 = inlined_call_operand.vmem [shape: f32[1,128], index: 6, kind: input, shape index: {}]   ;;  %s6876_s7 = inlined_call_operand.vmem [shape: bf16[2,64,128], index: 7, kind: output, shape index: {}]  }
   0x1   :  { %s4720_s26 = smov 0  }
   0x2 LB: > { %s29_s27 = sadd.s32 1, %s4661_s25  ;;  %p4146_p0 = scmp.ge.s32.totalorder %s4665_s26, 1  ;;  %s4665_s26 = sphi %s4720_s26, %s17_s26   ;;  %s4661_s25 = sphi %s4718_s25, %s7489_s25   ;;  %s4657_s24 = sphi %s4716_s24, %s7488_s24  }
   0x3   : > { %p31_p1 = scmp.ge.s32.totalorder %s29_s27, 2  ;;  %p291_p2 = scmp.lt.s32.totalorder %s4665_s26, 3 }
   0x5   : > { %s7491_s27 = smov (%p31_p1, %s29_s27), 0  ;;  %p292_p3 = pnand %p4146_p0, %p291_p2 }
   0x7   : > { %295 = sbr.rel (%p292_p3) target bundleno = 1232 (0x4d0), region = 48 }
   0xc   : > { %v4413_v0 = vld [vmem:[%s6872_s3] sm:$0xf]  ;;  %v4573_v1 = vld [vmem:[%s6872_s3] sm:$0x30]  ;;  %vm1037_vm0 = vcmask 1044480   ;;  %vm1038_vm1 = vcmask 1045504  }
   0xd   : > { %v4414_v2 = vor.u32 %v4573_v1, %v4413_v0  ;;  %p347_p4 = scmp.lt.s32.totalorder %s4657_s24, 1  ;;  %v4497_v3 = vld [vmem:[%s6873_s4] sm:$0xf]  ;;  %v4667_v4 = vmov 65535   ;;  %v4578_v6 = vld [vmem:[%s6873_s4] sm:$0x30] }
   0xe   : > { %v1039_v5 = vsel %vm1037_vm0, 4294967295, %v4667_v4  ;;  %v4498_v8 = vor.u32 %v4578_v6, %v4497_v3  ;;  %vm844_vm2 = vcmask 89088   ;;  %v6877_v15 = vmov 0   ;;  %s4670_s29 = smov 1   ;;  %s4671_s30 = smov 127  }
   0xf   : > { %v1040_v7 = vsel %vm1038_vm1, %v1039_v5, 0  ;;  %s7493_s24 = smov (!%p347_p4, %s4657_s24), 1  ;;  %4638 = vset.pattern.permute.xlu0 %v6877_v15  ;;  %4639 = vset.pattern.permute.xlu1 %v6877_v15  ;;  %vm3205_vm3 = vcmask 1041409   ;;  %vm3207_vm4 = vcmask 1042434   ;;  %vm3209_vm5 = vcmask 1043459   ;;  %s4672_s8 = smov 2  }
  0x10   : > { %v1042_v9 = vand.u32 %v4414_v2, %v1040_v7  ;;  %s4505_s13 = sshll.u32 %s7493_s24, 9  ;;  %v1421_v10 = vand.u32 %v4498_v8, %v1040_v7  ;;  %4640 = vset.pattern.permute.xlu2 %v6877_v15  ;;  %s4507_s17 = sshll.u32 %s7493_s24, 6  ;;  %vm3211_vm6 = vcmask 1044484   ;;  %vm3213_vm7 = vcmask 1045509  }
  0x11   : > { %s4752_s16 = scalar_lea.vmem %s6869_s0, %s4505_s13  ;;  %s4773_s20 = scalar_lea.vmem %s6871_s2, %s4507_s17  ;;  %vm3215_vm8 = vcmask 1046534   ;;  %vm3217_vm9 = vcmask 1047559  }
  0x12   : > { %1051 = vmatpush.bf16.msra.mxu0 %v1042_v9  ;;  %4602 = vmatpush.bf16.msra.mxu1 %v1042_v9  ;;  %v4509_v11 = vld [vmem:[%s4752_s16] sm:$0xff]  ;;  %v4526_v12 = vld [vmem:[%s4752_s16 + $0x88] sm:$0xff]  ;;  %v4539_v13 = vld [vmem:[%s4752_s16 + $0xf0] sm:$0xff]  ;;  %s4506_s21 = sshll.u32 %s7493_s24, 5  ;;  %s4673_s9 = smov 126  }
  0x13   : > { %4603 = vmatpush.bf16.msra.mxu2 %v1042_v9  ;;  %4604 = vmatpush.bf16.msra.mxu3 %v1042_v9  ;;  %v4556_v14 = vld [vmem:[%s4752_s16 + $0x178] sm:$0xff]  ;;  %v4510_v16 = vld [vmem:[%s4752_s16 + $0x8] sm:$0xff]  ;;  %v4527_v17 = vld [vmem:[%s4752_s16 + $0x90] sm:$0xff]  ;;  %s5008_s28 = scalar_lea.vmem %s6870_s1, %s4506_s21  ;;  %s4674_s10 = smov 124  }
  0x14   : > { %v4540_v18 = vld [vmem:[%s4752_s16 + $0xf8] sm:$0xff]  ;;  %v4557_v19 = vld [vmem:[%s4752_s16 + $0x180] sm:$0xff]  ;;  %v4511_v24 = vld [vmem:[%s4752_s16 + $0x10] sm:$0xff]  ;;  %s4675_s11 = smov 4   ;;  %s381_s18 = scalar_lea.vmem %s6876_s7, %s4506_s21 }
  0x15   : > { %4415 = vmatmul.msk.bf16.vlgmr.msra.gmra.mxu0 %vm844_vm2, %v4509_v11  ;;  %4432 = vmatmul.msk.bf16.vlgmr.msra.gmra.mxu1 %vm844_vm2, %v4526_v12  ;;  %v4778_v20 = vld [vmem:[%s4773_s20] sm:$0xff]  ;;  %v4528_v25 = vld [vmem:[%s4752_s16 + $0x98] sm:$0xff]  ;;  %v4558_v27 = vld [vmem:[%s4752_s16 + $0x188] sm:$0xff] }
  0x16   : > { %1430 = vmatpush.bf16.msrb.mxu1 %v1421_v10  ;;  %4445 = vmatmul.msk.bf16.vlgmr.msra.gmra.mxu2 %vm844_vm2, %v4539_v13  ;;  %v1844_v21 = vperm.slane %v4778_v20, 0  ;;  %v1788_v22 = vrot.slane %v4778_v20, 1  ;;  %v4541_v26 = vld [vmem:[%s4752_s16 + $0x100] sm:$0xff]  ;;  %v1789_v28 = vrot.slane %v4778_v20, 2  ;;  %v1793_v29 = vrot.slane %v4778_v20, 6  ;;  %v4795_v32 = vld [vmem:[%s4773_s20 + $0x8] sm:$0xff] }
  0x17   : > { %4462 = vmatmul.msk.bf16.vlgmr.msra.gmra.mxu3 %vm844_vm2, %v4556_v14  ;;  %v1790_v33 = vrot.slane %v4778_v20, 3  ;;  %v1795_v34 = vrot.slane %v4795_v32, 1  ;;  %v4512_v37 = vld [vmem:[%s4752_s16 + $0x18] sm:$0xff]  ;;  %v4529_v38 = vld [vmem:[%s4752_s16 + $0xa0] sm:$0xff]  ;;  %v4542_v39 = vld [vmem:[%s4752_s16 + $0x108] sm:$0xff]  ;;  %v1794_v41 = vrot.slane %v4778_v20, 7 }
  0x18   : > { %1909 = vperm.xlu0 %4638, %v1844_v21   ;;  %v1845_v23 = vperm.slane %v1788_v22, 0  ;;  %v1846_v30 = vperm.slane %v1789_v28, 0  ;;  %v1850_v31 = vperm.slane %v1793_v29, 0  ;;  %v4559_v40 = vld [vmem:[%s4752_s16 + $0x190] sm:$0xff]  ;;  %v1798_v42 = vrot.slane %v4795_v32, 4  ;;  %v4513_v49 = vld [vmem:[%s4752_s16 + $0x20] sm:$0xff] }
  0x19   : > { %v1847_v35 = vperm.slane %v1790_v33, 0  ;;  %v1853_v36 = vperm.slane %v1795_v34, 0  ;;  %v1851_v43 = vperm.slane %v1794_v41, 0  ;;  %v1796_v45 = vrot.slane %v4795_v32, 2  ;;  %v4530_v50 = vld [vmem:[%s4752_s16 + $0xa8] sm:$0xff]  ;;  %v4543_v51 = vld [vmem:[%s4752_s16 + $0x110] sm:$0xff] }
  0x1a   : > { %1917 = vperm.xlu1 %4639, %v1846_v30   ;;  %v1856_v44 = vperm.slane %v1798_v42, 0  ;;  %v1801_v46 = vrot.slane %v4795_v32, 7  ;;  %v4560_v52 = vld [vmem:[%s4752_s16 + $0x198] sm:$0xff]  ;;  %v4816_v53 = vld [vmem:[%s4773_s20 + $0x10] sm:$0xff]  ;;  %v1791_v54 = vrot.slane %v4778_v20, 4  ;;  %v1799_v55 = vrot.slane %v4795_v32, 5 }
  0x1b   : > { %v1854_v47 = vperm.slane %v1796_v45, 0  ;;  %v1803_v56 = vrot.slane %v4816_v53, 2  ;;  %v1792_v60 = vrot.slane %v4778_v20, 5  ;;  %v1806_v61 = vrot.slane %v4816_v53, 5  ;;  %v4514_v1 = vld [vmem:[%s4752_s16 + $0x28] sm:$0xff]  ;;  %v4531_v2 = vld [vmem:[%s4752_s16 + $0xb0] sm:$0xff] }
  0x1c   : > { %v1859_v48 = vperm.slane %v1801_v46, 0  ;;  %v1848_v57 = vperm.slane %v1791_v54, 0  ;;  %v1857_v58 = vperm.slane %v1799_v55, 0  ;;  %v1860_v63 = vperm.slane %v4816_v53, 0  ;;  %v4544_v3 = vld [vmem:[%s4752_s16 + $0x118] sm:$0xff]  ;;  %v4561_v4 = vld [vmem:[%s4752_s16 + $0x1a0] sm:$0xff] }
  0x1d   : > { %v1862_v59 = vperm.slane %v1803_v56, 0  ;;  %v1849_v62 = vperm.slane %v1792_v60, 0  ;;  %v1865_v0 = vperm.slane %v1806_v61, 0  ;;  %v1804_v5 = vrot.slane %v4816_v53, 3  ;;  %v4837_v8 = vld [vmem:[%s4773_s20 + $0x18] sm:$0xff]  ;;  %v4562_v20 = vld [vmem:[%s4752_s16 + $0x1a8] sm:$0xff] }
  0x1e   : > { %1925 = vperm.xlu2 %4640, %v1848_v57   ;;  %v1852_v6 = vperm.slane %v4795_v32, 0  ;;  %v1868_v9 = vperm.slane %v4837_v8, 0  ;;  %v1797_v10 = vrot.slane %v4795_v32, 3  ;;  %v1807_v11 = vrot.slane %v4816_v53, 6  ;;  %v4859_v29 = vld [vmem:[%s4773_s20 + $0x20] sm:$0xff]  ;;  %v4516_v34 = vld [vmem:[%s4752_s16 + $0x38] sm:$0xff] }
  0x1f   : > { %v1863_v7 = vperm.slane %v1804_v5, 0  ;;  %v1811_v12 = vrot.slane %v4837_v8, 3  ;;  %v1800_v21 = vrot.slane %v4795_v32, 6  ;;  %v1809_v22 = vrot.slane %v4837_v8, 1  ;;  %v4547_v54 = vld [vmem:[%s4752_s16 + $0x130] sm:$0xff]  ;;  %v4564_v55 = vld [vmem:[%s4752_s16 + $0x1b8] sm:$0xff] }
  0x20   : > { %1913 = vperm.xlu0 %4638, %v1845_v23   ;;  %v1855_v13 = vperm.slane %v1797_v10, 0  ;;  %v1866_v14 = vperm.slane %v1807_v11, 0  ;;  %v1814_v23 = vrot.slane %v4837_v8, 6  ;;  %v1812_v28 = vrot.slane %v4837_v8, 4  ;;  %v4883_v56 = vld [vmem:[%s4773_s20 + $0x28] sm:$0xff]  ;;  %v4565_v10 = vld [vmem:[%s4752_s16 + $0x1c0] sm:$0xff] }
  0x21   : > { %v1816_v30 = vrot.slane %v4859_v29, 1  ;;  %v1817_v45 = vrot.slane %v4859_v29, 2  ;;  %v1822_v46 = vrot.slane %v4859_v29, 7  ;;  %v1820_v57 = vrot.slane %v4859_v29, 5  ;;  %v4518_v5 = vld [vmem:[%s4752_s16 + $0x48] sm:$0xff] }
  0x22   : > { %1921 = vperm.xlu1 %4639, %v1847_v35   ;;  %v1872_v32 = vperm.slane %v1812_v28, 0  ;;  %v4533_v35 = vld [vmem:[%s4752_s16 + $0xc0] sm:$0xff]  ;;  %v1876_v11 = vperm.slane %v4859_v29, 0 }
  0x23   : > { %v1877_v33 = vperm.slane %v1816_v30, 0  ;;  %v1881_v60 = vperm.slane %v1820_v57, 0  ;;  %v4549_v28 = vld [vmem:[%s4752_s16 + $0x140] sm:$0xff]  ;;  %v4566_v30 = vld [vmem:[%s4752_s16 + $0x1c8] sm:$0xff] }
  0x25   : > { %4416 = vmatmul.msk.bf16.gmra.mxu0 %vm844_vm2, %v4510_v16  ;;  %4433 = vmatmul.msk.bf16.gmra.mxu1 %vm844_vm2, %v4527_v17  ;;  %v1871_v16 = vperm.slane %v1811_v12, 0  ;;  %v4515_v17 = vld [vmem:[%s4752_s16 + $0x30] sm:$0xff] }
  0x26   : > { %4446 = vmatmul.msk.bf16.gmra.mxu2 %vm844_vm2, %v4540_v18  ;;  %1929 = vperm.xlu2 %4640, %v1849_v62   ;;  %v4532_v18 = vld [vmem:[%s4752_s16 + $0xb8] sm:$0xff] }
  0x27   : > { %4463 = vmatmul.msk.bf16.gmra.mxu3 %vm844_vm2, %v4557_v19  ;;  %v4545_v19 = vld [vmem:[%s4752_s16 + $0x120] sm:$0xff] }
  0x28   : > { %1933 = vperm.xlu0 %4638, %v1850_v31  }
  0x2a   : > { %1937 = vperm.xlu1 %4639, %v1851_v43  }
  0x2e   : > { %1941 = vperm.xlu2 %4640, %v1852_v6   ;;  %v4535_v6 = vld [vmem:[%s4752_s16 + $0xd0] sm:$0xff] }
  0x30   : > { %1945 = vperm.xlu0 %4638, %v1853_v36   ;;  %v4546_v36 = vld [vmem:[%s4752_s16 + $0x128] sm:$0xff] }
  0x32   : > { %1949 = vperm.xlu1 %4639, %v1854_v47  }
  0x35   : > { %4417 = vmatmul.msk.bf16.gmra.mxu0 %vm844_vm2, %v4511_v24  ;;  %4434 = vmatmul.msk.bf16.gmra.mxu1 %vm844_vm2, %v4528_v25  ;;  %v1858_v24 = vperm.slane %v1800_v21, 0  ;;  %v1869_v25 = vperm.slane %v1809_v22, 0 }
  0x36   : > { %4447 = vmatmul.msk.bf16.gmra.mxu2 %vm844_vm2, %v4541_v26  ;;  %1953 = vperm.xlu2 %4640, %v1855_v13   ;;  %v1874_v26 = vperm.slane %v1814_v23, 0  ;;  %v4910_v13 = vld [vmem:[%s4773_s20 + $0x30] sm:$0xff] }
  0x37   : > { %4464 = vmatmul.msk.bf16.gmra.mxu3 %vm844_vm2, %v4558_v27  ;;  %v1802_v27 = vrot.slane %v4816_v53, 1 }
  0x38   : > { %1957 = vperm.xlu0 %4638, %v1856_v44   ;;  %v1808_v44 = vrot.slane %v4816_v53, 7 }
  0x39   : > { %v1861_v31 = vperm.slane %v1802_v27, 0 }
  0x3a   : > { %1961 = vperm.xlu1 %4639, %v1857_v58   ;;  %v1867_v47 = vperm.slane %v1808_v44, 0  ;;  %v1824_v58 = vrot.slane %v4883_v56, 2 }
  0x3c   : > { %v1886_v61 = vperm.slane %v1824_v58, 0 }
  0x3e   : > { %1965 = vperm.xlu2 %4640, %v1858_v24  }
  0x40   : > { %1969 = vperm.xlu0 %4638, %v1859_v48   ;;  %v1878_v48 = vperm.slane %v1817_v45, 0 }
  0x42   : > { %1973 = vperm.xlu1 %4639, %v1860_v63   ;;  %v1813_v63 = vrot.slane %v4837_v8, 5 }
  0x45   : > { %4418 = vmatmul.msk.bf16.gmra.mxu0 %vm844_vm2, %v4512_v37  ;;  %4435 = vmatmul.msk.bf16.gmra.mxu1 %vm844_vm2, %v4529_v38  ;;  %v4563_v37 = vld [vmem:[%s4752_s16 + $0x1b0] sm:$0xff]  ;;  %v1805_v38 = vrot.slane %v4816_v53, 4  ;;  %v1810_v53 = vrot.slane %v4837_v8, 2 }
  0x46   : > { %4448 = vmatmul.msk.bf16.gmra.mxu2 %vm844_vm2, %v4542_v39  ;;  %1977 = vperm.xlu2 %4640, %v1861_v31   ;;  %v1815_v39 = vrot.slane %v4837_v8, 7  ;;  %v1825_v8 = vrot.slane %v4883_v56, 3  ;;  %v1821_v31 = vrot.slane %v4859_v29, 6 }
  0x47   : > { %4465 = vmatmul.msk.bf16.gmra.mxu3 %vm844_vm2, %v4559_v40  ;;  %v1819_v40 = vrot.slane %v4859_v29, 4  ;;  %v1864_v41 = vperm.slane %v1805_v38, 0  ;;  %v1823_v38 = vrot.slane %v4883_v56, 1 }
  0x48   : > { %1981 = vperm.xlu0 %4638, %v1862_v59   ;;  %v1875_v42 = vperm.slane %v1815_v39, 0  ;;  %v1870_v59 = vperm.slane %v1810_v53, 0  ;;  %v1887_v12 = vperm.slane %v1825_v8, 0  ;;  %v1833_v39 = vrot.slane %v4910_v13, 4 }
  0x49   : > { %v1880_v43 = vperm.slane %v1819_v40, 0  ;;  %v4944_v40 = vld [vmem:[%s4773_s20 + $0x38] sm:$0xff]  ;;  %v1885_v44 = vperm.slane %v1823_v38, 0 }
  0x4a   : > { %1985 = vperm.xlu1 %4639, %v1863_v7   ;;  %v1896_v45 = vperm.slane %v1833_v39, 0  ;;  %v1840_v53 = vrot.slane %v4944_v40, 4  ;;  %v4552_v38 = vld [vmem:[%s4752_s16 + $0x158] sm:$0xff]  ;;  %v4569_v39 = vld [vmem:[%s4752_s16 + $0x1e0] sm:$0xff] }
  0x4e   : > { %1989 = vperm.xlu2 %4640, %v1864_v41  }
  0x50   : > { %1993 = vperm.xlu0 %4638, %v1865_v0   ;;  %v1827_v0 = vrot.slane %v4883_v56, 5 }
  0x52   : > { %1997 = vperm.xlu1 %4639, %v1866_v14  }
  0x55   : > { %4419 = vmatmul.msk.bf16.gmra.mxu0 %vm844_vm2, %v4513_v49  ;;  %4436 = vmatmul.msk.bf16.gmra.mxu1 %vm844_vm2, %v4530_v50  ;;  %v1883_v49 = vperm.slane %v1822_v46, 0  ;;  %v4517_v50 = vld [vmem:[%s4752_s16 + $0x40] sm:$0xff] }
  0x56   : > { %4449 = vmatmul.msk.bf16.gmra.mxu2 %vm844_vm2, %v4543_v51  ;;  %2001 = vperm.xlu2 %4640, %v1867_v47   ;;  %v4534_v51 = vld [vmem:[%s4752_s16 + $0xc8] sm:$0xff]  ;;  %v4520_v47 = vld [vmem:[%s4752_s16 + $0x58] sm:$0xff] }
  0x57   : > { %4466 = vmatmul.msk.bf16.gmra.mxu3 %vm844_vm2, %v4560_v52 }
  0x58   : > { %2005 = vperm.xlu0 %4638, %v1868_v9   ;;  %v4548_v9 = vld [vmem:[%s4752_s16 + $0x138] sm:$0xff] }
  0x5a   : > { %2009 = vperm.xlu1 %4639, %v1869_v25   ;;  %v4519_v25 = vld [vmem:[%s4752_s16 + $0x50] sm:$0xff] }
  0x5e   : > { %2013 = vperm.xlu2 %4640, %v1870_v59  }
  0x60   : > { %2017 = vperm.xlu0 %4638, %v1871_v16   ;;  %v1892_v16 = vperm.slane %v4910_v13, 0 }
  0x62   : > { %2021 = vperm.xlu1 %4639, %v1872_v32   ;;  %v1830_v32 = vrot.slane %v4910_v13, 1 }
  0x65   : > { %4420 = vmatmul.msk.bf16.gmra.mxu0 %vm844_vm2, %v4514_v1  ;;  %4437 = vmatmul.msk.bf16.gmra.mxu1 %vm844_vm2, %v4531_v2  ;;  %v1884_v1 = vperm.slane %v4883_v56, 0 }
  0x66   : > { %4450 = vmatmul.msk.bf16.gmra.mxu2 %vm844_vm2, %v4544_v3  ;;  %v1873_v3 = vperm.slane %v1813_v63, 0 }
  0x67   : > { %4467 = vmatmul.msk.bf16.gmra.mxu3 %vm844_vm2, %v4561_v4  ;;  %v1889_v4 = vperm.slane %v1827_v0, 0 }
  0x68   : > { %2029 = vperm.xlu0 %4638, %v1874_v26   ;;  %2025 = vperm.xlu2 %4640, %v1873_v3   ;;  %v4536_v26 = vld [vmem:[%s4752_s16 + $0xd8] sm:$0xff]  ;;  %v1838_v3 = vrot.slane %v4944_v40, 2 }
  0x6a   : > { %2033 = vperm.xlu1 %4639, %v1875_v42   ;;  %v1837_v42 = vrot.slane %v4944_v40, 1 }
  0x6c   : > { %v1901_v46 = vperm.slane %v1837_v42, 0 }
  0x70   : > { %2041 = vperm.xlu0 %4638, %v1877_v33   ;;  %2037 = vperm.xlu2 %4640, %v1876_v11   ;;  %v1835_v33 = vrot.slane %v4910_v13, 6 }
  0x72   : > { %2045 = vperm.xlu1 %4639, %v1878_v48   ;;  %v4537_v48 = vld [vmem:[%s4752_s16 + $0xe0] sm:$0xff] }
  0x75   : > { %4421 = vmatmul.msk.bf16.gmra.mxu0 %vm844_vm2, %v4515_v17  ;;  %4438 = vmatmul.msk.bf16.gmra.mxu1 %vm844_vm2, %v4532_v18  ;;  %v1818_v18 = vrot.slane %v4859_v29, 3 }
  0x76   : > { %4451 = vmatmul.msk.bf16.gmra.mxu2 %vm844_vm2, %v4545_v19  ;;  %v1828_v19 = vrot.slane %v4883_v56, 6 }
  0x77   : > { %4468 = vmatmul.msk.bf16.gmra.mxu3 %vm844_vm2, %v4562_v20  ;;  %v1832_v20 = vrot.slane %v4910_v13, 3  ;;  %v1879_v21 = vperm.slane %v1818_v18, 0  ;;  %v4551_v18 = vld [vmem:[%s4752_s16 + $0x150] sm:$0xff] }
  0x78   : > { %2053 = vperm.xlu0 %4638, %v1880_v43   ;;  %v1890_v22 = vperm.slane %v1828_v19, 0  ;;  %v4568_v19 = vld [vmem:[%s4752_s16 + $0x1d8] sm:$0xff] }
  0x79   : > { %v1895_v23 = vperm.slane %v1832_v20, 0  ;;  %2049 = vperm.xlu2 %4640, %v1879_v21   ;;  %v1831_v20 = vrot.slane %v4910_v13, 2  ;;  %v1841_v21 = vrot.slane %v4944_v40, 5 }
  0x7a   : > { %2057 = vperm.xlu1 %4639, %v1881_v60  }
  0x80   : > { %2065 = vperm.xlu0 %4638, %v1883_v49  }
  0x82   : > { %2069 = vperm.xlu1 %4639, %v1884_v1   ;;  %v1829_v1 = vrot.slane %v4883_v56, 7 }
  0x85   : > { %4422 = vmatmul.msk.bf16.gmra.mxu0 %vm844_vm2, %v4516_v34  ;;  %4439 = vmatmul.msk.bf16.gmra.mxu1 %vm844_vm2, %v4533_v35  ;;  %v1882_v34 = vperm.slane %v1821_v31, 0  ;;  %v1893_v35 = vperm.slane %v1830_v32, 0  ;;  %v1834_v31 = vrot.slane %v4910_v13, 5 }
  0x86   : > { %4452 = vmatmul.msk.bf16.gmra.mxu2 %vm844_vm2, %v4546_v36  ;;  %v1898_v36 = vperm.slane %v1835_v33, 0  ;;  %v4522_v33 = vld [vmem:[%s4752_s16 + $0x68] sm:$0xff] }
  0x87   : > { %4469 = vmatmul.msk.bf16.gmra.mxu3 %vm844_vm2, %v4563_v37  ;;  %2061 = vperm.xlu2 %4640, %v1882_v34   ;;  %v1897_v32 = vperm.slane %v1834_v31, 0  ;;  %v4574_v34 = vld [vmem:[%s5008_s28] sm:$0xff] }
  0x88   : > { %2077 = vperm.xlu0 %4638, %v1886_v61   ;;  %v1904_v61 = vperm.slane %v1840_v53, 0 }
  0x8a   : > { %2081 = vperm.xlu1 %4639, %v1887_v12   ;;  %v4521_v12 = vld [vmem:[%s4752_s16 + $0x60] sm:$0xff] }
  0x8f   : > { %2073 = vperm.xlu2 %4640, %v1885_v44   ;;  %v1900_v44 = vperm.slane %v4944_v40, 0 }
  0x90   : > { %2089 = vperm.xlu0 %4638, %v1889_v4   ;;  %v1843_v4 = vrot.slane %v4944_v40, 7 }
  0x92   : > { %v4878_v52 = vpop.f32.mrf.mxu1  ;;  %v4897_v2 = vpop.f32.mrf.mxu0  ;;  %2093 = vperm.xlu1 %4639, %v1890_v22   ;;  %v1894_v22 = vperm.slane %v1831_v20, 0  ;;  %v4554_v20 = vld [vmem:[%s4752_s16 + $0x168] sm:$0xff] }
  0x93   : > { %7063 = vst [vmem:[#allocation6_spill] sm:$0xff] %v4878_v52 }
  0x95   : > { %4423 = vmatmul.msk.bf16.gmra.mxu0 %vm844_vm2, %v4517_v50  ;;  %4440 = vmatmul.msk.bf16.gmra.mxu1 %vm844_vm2, %v4534_v51  ;;  %v4550_v50 = vld [vmem:[%s4752_s16 + $0x148] sm:$0xff]  ;;  %v4567_v51 = vld [vmem:[%s4752_s16 + $0x1d0] sm:$0xff] }
  0x96   : > { %4453 = vmatmul.msk.bf16.gmra.mxu2 %vm844_vm2, %v4547_v54  ;;  %v1826_v54 = vrot.slane %v4883_v56, 4 }
  0x97   : > { %4470 = vmatmul.msk.bf16.gmra.mxu3 %vm844_vm2, %v4564_v55  ;;  %v1836_v55 = vrot.slane %v4910_v13, 7 }
  0x98   : > { %2101 = vperm.xlu0 %4638, %v1892_v16   ;;  %v1888_v59 = vperm.slane %v1826_v54, 0  ;;  %v4538_v16 = vld [vmem:[%s4752_s16 + $0xe8] sm:$0xff]  ;;  %v4523_v54 = vld [vmem:[%s4752_s16 + $0x70] sm:$0xff] }
  0x99   : > { %v4946_v41 = vpop.f32.mrf.mxu2  ;;  %v1899_v60 = vperm.slane %v1836_v55, 0  ;;  %v4575_v55 = vld [vmem:[%s5008_s28 + $0x8] sm:$0xff] }
  0x9a   : > { %v4892_v62 = vpop.f32.mrf.mxu1  ;;  %v4912_v14 = vpop.f32.mrf.mxu0  ;;  %2105 = vperm.xlu1 %4639, %v1893_v35   ;;  %7069 = vst [vmem:[#allocation12_spill] sm:$0xff] %v4946_v41  ;;  %2085 = vperm.xlu2 %4640, %v1888_v59   ;;  %v4553_v59 = vld [vmem:[%s4752_s16 + $0x160] sm:$0xff] }
  0x9b   : > { %7064 = vst [vmem:[#allocation7_spill] sm:$0xff] %v4892_v62  ;;  %v4949_v43 = vpop.f32.mrf.mxu3 }
  0x9c   : > { %7070 = vst [vmem:[#allocation13_spill] sm:$0xff] %v4949_v43 }
  0xa0   : > { %2113 = vperm.xlu0 %4638, %v1895_v23   ;;  %v1905_v23 = vperm.slane %v1841_v21, 0  ;;  %v4571_v21 = vld [vmem:[%s4752_s16 + $0x1f0] sm:$0xff] }
  0xa1   : > { %v4962_v58 = vpop.f32.mrf.mxu2 }
  0xa2   : > { %v4901_v7 = vpop.f32.mrf.mxu1  ;;  %v4922_v24 = vpop.f32.mrf.mxu0  ;;  %2117 = vperm.xlu1 %4639, %v1896_v45   ;;  %7072 = vst [vmem:[#allocation15_spill] sm:$0xff] %v4962_v58 }
  0xa3   : > { %7065 = vst [vmem:[#allocation8_spill] sm:$0xff] %v4901_v7  ;;  %v4966_v63 = vpop.f32.mrf.mxu3 }
  0xa4   : > { %7073 = vst [vmem:[#allocation16_spill] sm:$0xff] %v4966_v63  ;;  %v1918_v63 = vpop.permute.xlu1 %1917 }
  0xa5   : > { %4424 = vmatmul.msk.bf16.gmra.mxu0 %vm844_vm2, %v4518_v5  ;;  %4441 = vmatmul.msk.bf16.gmra.mxu1 %vm844_vm2, %v4535_v6  ;;  %v1891_v5 = vperm.slane %v1829_v1, 0  ;;  %v1902_v6 = vperm.slane %v1838_v3, 0 }
  0xa6   : > { %4454 = vmatmul.msk.bf16.gmra.mxu2 %vm844_vm2, %v4548_v9  ;;  %v1907_v9 = vperm.slane %v1843_v4, 0 }
  0xa7   : > { %4471 = vmatmul.msk.bf16.gmra.mxu3 %vm844_vm2, %v4565_v10  ;;  %2097 = vperm.xlu2 %4640, %v1891_v5  }
  0xa8   : > { %2125 = vperm.xlu0 %4638, %v1898_v36  }
  0xa9   : > { %v4977_v8 = vpop.f32.mrf.mxu2 }
  0xaa   : > { %v4917_v17 = vpop.f32.mrf.mxu1  ;;  %v4937_v29 = vpop.f32.mrf.mxu0  ;;  %2129 = vperm.xlu1 %4639, %v1899_v60   ;;  %7075 = vst [vmem:[#allocation18_spill] sm:$0xff] %v4977_v8  ;;  %v4570_v60 = vld [vmem:[%s4752_s16 + $0x1e8] sm:$0xff] }
  0xab   : > { %7066 = vst [vmem:[#allocation9_spill] sm:$0xff] %v4917_v17  ;;  %v4979_v11 = vpop.f32.mrf.mxu3 }
  0xac   : > { %7076 = vst [vmem:[#allocation19_spill] sm:$0xff] %v4979_v11 }
  0xaf   : > { %2109 = vperm.xlu2 %4640, %v1894_v22  }
  0xb0   : > { %2137 = vperm.xlu0 %4638, %v1901_v46   ;;  %v1839_v46 = vrot.slane %v4944_v40, 3 }
  0xb2   : > { %v4926_v27 = vpop.f32.mrf.mxu1  ;;  %v4960_v57 = vpop.f32.mrf.mxu0  ;;  %2141 = vperm.xlu1 %4639, %v1902_v6  }
  0xb3   : > { %7067 = vst [vmem:[#allocation10_spill] sm:$0xff] %v4926_v27 }
  0xb5   : > { %4425 = vmatmul.msk.bf16.gmra.mxu0 %vm844_vm2, %v4519_v25  ;;  %4442 = vmatmul.msk.bf16.gmra.mxu1 %vm844_vm2, %v4536_v26  ;;  %v4995_v26 = vpop.f32.mrf.mxu2 }
  0xb6   : > { %4455 = vmatmul.msk.bf16.gmra.mxu2 %vm844_vm2, %v4549_v28  ;;  %7078 = vst [vmem:[#allocation21_spill] sm:$0xff] %v4995_v26  ;;  %v4997_v28 = vpop.f32.mrf.mxu3 }
  0xb7   : > { %4472 = vmatmul.msk.bf16.gmra.mxu3 %vm844_vm2, %v4566_v30  ;;  %7079 = vst [vmem:[#allocation22_spill] sm:$0xff] %v4997_v28  ;;  %2121 = vperm.xlu2 %4640, %v1897_v32  }
  0xb8   : > { %2149 = vperm.xlu0 %4638, %v1904_v61   ;;  %v1842_v61 = vrot.slane %v4944_v40, 6 }
  0xba   : > { %v4939_v37 = vpop.f32.mrf.mxu1  ;;  %v4975_v10 = vpop.f32.mrf.mxu0  ;;  %2153 = vperm.xlu1 %4639, %v1905_v23   ;;  %v1906_v1 = vperm.slane %v1842_v61, 0 }
  0xbb   : > { %7068 = vst [vmem:[#allocation11_spill] sm:$0xff] %v4939_v37 }
  0xbd   : > { %v5018_v13 = vpop.f32.mrf.mxu2 }
  0xbe   : > { %7082 = vst [vmem:[#allocation25_spill] sm:$0xff] %v5018_v13  ;;  %v5020_v42 = vpop.f32.mrf.mxu3 }
  0xbf   : > { %7083 = vst [vmem:[#allocation26_spill] sm:$0xff] %v5020_v42  ;;  %2133 = vperm.xlu2 %4640, %v1900_v44   ;;  %v4572_v44 = vld [vmem:[%s4752_s16 + $0x1f8] sm:$0xff] }
  0xc0   : > { %2161 = vperm.xlu0 %4638, %v1907_v9  }
  0xc2   : > { %v4953_v49 = vpop.f32.mrf.mxu1  ;;  %v4993_v25 = vpop.f32.mrf.mxu0 }
  0xc3   : > { %7071 = vst [vmem:[#allocation14_spill] sm:$0xff] %v4953_v49 }
  0xc5   : > { %4426 = vmatmul.msk.bf16.gmra.mxu0 %vm844_vm2, %v4520_v47  ;;  %4443 = vmatmul.msk.bf16.gmra.mxu1 %vm844_vm2, %v4537_v48  ;;  %v1903_v48 = vperm.slane %v1839_v46, 0 }
  0xc6   : > { %4456 = vmatmul.msk.bf16.gmra.mxu2 %vm844_vm2, %v4550_v50  ;;  %v5032_v50 = vpop.f32.mrf.mxu2 }
  0xc7   : > { %4473 = vmatmul.msk.bf16.gmra.mxu3 %vm844_vm2, %v4567_v51  ;;  %7085 = vst [vmem:[#allocation28_spill] sm:$0xff] %v5032_v50  ;;  %v5034_v51 = vpop.f32.mrf.mxu3  ;;  %2145 = vperm.xlu2 %4640, %v1903_v48  }
  0xc8   : > { %7086 = vst [vmem:[#allocation29_spill] sm:$0xff] %v5034_v51  ;;  %v1910_v51 = vpop.permute.xlu0 %1909 }
  0xca   : > { %v4970_v0 = vpop.f32.mrf.mxu1  ;;  %v5012_v35 = vpop.f32.mrf.mxu0 }
  0xcb   : > { %7074 = vst [vmem:[#allocation17_spill] sm:$0xff] %v4970_v0 }
  0xce   : > { %v5049_v4 = vpop.f32.mrf.mxu2 }
  0xcf   : > { %7088 = vst [vmem:[#allocation31_spill] sm:$0xff] %v5049_v4  ;;  %2157 = vperm.xlu2 %4640, %v1906_v1   ;;  %v5051_v5 = vpop.f32.mrf.mxu3 }
  0xd0   : > { %7089 = vst [vmem:[#allocation32_spill] sm:$0xff] %v5051_v5 }
  0xd2   : > { %v4983_v56 = vpop.f32.mrf.mxu1  ;;  %v5030_v47 = vpop.f32.mrf.mxu0 }
  0xd3   : > { %7077 = vst [vmem:[#allocation20_spill] sm:$0xff] %v4983_v56 }
  0xd5   : > { %4427 = vmatmul.msk.bf16.gmra.mxu0 %vm844_vm2, %v4521_v12  ;;  %4444 = vmatmul.msk.bf16.gmra.mxu1 %vm844_vm2, %v4538_v16  ;;  %v4524_v12 = vld [vmem:[%s4752_s16 + $0x78] sm:$0xff]  ;;  %v4576_v16 = vld [vmem:[%s5008_s28 + $0x10] sm:$0xff] }
  0xd6   : > { %4457 = vmatmul.msk.bf16.gmra.mxu2 %vm844_vm2, %v4551_v18  ;;  %v5057_v9 = vpop.f32.mrf.mxu2 }
  0xd7   : > { %4474 = vmatmul.msk.bf16.gmra.mxu3 %vm844_vm2, %v4568_v19  ;;  %7091 = vst [vmem:[#allocation34_spill] sm:$0xff] %v5057_v9  ;;  %v5061_v18 = vpop.f32.mrf.mxu3 }
  0xd8   : > { %7092 = vst [vmem:[#allocation35_spill] sm:$0xff] %v5061_v18 }
  0xda   : > { %v4999_v30 = vpop.f32.mrf.mxu1  ;;  %v5045_v3 = vpop.f32.mrf.mxu0 }
  0xdb   : > { %7080 = vst [vmem:[#allocation23_spill] sm:$0xff] %v4999_v30 }
  0xde   : > { %v5073_v31 = vpop.f32.mrf.mxu2 }
  0xdf   : > { %7095 = vst [vmem:[#allocation38_spill] sm:$0xff] %v5073_v31  ;;  %v5075_v32 = vpop.f32.mrf.mxu3  ;;  %v1926_v31 = vpop.permute.xlu2 %1925 }
  0xe0   : > { %7096 = vst [vmem:[#allocation39_spill] sm:$0xff] %v5075_v32 }
  0xe2   : > { %v5014_v36 = vpop.f32.mrf.mxu1  ;;  %v5055_v40 = vpop.f32.mrf.mxu0 }
  0xe3   : > { %7081 = vst [vmem:[#allocation24_spill] sm:$0xff] %v5014_v36 }
  0xe5   : > { %4428 = vmatmul.msk.bf16.gmra.mxu0 %vm844_vm2, %v4522_v33  ;;  %4499 = vmatmul.msk.bf16.vlgmr.msrb.gmra.mxu1 %vm844_vm2, %v4574_v34  ;;  %v4525_v33 = vld [vmem:[%s4752_s16 + $0x80] sm:$0xff]  ;;  %v4577_v34 = vld [vmem:[%s5008_s28 + $0x18] sm:$0xff] }
  0xe6   : > { %4458 = vmatmul.msk.bf16.gmra.mxu2 %vm844_vm2, %v4552_v38  ;;  %v5087_v48 = vpop.f32.mrf.mxu2 }
  0xe7   : > { %4475 = vmatmul.msk.bf16.gmra.mxu3 %vm844_vm2, %v4569_v39  ;;  %v4555_v39 = vld [vmem:[%s4752_s16 + $0x170] sm:$0xff]  ;;  %7098 = vst [vmem:[#allocation41_spill] sm:$0xff] %v5087_v48 }
  0xea   : > { %v5027_v45 = vpop.f32.mrf.mxu1  ;;  %v1080_v22 = vpop.f32.mrf.mxu0 }
  0xeb   : > { %7084 = vst [vmem:[#allocation27_spill] sm:$0xff] %v5027_v45 }
  0xf2   : > { %v5038_v53 = vpop.f32.mrf.mxu1  ;;  %v5083_v46 = vpop.f32.mrf.mxu0 }
  0xf3   : > { %7087 = vst [vmem:[#allocation30_spill] sm:$0xff] %v5038_v53 }
  0xf5   : > { %4429 = vmatmul.msk.bf16.gmra.mxu0 %vm844_vm2, %v4523_v54  ;;  %4500 = vmatmul.msk.bf16.gmra.mxu1 %vm844_vm2, %v4575_v55  ;;  %v5089_v54 = vpop.f32.mrf.mxu3 }
  0xf6   : > { %4459 = vmatmul.msk.bf16.gmra.mxu2 %vm844_vm2, %v4553_v59  ;;  %7099 = vst [vmem:[#allocation42_spill] sm:$0xff] %v5089_v54 }
  0xf7   : > { %4476 = vmatmul.msk.bf16.gmra.mxu3 %vm844_vm2, %v4570_v60 }
  0xfa   : > { %v5053_v6 = vpop.f32.mrf.mxu1  ;;  %v5095_v59 = vpop.f32.mrf.mxu0 }
  0xfb   : > { %7090 = vst [vmem:[#allocation33_spill] sm:$0xff] %v5053_v6 }
 0x102   : > { %v5063_v19 = vpop.f32.mrf.mxu1  ;;  %v5099_v61 = vpop.f32.mrf.mxu0 }
 0x103   : > { %7093 = vst [vmem:[#allocation36_spill] sm:$0xff] %v5063_v19 }
 0x105   : > { %4430 = vmatmul.msk.bf16.gmra.mxu0 %vm844_vm2, %v4524_v12  ;;  %4501 = vmatmul.msk.bf16.gmra.mxu1 %vm844_vm2, %v4576_v16 }
 0x106   : > { %4460 = vmatmul.msk.bf16.gmra.mxu2 %vm844_vm2, %v4554_v20 }
 0x107   : > { %4477 = vmatmul.msk.bf16.gmra.mxu3 %vm844_vm2, %v4571_v21 }
 0x10a   : > { %v5071_v23 = vpop.f32.mrf.mxu1  ;;  %v5103_v12 = vpop.f32.mrf.mxu0 }
 0x10b   : > { %7094 = vst [vmem:[#allocation37_spill] sm:$0xff] %v5071_v23 }
 0x112   : > { %v5079_v38 = vpop.f32.mrf.mxu1  ;;  %v5109_v21 = vpop.f32.mrf.mxu0 }
 0x113   : > { %7097 = vst [vmem:[#allocation40_spill] sm:$0xff] %v5079_v38 }
 0x115   : > { %4431 = vmatmul.msk.bf16.gmra.mxu0 %vm844_vm2, %v4525_v33  ;;  %4502 = vmatmul.msk.bf16.gmra.mxu1 %vm844_vm2, %v4577_v34 }
 0x116   : > { %4461 = vmatmul.msk.bf16.gmra.mxu2 %vm844_vm2, %v4555_v39 }
 0x117   : > { %4478 = vmatmul.msk.bf16.gmra.mxu3 %vm844_vm2, %v4572_v44 }
 0x11a   : > { %v5093_v55 = vpop.f32.mrf.mxu1  ;;  %v5113_v34 = vpop.f32.mrf.mxu0 }
 0x11b   : > { %7100 = vst [vmem:[#allocation43_spill] sm:$0xff] %v5093_v55 }
 0x122   : > { %v5097_v60 = vpop.f32.mrf.mxu1  ;;  %v5117_v44 = vpop.f32.mrf.mxu0 }
 0x123   : > { %7101 = vst [vmem:[#allocation44_spill] sm:$0xff] %v5097_v60 }
 0x12a   : > { %v5101_v1 = vpop.f32.mrf.mxu1  ;;  %v5121_v54 = vpop.f32.mrf.mxu0 }
 0x12b   : > { %7102 = vst [vmem:[#allocation45_spill] sm:$0xff] %v5101_v1 }
 0x132   : > { %v5105_v16 = vpop.f32.mrf.mxu1  ;;  %v5125_v42 = vpop.f32.mrf.mxu0 }
 0x133   : > { %7103 = vst [vmem:[#allocation46_spill] sm:$0xff] %v5105_v16 }
 0x13a   : > { %v5107_v20 = vpop.f32.mrf.mxu1 }
 0x13b   : > { %7104 = vst [vmem:[#allocation47_spill] sm:$0xff] %v5107_v20 }
 0x142   : > { %v5111_v33 = vpop.f32.mrf.mxu1 }
 0x143   : > { %7105 = vst [vmem:[#allocation48_spill] sm:$0xff] %v5111_v33 }
 0x14a   : > { %v5115_v39 = vpop.f32.mrf.mxu1 }
 0x14b   : > { %7106 = vst [vmem:[#allocation49_spill] sm:$0xff] %v5115_v39 }
 0x152   : > { %v5119_v15 = vpop.f32.mrf.mxu1 }
 0x153   : > { %7107 = vst [vmem:[#allocation50_spill] sm:$0xff] %v5119_v15 }
 0x15a   : > { %v5123_v32 = vpop.f32.mrf.mxu1 }
 0x15b   : > { %7108 = vst [vmem:[#allocation51_spill] sm:$0xff] %v5123_v32 }
 0x162   : > { %v1432_v18 = vpop.f32.mrf.mxu1 }
 0x163   : > { %v1460_v5 = vrot.slane %v1432_v18, 1  ;;  %v1461_v28 = vrot.slane %v1432_v18, 2  ;;  %v1462_v11 = vrot.slane %v1432_v18, 3  ;;  %v1463_v43 = vrot.slane %v1432_v18, 4 }
 0x164   : > { %v1464_v48 = vrot.slane %v1432_v18, 5  ;;  %v1516_v9 = vperm.slane %v1432_v18, 0 }
 0x165   : > { %v1517_v4 = vperm.slane %v1460_v5, 0  ;;  %v1518_v50 = vperm.slane %v1461_v28, 0  ;;  %v1519_v13 = vperm.slane %v1462_v11, 0  ;;  %v1520_v26 = vperm.slane %v1463_v43, 0 }
 0x166   : > { %v1521_v8 = vperm.slane %v1464_v48, 0  ;;  %v1644_v58 = vadd.f32 %v1516_v9, %v4897_v2  ;;  %v1645_v41 = vadd.f32 %v1516_v9, %v4912_v14  ;;  %v1914_v14 = vpop.permute.xlu0 %1913  ;;  %v5138_v9 = vpop.f32.mrf.mxu0 }
 0x167   : > { %v1646_v32 = vadd.f32 %v1517_v4, %v4922_v24  ;;  %v1647_v15 = vadd.f32 %v1517_v4, %v4937_v29  ;;  %v1648_v39 = vadd.f32 %v1518_v50, %v4960_v57  ;;  %v1649_v33 = vadd.f32 %v1518_v50, %v4975_v10  ;;  %v1922_v4 = vpop.permute.xlu1 %1921 }
 0x168   : > { %v1650_v20 = vadd.f32 %v1519_v13, %v4993_v25  ;;  %v1651_v5 = vadd.f32 %v1519_v13, %v5012_v35  ;;  %v1652_v11 = vadd.f32 %v1520_v26, %v5030_v47  ;;  %v1653_v43 = vadd.f32 %v1520_v26, %v5045_v3  ;;  %v1930_v13 = vpop.permute.xlu2 %1929 }
 0x169   : > { %v1654_v2 = vadd.f32 %v1521_v8, %v5055_v40  ;;  %v1655_v28 = vadd.f32 %v1521_v8, %v1080_v22  ;;  %v1465_v24 = vrot.slane %v1432_v18, 6  ;;  %v1466_v29 = vrot.slane %v1432_v18, 7 }
 0x16a   : > { %v5140_v57 = vmul.f32 %v1910_v51, %v1644_v58  ;;  %v5142_v10 = vmul.f32 %v1910_v51, %v1645_v41  ;;  %v5144_v25 = vmul.f32 %v1914_v14, %v1646_v32  ;;  %v5146_v35 = vmul.f32 %v1914_v14, %v1647_v15 }
 0x16b   : > { %v5148_v47 = vmul.f32 %v1918_v63, %v1648_v39  ;;  %v5150_v26 = vmul.f32 %v1918_v63, %v1649_v33  ;;  %v5152_v8 = vmul.f32 %v1922_v4, %v1650_v20  ;;  %v5154_v50 = vmul.f32 %v1922_v4, %v1651_v5 }
 0x16c   : > { %v5156_v3 = vmul.f32 %v1926_v31, %v1652_v11  ;;  %v5158_v40 = vmul.f32 %v1926_v31, %v1653_v43  ;;  %v5160_v58 = vmul.f32 %v1930_v13, %v1654_v2  ;;  %v5162_v41 = vmul.f32 %v1930_v13, %v1655_v28 }
 0x16d   : > { %v1522_v51 = vperm.slane %v1465_v24, 0  ;;  %v2693_v15 = vmax.f32 %v5140_v57, %v5142_v10  ;;  %v2700_v63 = vmax.f32 %v5144_v25, %v5146_v35  ;;  %v2707_v18 = vmax.f32 %v5148_v47, %v5150_v26 }
 0x16e   : > { %v2714_v22 = vmax.f32 %v5152_v8, %v5154_v50  ;;  %v1523_v32 = vperm.slane %v1466_v29, 0  ;;  %v2721_v48 = vmax.f32 %v5156_v3, %v5158_v40  ;;  %v2728_v20 = vmax.f32 %v5160_v58, %v5162_v41  ;;  %v5177_v14 = vpop.f32.mrf.mxu0 }
 0x16f   : > { %v2694_v31 = vrot.slane %v2693_v15, 4  ;;  %v2701_v33 = vrot.slane %v2700_v63, 4  ;;  %v2708_v39 = vrot.slane %v2707_v18, 4  ;;  %v1656_v11 = vadd.f32 %v1522_v51, %v5083_v46 }
 0x170   : > { %v2715_v5 = vrot.slane %v2714_v22, 4  ;;  %v2722_v2 = vrot.slane %v2721_v48, 4  ;;  %v2729_v28 = vrot.slane %v2728_v20, 4  ;;  %v1657_v24 = vadd.f32 %v1522_v51, %v5095_v59 }
 0x171   : > { %v2695_v43 = vmax.f32 %v2693_v15, %v2694_v31  ;;  %v2702_v29 = vmax.f32 %v2700_v63, %v2701_v33  ;;  %v2709_v4 = vmax.f32 %v2707_v18, %v2708_v39  ;;  %v1658_v16 = vadd.f32 %v1523_v32, %v5099_v61  ;;  %v1934_v15 = vpop.permute.xlu0 %1933  ;;  %v1938_v18 = vpop.permute.xlu1 %1937 }
 0x172   : > { %v2716_v13 = vmax.f32 %v2714_v22, %v2715_v5  ;;  %v2723_v60 = vmax.f32 %v2721_v48, %v2722_v2  ;;  %v2730_v55 = vmax.f32 %v2728_v20, %v2729_v28  ;;  %v1659_v38 = vadd.f32 %v1523_v32, %v5103_v12 }
 0x173   : > { %v2696_v1 = vrot.slane %v2695_v43, 2  ;;  %v2703_v23 = vrot.slane %v2702_v29, 2  ;;  %v2710_v19 = vrot.slane %v2709_v4, 2  ;;  %v5182_v62 = vmul.f32 %v1934_v15, %v1656_v11 }
 0x174   : > { %v2717_v46 = vrot.slane %v2716_v13, 2  ;;  %v2724_v6 = vrot.slane %v2723_v60, 2  ;;  %v2731_v53 = vrot.slane %v2730_v55, 2  ;;  %v5184_v22 = vmul.f32 %v1934_v15, %v1657_v24 }
 0x175   : > { %v2697_v31 = vmax.f32 %v2695_v43, %v2696_v1  ;;  %v2704_v59 = vmax.f32 %v2702_v29, %v2703_v23  ;;  %v2711_v51 = vmax.f32 %v2709_v4, %v2710_v19  ;;  %v5186_v33 = vmul.f32 %v1938_v18, %v1658_v16 }
 0x176   : > { %v2718_v63 = vmax.f32 %v2716_v13, %v2717_v46  ;;  %v2725_v48 = vmax.f32 %v2723_v60, %v2724_v6  ;;  %v2732_v20 = vmax.f32 %v2730_v55, %v2731_v53  ;;  %v5188_v12 = vmul.f32 %v1938_v18, %v1659_v38  ;;  %v5194_v28 = vpop.f32.mrf.mxu0 }
 0x177   : > { %v2698_v61 = vrot.slane %v2697_v31, 1  ;;  %v2705_v32 = vrot.slane %v2704_v59, 1  ;;  %v2712_v39 = vrot.slane %v2711_v51, 1  ;;  %v5192_v19 = vmax.f32 %v5182_v62, %v5184_v22 }
 0x178   : > { %v2719_v1 = vrot.slane %v2718_v63, 1  ;;  %v2726_v11 = vrot.slane %v2725_v48, 1  ;;  %v2733_v23 = vrot.slane %v2732_v20, 1  ;;  %v5198_v53 = vmax.f32 %v5186_v33, %v5188_v12 }
 0x179   : > { %v2706_v5 = vmax.f32 %v2704_v59, %v2705_v32  ;;  %v2713_v43 = vmax.f32 %v2711_v51, %v2712_v39  ;;  %v2699_v2 = vmax.f32 %v2697_v31, %v2698_v61  ;;  %7109 = vst [vmem:[#allocation52_spill] sm:$0xff] %v5192_v19  ;;  %v3285_v4 = vmin.f32 %v5140_v57, %v5142_v10 }
 0x17a   : > { %7110 = vst [vmem:[#allocation53_spill] sm:$0xff] %v5198_v53  ;;  %v2720_v6 = vmax.f32 %v2718_v63, %v2719_v1  ;;  %v2727_v55 = vmax.f32 %v2725_v48, %v2726_v11  ;;  %v2734_v16 = vmax.f32 %v2732_v20, %v2733_v23  ;;  %v3292_v46 = vmin.f32 %v5144_v25, %v5146_v35 }
 0x17b   : > { %v3206_v38 = vsel %vm3205_vm3, %v2706_v5, %v2699_v2  ;;  %v3286_v15 = vrot.slane %v3285_v4, 4  ;;  %v3299_v31 = vmin.f32 %v5148_v47, %v5150_v26  ;;  %v3306_v51 = vmin.f32 %v5152_v8, %v5154_v50 }
 0x17c   : > { %v3208_v60 = vsel %vm3207_vm4, %v2713_v43, %v3206_v38  ;;  %v3293_v59 = vrot.slane %v3292_v46, 4  ;;  %v3313_v1 = vmin.f32 %v5156_v3, %v5158_v40 }
 0x17d   : > { %v3210_v24 = vsel %vm3209_vm5, %v2720_v6, %v3208_v60  ;;  %v3287_v63 = vmin.f32 %v3285_v4, %v3286_v15  ;;  %v3300_v18 = vrot.slane %v3299_v31, 4  ;;  %v3307_v48 = vrot.slane %v3306_v51, 4 }
 0x17e   : > { %v3212_v29 = vsel %vm3211_vm6, %v2727_v55, %v3210_v24  ;;  %v3294_v61 = vmin.f32 %v3292_v46, %v3293_v59  ;;  %v1113_v20 = vpop.f32.mrf.mxu0  ;;  %v3314_v23 = vrot.slane %v3313_v1, 4  ;;  %v3320_v55 = vmin.f32 %v5160_v58, %v5162_v41 }
 0x17f   : > { %v5207_v13 = vsel %vm3213_vm7, %v2734_v16, %v3212_v29  ;;  %v3288_v32 = vrot.slane %v3287_v63, 2  ;;  %v3301_v39 = vmin.f32 %v3299_v31, %v3300_v18  ;;  %v3308_v43 = vmin.f32 %v3306_v51, %v3307_v48 }
 0x180   : > { %7111 = vst [vmem:[#allocation54_spill] sm:$0xff] %v5207_v13  ;;  %v3295_v5 = vrot.slane %v3294_v61, 2  ;;  %v3315_v24 = vmin.f32 %v3313_v1, %v3314_v23  ;;  %v5221_v29 = vmin.f32 %v5182_v62, %v5184_v22  ;;  %v3321_v15 = vrot.slane %v3320_v55, 4  ;;  %v1942_v13 = vpop.permute.xlu2 %1941 }
 0x181   : > { %v3289_v11 = vmin.f32 %v3287_v63, %v3288_v32  ;;  %v3302_v2 = vrot.slane %v3301_v39, 2  ;;  %v3309_v38 = vrot.slane %v3308_v43, 2  ;;  %v5225_v31 = vmin.f32 %v5186_v33, %v5188_v12  ;;  %v5227_v63 = vpop.f32.mrf.mxu1 }
 0x182   : > { %v3296_v6 = vmin.f32 %v3294_v61, %v3295_v5  ;;  %7112 = vst [vmem:[#allocation55_spill] sm:$0xff] %v5221_v29  ;;  %v3316_v51 = vrot.slane %v3315_v24, 2  ;;  %v3322_v32 = vmin.f32 %v3320_v55, %v3321_v15  ;;  %v1946_v5 = vpop.permute.xlu0 %1945  ;;  %v1468_v45 = vrot.slane %v5227_v63, 2 }
 0x183   : > { %v3290_v60 = vrot.slane %v3289_v11, 1  ;;  %v3303_v16 = vmin.f32 %v3301_v39, %v3302_v2  ;;  %v3310_v46 = vmin.f32 %v3308_v43, %v3309_v38  ;;  %7113 = vst [vmem:[#allocation56_spill] sm:$0xff] %v5225_v31  ;;  %v1467_v38 = vrot.slane %v5227_v63, 1 }
 0x184   : > { %v3297_v4 = vrot.slane %v3296_v6, 1  ;;  %v3317_v1 = vmin.f32 %v3315_v24, %v3316_v51  ;;  %v3323_v23 = vrot.slane %v3322_v32, 2  ;;  %v1469_v55 = vrot.slane %v5227_v63, 3 }
 0x185   : > { %v3304_v59 = vrot.slane %v3303_v16, 1  ;;  %v3291_v18 = vmin.f32 %v3289_v11, %v3290_v60  ;;  %v3311_v48 = vrot.slane %v3310_v46, 1 }
 0x186   : > { %v3298_v61 = vmin.f32 %v3296_v6, %v3297_v4  ;;  %v1115_v0 = vpop.f32.mrf.mxu0  ;;  %v3318_v49 = vrot.slane %v3317_v1, 1  ;;  %v3324_v11 = vmin.f32 %v3322_v32, %v3323_v23  ;;  %v1524_v4 = vperm.slane %v5227_v63, 0 }
 0x187   : > { %v3305_v39 = vmin.f32 %v3303_v16, %v3304_v59  ;;  %v3312_v2 = vmin.f32 %v3310_v46, %v3311_v48  ;;  %v1470_v16 = vrot.slane %v5227_v63, 4  ;;  %v1525_v46 = vperm.slane %v1467_v38, 0 }
 0x188   : > { %v3797_v43 = vsel %vm3205_vm3, %v3298_v61, %v3291_v18  ;;  %v3319_v60 = vmin.f32 %v3317_v1, %v3318_v49  ;;  %v3325_v24 = vrot.slane %v3324_v11, 1  ;;  %v1526_v59 = vperm.slane %v1468_v45, 0 }
 0x189   : > { %v3798_v37 = vsel %vm3207_vm4, %v3305_v39, %v3797_v43  ;;  %v1527_v51 = vperm.slane %v1469_v55, 0  ;;  %v1528_v61 = vperm.slane %v1470_v16, 0  ;;  %v1660_v48 = vadd.f32 %v1524_v4, %v5109_v21  ;;  %v1950_v21 = vpop.permute.xlu1 %1949 }
 0x18a   : > { %v3799_v6 = vsel %vm3209_vm5, %v3312_v2, %v3798_v37  ;;  %v3326_v18 = vmin.f32 %v3324_v11, %v3325_v24  ;;  %v1661_v32 = vadd.f32 %v1524_v4, %v5113_v34  ;;  %v1662_v37 = vadd.f32 %v1525_v46, %v5117_v44  ;;  %v1958_v38 = vpop.permute.xlu0 %1957  ;;  %v1954_v44 = vpop.permute.xlu2 %1953 }
 0x18b   : > { %v3800_v15 = vsel %vm3211_vm6, %v3319_v60, %v3799_v6  ;;  %v1663_v39 = vadd.f32 %v1525_v46, %v5121_v54  ;;  %v1664_v1 = vadd.f32 %v1526_v59, %v5125_v42  ;;  %v1665_v2 = vadd.f32 %v1526_v59, %v5138_v9 }
 0x18c   : > { %v5242_v49 = vsel %vm3213_vm7, %v3326_v18, %v3800_v15  ;;  %v1666_v45 = vadd.f32 %v1527_v51, %v5177_v14  ;;  %v1667_v23 = vadd.f32 %v1527_v51, %v5194_v28  ;;  %v1668_v43 = vadd.f32 %v1528_v61, %v1113_v20 }
 0x18d   : > { %7114 = vst [vmem:[#allocation57_spill] sm:$0xff] %v5242_v49  ;;  %v1669_v11 = vadd.f32 %v1528_v61, %v1115_v0  ;;  %v5249_v34 = vmul.f32 %v1942_v13, %v1660_v48  ;;  %v5251_v55 = vmul.f32 %v1942_v13, %v1661_v32  ;;  %v5253_v60 = vmul.f32 %v1946_v5, %v1662_v37 }
 0x18e   : > { %v1118_v6 = vpop.f32.mrf.mxu0  ;;  %v5255_v54 = vmul.f32 %v1946_v5, %v1663_v39  ;;  %v5257_v42 = vmul.f32 %v1950_v21, %v1664_v1  ;;  %v5259_v9 = vmul.f32 %v1950_v21, %v1665_v2  ;;  %v5261_v14 = vmul.f32 %v1954_v44, %v1666_v45 }
 0x18f   : > { %v5263_v28 = vmul.f32 %v1954_v44, %v1667_v23  ;;  %v5265_v20 = vmul.f32 %v1958_v38, %v1668_v43  ;;  %v5267_v0 = vmul.f32 %v1958_v38, %v1669_v11  ;;  %v1471_v16 = vrot.slane %v5227_v63, 5 }
 0x190   : > { %v2749_v13 = vmax.f32 %v5249_v34, %v5251_v55  ;;  %v2756_v5 = vmax.f32 %v5253_v60, %v5255_v54  ;;  %v2763_v24 = vmax.f32 %v5257_v42, %v5259_v9  ;;  %v3341_v15 = vmin.f32 %v5249_v34, %v5251_v55 }
 0x191   : > { %7115 = vst [vmem:[#allocation58_spill] sm:$0xff] %v5263_v28  ;;  %v2770_v4 = vmax.f32 %v5261_v14, %v5263_v28  ;;  %v2777_v46 = vmax.f32 %v5265_v20, %v5267_v0  ;;  %v3348_v59 = vmin.f32 %v5253_v60, %v5255_v54  ;;  %v1529_v51 = vperm.slane %v1471_v16, 0  ;;  %v1962_v1 = vpop.permute.xlu1 %1961 }
 0x192   : > { %7116 = vst [vmem:[#allocation59_spill] sm:$0xff] %v5265_v20  ;;  %v3355_v18 = vmin.f32 %v5257_v42, %v5259_v9  ;;  %v3362_v61 = vmin.f32 %v5261_v14, %v5263_v28  ;;  %v5290_v32 = vmin.f32 %v5265_v20, %v5267_v0  ;;  %v2757_v38 = vrot.slane %v2756_v5, 4 }
 0x193   : > { %7117 = vst [vmem:[#allocation60_spill] sm:$0xff] %v5267_v0  ;;  %v1670_v37 = vadd.f32 %v1529_v51, %v1118_v6  ;;  %v2750_v21 = vrot.slane %v2749_v13, 4  ;;  %v2764_v16 = vrot.slane %v2763_v24, 4  ;;  %v3342_v49 = vrot.slane %v3341_v15, 4 }
 0x194   : > { %v2758_v44 = vmax.f32 %v2756_v5, %v2757_v38  ;;  %v3349_v27 = vrot.slane %v3348_v59, 4  ;;  %v3356_v36 = vrot.slane %v3355_v18, 4  ;;  %v3363_v0 = vrot.slane %v3362_v61, 4 }
 0x195   : > { %v5292_v2 = vmul.f32 %v1962_v1, %v1670_v37  ;;  %v2751_v6 = vmax.f32 %v2749_v13, %v2750_v21  ;;  %v3343_v37 = vmin.f32 %v3341_v15, %v3342_v49 }
 0x196   : > { %v1120_v48 = vpop.f32.mrf.mxu0  ;;  %v3350_v17 = vmin.f32 %v3348_v59, %v3349_v27  ;;  %v3357_v38 = vmin.f32 %v3355_v18, %v3356_v36  ;;  %v2778_v27 = vrot.slane %v2777_v46, 4 }
 0x197   : > { %v1671_v39 = vadd.f32 %v1529_v51, %v1120_v48  ;;  %7118 = vst [vmem:[#allocation61_spill] sm:$0xff] %v5292_v2  ;;  %v2759_v51 = vrot.slane %v2758_v44, 2  ;;  %v2765_v48 = vmax.f32 %v2763_v24, %v2764_v16  ;;  %v3344_v56 = vrot.slane %v3343_v37, 2  ;;  %v1966_v16 = vpop.permute.xlu2 %1965 }
 0x198   : > { %v3351_v31 = vrot.slane %v3350_v17, 2 }
 0x199   : > { %v5294_v45 = vmul.f32 %v1962_v1, %v1671_v39  ;;  %v1472_v39 = vrot.slane %v5227_v63, 6  ;;  %v2752_v1 = vrot.slane %v2751_v6, 2  ;;  %v2760_v30 = vmax.f32 %v2758_v44, %v2759_v51 }
 0x19a   : > { %v2766_v7 = vrot.slane %v2765_v48, 2  ;;  %v3345_v24 = vmin.f32 %v3343_v37, %v3344_v56  ;;  %v3352_v15 = vmin.f32 %v3350_v17, %v3351_v31  ;;  %v3358_v44 = vrot.slane %v3357_v38, 2 }
 0x19b   : > { %7119 = vst [vmem:[#allocation62_spill] sm:$0xff] %v5294_v45  ;;  %v2784_v23 = vmax.f32 %v5292_v2, %v5294_v45  ;;  %v3376_v43 = vmin.f32 %v5292_v2, %v5294_v45  ;;  %v2771_v45 = vrot.slane %v2770_v4, 4  ;;  %v1530_v29 = vperm.slane %v1472_v39, 0 }
 0x19c   : > { %v2753_v5 = vmax.f32 %v2751_v6, %v2752_v1  ;;  %v2761_v13 = vrot.slane %v2760_v30, 1  ;;  %v2767_v21 = vmax.f32 %v2765_v48, %v2766_v7  ;;  %v3346_v28 = vrot.slane %v3345_v24, 1 }
 0x19d   : > { %v2785_v2 = vrot.slane %v2784_v23, 4  ;;  %v2772_v49 = vmax.f32 %v2770_v4, %v2771_v45  ;;  %v3377_v39 = vrot.slane %v3376_v43, 4  ;;  %v3353_v18 = vrot.slane %v3352_v15, 1 }
 0x19e   : > { %v1123_v11 = vpop.f32.mrf.mxu0  ;;  %v2754_v19 = vrot.slane %v2753_v5, 1  ;;  %v2762_v6 = vmax.f32 %v2760_v30, %v2761_v13  ;;  %v2768_v36 = vrot.slane %v2767_v21, 1  ;;  %v2779_v56 = vmax.f32 %v2777_v46, %v2778_v27 }
 0x19f   : > { %v1672_v59 = vadd.f32 %v1530_v29, %v1123_v11  ;;  %v2786_v51 = vmax.f32 %v2784_v23, %v2785_v2  ;;  %v2773_v7 = vrot.slane %v2772_v49, 2  ;;  %v3359_v4 = vmin.f32 %v3357_v38, %v3358_v44 }
 0x1a0   : > { %v2755_v45 = vmax.f32 %v2753_v5, %v2754_v19  ;;  %v2769_v17 = vmax.f32 %v2767_v21, %v2768_v36  ;;  %v3364_v31 = vmin.f32 %v3362_v61, %v3363_v0  ;;  %v2780_v48 = vrot.slane %v2779_v56, 2 }
 0x1a1   : > { %v2774_v11 = vmax.f32 %v2772_v49, %v2773_v7  ;;  %v3370_v2 = vrot.slane %v5290_v32, 4  ;;  %v3378_v23 = vmin.f32 %v3376_v43, %v3377_v39  ;;  %v3347_v5 = vmin.f32 %v3345_v24, %v3346_v28 }
 0x1a2   : > { %v3219_v37 = vsel %vm3205_vm3, %v2762_v6, %v2755_v45  ;;  %v2781_v13 = vmax.f32 %v2779_v56, %v2780_v48  ;;  %v3354_v38 = vmin.f32 %v3352_v15, %v3353_v18  ;;  %v3360_v0 = vrot.slane %v3359_v4, 1 }
 0x1a3   : > { %v2775_v1 = vrot.slane %v2774_v11, 1  ;;  %v3220_v46 = vsel %vm3207_vm4, %v2769_v17, %v3219_v37  ;;  %v3365_v27 = vrot.slane %v3364_v31, 2  ;;  %v3371_v43 = vmin.f32 %v5290_v32, %v3370_v2 }
 0x1a4   : > { %v2782_v21 = vrot.slane %v2781_v13, 1  ;;  %v3361_v44 = vmin.f32 %v3359_v4, %v3360_v0  ;;  %v3804_v24 = vsel %vm3205_vm3, %v3354_v38, %v3347_v5 }
 0x1a5   : > { %v2776_v61 = vmax.f32 %v2774_v11, %v2775_v1  ;;  %v3366_v7 = vmin.f32 %v3364_v31, %v3365_v27  ;;  %v3372_v56 = vrot.slane %v3371_v43, 2 }
 0x1a6   : > { %v1125_v52 = vpop.f32.mrf.mxu0  ;;  %v2783_v39 = vmax.f32 %v2781_v13, %v2782_v21  ;;  %v3805_v4 = vsel %vm3207_vm4, %v3361_v44, %v3804_v24 }
 0x1a7   : > { %v1673_v53 = vadd.f32 %v1530_v29, %v1125_v52  ;;  %v5303_v52 = vmul.f32 %v1966_v16, %v1672_v59  ;;  %v2787_v29 = vrot.slane %v2786_v51, 2  ;;  %v3221_v36 = vsel %vm3209_vm5, %v2776_v61, %v3220_v46 }
 0x1a8   : > { %v3222_v18 = vsel %vm3211_vm6, %v2783_v39, %v3221_v36  ;;  %v3367_v17 = vrot.slane %v3366_v7, 1  ;;  %v2429_v36 = vmul.f32 %v5140_v57, %v5140_v57 }
 0x1a9   : > { %v5301_v20 = vmul.f32 %v1966_v16, %v1673_v53  ;;  %v2788_v30 = vmax.f32 %v2786_v51, %v2787_v29  ;;  %v3379_v51 = vrot.slane %v3378_v23, 2  ;;  %v3373_v29 = vmin.f32 %v3371_v43, %v3372_v56 }
 0x1aa   : > { %v2293_v43 = vadd.f32 %v5142_v10, %v5140_v57 }
 0x1ab   : > { %v2791_v53 = vmax.f32 %v5303_v52, %v5301_v20  ;;  %v2789_v19 = vrot.slane %v2788_v30, 1  ;;  %v3380_v45 = vmin.f32 %v3378_v23, %v3379_v51  ;;  %v3383_v28 = vmin.f32 %v5303_v52, %v5301_v20 }
 0x1ac   : > { %v3374_v2 = vrot.slane %v3373_v29, 1  ;;  %v2294_v39 = vadd.f32 %v2293_v43, %v5144_v25 }
 0x1ad   : > { %v2792_v59 = vrot.slane %v2791_v53, 4  ;;  %v2790_v16 = vmax.f32 %v2788_v30, %v2789_v19  ;;  %v3384_v11 = vrot.slane %v3383_v28, 4  ;;  %v3381_v31 = vrot.slane %v3380_v45, 1 }
 0x1ae   : > { %v3375_v1 = vmin.f32 %v3373_v29, %v3374_v2 }
 0x1af   : > { %v2793_v49 = vmax.f32 %v2791_v53, %v2792_v59  ;;  %v3223_v32 = vsel %vm3213_vm7, %v2790_v16, %v3222_v18  ;;  %v3368_v53 = vmin.f32 %v3366_v7, %v3367_v17  ;;  %v3385_v23 = vmin.f32 %v3383_v28, %v3384_v11 }
 0x1b0   : > { %v3382_v46 = vmin.f32 %v3380_v45, %v3381_v31  ;;  %v2430_v7 = vmul.f32 %v5142_v10, %v5142_v10  ;;  %v2431_v28 = vmul.f32 %v5144_v25, %v5144_v25  ;;  %v1128_v10 = vpop.f32.mrf.mxu0  ;;  %v2433_v11 = vmul.f32 %v5148_v47, %v5148_v47 }
 0x1b1   : > { %v2794_v6 = vrot.slane %v2793_v49, 2  ;;  %v3806_v37 = vsel %vm3209_vm5, %v3368_v53, %v3805_v4  ;;  %v3386_v13 = vrot.slane %v3385_v23, 2  ;;  %v2432_v4 = vmul.f32 %v5146_v35, %v5146_v35 }
 0x1b2   : > { %v3807_v5 = vsel %vm3211_vm6, %v3375_v1, %v3806_v37  ;;  %v2557_v24 = vadd.f32 %v2430_v7, %v2429_v36  ;;  %v2434_v53 = vmul.f32 %v5150_v26, %v5150_v26  ;;  %v1473_v31 = vrot.slane %v5227_v63, 7 }
 0x1b3   : > { %v2795_v15 = vmax.f32 %v2793_v49, %v2794_v6  ;;  %v3387_v19 = vmin.f32 %v3385_v23, %v3386_v13  ;;  %v3808_v38 = vsel %vm3213_vm7, %v3382_v46, %v3807_v5  ;;  %v5327_v49 = vpop.f32.mrf.mxu2  ;;  %v2295_v6 = vadd.f32 %v2294_v39, %v5146_v35  ;;  %v1970_v5 = vpop.permute.xlu0 %1969 }
 0x1b4   : > { %7120 = vst [vmem:[#allocation63_spill] sm:$0xff] %v5327_v49  ;;  %v2558_v18 = vadd.f32 %v2557_v24, %v2431_v28  ;;  %v1531_v37 = vperm.slane %v1473_v31, 0  ;;  %v2438_v28 = vmul.f32 %v5158_v40, %v5158_v40  ;;  %v7198_v49 = vld [vmem:[#allocation50_spill] sm:$0xff] }
 0x1b5   : > { %v2796_v48 = vrot.slane %v2795_v15, 1  ;;  %v3388_v0 = vrot.slane %v3387_v19, 1  ;;  %v2296_v45 = vadd.f32 %v2295_v6, %v5148_v47 }
 0x1b6   : > { %v1674_v47 = vadd.f32 %v1531_v37, %v1128_v10 }
 0x1b7   : > { %v2797_v30 = vmax.f32 %v2795_v15, %v2796_v48  ;;  %v3389_v61 = vmin.f32 %v3387_v19, %v3388_v0  ;;  %v2297_v15 = vadd.f32 %v2296_v45, %v5150_v26  ;;  %v2436_v26 = vmul.f32 %v5154_v50, %v5154_v50 }
 0x1b8   : > { %v1130_v1 = vpop.f32.mrf.mxu0  ;;  %v5373_v0 = vmul.f32 %v1970_v5, %v1674_v47 }
 0x1b9   : > { %v5320_v59 = vsel %vm3215_vm8, %v2797_v30, %v3223_v32  ;;  %v5325_v21 = vsel %vm3215_vm8, %v3389_v61, %v3808_v38  ;;  %v2298_v17 = vadd.f32 %v2297_v15, %v5152_v8  ;;  %v2559_v32 = vadd.f32 %v2558_v18, %v2432_v4 }
 0x1ba   : > { %v2435_v30 = vmul.f32 %v5152_v8, %v5152_v8  ;;  %v1675_v19 = vadd.f32 %v1531_v37, %v1130_v1  ;;  %v2437_v8 = vmul.f32 %v5156_v3, %v5156_v3 }
 0x1bb   : > { %v5329_v27 = vpop.f32.mrf.mxu2  ;;  %v2299_v29 = vadd.f32 %v2298_v17, %v5154_v50  ;;  %v2560_v48 = vadd.f32 %v2559_v32, %v2433_v11  ;;  %v2439_v32 = vmul.f32 %v5160_v58, %v5160_v58 }
 0x1bc   : > { %7121 = vst [vmem:[#allocation64_spill] sm:$0xff] %v5329_v27  ;;  %v5371_v63 = vmul.f32 %v1970_v5, %v1675_v19  ;;  %v7190_v27 = vld [vmem:[#allocation44_spill] sm:$0xff] }
 0x1bd   : > { %v2300_v25 = vadd.f32 %v2299_v29, %v5156_v3  ;;  %v2561_v2 = vadd.f32 %v2560_v48, %v2434_v53 }
 0x1be   : > { %v2798_v43 = vmax.f32 %v5373_v0, %v5371_v63  ;;  %v3390_v39 = vmin.f32 %v5373_v0, %v5371_v63 }
 0x1bf   : > { %v2301_v35 = vadd.f32 %v2300_v25, %v5158_v40  ;;  %v2562_v13 = vadd.f32 %v2561_v2, %v2435_v30  ;;  %v2440_v40 = vmul.f32 %v5162_v41, %v5162_v41 }
 0x1c0   : > { %v2799_v50 = vrot.slane %v2798_v43, 4  ;;  %v3391_v7 = vrot.slane %v3390_v39, 4 }
 0x1c1   : > { %v2302_v46 = vadd.f32 %v2301_v35, %v5160_v58  ;;  %v2563_v38 = vadd.f32 %v2562_v13, %v2436_v26  ;;  %v2441_v13 = vmul.f32 %v5182_v62, %v5182_v62 }
 0x1c2   : > { %v2800_v24 = vmax.f32 %v2798_v43, %v2799_v50  ;;  %v3392_v15 = vmin.f32 %v3390_v39, %v3391_v7 }
 0x1c3   : > { %v5331_v16 = vpop.f32.mrf.mxu2  ;;  %v2303_v61 = vadd.f32 %v2302_v46, %v5162_v41  ;;  %v2564_v36 = vadd.f32 %v2563_v38, %v2437_v8  ;;  %v2442_v46 = vmul.f32 %v5184_v22, %v5184_v22 }
 0x1c4   : > { %7122 = vst [vmem:[#allocation65_spill] sm:$0xff] %v5331_v16  ;;  %v2801_v3 = vrot.slane %v2800_v24, 2  ;;  %v3393_v17 = vrot.slane %v3392_v15, 2 }
 0x1c5   : > { %v2304_v45 = vadd.f32 %v2303_v61, %v5182_v62  ;;  %v2565_v18 = vadd.f32 %v2564_v36, %v2438_v28  ;;  %v2444_v62 = vmul.f32 %v5188_v12, %v5188_v12  ;;  %v5422_v36 = vpop.permute.xlu1 %1973  ;;  %v5430_v28 = vpop.permute.xlu0 %1981 }
 0x1c6   : > { %v2802_v10 = vmax.f32 %v2800_v24, %v2801_v3  ;;  %v3394_v29 = vmin.f32 %v3392_v15, %v3393_v17  ;;  %v2447_v24 = vmul.f32 %v5253_v60, %v5253_v60  ;;  %v2448_v3 = vmul.f32 %v5255_v54, %v5255_v54 }
 0x1c7   : > { %v2305_v4 = vadd.f32 %v2304_v45, %v5184_v22  ;;  %v2566_v11 = vadd.f32 %v2565_v18, %v2439_v32  ;;  %v2445_v22 = vmul.f32 %v5249_v34, %v5249_v34  ;;  %v5427_v45 = vpop.permute.xlu2 %1977 }
 0x1c8   : > { %v2803_v48 = vrot.slane %v2802_v10, 1  ;;  %v3395_v25 = vrot.slane %v3394_v29, 1 }
 0x1c9   : > { %v2306_v31 = vadd.f32 %v2305_v4, %v5186_v33  ;;  %v2567_v30 = vadd.f32 %v2566_v11, %v2440_v40  ;;  %v7134_v4 = vld [vmem:[#allocation58_spill] sm:$0xff] }
 0x1ca   : > { %v2804_v2 = vmax.f32 %v2802_v10, %v2803_v48  ;;  %v3396_v35 = vmin.f32 %v3394_v29, %v3395_v25  ;;  %v2449_v10 = vmul.f32 %v5257_v42, %v5257_v42  ;;  %v7135_v25 = vld [vmem:[#allocation59_spill] sm:$0xff] }
 0x1cb   : > { %v5333_v44 = vpop.f32.mrf.mxu2  ;;  %v2307_v1 = vadd.f32 %v2306_v31, %v5188_v12  ;;  %v2568_v47 = vadd.f32 %v2567_v30, %v2441_v13 }
 0x1cc   : > { %7123 = vst [vmem:[#allocation66_spill] sm:$0xff] %v5333_v44  ;;  %v5397_v37 = vsel %vm3217_vm9, %v2804_v2, %v5320_v59  ;;  %v5401_v58 = vsel %vm3217_vm9, %v3396_v35, %v5325_v21  ;;  %v2443_v21 = vmul.f32 %v5186_v33, %v5186_v33  ;;  %v2446_v33 = vmul.f32 %v5251_v55, %v5251_v55  ;;  %v7136_v35 = vld [vmem:[#allocation60_spill] sm:$0xff] }
 0x1cd   : > { %7130 = vst [vmem:[#allocation73_spill] sm:$0xff] %v5397_v37  ;;  %v2308_v41 = vadd.f32 %v2307_v1, %v5249_v34  ;;  %v2569_v5 = vadd.f32 %v2568_v47, %v2442_v46  ;;  %v5439_v17 = vpop.permute.xlu1 %1985  ;;  %v5446_v11 = vpop.permute.xlu0 %1993  ;;  %v7137_v1 = vld [vmem:[#allocation52_spill] sm:$0xff]  ;;  %v7138_v47 = vld [vmem:[#allocation53_spill] sm:$0xff] }
 0x1ce   : > { %7131 = vst [vmem:[#allocation74_spill] sm:$0xff] %v5401_v58  ;;  %v2736_v13 = vrot.slane %v7137_v1, 4 }
 0x1cf   : > { %v2309_v59 = vadd.f32 %v2308_v41, %v5251_v55  ;;  %v2570_v26 = vadd.f32 %v2569_v5, %v2443_v21  ;;  %v5444_v29 = vpop.permute.xlu2 %1989  ;;  %v2743_v41 = vrot.slane %v7138_v47, 4 }
 0x1d1   : > { %v2310_v38 = vadd.f32 %v2309_v59, %v5253_v60  ;;  %v2571_v61 = vadd.f32 %v2570_v26, %v2444_v62  ;;  %v7139_v59 = vld [vmem:[#allocation61_spill] sm:$0xff]  ;;  %v2737_v62 = vmax.f32 %v7137_v1, %v2736_v13  ;;  %v2454_v1 = vmul.f32 %v7136_v35, %v7136_v35 }
 0x1d3   : > { %v5337_v51 = vpop.f32.mrf.mxu2  ;;  %v2311_v43 = vadd.f32 %v2310_v38, %v5255_v54  ;;  %v2572_v39 = vadd.f32 %v2571_v61, %v2445_v22  ;;  %v2450_v54 = vmul.f32 %v5259_v9, %v5259_v9  ;;  %v5471_v61 = vpop.f32.mrf.mxu1 }
 0x1d4   : > { %7124 = vst [vmem:[#allocation67_spill] sm:$0xff] %v5337_v51  ;;  %v1480_v13 = vrot.slane %v5471_v61, 7  ;;  %v7187_v51 = vld [vmem:[#allocation40_spill] sm:$0xff] }
 0x1d5   : > { %v2312_v50 = vadd.f32 %v2311_v43, %v5257_v42  ;;  %v2573_v7 = vadd.f32 %v2572_v39, %v2446_v33  ;;  %v5453_v2 = vpop.permute.xlu1 %1997  ;;  %v2451_v42 = vmul.f32 %v5261_v14, %v5261_v14  ;;  %v5463_v26 = vpop.permute.xlu0 %2005  ;;  %v7141_v43 = vld [vmem:[#allocation55_spill] sm:$0xff]  ;;  %v7142_v39 = vld [vmem:[#allocation56_spill] sm:$0xff] }
 0x1d6   : > { %v3328_v22 = vrot.slane %v7141_v43, 4 }
 0x1d7   : > { %v2313_v12 = vadd.f32 %v2312_v50, %v5259_v9  ;;  %v2574_v34 = vadd.f32 %v2573_v7, %v2447_v24  ;;  %v5460_v5 = vpop.permute.xlu2 %2001  ;;  %v2452_v9 = vmul.f32 %v7134_v4, %v7134_v4  ;;  %v3335_v50 = vrot.slane %v7142_v39, 4  ;;  %v7143_v7 = vld [vmem:[#allocation62_spill] sm:$0xff] }
 0x1d8   : > { %v2453_v24 = vmul.f32 %v7135_v25, %v7135_v25 }
 0x1d9   : > { %v2314_v18 = vadd.f32 %v2313_v12, %v5261_v14  ;;  %v2575_v55 = vadd.f32 %v2574_v34, %v2448_v3  ;;  %v2744_v14 = vmax.f32 %v7138_v47, %v2743_v41  ;;  %v1474_v34 = vrot.slane %v5471_v61, 1 }
 0x1db   : > { %v5345_v56 = vpop.f32.mrf.mxu2  ;;  %v2315_v32 = vadd.f32 %v2314_v18, %v7134_v4  ;;  %v2576_v60 = vadd.f32 %v2575_v55, %v2449_v10  ;;  %v1478_v18 = vrot.slane %v5471_v61, 5  ;;  %v2738_v55 = vrot.slane %v2737_v62, 2 }
 0x1dc   : > { %7125 = vst [vmem:[#allocation68_spill] sm:$0xff] %v5345_v56  ;;  %v2745_v4 = vrot.slane %v2744_v14, 2  ;;  %v1479_v10 = vrot.slane %v5471_v61, 6  ;;  %v1533_v47 = vperm.slane %v1474_v34, 0  ;;  %v2455_v34 = vmul.f32 %v7139_v59, %v7139_v59 }
 0x1dd   : > { %v2316_v31 = vadd.f32 %v2315_v32, %v7135_v25  ;;  %v2577_v40 = vadd.f32 %v2576_v60, %v2450_v54  ;;  %v5480_v3 = vpop.permute.xlu1 %2009  ;;  %v1475_v32 = vrot.slane %v5471_v61, 2  ;;  %v5484_v60 = vpop.f32.mrf.mxu3  ;;  %v5490_v54 = vmin.f32 %v7142_v39, %v3335_v50  ;;  %v7153_v39 = vld [vmem:[#allocation23_spill] sm:$0xff] }
 0x1de   : > { %7144 = vst [vmem:[#allocation59_spill] sm:$0xff] %v5484_v60  ;;  %v1537_v41 = vperm.slane %v1478_v18, 0  ;;  %v7154_v60 = vld [vmem:[#allocation24_spill] sm:$0xff] }
 0x1df   : > { %v2317_v30 = vadd.f32 %v2316_v31, %v7136_v35  ;;  %v2578_v46 = vadd.f32 %v2577_v40, %v2451_v42  ;;  %v5487_v31 = vmin.f32 %v7141_v43, %v3328_v22  ;;  %7146 = vst [vmem:[#allocation52_spill] sm:$0xff] %v5490_v54  ;;  %v1476_v40 = vrot.slane %v5471_v61, 3  ;;  %v5506_v35 = vpop.permute.xlu0 %2017 }
 0x1e0   : > { %v1477_v42 = vrot.slane %v5471_v61, 4  ;;  %v1534_v43 = vperm.slane %v1475_v32, 0  ;;  %v1538_v22 = vperm.slane %v1479_v10, 0  ;;  %v7150_v32 = vld [vmem:[#allocation6_spill] sm:$0xff]  ;;  %v1687_v58 = vadd.f32 %v1537_v41, %v7153_v39 }
 0x1e1   : > { %v2318_v21 = vadd.f32 %v2317_v30, %v7139_v59  ;;  %v2579_v33 = vadd.f32 %v2578_v46, %v2452_v9  ;;  %7145 = vst [vmem:[#allocation60_spill] sm:$0xff] %v5487_v31  ;;  %v5498_v46 = vpop.permute.xlu2 %2013  ;;  %v5502_v9 = vmax.f32 %v2744_v14, %v2745_v4  ;;  %v1539_v4 = vperm.slane %v1480_v13, 0 }
 0x1e2   : > { %v1536_v14 = vperm.slane %v1477_v42, 0  ;;  %v1678_v10 = vadd.f32 %v1533_v47, %v7150_v32  ;;  %v1688_v59 = vadd.f32 %v1538_v22, %v7154_v60  ;;  %v7155_v42 = vld [vmem:[#allocation9_spill] sm:$0xff]  ;;  %v7158_v32 = vld [vmem:[#allocation11_spill] sm:$0xff] }
 0x1e3   : > { %v5354_v57 = vpop.f32.mrf.mxu2  ;;  %v2319_v12 = vadd.f32 %v2318_v21, %v7143_v7  ;;  %v2580_v25 = vadd.f32 %v2579_v33, %v2453_v24  ;;  %v5500_v21 = vmax.f32 %v2737_v62, %v2738_v55  ;;  %7148 = vst [vmem:[#allocation61_spill] sm:$0xff] %v5502_v9  ;;  %v1133_v24 = vpop.f32.mrf.mxu0  ;;  %v2456_v62 = vmul.f32 %v7143_v7, %v7143_v7 }
 0x1e4   : > { %7126 = vst [vmem:[#allocation69_spill] sm:$0xff] %v5354_v57  ;;  %v2457_v55 = vmul.f32 %v5303_v52, %v5303_v52  ;;  %v5608_v56 = vmul.f32 %v5427_v45, %v1678_v10 }
 0x1e5   : > { %v2320_v30 = vadd.f32 %v2319_v12, %v5303_v52  ;;  %7147 = vst [vmem:[#allocation53_spill] sm:$0xff] %v5500_v21  ;;  %v2581_v33 = vadd.f32 %v2580_v25, %v2454_v1  ;;  %v1535_v12 = vperm.slane %v1476_v40, 0  ;;  %v7151_v25 = vld [vmem:[#allocation20_spill] sm:$0xff]  ;;  %v5526_v13 = vpop.permute.xlu1 %2021  ;;  %v5532_v60 = vpop.f32.mrf.mxu3 }
 0x1e6   : > { %v1686_v40 = vadd.f32 %v1537_v41, %v7151_v25  ;;  %v7152_v1 = vld [vmem:[#allocation8_spill] sm:$0xff]  ;;  %v7159_v25 = vld [vmem:[#allocation14_spill] sm:$0xff]  ;;  %7161 = vst [vmem:[#allocation56_spill] sm:$0xff] %v5532_v60 }
 0x1e7   : > { %v2321_v18 = vadd.f32 %v2320_v30, %v5301_v20  ;;  %v1680_v50 = vadd.f32 %v1534_v43, %v7152_v1  ;;  %v2582_v7 = vadd.f32 %v2581_v33, %v2455_v34  ;;  %v7156_v30 = vld [vmem:[#allocation10_spill] sm:$0xff]  ;;  %v1683_v54 = vadd.f32 %v1535_v12, %v7158_v32  ;;  %v7160_v1 = vld [vmem:[#allocation17_spill] sm:$0xff] }
 0x1e8   : > { %v1682_v9 = vadd.f32 %v1535_v12, %v7156_v30  ;;  %v1684_v31 = vadd.f32 %v1536_v14, %v7159_v25  ;;  %v1685_v21 = vadd.f32 %v1536_v14, %v7160_v1  ;;  %v7163_v33 = vld [vmem:[#allocation30_spill] sm:$0xff]  ;;  %v7164_v34 = vld [vmem:[#allocation33_spill] sm:$0xff]  ;;  %v5544_v12 = vmul.f32 %v5446_v11, %v1687_v58 }
 0x1e9   : > { %v2322_v41 = vadd.f32 %v2321_v18, %v5373_v0  ;;  %v5547_v14 = vmul.f32 %v5453_v2, %v1688_v59  ;;  %v1439_v18 = vpop.f32.mrf.mxu1  ;;  %v2583_v32 = vadd.f32 %v2582_v7, %v2456_v62  ;;  %v5561_v58 = vmul.f32 %v5439_v17, %v1683_v54  ;;  %v5580_v62 = vpop.permute.xlu0 %2029 }
 0x1ea   : > { %7167 = vst [vmem:[#allocation20_spill] sm:$0xff] %v5544_v12  ;;  %v1483_v25 = vrot.slane %v1439_v18, 3  ;;  %v1484_v1 = vrot.slane %v1439_v18, 4  ;;  %v1540_v60 = vperm.slane %v1439_v18, 0 }
 0x1eb   : > { %v5363_v23 = vpop.f32.mrf.mxu2  ;;  %7168 = vst [vmem:[#allocation8_spill] sm:$0xff] %v5547_v14  ;;  %v1135_v54 = vpop.f32.mrf.mxu0  ;;  %v2584_v7 = vadd.f32 %v2583_v32, %v2457_v55 }
 0x1ec   : > { %7127 = vst [vmem:[#allocation70_spill] sm:$0xff] %v5363_v23  ;;  %v7157_v23 = vld [vmem:[#allocation27_spill] sm:$0xff] }
 0x1ed   : > { %v1689_v52 = vadd.f32 %v1538_v22, %v7157_v23  ;;  %v5538_v23 = vmul.f32 %v5446_v11, %v1686_v40  ;;  %v5541_v22 = vmul.f32 %v5430_v28, %v1680_v50  ;;  %v5558_v50 = vpop.permute.xlu2 %2025  ;;  %7172 = vst [vmem:[#allocation10_spill] sm:$0xff] %v5561_v58  ;;  %v5564_v11 = vmul.f32 %v5444_v29, %v1684_v31 }
 0x1ef   : > { %7165 = vst [vmem:[#allocation62_spill] sm:$0xff] %v5538_v23  ;;  %v5556_v40 = vmul.f32 %v5453_v2, %v1689_v52  ;;  %v5578_v2 = vmul.f32 %v5538_v23, %v5538_v23 }
 0x1f0   : > { %7166 = vst [vmem:[#allocation6_spill] sm:$0xff] %v5541_v22 }
 0x1f1   : > { %7171 = vst [vmem:[#allocation9_spill] sm:$0xff] %v5556_v40  ;;  %v5597_v52 = vmul.f32 %v5556_v40, %v5556_v40 }
 0x1f2   : > { %7173 = vst [vmem:[#allocation27_spill] sm:$0xff] %v5564_v11 }
 0x1f3   : > { %v5382_v6 = vpop.f32.mrf.mxu2  ;;  %7181 = vst [vmem:[#allocation78_spill] sm:$0xff] %v5597_v52 }
 0x1f4   : > { %7128 = vst [vmem:[#allocation71_spill] sm:$0xff] %v5382_v6  ;;  %v1681_v6 = vadd.f32 %v1534_v43, %v7155_v42  ;;  %v1690_v43 = vadd.f32 %v1539_v4, %v7163_v33  ;;  %v1691_v42 = vadd.f32 %v1539_v4, %v7164_v34  ;;  %v5553_v4 = vmul.f32 %v5439_v17, %v1682_v9 }
 0x1f5   : > { %v1481_v17 = vrot.slane %v1439_v18, 1  ;;  %v2458_v34 = vmul.f32 %v5301_v20, %v5301_v20  ;;  %v5627_v16 = vpop.permute.xlu2 %2037 }
 0x1f6   : > { %7170 = vst [vmem:[#allocation24_spill] sm:$0xff] %v5553_v4  ;;  %v5574_v9 = vmul.f32 %v5460_v5, %v1691_v42  ;;  %v1487_v42 = vrot.slane %v1439_v18, 7 }
 0x1f7   : > { %v1541_v57 = vperm.slane %v1481_v17, 0  ;;  %v1544_v17 = vperm.slane %v1484_v1, 0  ;;  %v7191_v1 = vld [vmem:[#allocation45_spill] sm:$0xff] }
 0x1f8   : > { %7176 = vst [vmem:[#allocation17_spill] sm:$0xff] %v5574_v9 }
 0x1f9   : > { %v1694_v44 = vadd.f32 %v1541_v57, %v7187_v51  ;;  %v5638_v51 = vpop.permute.xlu0 %2041 }
 0x1fb   : > { %v5390_v53 = vpop.f32.mrf.mxu2 }
 0x1fc   : > { %7129 = vst [vmem:[#allocation72_spill] sm:$0xff] %v5390_v53  ;;  %v1532_v53 = vperm.slane %v5471_v61, 0  ;;  %v7162_v61 = vld [vmem:[#allocation7_spill] sm:$0xff] }
 0x1fd   : > { %v1679_v39 = vadd.f32 %v1533_v47, %v7162_v61  ;;  %v5550_v47 = vmul.f32 %v5430_v28, %v1681_v6  ;;  %v2323_v6 = vadd.f32 %v2322_v41, %v5371_v63  ;;  %v5571_v28 = vmul.f32 %v5460_v5, %v1690_v43  ;;  %7177 = vst [vmem:[#allocation7_spill] sm:$0xff] %v5578_v2  ;;  %v7200_v2 = vld [vmem:[#allocation12_spill] sm:$0xff] }
 0x1fe   : > { %v1676_v30 = vadd.f32 %v1532_v53, %v1133_v24  ;;  %v5567_v24 = vmul.f32 %v5444_v29, %v1685_v21  ;;  %v5586_v29 = vmul.f32 %v5544_v12, %v5544_v12  ;;  %v5590_v21 = vmul.f32 %v5547_v14, %v5547_v14 }
 0x1ff   : > { %7169 = vst [vmem:[#allocation23_spill] sm:$0xff] %v5550_v47  ;;  %v1482_v5 = vrot.slane %v1439_v18, 2  ;;  %v1485_v41 = vrot.slane %v1439_v18, 5  ;;  %v1486_v61 = vrot.slane %v1439_v18, 6  ;;  %v1677_v43 = vadd.f32 %v1532_v53, %v1135_v54 }
 0x200   : > { %7174 = vst [vmem:[#allocation11_spill] sm:$0xff] %v5567_v24  ;;  %v5593_v59 = vmul.f32 %v5422_v36, %v1676_v30  ;;  %v5602_v30 = vpop.permute.xlu1 %2033  ;;  %v5611_v52 = vmul.f32 %v5427_v45, %v1679_v39  ;;  %v5617_v20 = vmul.f32 %v5571_v28, %v5571_v28  ;;  %v5621_v53 = vmul.f32 %v5574_v9, %v5574_v9  ;;  %v7185_v45 = vld [vmem:[#allocation36_spill] sm:$0xff] }
 0x201   : > { %7175 = vst [vmem:[#allocation14_spill] sm:$0xff] %v5571_v28  ;;  %v1542_v55 = vperm.slane %v1482_v5, 0  ;;  %v5605_v32 = vmul.f32 %v5422_v36, %v1677_v43  ;;  %v1543_v18 = vperm.slane %v1483_v25, 0  ;;  %v2585_v36 = vadd.f32 %v2584_v7, %v2458_v34  ;;  %v7193_v34 = vld [vmem:[#allocation47_spill] sm:$0xff] }
 0x202   : > { %7179 = vst [vmem:[#allocation33_spill] sm:$0xff] %v5586_v29  ;;  %v2324_v33 = vadd.f32 %v2323_v6, %v5593_v59  ;;  %v5613_v6 = vpop.f32.mrf.mxu3  ;;  %v1545_v54 = vperm.slane %v1485_v41, 0  ;;  %v1546_v5 = vperm.slane %v1486_v61, 0  ;;  %v1547_v43 = vperm.slane %v1487_v42, 0  ;;  %v7192_v61 = vld [vmem:[#allocation46_spill] sm:$0xff] }
 0x203   : > { %v5409_v19 = vpop.f32.mrf.mxu2  ;;  %7180 = vst [vmem:[#allocation77_spill] sm:$0xff] %v5590_v21  ;;  %v1692_v39 = vadd.f32 %v1540_v60, %v7185_v45  ;;  %v7186_v21 = vld [vmem:[#allocation37_spill] sm:$0xff]  ;;  %v2812_v7 = vmax.f32 %v5608_v56, %v5611_v52  ;;  %v1697_v41 = vadd.f32 %v1542_v55, %v7191_v1  ;;  %v1699_v42 = vadd.f32 %v1543_v18, %v7193_v34  ;;  %v7199_v1 = vld [vmem:[#allocation51_spill] sm:$0xff] }
 0x204   : > { %7132 = vst [vmem:[#allocation75_spill] sm:$0xff] %v5409_v19  ;;  %v2325_v10 = vadd.f32 %v2324_v33, %v5605_v32  ;;  %v1698_v33 = vadd.f32 %v1543_v18, %v7192_v61  ;;  %v1703_v61 = vadd.f32 %v1545_v54, %v7199_v1  ;;  %v1704_v18 = vadd.f32 %v1546_v5, %v7200_v2  ;;  %v5661_v1 = vpop.f32.mrf.mxu1 }
 0x205   : > { %7182 = vst [vmem:[#allocation79_spill] sm:$0xff] %v5613_v6  ;;  %v1693_v6 = vadd.f32 %v1540_v60, %v7186_v21  ;;  %v7194_v60 = vld [vmem:[#allocation48_spill] sm:$0xff]  ;;  %v3404_v34 = vmin.f32 %v5608_v56, %v5611_v52 }
 0x206   : > { %7183 = vst [vmem:[#allocation80_spill] sm:$0xff] %v5617_v20  ;;  %v7189_v20 = vld [vmem:[#allocation43_spill] sm:$0xff]  ;;  %v2326_v25 = vadd.f32 %v2325_v10, %v5608_v56  ;;  %v1700_v21 = vadd.f32 %v1544_v17, %v7194_v60 }
 0x207   : > { %7184 = vst [vmem:[#allocation81_spill] sm:$0xff] %v5621_v53  ;;  %v1695_v29 = vadd.f32 %v1541_v57, %v7189_v20  ;;  %v1696_v53 = vadd.f32 %v1542_v55, %v7190_v27  ;;  %v7197_v57 = vld [vmem:[#allocation49_spill] sm:$0xff]  ;;  %v2459_v27 = vmul.f32 %v5373_v0, %v5373_v0  ;;  %v1702_v55 = vadd.f32 %v1545_v54, %v7198_v49  ;;  %v7201_v0 = vld [vmem:[#allocation15_spill] sm:$0xff] }
 0x208   : > { %7188 = vst [vmem:[#allocation36_spill] sm:$0xff] %v5627_v16  ;;  %v1701_v20 = vadd.f32 %v1544_v17, %v7197_v57  ;;  %v2327_v10 = vadd.f32 %v2326_v25, %v5611_v52  ;;  %v2813_v16 = vrot.slane %v2812_v7, 4  ;;  %v2805_v17 = vmax.f32 %v5593_v59, %v5605_v32  ;;  %v7202_v25 = vld [vmem:[#allocation18_spill] sm:$0xff]  ;;  %v5659_v2 = vpop.permute.xlu1 %2045 }
 0x209   : > { %7195 = vst [vmem:[#allocation37_spill] sm:$0xff] %v5638_v51  ;;  %v2586_v60 = vadd.f32 %v2585_v36, %v2459_v27  ;;  %v3397_v54 = vmin.f32 %v5593_v59, %v5605_v32  ;;  %v2460_v36 = vmul.f32 %v5371_v63, %v5371_v63  ;;  %v5676_v63 = vmul.f32 %v5480_v3, %v1694_v44 }
 0x20a   : > { %v2328_v51 = vadd.f32 %v2327_v10, %v5541_v22  ;;  %v2814_v57 = vmax.f32 %v2812_v7, %v2813_v16  ;;  %7204 = vst [vmem:[#allocation43_spill] sm:$0xff] %v5659_v2  ;;  %v2806_v10 = vrot.slane %v2805_v17, 4  ;;  %v5666_v7 = vpop.f32.mrf.mxu3  ;;  %v5693_v44 = vmul.f32 %v5506_v35, %v1698_v33 }
 0x20b   : > { %v5417_v8 = vpop.f32.mrf.mxu2  ;;  %7205 = vst [vmem:[#allocation44_spill] sm:$0xff] %v5661_v1  ;;  %v5710_v33 = vmul.f32 %v5558_v50, %v1702_v55 }
 0x20c   : > { %7133 = vst [vmem:[#allocation76_spill] sm:$0xff] %v5417_v8  ;;  %v2329_v27 = vadd.f32 %v2328_v51, %v5550_v47  ;;  %v2815_v16 = vrot.slane %v2814_v57, 2  ;;  %v5679_v51 = vmul.f32 %v5480_v3, %v1695_v29 }
 0x20d   : > { %7206 = vst [vmem:[#allocation45_spill] sm:$0xff] %v5666_v7 }
 0x20e   : > { %v2330_v2 = vadd.f32 %v2329_v27, %v5553_v4  ;;  %v2816_v8 = vmax.f32 %v2814_v57, %v2815_v16  ;;  %7209 = vst [vmem:[#allocation48_spill] sm:$0xff] %v5676_v63  ;;  %v5690_v57 = vmul.f32 %v5498_v46, %v1697_v41  ;;  %v5707_v41 = vmul.f32 %v5526_v13, %v1701_v20  ;;  %v5725_v20 = vpop.f32.mrf.mxu1 }
 0x20f   : > { %7210 = vst [vmem:[#allocation49_spill] sm:$0xff] %v5679_v51  ;;  %v2462_v16 = vmul.f32 %v5605_v32, %v5605_v32 }
 0x210   : > { %7212 = vst [vmem:[#allocation51_spill] sm:$0xff] %v5690_v57  ;;  %v2817_v3 = vrot.slane %v2816_v8, 1 }
 0x211   : > { %7213 = vst [vmem:[#allocation12_spill] sm:$0xff] %v5693_v44 }
 0x212   : > { %7217 = vst [vmem:[#allocation82_spill] sm:$0xff] %v5710_v33 }
 0x213   : > { %v5434_v15 = vpop.f32.mrf.mxu2 }
 0x21b   : > { %v5448_v48 = vpop.f32.mrf.mxu2 }
 0x223   : > { %v5467_v38 = vpop.f32.mrf.mxu2 }
 0x224   : > { %7140 = vst [vmem:[#allocation58_spill] sm:$0xff] %v5467_v38  ;;  %v2807_v38 = vmax.f32 %v2805_v17, %v2806_v10 }
 0x226   : > { %v2808_v17 = vrot.slane %v2807_v38, 2 }
 0x228   : > { %v2809_v27 = vmax.f32 %v2807_v38, %v2808_v17 }
 0x22b   : > { %v5508_v37 = vpop.f32.mrf.mxu2 }
 0x22c   : > { %7149 = vst [vmem:[#allocation55_spill] sm:$0xff] %v5508_v37  ;;  %v7203_v37 = vld [vmem:[#allocation21_spill] sm:$0xff] }
 0x22d   : > { %v1707_v49 = vadd.f32 %v1547_v43, %v7203_v37  ;;  %v5672_v37 = vmul.f32 %v5463_v26, %v1693_v6  ;;  %v2461_v6 = vmul.f32 %v5593_v59, %v5593_v59  ;;  %7216 = vst [vmem:[#allocation21_spill] sm:$0xff] %v5707_v41 }
 0x22f   : > { %7208 = vst [vmem:[#allocation47_spill] sm:$0xff] %v5672_v37 }
 0x233   : > { %v5582_v31 = vpop.f32.mrf.mxu2 }
 0x234   : > { %7178 = vst [vmem:[#allocation30_spill] sm:$0xff] %v5582_v31  ;;  %v1706_v31 = vadd.f32 %v1547_v43, %v7202_v25  ;;  %v3398_v43 = vrot.slane %v3397_v54, 4  ;;  %v2587_v25 = vadd.f32 %v2586_v60, %v2460_v36  ;;  %v2331_v60 = vadd.f32 %v2330_v2, %v5561_v58 }
 0x235   : > { %v5701_v2 = vmul.f32 %v5506_v35, %v1699_v42  ;;  %v5719_v35 = vmul.f32 %v5580_v62, %v1704_v18  ;;  %v2818_v42 = vmax.f32 %v2816_v8, %v2817_v3  ;;  %v2464_v8 = vmul.f32 %v5611_v52, %v5611_v52 }
 0x236   : > { %v3399_v7 = vmin.f32 %v3397_v54, %v3398_v43  ;;  %v2332_v36 = vadd.f32 %v2331_v60, %v5564_v11  ;;  %v2810_v43 = vrot.slane %v2809_v27, 1  ;;  %v1495_v52 = vrot.slane %v5725_v20, 1 }
 0x237   : > { %7214 = vst [vmem:[#allocation15_spill] sm:$0xff] %v5701_v2  ;;  %v2465_v3 = vmul.f32 %v5541_v22, %v5541_v22 }
 0x238   : > { %v3400_v29 = vrot.slane %v3399_v7, 2  ;;  %v2333_v10 = vadd.f32 %v2332_v36, %v5567_v24  ;;  %7219 = vst [vmem:[#allocation84_spill] sm:$0xff] %v5719_v35  ;;  %v2811_v32 = vmax.f32 %v2809_v27, %v2810_v43  ;;  %v5765_v36 = vmul.f32 %v5679_v51, %v5679_v51 }
 0x23a   : > { %v3401_v38 = vmin.f32 %v3399_v7, %v3400_v29  ;;  %v2334_v55 = vadd.f32 %v2333_v10, %v5538_v23  ;;  %v5728_v7 = vpop.f32.mrf.mxu3  ;;  %v5743_v17 = vsel %vm3205_vm3, %v2818_v42, %v2811_v32  ;;  %v1496_v10 = vrot.slane %v5725_v20, 2 }
 0x23b   : > { %v5640_v45 = vpop.f32.mrf.mxu2  ;;  %7221 = vst [vmem:[#allocation86_spill] sm:$0xff] %v5728_v7  ;;  %v2466_v42 = vmul.f32 %v5550_v47, %v5550_v47  ;;  %v5785_v32 = vmul.f32 %v5693_v44, %v5693_v44 }
 0x23c   : > { %7196 = vst [vmem:[#allocation40_spill] sm:$0xff] %v5640_v45  ;;  %v1705_v45 = vadd.f32 %v1546_v5, %v7201_v0  ;;  %v5669_v5 = vmul.f32 %v5463_v26, %v1692_v39  ;;  %v3405_v0 = vrot.slane %v3404_v34, 4  ;;  %v5681_v39 = vpop.permute.xlu2 %2049  ;;  %v5684_v26 = vmul.f32 %v5498_v46, %v1696_v53 }
 0x23d   : > { %v2588_v53 = vadd.f32 %v2587_v25, %v2461_v6  ;;  %v5704_v46 = vmul.f32 %v5526_v13, %v1700_v21  ;;  %v2463_v13 = vmul.f32 %v5608_v56, %v5608_v56  ;;  %v5723_v21 = vpop.permute.xlu1 %2057  ;;  %v5737_v56 = vmul.f32 %v5602_v30, %v1707_v49  ;;  %7224 = vst [vmem:[#allocation89_spill] sm:$0xff] %v5743_v17 }
 0x23e   : > { %7207 = vst [vmem:[#allocation46_spill] sm:$0xff] %v5669_v5  ;;  %v3406_v19 = vmin.f32 %v3404_v34, %v3405_v0  ;;  %v5695_v34 = vpop.permute.xlu0 %2053  ;;  %v5716_v0 = vmul.f32 %v5558_v50, %v1703_v61  ;;  %v5731_v50 = vmul.f32 %v5580_v62, %v1705_v45  ;;  %v5734_v61 = vmul.f32 %v5602_v30, %v1706_v31 }
 0x23f   : > { %7211 = vst [vmem:[#allocation50_spill] sm:$0xff] %v5684_v26  ;;  %v2589_v25 = vadd.f32 %v2588_v53, %v2462_v16  ;;  %v2335_v18 = vadd.f32 %v2334_v55, %v5544_v12  ;;  %v5747_v62 = vmul.f32 %v5669_v5, %v5669_v5  ;;  %v5751_v31 = vmul.f32 %v5672_v37, %v5672_v37 }
 0x240   : > { %v3407_v59 = vrot.slane %v3406_v19, 2  ;;  %7215 = vst [vmem:[#allocation18_spill] sm:$0xff] %v5704_v46  ;;  %v5755_v30 = vmul.f32 %v5676_v63, %v5676_v63  ;;  %v5769_v27 = vmul.f32 %v5684_v26, %v5684_v26 }
 0x241   : > { %7218 = vst [vmem:[#allocation83_spill] sm:$0xff] %v5716_v0  ;;  %v2590_v60 = vadd.f32 %v2589_v25, %v2463_v13  ;;  %v2336_v49 = vadd.f32 %v2335_v18, %v5547_v14  ;;  %v1497_v18 = vrot.slane %v5725_v20, 3 }
 0x242   : > { %7220 = vst [vmem:[#allocation85_spill] sm:$0xff] %v5723_v21  ;;  %v3408_v6 = vmin.f32 %v3406_v19, %v3407_v59  ;;  %v3402_v19 = vrot.slane %v3401_v38, 1  ;;  %v5773_v59 = vmul.f32 %v5690_v57, %v5690_v57 }
 0x243   : > { %v5697_v54 = vpop.f32.mrf.mxu2  ;;  %7222 = vst [vmem:[#allocation87_spill] sm:$0xff] %v5734_v61  ;;  %v2591_v29 = vadd.f32 %v2590_v60, %v2464_v8  ;;  %v2337_v13 = vadd.f32 %v2336_v49, %v5556_v40  ;;  %v5789_v8 = vmul.f32 %v5701_v2, %v5701_v2  ;;  %v1557_v60 = vperm.slane %v1495_v52, 0  ;;  %v7233_v40 = vld [vmem:[#allocation58_spill] sm:$0xff] }
 0x244   : > { %7223 = vst [vmem:[#allocation88_spill] sm:$0xff] %v5737_v56  ;;  %v5758_v45 = vpop.permute.xlu2 %2061  ;;  %v3409_v53 = vrot.slane %v3408_v6, 1  ;;  %v3403_v25 = vmin.f32 %v3401_v38, %v3402_v19  ;;  %v2467_v49 = vmul.f32 %v5553_v4, %v5553_v4  ;;  %v1488_v38 = vrot.slane %v5661_v1, 1  ;;  %v5804_v4 = vpop.f32.mrf.mxu3 }
 0x245   : > { %7225 = vst [vmem:[#allocation90_spill] sm:$0xff] %v5758_v45  ;;  %v2592_v55 = vadd.f32 %v2591_v29, %v2465_v3  ;;  %v2338_v17 = vadd.f32 %v2337_v13, %v5571_v28  ;;  %v1489_v19 = vrot.slane %v5661_v1, 2  ;;  %v1556_v3 = vperm.slane %v5725_v20, 0  ;;  %v2070_v23 = vpop.permute.xlu1 %2069 }
 0x246   : > { %v5776_v16 = vpop.permute.xlu0 %2065  ;;  %7227 = vst [vmem:[#allocation92_spill] sm:$0xff] %v5785_v32  ;;  %v3410_v47 = vmin.f32 %v3408_v6, %v3409_v53  ;;  %v1558_v29 = vperm.slane %v1496_v10, 0  ;;  %v2468_v52 = vmul.f32 %v5561_v58, %v5561_v58  ;;  %v1490_v6 = vrot.slane %v5661_v1, 3 }
 0x247   : > { %7226 = vst [vmem:[#allocation91_spill] sm:$0xff] %v5776_v16  ;;  %v2593_v22 = vadd.f32 %v2592_v55, %v2466_v42  ;;  %v2339_v12 = vadd.f32 %v2338_v17, %v5574_v9  ;;  %v1491_v53 = vrot.slane %v5661_v1, 4  ;;  %v1726_v42 = vadd.f32 %v1557_v60, %v5434_v15  ;;  %v7234_v9 = vld [vmem:[#allocation55_spill] sm:$0xff]  ;;  %v7252_v16 = vld [vmem:[#allocation38_spill] sm:$0xff] }
 0x248   : > { %7228 = vst [vmem:[#allocation93_spill] sm:$0xff] %v5789_v8  ;;  %v5802_v13 = vsel %vm3205_vm3, %v3410_v47, %v3403_v25  ;;  %v1727_v10 = vadd.f32 %v1557_v60, %v5448_v48  ;;  %v1559_v55 = vperm.slane %v1497_v18, 0  ;;  %v2469_v58 = vmul.f32 %v5564_v11, %v5564_v11  ;;  %v7232_v25 = vld [vmem:[#allocation76_spill] sm:$0xff]  ;;  %v7253_v8 = vld [vmem:[#allocation41_spill] sm:$0xff] }
 0x249   : > { %v2594_v14 = vadd.f32 %v2593_v22, %v2467_v49  ;;  %7229 = vst [vmem:[#allocation94_spill] sm:$0xff] %v5802_v13  ;;  %v2340_v17 = vadd.f32 %v2339_v12, %v5669_v5  ;;  %v7231_v49 = vld [vmem:[#allocation75_spill] sm:$0xff]  ;;  %v1725_v13 = vadd.f32 %v1556_v3, %v7232_v25  ;;  %v1728_v28 = vadd.f32 %v1558_v29, %v7233_v40  ;;  %v7238_v25 = vld [vmem:[#allocation40_spill] sm:$0xff] }
 0x24a   : > { %7230 = vst [vmem:[#allocation95_spill] sm:$0xff] %v5804_v4  ;;  %v1724_v47 = vadd.f32 %v1556_v3, %v7231_v49  ;;  %v1729_v4 = vadd.f32 %v1558_v29, %v7234_v9  ;;  %v1492_v15 = vrot.slane %v5661_v1, 5  ;;  %v1493_v48 = vrot.slane %v5661_v1, 6  ;;  %v7237_v9 = vld [vmem:[#allocation30_spill] sm:$0xff] }
 0x24b   : > { %v5778_v43 = vpop.f32.mrf.mxu2  ;;  %v2595_v22 = vadd.f32 %v2594_v14, %v2468_v52  ;;  %v2341_v18 = vadd.f32 %v2340_v17, %v5672_v37  ;;  %v1498_v14 = vrot.slane %v5725_v20, 4  ;;  %v1730_v29 = vadd.f32 %v1559_v55, %v7237_v9 }
 0x24c   : > { %v2074_v7 = vpop.permute.xlu2 %2073  ;;  %v1731_v11 = vadd.f32 %v1559_v55, %v7238_v25  ;;  %v5833_v17 = vmul.f32 %v2070_v23, %v1724_v47  ;;  %v1549_v60 = vperm.slane %v1488_v38, 0  ;;  %v1550_v55 = vperm.slane %v1489_v19, 0 }
 0x24d   : > { %v2596_v12 = vadd.f32 %v2595_v22, %v2469_v58  ;;  %v5822_v52 = vmul.f32 %v2074_v7, %v1726_v42  ;;  %v5824_v49 = vmul.f32 %v2074_v7, %v1727_v10  ;;  %v2342_v5 = vadd.f32 %v2341_v18, %v5676_v63  ;;  %v2082_v47 = vpop.permute.xlu1 %2081 }
 0x24e   : > { %v2078_v3 = vpop.permute.xlu0 %2077  ;;  %v2470_v58 = vmul.f32 %v5567_v24, %v5567_v24  ;;  %7239 = vst [vmem:[#allocation58_spill] sm:$0xff] %v5833_v17  ;;  %v5835_v22 = vmul.f32 %v2070_v23, %v1725_v13  ;;  %v1548_v10 = vperm.slane %v5661_v1, 0  ;;  %v1551_v25 = vperm.slane %v1490_v6, 0  ;;  %v5850_v13 = vpop.f32.mrf.mxu3  ;;  %v7260_v1 = vld [vmem:[#allocation66_spill] sm:$0xff] }
 0x24f   : > { %7235 = vst [vmem:[#allocation75_spill] sm:$0xff] %v5822_v52  ;;  %v5837_v42 = vmul.f32 %v2078_v3, %v1728_v28  ;;  %v5839_v7 = vmul.f32 %v2078_v3, %v1729_v4  ;;  %v2343_v9 = vadd.f32 %v2342_v5, %v5679_v51  ;;  %v1560_v18 = vperm.slane %v1498_v14, 0  ;;  %v7249_v3 = vld [vmem:[#allocation7_spill] sm:$0xff]  ;;  %v7251_v51 = vld [vmem:[#allocation34_spill] sm:$0xff] }
 0x250   : > { %7236 = vst [vmem:[#allocation76_spill] sm:$0xff] %v5824_v49  ;;  %v2597_v37 = vadd.f32 %v2596_v12, %v2470_v58  ;;  %v2980_v24 = vmax.f32 %v5822_v52, %v5824_v49  ;;  %v1552_v63 = vperm.slane %v1491_v53, 0  ;;  %v5845_v23 = vperm.slane %v1492_v15, 0  ;;  %v7247_v12 = vld [vmem:[#allocation25_spill] sm:$0xff]  ;;  %v7248_v15 = vld [vmem:[#allocation28_spill] sm:$0xff] }
 0x251   : > { %7240 = vst [vmem:[#allocation55_spill] sm:$0xff] %v5835_v22  ;;  %v5847_v28 = vperm.slane %v1493_v48, 0  ;;  %v2344_v4 = vadd.f32 %v2343_v9, %v5684_v26  ;;  %v5852_v38 = vmul.f32 %v2082_v47, %v1730_v29  ;;  %v5854_v5 = vmul.f32 %v2082_v47, %v1731_v11  ;;  %v7250_v9 = vld [vmem:[#allocation31_spill] sm:$0xff] }
 0x252   : > { %7241 = vst [vmem:[#allocation30_spill] sm:$0xff] %v5837_v42  ;;  %v2973_v19 = vmax.f32 %v5833_v17, %v5835_v22  ;;  %v2987_v6 = vmax.f32 %v5837_v42, %v5839_v7  ;;  %v1708_v53 = vadd.f32 %v1548_v10, %v7247_v12  ;;  %v1709_v14 = vadd.f32 %v1548_v10, %v7248_v15  ;;  %v7254_v10 = vld [vmem:[#allocation63_spill] sm:$0xff] }
 0x253   : > { %v5826_v40 = vpop.f32.mrf.mxu2  ;;  %7242 = vst [vmem:[#allocation40_spill] sm:$0xff] %v5839_v7  ;;  %v2345_v48 = vadd.f32 %v2344_v4, %v5690_v57  ;;  %v2598_v58 = vadd.f32 %v2597_v37, %v7249_v3  ;;  %v1710_v26 = vadd.f32 %v1549_v60, %v7250_v9  ;;  %v1732_v29 = vadd.f32 %v1560_v18, %v5697_v54  ;;  %v7255_v54 = vld [vmem:[#allocation64_spill] sm:$0xff] }
 0x254   : > { %7243 = vst [vmem:[#allocation96_spill] sm:$0xff] %v5847_v28  ;;  %v1733_v11 = vadd.f32 %v1560_v18, %v5778_v43  ;;  %v2981_v47 = vrot.slane %v2980_v24, 4  ;;  %v1712_v45 = vadd.f32 %v1550_v55, %v7252_v16  ;;  %v1713_v21 = vadd.f32 %v1550_v55, %v7253_v8  ;;  %v2086_v3 = vpop.permute.xlu2 %2085  ;;  %v7256_v16 = vld [vmem:[#allocation33_spill] sm:$0xff] }
 0x255   : > { %7244 = vst [vmem:[#allocation97_spill] sm:$0xff] %v5850_v13  ;;  %v1711_v13 = vadd.f32 %v1549_v60, %v7251_v51  ;;  %v2346_v12 = vadd.f32 %v2345_v48, %v5693_v44  ;;  %v1714_v15 = vadd.f32 %v1551_v25, %v7254_v10  ;;  %v2974_v4 = vrot.slane %v2973_v19, 4  ;;  %v7259_v44 = vld [vmem:[#allocation65_spill] sm:$0xff] }
 0x256   : > { %7245 = vst [vmem:[#allocation98_spill] sm:$0xff] %v5852_v38  ;;  %v2988_v57 = vrot.slane %v2987_v6, 4  ;;  %v2994_v37 = vmax.f32 %v5852_v38, %v5854_v5  ;;  %v1715_v9 = vadd.f32 %v1551_v25, %v7255_v54  ;;  %v1499_v18 = vrot.slane %v5725_v20, 5  ;;  %v7261_v54 = vld [vmem:[#allocation67_spill] sm:$0xff] }
 0x257   : > { %7246 = vst [vmem:[#allocation99_spill] sm:$0xff] %v5854_v5  ;;  %v2347_v51 = vadd.f32 %v2346_v12, %v5701_v2  ;;  %v2599_v60 = vadd.f32 %v2598_v58, %v7256_v16  ;;  %v5878_v8 = vmul.f32 %v2086_v3, %v1732_v29  ;;  %v5880_v55 = vmul.f32 %v2086_v3, %v1733_v11  ;;  %v5901_v16 = vpop.f32.mrf.mxu3 }
 0x258   : > { %v2982_v48 = vmax.f32 %v2980_v24, %v2981_v47  ;;  %v3572_v10 = vmin.f32 %v5822_v52, %v5824_v49  ;;  %v5885_v28 = vadd.f32 %v1552_v63, %v7259_v44  ;;  %v5888_v25 = vadd.f32 %v1552_v63, %v7260_v1  ;;  %v7263_v1 = vld [vmem:[#allocation77_spill] sm:$0xff]  ;;  %7264 = vst [vmem:[#allocation31_spill] sm:$0xff] %v5901_v16 }
 0x259   : > { %7257 = vst [vmem:[#allocation25_spill] sm:$0xff] %v5878_v8  ;;  %v5892_v32 = vadd.f32 %v5845_v23, %v7261_v54  ;;  %v2348_v58 = vadd.f32 %v2347_v51, %v5704_v46  ;;  %v2975_v29 = vmax.f32 %v2973_v19, %v2974_v4  ;;  %v2989_v12 = vmax.f32 %v2987_v6, %v2988_v57  ;;  %v7265_v54 = vld [vmem:[#allocation36_spill] sm:$0xff]  ;;  %v7268_v4 = vld [vmem:[#allocation37_spill] sm:$0xff] }
 0x25a   : > { %7258 = vst [vmem:[#allocation28_spill] sm:$0xff] %v5880_v55  ;;  %v2995_v11 = vrot.slane %v2994_v37, 4  ;;  %v3565_v24 = vmin.f32 %v5833_v17, %v5835_v22  ;;  %v3579_v47 = vmin.f32 %v5837_v42, %v5839_v7  ;;  %v1561_v44 = vperm.slane %v1499_v18, 0  ;;  %v7271_v22 = vld [vmem:[#allocation78_spill] sm:$0xff] }
 0x25b   : > { %v1280_v43 = vpop.f32.mrf.mxu2  ;;  %7262 = vst [vmem:[#allocation7_spill] sm:$0xff] %v5892_v32  ;;  %v2349_v3 = vadd.f32 %v2348_v58, %v5707_v41  ;;  %v2600_v63 = vadd.f32 %v2599_v60, %v7263_v1  ;;  %v5904_v2 = vmul.f32 %v7265_v54, %v1708_v53  ;;  %v2983_v51 = vrot.slane %v2982_v48, 2 }
 0x25c   : > { %v3001_v57 = vmax.f32 %v5878_v8, %v5880_v55  ;;  %v3573_v19 = vrot.slane %v3572_v10, 4  ;;  %v5909_v6 = vmul.f32 %v7265_v54, %v1709_v14  ;;  %v5912_v7 = vmul.f32 %v7268_v4, %v1710_v26  ;;  %v2090_v14 = vpop.permute.xlu0 %2089  ;;  %v7272_v54 = vld [vmem:[#allocation43_spill] sm:$0xff] }
 0x25d   : > { %7266 = vst [vmem:[#allocation34_spill] sm:$0xff] %v5904_v2  ;;  %v1735_v18 = vadd.f32 %v1561_v44, %v1280_v43  ;;  %v2350_v58 = vadd.f32 %v2349_v3, %v5710_v33  ;;  %v5916_v60 = vmul.f32 %v7268_v4, %v1711_v13  ;;  %v2976_v1 = vrot.slane %v2975_v29, 2 }
 0x25e   : > { %7267 = vst [vmem:[#allocation38_spill] sm:$0xff] %v5909_v6  ;;  %v3566_v53 = vrot.slane %v3565_v24, 4  ;;  %v2990_v16 = vrot.slane %v2989_v12, 2  ;;  %v3580_v42 = vrot.slane %v3579_v47, 4  ;;  %v1734_v49 = vadd.f32 %v1561_v44, %v5826_v40  ;;  %v7276_v44 = vld [vmem:[#allocation80_spill] sm:$0xff] }
 0x25f   : > { %7269 = vst [vmem:[#allocation41_spill] sm:$0xff] %v5912_v7  ;;  %v2996_v52 = vmax.f32 %v2994_v37, %v2995_v11  ;;  %v2601_v17 = vadd.f32 %v2600_v63, %v7271_v22  ;;  %v5921_v41 = vmul.f32 %v7272_v54, %v1712_v45  ;;  %v2984_v26 = vmax.f32 %v2982_v48, %v2983_v51 }
 0x260   : > { %7270 = vst [vmem:[#allocation63_spill] sm:$0xff] %v5916_v60  ;;  %v3574_v43 = vmin.f32 %v3572_v10, %v3573_v19  ;;  %v3002_v46 = vrot.slane %v3001_v57, 4  ;;  %v5924_v3 = vmul.f32 %v7272_v54, %v1713_v21  ;;  %v3586_v13 = vmin.f32 %v5852_v38, %v5854_v5 }
 0x261   : > { %7273 = vst [vmem:[#allocation64_spill] sm:$0xff] %v5921_v41  ;;  %v5928_v4 = vmul.f32 %v2090_v14, %v1735_v18  ;;  %v2351_v40 = vadd.f32 %v2350_v58, %v5716_v0  ;;  %v5934_v22 = vmul.f32 %v5681_v39, %v1714_v15  ;;  %v2977_v45 = vmax.f32 %v2975_v29, %v2976_v1 }
 0x262   : > { %v3567_v37 = vmin.f32 %v3565_v24, %v3566_v53  ;;  %v2991_v48 = vmax.f32 %v2989_v12, %v2990_v16  ;;  %v3581_v10 = vmin.f32 %v3579_v47, %v3580_v42  ;;  %v5936_v11 = vmul.f32 %v2090_v14, %v1734_v49  ;;  %v5947_v49 = vpop.f32.mrf.mxu3  ;;  %v7279_v16 = vld [vmem:[#allocation81_spill] sm:$0xff] }
 0x263   : > { %7274 = vst [vmem:[#allocation33_spill] sm:$0xff] %v5928_v4  ;;  %v5930_v33 = vpop.f32.mrf.mxu2  ;;  %v2997_v21 = vrot.slane %v2996_v52, 2  ;;  %v2602_v63 = vadd.f32 %v2601_v17, %v7276_v44  ;;  %v5940_v51 = vmul.f32 %v5681_v39, %v1715_v9  ;;  %v3575_v19 = vrot.slane %v3574_v43, 2 }
 0x264   : > { %7275 = vst [vmem:[#allocation65_spill] sm:$0xff] %v5934_v22  ;;  %v2985_v18 = vrot.slane %v2984_v26, 1  ;;  %v3003_v54 = vmax.f32 %v3001_v57, %v3002_v46  ;;  %v3587_v5 = vrot.slane %v3586_v13, 4  ;;  %v3593_v15 = vmin.f32 %v5878_v8, %v5880_v55 }
 0x265   : > { %7277 = vst [vmem:[#allocation66_spill] sm:$0xff] %v5940_v51  ;;  %v3008_v29 = vmax.f32 %v5936_v11, %v5928_v4  ;;  %v2352_v42 = vadd.f32 %v2351_v40, %v5719_v35  ;;  %v1501_v12 = vrot.slane %v5725_v20, 7  ;;  %v3568_v17 = vrot.slane %v3567_v37, 2 }
 0x266   : > { %7278 = vst [vmem:[#allocation67_spill] sm:$0xff] %v5947_v49  ;;  %v2978_v24 = vrot.slane %v2977_v45, 1  ;;  %v2992_v39 = vrot.slane %v2991_v48, 1  ;;  %v2998_v9 = vmax.f32 %v2996_v52, %v2997_v21  ;;  %v3582_v47 = vrot.slane %v3581_v10, 2 }
 0x267   : > { %v3600_v46 = vmin.f32 %v5936_v11, %v5928_v4  ;;  %v2603_v57 = vadd.f32 %v2602_v63, %v7279_v16  ;;  %v3576_v58 = vmin.f32 %v3574_v43, %v3575_v19  ;;  %v2986_v1 = vmax.f32 %v2984_v26, %v2985_v18 }
 0x268   : > { %v3004_v53 = vrot.slane %v3003_v54, 2  ;;  %v1500_v14 = vrot.slane %v5725_v20, 6  ;;  %v3009_v40 = vrot.slane %v3008_v29, 4  ;;  %v3588_v44 = vmin.f32 %v3586_v13, %v3587_v5 }
 0x269   : > { %v3594_v49 = vrot.slane %v3593_v15, 4  ;;  %v2353_v55 = vadd.f32 %v2352_v42, %v5731_v50  ;;  %v1563_v8 = vperm.slane %v1501_v12, 0  ;;  %v3569_v38 = vmin.f32 %v3567_v37, %v3568_v17  ;;  %v7280_v12 = vld [vmem:[#allocation13_spill] sm:$0xff] }
 0x26a   : > { %v2979_v35 = vmax.f32 %v2977_v45, %v2978_v24  ;;  %v2993_v52 = vmax.f32 %v2991_v48, %v2992_v39  ;;  %v2999_v21 = vrot.slane %v2998_v9, 1  ;;  %v3583_v0 = vmin.f32 %v3581_v10, %v3582_v47  ;;  %v7281_v45 = vld [vmem:[#allocation16_spill] sm:$0xff]  ;;  %v5961_v47 = vpop.f32.mrf.mxu3 }
 0x26b   : > { %v3601_v32 = vrot.slane %v3600_v46, 4  ;;  %v2604_v4 = vadd.f32 %v2603_v57, %v5747_v62  ;;  %v1285_v63 = vpop.f32.mrf.mxu2  ;;  %v3005_v43 = vmax.f32 %v3003_v54, %v3004_v53  ;;  %v3577_v19 = vrot.slane %v3576_v58, 1 }
 0x26c   : > { %v3247_v26 = vsel %vm3205_vm3, %v2986_v1, %v2979_v35  ;;  %v1562_v20 = vperm.slane %v1500_v14, 0  ;;  %v3010_v18 = vmax.f32 %v3008_v29, %v3009_v40  ;;  %v3589_v5 = vrot.slane %v3588_v44, 2 }
 0x26d   : > { %v3595_v13 = vmin.f32 %v3593_v15, %v3594_v49  ;;  %v2354_v42 = vadd.f32 %v2353_v55, %v5734_v61  ;;  %v1738_v37 = vadd.f32 %v1563_v8, %v7280_v12  ;;  %v1739_v48 = vadd.f32 %v1563_v8, %v7281_v45  ;;  %v2094_v55 = vpop.permute.xlu1 %2093  ;;  %v2098_v49 = vpop.permute.xlu2 %2097 }
 0x26e   : > { %v3570_v17 = vrot.slane %v3569_v38, 1  ;;  %v1737_v10 = vadd.f32 %v1562_v20, %v1285_v63  ;;  %v3000_v24 = vmax.f32 %v2998_v9, %v2999_v21  ;;  %v3584_v39 = vrot.slane %v3583_v0, 1 }
 0x26f   : > { %v3602_v62 = vmin.f32 %v3600_v46, %v3601_v32  ;;  %v2605_v54 = vadd.f32 %v2604_v4, %v5751_v31  ;;  %v3006_v35 = vrot.slane %v3005_v43, 1  ;;  %v3248_v29 = vsel %vm3207_vm4, %v2993_v52, %v3247_v26 }
 0x270   : > { %v3578_v16 = vmin.f32 %v3576_v58, %v3577_v19  ;;  %v1736_v15 = vadd.f32 %v1562_v20, %v5930_v33  ;;  %v3011_v57 = vrot.slane %v3010_v18, 2  ;;  %v3590_v1 = vmin.f32 %v3588_v44, %v3589_v5 }
 0x271   : > { %v3596_v8 = vrot.slane %v3595_v13, 2  ;;  %v2355_v53 = vadd.f32 %v2354_v42, %v5737_v56  ;;  %v3571_v9 = vmin.f32 %v3569_v38, %v3570_v17  ;;  %v5966_v14 = vmul.f32 %v2094_v55, %v1737_v10 }
 0x272   : > { %v5968_v32 = vmul.f32 %v2098_v49, %v1738_v37  ;;  %v5970_v31 = vmul.f32 %v2098_v49, %v1739_v48  ;;  %v3585_v4 = vmin.f32 %v3583_v0, %v3584_v39  ;;  %v3603_v46 = vrot.slane %v3602_v62, 2 }
 0x273   : > { %v2606_v58 = vadd.f32 %v2605_v54, %v5755_v30  ;;  %v2356_v33 = vadd.f32 %v2355_v53, %v5904_v2  ;;  %v3007_v40 = vmax.f32 %v3005_v43, %v3006_v35  ;;  %v3249_v52 = vsel %vm3209_vm5, %v3000_v24, %v3248_v29  ;;  %v5991_v54 = vpop.f32.mrf.mxu3 }
 0x274   : > { %v3832_v44 = vsel %vm3205_vm3, %v3578_v16, %v3571_v9  ;;  %v5976_v21 = vmul.f32 %v2094_v55, %v1736_v15  ;;  %v3012_v38 = vmax.f32 %v3010_v18, %v3011_v57  ;;  %v3591_v63 = vrot.slane %v3590_v1, 1 }
 0x275   : > { %v3597_v26 = vmin.f32 %v3595_v13, %v3596_v8  ;;  %v2357_v19 = vadd.f32 %v2356_v33, %v5909_v6  ;;  %v3022_v30 = vmax.f32 %v5968_v32, %v5970_v31  ;;  %v3614_v20 = vmin.f32 %v5968_v32, %v5970_v31 }
 0x276   : > { %v3015_v0 = vmax.f32 %v5976_v21, %v5966_v14  ;;  %v3607_v43 = vmin.f32 %v5976_v21, %v5966_v14  ;;  %v3604_v5 = vmin.f32 %v3602_v62, %v3603_v46  ;;  %v3833_v42 = vsel %vm3207_vm4, %v3585_v4, %v3832_v44 }
 0x277   : > { %v2607_v18 = vadd.f32 %v2606_v58, %v5765_v36  ;;  %v2358_v13 = vadd.f32 %v2357_v19, %v5912_v7  ;;  %v3023_v37 = vrot.slane %v3022_v30, 4  ;;  %v3615_v48 = vrot.slane %v3614_v20, 4 }
 0x278   : > { %v3016_v12 = vrot.slane %v3015_v0, 4  ;;  %v3608_v45 = vrot.slane %v3607_v43, 4  ;;  %v3013_v17 = vrot.slane %v3012_v38, 1  ;;  %v3592_v10 = vmin.f32 %v3590_v1, %v3591_v63 }
 0x279   : > { %v3598_v24 = vrot.slane %v3597_v26, 1  ;;  %v2359_v39 = vadd.f32 %v2358_v13, %v5916_v60  ;;  %v3024_v29 = vmax.f32 %v3022_v30, %v3023_v37  ;;  %v3616_v16 = vmin.f32 %v3614_v20, %v3615_v48  ;;  %v7282_v13 = vld [vmem:[#allocation68_spill] sm:$0xff] }
 0x27a   : > { %v3017_v35 = vmax.f32 %v3015_v0, %v3016_v12  ;;  %v3609_v62 = vmin.f32 %v3607_v43, %v3608_v45  ;;  %v3605_v15 = vrot.slane %v3604_v5, 1  ;;  %v3834_v36 = vsel %vm3209_vm5, %v3592_v10, %v3833_v42  ;;  %v7284_v48 = vld [vmem:[#allocation92_spill] sm:$0xff] }
 0x27b   : > { %v2608_v55 = vadd.f32 %v2607_v18, %v5769_v27  ;;  %v2360_v49 = vadd.f32 %v2359_v39, %v5921_v41  ;;  %v3025_v8 = vrot.slane %v3024_v29, 2  ;;  %v3617_v1 = vrot.slane %v3616_v16, 2  ;;  %v7285_v39 = vld [vmem:[#allocation44_spill] sm:$0xff] }
 0x27c   : > { %v3018_v57 = vrot.slane %v3017_v35, 2  ;;  %v3610_v53 = vrot.slane %v3609_v62, 2  ;;  %v3014_v9 = vmax.f32 %v3012_v38, %v3013_v17  ;;  %v3250_v4 = vsel %vm3211_vm6, %v3007_v40, %v3249_v52 }
 0x27d   : > { %v3599_v46 = vmin.f32 %v3597_v26, %v3598_v24  ;;  %v2361_v58 = vadd.f32 %v2360_v49, %v5924_v3  ;;  %v3026_v44 = vmax.f32 %v3024_v29, %v3025_v8  ;;  %v3618_v19 = vmin.f32 %v3616_v16, %v3617_v1  ;;  %v7288_v29 = vld [vmem:[#allocation96_spill] sm:$0xff]  ;;  %v7294_v1 = vld [vmem:[#allocation53_spill] sm:$0xff] }
 0x27e   : > { %v3019_v33 = vmax.f32 %v3017_v35, %v3018_v57  ;;  %v3611_v63 = vmin.f32 %v3609_v62, %v3610_v53  ;;  %v3606_v0 = vmin.f32 %v3604_v5, %v3605_v15  ;;  %v2609_v27 = vadd.f32 %v2608_v55, %v5773_v59  ;;  %v7290_v55 = vld [vmem:[#allocation85_spill] sm:$0xff] }
 0x27f   : > { %v3835_v30 = vsel %vm3211_vm6, %v3599_v46, %v3834_v36  ;;  %v2362_v43 = vadd.f32 %v2361_v58, %v5934_v22  ;;  %v3027_v42 = vrot.slane %v3026_v44, 1  ;;  %v3619_v38 = vrot.slane %v3618_v19, 1  ;;  %v7289_v36 = vld [vmem:[#allocation7_spill] sm:$0xff] }
 0x280   : > { %v3020_v20 = vrot.slane %v3019_v33, 1  ;;  %v3612_v18 = vrot.slane %v3611_v63, 1  ;;  %v1719_v40 = vadd.f32 %v5845_v23, %v7282_v13  ;;  %v6005_v52 = vmul.f32 %v5695_v34, %v5885_v28  ;;  %v6016_v28 = vpop.f32.mrf.mxu3 }
 0x281   : > { %v6009_v26 = vmul.f32 %v5695_v34, %v5888_v25  ;;  %v2363_v5 = vadd.f32 %v2362_v43, %v5940_v51  ;;  %v3251_v59 = vsel %vm3213_vm7, %v3014_v9, %v3250_v4  ;;  %v3836_v12 = vsel %vm3213_vm7, %v3606_v0, %v3835_v30  ;;  %v7287_v25 = vld [vmem:[#allocation69_spill] sm:$0xff]  ;;  %v7295_v4 = vld [vmem:[#allocation60_spill] sm:$0xff] }
 0x282   : > { %7283 = vst [vmem:[#allocation77_spill] sm:$0xff] %v6005_v52  ;;  %v3021_v37 = vmax.f32 %v3019_v33, %v3020_v20  ;;  %v3613_v45 = vmin.f32 %v3611_v63, %v3612_v18  ;;  %v2610_v17 = vadd.f32 %v2609_v27, %v7284_v48  ;;  %v3028_v10 = vmax.f32 %v3026_v44, %v3027_v42  ;;  %v7297_v33 = vld [vmem:[#allocation52_spill] sm:$0xff]  ;;  %v7301_v27 = vld [vmem:[#allocation93_spill] sm:$0xff] }
 0x283   : > { %v2364_v23 = vadd.f32 %v2363_v5, %v6005_v52  ;;  %v3620_v24 = vmin.f32 %v3618_v19, %v3619_v38  ;;  %v7286_v35 = vrot.slane %v7285_v39, 7  ;;  %v1720_v62 = vadd.f32 %v7288_v29, %v7287_v25  ;;  %v7299_v19 = vld [vmem:[#allocation70_spill] sm:$0xff]  ;;  %v7302_v42 = vld [vmem:[#allocation61_spill] sm:$0xff]  ;;  %v7304_v5 = vld [vmem:[#allocation71_spill] sm:$0xff] }
 0x284   : > { %v3252_v16 = vsel %vm3215_vm8, %v3021_v37, %v3251_v59  ;;  %v3837_v15 = vsel %vm3215_vm8, %v3613_v45, %v3836_v12  ;;  %v6026_v49 = vmul.f32 %v7290_v55, %v7289_v36  ;;  %v2740_v9 = vrot.slane %v7294_v1, 1  ;;  %v7303_v38 = vld [vmem:[#allocation18_spill] sm:$0xff]  ;;  %v7310_v36 = vld [vmem:[#allocation91_spill] sm:$0xff] }
 0x285   : > { %v1555_v34 = vperm.slane %v7286_v35, 0  ;;  %v2365_v57 = vadd.f32 %v2364_v23, %v6009_v26  ;;  %v6030_v8 = vsel %vm3217_vm9, %v3028_v10, %v3252_v16  ;;  %v6033_v53 = vsel %vm3217_vm9, %v3620_v24, %v3837_v15  ;;  %v7305_v12 = vld [vmem:[#allocation90_spill] sm:$0xff]  ;;  %v7307_v10 = vld [vmem:[#allocation72_spill] sm:$0xff]  ;;  %v7309_v16 = vld [vmem:[#allocation21_spill] sm:$0xff] }
 0x286   : > { %7291 = vst [vmem:[#allocation36_spill] sm:$0xff] %v6026_v49  ;;  %v7296_v46 = vrot.slane %v7295_v4, 2  ;;  %v7298_v44 = vrot.slane %v7297_v33, 2  ;;  %v1721_v0 = vadd.f32 %v7288_v29, %v7299_v19  ;;  %v6045_v30 = vmul.f32 %v7290_v55, %v1719_v40  ;;  %v7308_v29 = vld [vmem:[#allocation54_spill] sm:$0xff]  ;;  %v7314_v19 = vld [vmem:[#allocation57_spill] sm:$0xff] }
 0x287   : > { %7292 = vst [vmem:[#allocation37_spill] sm:$0xff] %v6030_v8  ;;  %v2611_v43 = vadd.f32 %v2610_v17, %v7301_v27  ;;  %v2366_v20 = vadd.f32 %v2365_v57, %v6026_v49  ;;  %v2747_v18 = vrot.slane %v7302_v42, 1  ;;  %v2485_v13 = vmul.f32 %v7303_v38, %v7303_v38  ;;  %v7315_v27 = vld [vmem:[#allocation82_spill] sm:$0xff] }
 0x288   : > { %7293 = vst [vmem:[#allocation78_spill] sm:$0xff] %v6033_v53  ;;  %v3331_v58 = vmin.f32 %v7295_v4, %v7296_v46  ;;  %v3338_v63 = vmin.f32 %v7297_v33, %v7298_v44  ;;  %v1722_v59 = vadd.f32 %v1555_v34, %v7304_v5  ;;  %v6054_v37 = vmul.f32 %v7305_v12, %v1720_v62 }
 0x289   : > { %7300 = vst [vmem:[#allocation43_spill] sm:$0xff] %v6045_v30  ;;  %v2367_v45 = vadd.f32 %v2366_v20, %v6045_v30  ;;  %v2741_v48 = vmax.f32 %v7294_v1, %v2740_v9  ;;  %v1723_v17 = vadd.f32 %v1555_v34, %v7307_v10  ;;  %v6060_v24 = vmul.f32 %v7305_v12, %v1721_v0  ;;  %v6072_v34 = vpop.f32.mrf.mxu3  ;;  %v7321_v10 = vld [vmem:[#allocation84_spill] sm:$0xff] }
 0x28a   : > { %7306 = vst [vmem:[#allocation80_spill] sm:$0xff] %v6054_v37  ;;  %v3332_v40 = vrot.slane %v3331_v58, 1  ;;  %v3339_v23 = vrot.slane %v3338_v63, 1  ;;  %v2612_v39 = vadd.f32 %v2611_v43, %v2485_v13  ;;  %v2748_v25 = vmax.f32 %v7302_v42, %v2747_v18  ;;  %v7317_v18 = vld [vmem:[#allocation58_spill] sm:$0xff]  ;;  %v7318_v13 = vld [vmem:[#allocation83_spill] sm:$0xff] }
 0x28b   : > { %v2368_v35 = vadd.f32 %v2367_v45, %v6054_v37  ;;  %v3216_v62 = vsel %vm3215_vm8, %v2741_v48, %v7308_v29  ;;  %v2486_v15 = vmul.f32 %v7309_v16, %v7309_v16  ;;  %v6069_v55 = vmul.f32 %v7310_v36, %v1722_v59  ;;  %v7319_v59 = vld [vmem:[#allocation55_spill] sm:$0xff]  ;;  %v7323_v29 = vld [vmem:[#allocation30_spill] sm:$0xff] }
 0x28c   : > { %v3333_v1 = vmin.f32 %v3331_v58, %v3332_v40  ;;  %v6075_v9 = vsel %vm3217_vm9, %v2748_v25, %v3216_v62  ;;  %v3340_v4 = vmin.f32 %v3338_v63, %v3339_v23  ;;  %v6078_v46 = vmul.f32 %v7310_v36, %v1723_v17  ;;  %v7320_v48 = vld [vmem:[#allocation75_spill] sm:$0xff]  ;;  %v7324_v36 = vld [vmem:[#allocation40_spill] sm:$0xff] }
 0x28d   : > { %7311 = vst [vmem:[#allocation81_spill] sm:$0xff] %v6069_v55  ;;  %v2369_v57 = vadd.f32 %v2368_v35, %v6060_v24  ;;  %v2613_v33 = vadd.f32 %v2612_v39, %v2486_v15  ;;  %v2487_v43 = vmul.f32 %v7315_v27, %v7315_v27  ;;  %v2488_v5 = vmul.f32 %v7318_v13, %v7318_v13  ;;  %v7322_v39 = vld [vmem:[#allocation76_spill] sm:$0xff] }
 0x28e   : > { %7312 = vst [vmem:[#allocation13_spill] sm:$0xff] %v6075_v9  ;;  %v3802_v0 = vsel %vm3215_vm8, %v3333_v1, %v7314_v19  ;;  %v2489_v17 = vmul.f32 %v7321_v10, %v7321_v10  ;;  %v2490_v15 = vmul.f32 %v5731_v50, %v5731_v50  ;;  %v7326_v19 = vld [vmem:[#allocation99_spill] sm:$0xff] }
 0x28f   : > { %7313 = vst [vmem:[#allocation16_spill] sm:$0xff] %v6078_v46  ;;  %v2370_v44 = vadd.f32 %v2369_v57, %v6069_v55  ;;  %v6087_v58 = vsel %vm3217_vm9, %v3340_v4, %v3802_v0  ;;  %v2614_v42 = vadd.f32 %v2613_v33, %v2487_v43  ;;  %v7325_v4 = vld [vmem:[#allocation98_spill] sm:$0xff]  ;;  %v7330_v9 = vld [vmem:[#allocation19_spill] sm:$0xff] }
 0x290   : > { %7316 = vst [vmem:[#allocation68_spill] sm:$0xff] %v6087_v58 }
 0x291   : > { %v2371_v20 = vadd.f32 %v2370_v44, %v6078_v46  ;;  %v2615_v45 = vadd.f32 %v2614_v42, %v2488_v5  ;;  %v6094_v23 = vpop.f32.mrf.mxu3  ;;  %v2491_v44 = vmul.f32 %v5734_v61, %v5734_v61  ;;  %v7327_v42 = vld [vmem:[#allocation25_spill] sm:$0xff]  ;;  %v2492_v5 = vmul.f32 %v5737_v56, %v5737_v56  ;;  %v7332_v61 = vld [vmem:[#allocation26_spill] sm:$0xff] }
 0x293   : > { %v2372_v63 = vadd.f32 %v2371_v20, %v7317_v18  ;;  %v2616_v25 = vadd.f32 %v2615_v45, %v2489_v17  ;;  %v2493_v17 = vmul.f32 %v5904_v2, %v5904_v2 }
 0x295   : > { %v2373_v12 = vadd.f32 %v2372_v63, %v7319_v59  ;;  %v2617_v1 = vadd.f32 %v2616_v25, %v2490_v15 }
 0x297   : > { %v2374_v40 = vadd.f32 %v2373_v12, %v7320_v48  ;;  %v2618_v20 = vadd.f32 %v2617_v1, %v2491_v44  ;;  %v7328_v12 = vld [vmem:[#allocation28_spill] sm:$0xff]  ;;  %v7329_v1 = vld [vmem:[#allocation33_spill] sm:$0xff] }
 0x299   : > { %v2375_v35 = vadd.f32 %v2374_v40, %v7322_v39  ;;  %v6107_v43 = vpop.f32.mrf.mxu3  ;;  %v6113_v40 = vpop.f32.mrf.mxu1  ;;  %v2619_v25 = vadd.f32 %v2618_v20, %v2492_v5  ;;  %v2496_v20 = vmul.f32 %v5916_v60, %v5916_v60 }
 0x29a   : > { %v1502_v15 = vrot.slane %v6113_v40, 1  ;;  %v1503_v5 = vrot.slane %v6113_v40, 2 }
 0x29b   : > { %v2376_v62 = vadd.f32 %v2375_v35, %v7323_v29  ;;  %v2620_v44 = vadd.f32 %v2619_v25, %v2493_v17  ;;  %v2497_v17 = vmul.f32 %v5921_v41, %v5921_v41  ;;  %v7331_v25 = vld [vmem:[#allocation22_spill] sm:$0xff] }
 0x29c   : > { %v1566_v60 = vperm.slane %v1503_v5, 0  ;;  %v2500_v5 = vmul.f32 %v5940_v51, %v5940_v51 }
 0x29d   : > { %v2377_v57 = vadd.f32 %v2376_v62, %v7324_v36  ;;  %v2494_v62 = vmul.f32 %v5909_v6, %v5909_v6 }
 0x29f   : > { %v2378_v33 = vadd.f32 %v2377_v57, %v7325_v4  ;;  %v1564_v57 = vperm.slane %v6113_v40, 0  ;;  %v2621_v8 = vadd.f32 %v2620_v44, %v2494_v62  ;;  %v2102_v44 = vpop.permute.xlu0 %2101 }
 0x2a1   : > { %v2379_v0 = vadd.f32 %v2378_v33, %v7326_v19  ;;  %v6126_v53 = vpop.f32.mrf.mxu3  ;;  %v1740_v58 = vadd.f32 %v1564_v57, %v7330_v9  ;;  %v1741_v6 = vadd.f32 %v1564_v57, %v7331_v25 }
 0x2a3   : > { %v2380_v63 = vadd.f32 %v2379_v0, %v7327_v42  ;;  %v2495_v0 = vmul.f32 %v5912_v7, %v5912_v7  ;;  %v2498_v7 = vmul.f32 %v5924_v3, %v5924_v3  ;;  %v6140_v56 = vmul.f32 %v2102_v44, %v1740_v58  ;;  %v7334_v58 = vld [vmem:[#allocation32_spill] sm:$0xff] }
 0x2a4   : > { %v6146_v25 = vmul.f32 %v2102_v44, %v1741_v6  ;;  %v1744_v41 = vadd.f32 %v1566_v60, %v7334_v58  ;;  %v2501_v6 = vmul.f32 %v6005_v52, %v6005_v52 }
 0x2a5   : > { %v2381_v45 = vadd.f32 %v2380_v63, %v7328_v12 }
 0x2a7   : > { %v2382_v35 = vadd.f32 %v2381_v45, %v5936_v11  ;;  %v1565_v45 = vperm.slane %v1502_v15, 0 }
 0x2a9   : > { %v2383_v33 = vadd.f32 %v2382_v35, %v7329_v1  ;;  %v2622_v35 = vadd.f32 %v2621_v8, %v2495_v0  ;;  %v1742_v15 = vadd.f32 %v1565_v45, %v7332_v61  ;;  %v2499_v0 = vmul.f32 %v5934_v22, %v5934_v22  ;;  %v6156_v22 = vpop.f32.mrf.mxu3 }
 0x2aa   : > { %v1504_v61 = vrot.slane %v6113_v40, 3 }
 0x2ab   : > { %v2384_v63 = vadd.f32 %v2383_v33, %v5976_v21  ;;  %v2623_v33 = vadd.f32 %v2622_v35, %v2496_v20  ;;  %v2106_v35 = vpop.permute.xlu1 %2105 }
 0x2ad   : > { %v2385_v2 = vadd.f32 %v2384_v63, %v5966_v14  ;;  %v2624_v8 = vadd.f32 %v2623_v33, %v2497_v17  ;;  %v7333_v63 = vld [vmem:[#allocation29_spill] sm:$0xff] }
 0x2ae   : > { %v1743_v57 = vadd.f32 %v1565_v45, %v7333_v63  ;;  %v1567_v63 = vperm.slane %v1504_v61, 0 }
 0x2af   : > { %v2386_v62 = vadd.f32 %v2385_v2, %v5968_v32  ;;  %v2625_v20 = vadd.f32 %v2624_v8, %v2498_v7  ;;  %v2502_v8 = vmul.f32 %v6009_v26, %v6009_v26 }
 0x2b0   : > { %v6160_v45 = vmul.f32 %v2106_v35, %v1743_v57 }
 0x2b1   : > { %v2387_v9 = vadd.f32 %v2386_v62, %v5970_v31  ;;  %v6153_v62 = vmul.f32 %v2106_v35, %v1742_v15  ;;  %v2626_v33 = vadd.f32 %v2625_v20, %v2499_v0  ;;  %v7335_v15 = vld [vmem:[#allocation35_spill] sm:$0xff]  ;;  %v2503_v20 = vmul.f32 %v6026_v49, %v6026_v49 }
 0x2b2   : > { %v1745_v58 = vadd.f32 %v1566_v60, %v7335_v15  ;;  %v2505_v60 = vmul.f32 %v6054_v37, %v6054_v37  ;;  %v6181_v15 = vpop.f32.mrf.mxu3 }
 0x2b3   : > { %v2388_v2 = vadd.f32 %v2387_v9, %v6140_v56  ;;  %v2627_v44 = vadd.f32 %v2626_v33, %v2500_v5  ;;  %v2110_v9 = vpop.permute.xlu2 %2109  ;;  %v2504_v5 = vmul.f32 %v6045_v30, %v6045_v30  ;;  %v7336_v33 = vld [vmem:[#allocation39_spill] sm:$0xff] }
 0x2b4   : > { %v6166_v51 = vmul.f32 %v2110_v9, %v1744_v41  ;;  %v1746_v61 = vadd.f32 %v1567_v63, %v7336_v33  ;;  %v6176_v52 = vmul.f32 %v2110_v9, %v1745_v58  ;;  %v2507_v58 = vmul.f32 %v6069_v55, %v6069_v55  ;;  %v7338_v33 = vld [vmem:[#allocation59_spill] sm:$0xff] }
 0x2b5   : > { %v2389_v17 = vadd.f32 %v2388_v2, %v6146_v25  ;;  %v2628_v2 = vadd.f32 %v2627_v44, %v2501_v6  ;;  %v2114_v44 = vpop.permute.xlu0 %2113 }
 0x2b6   : > { %v6186_v30 = vmul.f32 %v2114_v44, %v1746_v61 }
 0x2b7   : > { %v2390_v7 = vadd.f32 %v2389_v17, %v6153_v62  ;;  %v2629_v35 = vadd.f32 %v2628_v2, %v2502_v8  ;;  %v1505_v17 = vrot.slane %v6113_v40, 4  ;;  %v2506_v8 = vmul.f32 %v6060_v24, %v6060_v24  ;;  %v7337_v2 = vld [vmem:[#allocation42_spill] sm:$0xff] }
 0x2b8   : > { %v1747_v49 = vadd.f32 %v1567_v63, %v7337_v2  ;;  %v2509_v63 = vmul.f32 %v7317_v18, %v7317_v18  ;;  %v7339_v2 = vld [vmem:[#allocation56_spill] sm:$0xff] }
 0x2b9   : > { %v2391_v0 = vadd.f32 %v2390_v7, %v6160_v45  ;;  %v2630_v41 = vadd.f32 %v2629_v35, %v2503_v20 }
 0x2ba   : > { %v6195_v37 = vmul.f32 %v2114_v44, %v1747_v49  ;;  %v2511_v49 = vmul.f32 %v7320_v48, %v7320_v48 }
 0x2bb   : > { %v2392_v57 = vadd.f32 %v2391_v0, %v6166_v51  ;;  %v2631_v7 = vadd.f32 %v2630_v41, %v2504_v5  ;;  %v1568_v0 = vperm.slane %v1505_v17, 0  ;;  %v1506_v5 = vrot.slane %v6113_v40, 5  ;;  %v2122_v48 = vpop.permute.xlu2 %2121 }
 0x2bd   : > { %v2393_v6 = vadd.f32 %v2392_v57, %v6176_v52  ;;  %v2632_v9 = vadd.f32 %v2631_v7, %v2505_v60  ;;  %v2508_v57 = vmul.f32 %v6078_v46, %v6078_v46  ;;  %v1748_v41 = vadd.f32 %v1568_v0, %v7338_v33  ;;  %v2118_v7 = vpop.permute.xlu1 %2117  ;;  %v6205_v33 = vpop.f32.mrf.mxu3 }
 0x2bf   : > { %v2394_v20 = vadd.f32 %v2393_v6, %v6186_v30  ;;  %v2633_v35 = vadd.f32 %v2632_v9, %v2506_v8  ;;  %v2510_v6 = vmul.f32 %v7319_v59, %v7319_v59  ;;  %v1569_v8 = vperm.slane %v1506_v5, 0  ;;  %v7340_v59 = vld [vmem:[#allocation79_spill] sm:$0xff] }
 0x2c0   : > { %v1749_v9 = vadd.f32 %v1568_v0, %v7339_v2  ;;  %v6203_v55 = vmul.f32 %v2118_v7, %v1748_v41  ;;  %v2513_v5 = vmul.f32 %v7323_v29, %v7323_v29  ;;  %v2515_v2 = vmul.f32 %v7325_v4, %v7325_v4  ;;  %v2126_v4 = vpop.permute.xlu0 %2125 }
 0x2c1   : > { %v2634_v17 = vadd.f32 %v2633_v35, %v2507_v58  ;;  %v2395_v61 = vadd.f32 %v2394_v20, %v6195_v37  ;;  %v1507_v58 = vrot.slane %v6113_v40, 6  ;;  %v2512_v20 = vmul.f32 %v7322_v39, %v7322_v39 }
 0x2c2   : > { %v1750_v35 = vadd.f32 %v1569_v8, %v7340_v59  ;;  %v2514_v39 = vmul.f32 %v7324_v36, %v7324_v36  ;;  %v2517_v59 = vmul.f32 %v7327_v42, %v7327_v42  ;;  %v2520_v42 = vmul.f32 %v7329_v1, %v7329_v1 }
 0x2c3   : > { %v2635_v60 = vadd.f32 %v2634_v17, %v2508_v57  ;;  %v2396_v18 = vadd.f32 %v2395_v61, %v6203_v55  ;;  %v6214_v57 = vmul.f32 %v2118_v7, %v1749_v9  ;;  %v7341_v61 = vld [vmem:[#allocation45_spill] sm:$0xff] }
 0x2c5   : > { %v2636_v46 = vadd.f32 %v2635_v60, %v2509_v63  ;;  %v2397_v41 = vadd.f32 %v2396_v18, %v6214_v57  ;;  %v1570_v63 = vperm.slane %v1507_v58, 0  ;;  %v6220_v60 = vmul.f32 %v2122_v48, %v1750_v35  ;;  %v6227_v29 = vpop.f32.mrf.mxu3  ;;  %v7343_v18 = vld [vmem:[#allocation86_spill] sm:$0xff]  ;;  %v2130_v1 = vpop.permute.xlu1 %2129 }
 0x2c7   : > { %v2637_v44 = vadd.f32 %v2636_v46, %v2510_v6  ;;  %v1751_v46 = vadd.f32 %v1569_v8, %v7341_v61  ;;  %7342 = vst [vmem:[#allocation92_spill] sm:$0xff] %v6220_v60  ;;  %v2398_v7 = vadd.f32 %v2397_v41, %v6220_v60  ;;  %v2516_v8 = vmul.f32 %v7326_v19, %v7326_v19 }
 0x2c8   : > { %v2519_v19 = vmul.f32 %v5936_v11, %v5936_v11  ;;  %v2521_v11 = vmul.f32 %v5976_v21, %v5976_v21  ;;  %v2523_v21 = vmul.f32 %v5968_v32, %v5968_v32 }
 0x2c9   : > { %v2638_v0 = vadd.f32 %v2637_v44, %v2511_v49  ;;  %v1508_v49 = vrot.slane %v6113_v40, 7  ;;  %v1752_v44 = vadd.f32 %v1570_v63, %v7343_v18  ;;  %v6231_v58 = vmul.f32 %v2122_v48, %v1751_v46  ;;  %v6241_v40 = vpop.f32.mrf.mxu1  ;;  %v7349_v18 = vld [vmem:[#allocation31_spill] sm:$0xff] }
 0x2ca   : > { %v2518_v48 = vmul.f32 %v7328_v12, %v7328_v12 }
 0x2cb   : > { %v2639_v17 = vadd.f32 %v2638_v0, %v2512_v20  ;;  %7344 = vst [vmem:[#allocation44_spill] sm:$0xff] %v6231_v58  ;;  %v2399_v36 = vadd.f32 %v2398_v7, %v6231_v58  ;;  %v1571_v0 = vperm.slane %v1508_v49, 0 }
 0x2cd   : > { %v2640_v6 = vadd.f32 %v2639_v17, %v2513_v5  ;;  %v7345_v5 = vld [vmem:[#allocation95_spill] sm:$0xff]  ;;  %v6239_v17 = vmul.f32 %v2126_v4, %v1752_v44  ;;  %v6255_v12 = vpop.f32.mrf.mxu3  ;;  %v1755_v44 = vadd.f32 %v1571_v0, %v7349_v18 }
 0x2ce   : > { %v1753_v41 = vadd.f32 %v1570_v63, %v7345_v5  ;;  %v7347_v63 = vld [vmem:[#allocation97_spill] sm:$0xff] }
 0x2cf   : > { %v2641_v9 = vadd.f32 %v2640_v6, %v2514_v39  ;;  %7346 = vst [vmem:[#allocation69_spill] sm:$0xff] %v6239_v17  ;;  %v2400_v46 = vadd.f32 %v2399_v36, %v6239_v17  ;;  %v1509_v6 = vrot.slane %v6241_v40, 1  ;;  %v1754_v7 = vadd.f32 %v1571_v0, %v7347_v63 }
 0x2d0   : > { %v1510_v36 = vrot.slane %v6241_v40, 2 }
 0x2d1   : > { %v2642_v20 = vadd.f32 %v2641_v9, %v2515_v2  ;;  %v6252_v2 = vmul.f32 %v2126_v4, %v1753_v41  ;;  %v1572_v9 = vperm.slane %v6241_v40, 0  ;;  %v7351_v4 = vld [vmem:[#allocation67_spill] sm:$0xff]  ;;  %v2522_v41 = vmul.f32 %v5966_v14, %v5966_v14 }
 0x2d3   : > { %v2643_v35 = vadd.f32 %v2642_v20, %v2516_v8  ;;  %7348 = vst [vmem:[#allocation96_spill] sm:$0xff] %v6252_v2  ;;  %v2401_v8 = vadd.f32 %v2400_v46, %v6252_v2  ;;  %v1756_v5 = vadd.f32 %v1572_v9, %v7351_v4  ;;  %v1757_v0 = vadd.f32 %v1572_v9, %v5961_v47 }
 0x2d5   : > { %v2644_v61 = vadd.f32 %v2643_v35, %v2517_v59  ;;  %v1573_v59 = vperm.slane %v1509_v6, 0  ;;  %v6262_v35 = vmul.f32 %v2130_v1, %v1754_v7  ;;  %v1574_v6 = vperm.slane %v1510_v36, 0 }
 0x2d6   : > { %v4669_v7 = vmov 0.0  }
 0x2d7   : > { %v2645_v39 = vadd.f32 %v2644_v61, %v2518_v48  ;;  %7350 = vst [vmem:[#allocation7_spill] sm:$0xff] %v6262_v35  ;;  %v6267_v61 = vmul.f32 %v2130_v1, %v1755_v44  ;;  %v2402_v46 = vadd.f32 %v2401_v8, %v6262_v35  ;;  %v1758_v63 = vadd.f32 %v1573_v59, %v5991_v54  ;;  %v2138_v8 = vpop.permute.xlu0 %2137 }
 0x2d8   : > { %387 = vst [vmem:[#allocation2] sm:$0x1] %v4669_v7  ;;  %v1759_v9 = vadd.f32 %v1573_v59, %v6016_v28  ;;  %v2525_v44 = vmul.f32 %v6140_v56, %v6140_v56  ;;  %v1512_v1 = vrot.slane %v6241_v40, 4  ;;  %v2526_v28 = vmul.f32 %v6146_v25, %v6146_v25 }
 0x2d9   : > { %v2646_v49 = vadd.f32 %v2645_v39, %v2519_v19  ;;  %7352 = vst [vmem:[#allocation85_spill] sm:$0xff] %v6267_v61  ;;  %v2134_v39 = vpop.permute.xlu2 %2133  ;;  %v2403_v32 = vadd.f32 %v2402_v46, %v6267_v61  ;;  %v6288_v4 = vmul.f32 %v2138_v8, %v1758_v63  ;;  %v2142_v46 = vpop.permute.xlu1 %2141 }
 0x2da   : > { %v6275_v14 = vmul.f32 %v2134_v39, %v1756_v5  ;;  %388 = vst [vmem:[#allocation3] sm:$0x1] %v4669_v7  ;;  %v6281_v18 = vmul.f32 %v2134_v39, %v1757_v0  ;;  %v2527_v0 = vmul.f32 %v6153_v62, %v6153_v62  ;;  %v1576_v39 = vperm.slane %v1512_v1, 0 }
 0x2db   : > { %v2647_v20 = vadd.f32 %v2646_v49, %v2520_v42  ;;  %v1511_v42 = vrot.slane %v6241_v40, 3  ;;  %v2524_v49 = vmul.f32 %v5970_v31, %v5970_v31  ;;  %v1760_v31 = vadd.f32 %v1574_v6, %v6072_v34  ;;  %7355 = vst [vmem:[#allocation52_spill] sm:$0xff] %v6288_v4 }
 0x2dc   : > { %7353 = vst [vmem:[#allocation53_spill] sm:$0xff] %v6275_v14  ;;  %v2404_v54 = vadd.f32 %v2403_v32, %v6275_v14  ;;  %v1513_v34 = vrot.slane %v6241_v40, 5  ;;  %v2528_v7 = vmul.f32 %v6160_v45, %v6160_v45  ;;  %v2529_v32 = vmul.f32 %v6166_v51, %v6166_v51 }
 0x2dd   : > { %v2648_v48 = vadd.f32 %v2647_v20, %v2521_v11  ;;  %7354 = vst [vmem:[#allocation60_spill] sm:$0xff] %v6281_v18  ;;  %v1365_v20 = vpop.f32.mrf.mxu3  ;;  %v1575_v36 = vperm.slane %v1511_v42, 0  ;;  %v6301_v63 = vmul.f32 %v2142_v46, %v1760_v31  ;;  %v2530_v31 = vmul.f32 %v6176_v52, %v6176_v52 }
 0x2de   : > { %v2405_v5 = vadd.f32 %v2404_v54, %v6281_v18  ;;  %v1577_v54 = vperm.slane %v1513_v34, 0 }
 0x2df   : > { %v2649_v19 = vadd.f32 %v2648_v48, %v2522_v41  ;;  %v1761_v41 = vadd.f32 %v1574_v6, %v6094_v23  ;;  %v6294_v48 = vmul.f32 %v2138_v8, %v1759_v9  ;;  %v1762_v42 = vadd.f32 %v1575_v36, %v6107_v43  ;;  %7357 = vst [vmem:[#allocation93_spill] sm:$0xff] %v6301_v63 }
 0x2e0   : > { %v1514_v43 = vrot.slane %v6241_v40, 6  ;;  %v1764_v8 = vadd.f32 %v1576_v39, %v6156_v22  ;;  %v2150_v22 = vpop.permute.xlu0 %2149  ;;  %v1766_v34 = vadd.f32 %v1577_v54, %v6205_v33  ;;  %v2534_v33 = vmul.f32 %v6214_v57, %v6214_v57 }
 0x2e1   : > { %v2650_v47 = vadd.f32 %v2649_v19, %v2523_v21  ;;  %7356 = vst [vmem:[#allocation70_spill] sm:$0xff] %v6294_v48  ;;  %v2406_v19 = vadd.f32 %v2405_v5, %v6288_v4  ;;  %v1765_v5 = vadd.f32 %v1576_v39, %v6181_v15  ;;  %v2533_v15 = vmul.f32 %v6203_v55, %v6203_v55 }
 0x2e2   : > { %v1767_v39 = vadd.f32 %v1577_v54, %v6227_v29  ;;  %v2535_v29 = vmul.f32 %v6220_v60, %v6220_v60 }
 0x2e3   : > { %v2651_v11 = vadd.f32 %v2650_v47, %v2524_v49  ;;  %v2407_v6 = vadd.f32 %v2406_v19, %v6294_v48  ;;  %v1763_v49 = vadd.f32 %v1575_v36, %v6126_v53  ;;  %v6307_v47 = vmul.f32 %v2142_v46, %v1761_v41 }
 0x2e4   : > { %v2532_v19 = vmul.f32 %v6195_v37, %v6195_v37  ;;  %v1578_v46 = vperm.slane %v1514_v43, 0 }
 0x2e5   : > { %v2652_v59 = vadd.f32 %v2651_v11, %v2525_v44  ;;  %7358 = vst [vmem:[#allocation61_spill] sm:$0xff] %v6307_v47  ;;  %v2408_v44 = vadd.f32 %v2407_v6, %v6301_v63  ;;  %v2146_v11 = vpop.permute.xlu2 %2145 }
 0x2e6   : > { %v6314_v1 = vmul.f32 %v2146_v11, %v1762_v42  ;;  %v6322_v41 = vmul.f32 %v2146_v11, %v1763_v49  ;;  %v6328_v42 = vmul.f32 %v2150_v22, %v1764_v8  ;;  %v6335_v49 = vmul.f32 %v2150_v22, %v1765_v5 }
 0x2e7   : > { %v2653_v21 = vadd.f32 %v2652_v59, %v2526_v28  ;;  %v2409_v36 = vadd.f32 %v2408_v44, %v6307_v47  ;;  %v2531_v28 = vmul.f32 %v6186_v30, %v6186_v30  ;;  %v1368_v59 = vpop.f32.mrf.mxu3  ;;  %v2154_v44 = vpop.permute.xlu1 %2153  ;;  %v1768_v11 = vadd.f32 %v1578_v46, %v6255_v12 }
 0x2e8   : > { %7359 = vst [vmem:[#allocation18_spill] sm:$0xff] %v6314_v1  ;;  %v6341_v43 = vmul.f32 %v2154_v44, %v1766_v34  ;;  %v1769_v54 = vadd.f32 %v1578_v46, %v1365_v20 }
 0x2e9   : > { %v2654_v23 = vadd.f32 %v2653_v21, %v2527_v0  ;;  %7360 = vst [vmem:[#allocation71_spill] sm:$0xff] %v6322_v41  ;;  %v2410_v21 = vadd.f32 %v2409_v36, %v6314_v1 }
 0x2ea   : > { %7361 = vst [vmem:[#allocation90_spill] sm:$0xff] %v6328_v42 }
 0x2eb   : > { %v2655_v9 = vadd.f32 %v2654_v23, %v2528_v7  ;;  %v1515_v23 = vrot.slane %v6241_v40, 7  ;;  %v2411_v6 = vadd.f32 %v2410_v21, %v6322_v41  ;;  %7362 = vst [vmem:[#allocation72_spill] sm:$0xff] %v6335_v49 }
 0x2ec   : > { %7363 = vst [vmem:[#allocation54_spill] sm:$0xff] %v6341_v43 }
 0x2ed   : > { %v2656_v53 = vadd.f32 %v2655_v9, %v2529_v32  ;;  %v2412_v9 = vadd.f32 %v2411_v6, %v6328_v42  ;;  %v1579_v8 = vperm.slane %v1515_v23, 0  ;;  %v2158_v5 = vpop.permute.xlu2 %2157 }
 0x2ee   : > { %v6351_v21 = vmul.f32 %v2158_v5, %v1768_v11  ;;  %v6356_v20 = vmul.f32 %v2158_v5, %v1769_v54  ;;  %v2541_v54 = vmul.f32 %v6275_v14, %v6275_v14  ;;  %v2542_v5 = vmul.f32 %v6281_v18, %v6281_v18  ;;  %v7391_v18 = vld [vmem:[#allocation24_spill] sm:$0xff] }
 0x2ef   : > { %v2657_v0 = vadd.f32 %v2656_v53, %v2530_v31  ;;  %v2413_v31 = vadd.f32 %v2412_v9, %v6335_v49  ;;  %v6346_v53 = vmul.f32 %v2154_v44, %v1767_v39  ;;  %v1370_v12 = vpop.f32.mrf.mxu3  ;;  %v2538_v39 = vmul.f32 %v6252_v2, %v6252_v2 }
 0x2f0   : > { %7365 = vst [vmem:[#allocation91_spill] sm:$0xff] %v6351_v21  ;;  %v1771_v23 = vadd.f32 %v1579_v8, %v1370_v12  ;;  %v2539_v44 = vmul.f32 %v6262_v35, %v6262_v35 }
 0x2f1   : > { %v2658_v7 = vadd.f32 %v2657_v0, %v2531_v28  ;;  %7364 = vst [vmem:[#allocation21_spill] sm:$0xff] %v6346_v53  ;;  %v2414_v28 = vadd.f32 %v2413_v31, %v6341_v43  ;;  %v2536_v0 = vmul.f32 %v6231_v58, %v6231_v58 }
 0x2f2   : > { %7366 = vst [vmem:[#allocation57_spill] sm:$0xff] %v6356_v20 }
 0x2f3   : > { %v2659_v32 = vadd.f32 %v2658_v7, %v2532_v19  ;;  %v1770_v19 = vadd.f32 %v1579_v8, %v1368_v59  ;;  %v2415_v34 = vadd.f32 %v2414_v28, %v6346_v53  ;;  %v2537_v7 = vmul.f32 %v6239_v17, %v6239_v17 }
 0x2f4   : > { %v2540_v8 = vmul.f32 %v6267_v61, %v6267_v61 }
 0x2f5   : > { %v2660_v40 = vadd.f32 %v2659_v32, %v2533_v15  ;;  %v2416_v6 = vadd.f32 %v2415_v34, %v6351_v21  ;;  %v2162_v15 = vpop.permute.xlu0 %2161 }
 0x2f6   : > { %v6361_v9 = vmul.f32 %v2162_v15, %v1770_v19  ;;  %v6366_v11 = vmul.f32 %v2162_v15, %v1771_v23 }
 0x2f7   : > { %v2661_v36 = vadd.f32 %v2660_v40, %v2534_v33  ;;  %v2417_v59 = vadd.f32 %v2416_v6, %v6356_v20  ;;  %v2545_v6 = vmul.f32 %v6301_v63, %v6301_v63  ;;  %v7387_v63 = vld [vmem:[#allocation23_spill] sm:$0xff] }
 0x2f8   : > { %7367 = vst [vmem:[#allocation82_spill] sm:$0xff] %v6361_v9 }
 0x2f9   : > { %v2662_v22 = vadd.f32 %v2661_v36, %v2535_v29  ;;  %7368 = vst [vmem:[#allocation58_spill] sm:$0xff] %v6366_v11  ;;  %v2418_v40 = vadd.f32 %v2417_v59, %v6361_v9  ;;  %v2546_v59 = vmul.f32 %v6307_v47, %v6307_v47  ;;  %v7388_v47 = vld [vmem:[#allocation6_spill] sm:$0xff] }
 0x2fa   : > { %v6442_v14 = vmax.f32 %v7388_v47, %v7387_v63 }
 0x2fb   : > { %v2663_v46 = vadd.f32 %v2662_v22, %v2536_v0  ;;  %v2419_v31 = vadd.f32 %v2418_v40, %v6366_v11  ;;  %v2543_v22 = vmul.f32 %v6288_v4, %v6288_v4  ;;  %v2547_v40 = vmul.f32 %v6314_v1, %v6314_v1 }
 0x2fc   : > { %7389 = vst [vmem:[#allocation75_spill] sm:$0xff] %v6442_v14 }
 0x2fd   : > { %v2664_v32 = vadd.f32 %v2663_v46, %v2537_v7  ;;  %v2420_v36 = vrot.slane %v2419_v31, 4  ;;  %v2544_v7 = vmul.f32 %v6294_v48, %v6294_v48 }
 0x2ff   : > { %v2665_v33 = vadd.f32 %v2664_v32, %v2538_v39  ;;  %v2421_v0 = vadd.f32 %v2420_v36, %v2419_v31  ;;  %v2292_v32 = vld [vmem:[#allocation2] sm:$0x1]  ;;  %v2549_v36 = vmul.f32 %v6328_v42, %v6328_v42 }
 0x301   : > { %v2666_v29 = vadd.f32 %v2665_v33, %v2539_v44  ;;  %v2422_v19 = vrot.slane %v2421_v0, 2 }
 0x303   : > { %v2667_v28 = vadd.f32 %v2666_v29, %v2540_v8  ;;  %v2423_v46 = vadd.f32 %v2422_v19, %v2421_v0  ;;  %v2548_v29 = vmul.f32 %v6322_v41, %v6322_v41 }
 0x305   : > { %v2668_v12 = vadd.f32 %v2667_v28, %v2541_v54  ;;  %v2424_v15 = vrot.slane %v2423_v46, 1 }
 0x307   : > { %v2669_v34 = vadd.f32 %v2668_v12, %v2542_v5  ;;  %v2425_v44 = vadd.f32 %v2424_v15, %v2423_v46  ;;  %v2550_v5 = vmul.f32 %v6335_v49, %v6335_v49  ;;  %v2551_v12 = vmul.f32 %v6341_v43, %v6341_v43  ;;  %v7385_v43 = vld [vmem:[#allocation51_spill] sm:$0xff] }
 0x308   : > { %v2553_v46 = vmul.f32 %v6351_v21, %v6351_v21 }
 0x309   : > { %v2670_v23 = vadd.f32 %v2669_v34, %v2543_v22  ;;  %v2426_v8 = vadd.f32 %v2425_v44, %v2292_v32  ;;  %v2552_v34 = vmul.f32 %v6346_v53, %v6346_v53  ;;  %v7386_v53 = vld [vmem:[#allocation50_spill] sm:$0xff] }
 0x30a   : > { %v2875_v42 = vmax.f32 %v7386_v53, %v7385_v43 }
 0x30b   : > { %v2671_v39 = vadd.f32 %v2670_v23, %v2544_v7  ;;  %2427 = vst [vmem:[#allocation2] sm:$0x1] %v2426_v8 }
 0x30c   : > { %v2876_v35 = vrot.slane %v2875_v42, 4 }
 0x30d   : > { %v2672_v33 = vadd.f32 %v2671_v39, %v2545_v6  ;;  %v2554_v6 = vmul.f32 %v6356_v20, %v6356_v20  ;;  %v2555_v39 = vmul.f32 %v6361_v9, %v6361_v9  ;;  %v7383_v9 = vld [vmem:[#allocation11_spill] sm:$0xff] }
 0x30e   : > { %v2877_v58 = vmax.f32 %v2875_v42, %v2876_v35  ;;  %v2903_v35 = vmax.f32 %v7321_v10, %v5731_v50 }
 0x30f   : > { %v2673_v31 = vadd.f32 %v2672_v33, %v2546_v59  ;;  %v2556_v59 = vmul.f32 %v6366_v11, %v6366_v11  ;;  %v7384_v11 = vld [vmem:[#allocation27_spill] sm:$0xff] }
 0x310   : > { %v2833_v21 = vmax.f32 %v7384_v11, %v7383_v9 }
 0x311   : > { %v2674_v54 = vadd.f32 %v2673_v31, %v2547_v40 }
 0x312   : > { %v3873_v19 = vld [vmem:[#allocation2] sm:$0x1]  ;;  %v2834_v4 = vrot.slane %v2833_v21, 4 }
 0x313   : > { %v2675_v28 = vadd.f32 %v2674_v54, %v2548_v29  ;;  %3878 = vrot.lane.b32.xlu2 %v3873_v19, %s4670_s29  ;;  %3876 = vrot.lane.b32.xlu1 %v3873_v19, %s4671_s30 }
 0x315   : > { %v2676_v0 = vadd.f32 %v2675_v28, %v2549_v36  ;;  %v2428_v36 = vld [vmem:[#allocation3] sm:$0x1] }
 0x317   : > { %v2677_v22 = vadd.f32 %v2676_v0, %v2550_v5 }
 0x319   : > { %v2678_v7 = vadd.f32 %v2677_v22, %v2551_v12  ;;  %v3874_v12 = vlaneseq }
 0x31b   : > { %v2679_v23 = vadd.f32 %v2678_v7, %v2552_v34  ;;  %v6404_v22 = vand.u32 127, %v3874_v12  ;;  %v7377_v12 = vld [vmem:[#allocation20_spill] sm:$0xff] }
 0x31d   : > { %v2680_v15 = vadd.f32 %v2679_v23, %v2553_v46  ;;  %7369 = vst [vmem:[#allocation83_spill] sm:$0xff] %v6404_v22  ;;  %v3880_v34 = vand.u32 1, %v6404_v22 }
 0x31f   : > { %v2681_v32 = vadd.f32 %v2680_v15, %v2554_v6  ;;  %vm3881_vm10 = vcmp.eq.s32.totalorder %v3880_v34, 0  ;;  %v7378_v34 = vld [vmem:[#allocation62_spill] sm:$0xff] }
 0x321   : > { %v2682_v44 = vadd.f32 %v2681_v32, %v2555_v39 }
 0x323   : > { %v2683_v33 = vadd.f32 %v2682_v44, %v2556_v59  ;;  %v3888_v44 = vand.u32 2, %v6404_v22 }
 0x325   : > { %v2684_v40 = vrot.slane %v2683_v33, 4  ;;  %vm6408_vm11 = vcmp.eq.s32.totalorder %v3888_v44, 0 }
 0x327   : > { %v2685_v8 = vadd.f32 %v2684_v40, %v2683_v33 }
 0x329   : > { %v2686_v31 = vrot.slane %v2685_v8, 2 }
 0x32b   : > { %v2687_v29 = vadd.f32 %v2686_v31, %v2685_v8 }
 0x32d   : > { %v2688_v54 = vrot.slane %v2687_v29, 1 }
 0x32f   : > { %v2689_v28 = vadd.f32 %v2688_v54, %v2687_v29  ;;  %v7373_v29 = vld [vmem:[#allocation17_spill] sm:$0xff]  ;;  %v7374_v54 = vld [vmem:[#allocation14_spill] sm:$0xff] }
 0x330   : > { %v3446_v1 = vmin.f32 %v7374_v54, %v7373_v29 }
 0x331   : > { %v2690_v5 = vadd.f32 %v2689_v28, %v2428_v36  ;;  %v2854_v36 = vmax.f32 %v7374_v54, %v7373_v29  ;;  %v7375_v28 = vld [vmem:[#allocation9_spill] sm:$0xff] }
 0x332   : > { %v3447_v61 = vrot.slane %v3446_v1, 4 }
 0x333   : > { %2691 = vst [vmem:[#allocation3] sm:$0x1] %v2690_v5  ;;  %v7376_v5 = vld [vmem:[#allocation8_spill] sm:$0xff] }
 0x33a   : > { %v3901_v0 = vld [vmem:[#allocation3] sm:$0x1] }
 0x33b   : > { %3902 = vrot.lane.b32.xlu0 %v3901_v0, %s4671_s30  ;;  %3904 = vrot.lane.b32.xlu1 %v3901_v0, %s4670_s29 }
 0x36d   : > { %v3879_v7 = vpop.permute.xlu2 %3878 }
 0x385   : > { %v3877_v46 = vpop.permute.xlu1 %3876 }
 0x386   : > { %v3882_v23 = vsel %vm3881_vm10, %v3877_v46, %v3879_v7  ;;  %v2840_v7 = vmax.f32 %v7378_v34, %v7377_v12  ;;  %v2855_v46 = vrot.slane %v2854_v36, 4 }
 0x387   : > { %v3883_v6 = vadd.f32 %v3882_v23, %v3873_v19 }
 0x388   : > { %v2841_v44 = vrot.slane %v2840_v7, 4  ;;  %v2856_v20 = vmax.f32 %v2854_v36, %v2855_v46  ;;  %v3425_v36 = vmin.f32 %v7384_v11, %v7383_v9  ;;  %v7393_v9 = vld [vmem:[#allocation15_spill] sm:$0xff]  ;;  %v7394_v11 = vld [vmem:[#allocation12_spill] sm:$0xff] }
 0x389   : > { %3886 = vrot.lane.b32.xlu0 %v3883_v6, %s4672_s8  ;;  %3884 = vrot.lane.b32.xlu2 %v3883_v6, %s4673_s9  ;;  %v2882_v2 = vmax.f32 %v7394_v11, %v7393_v9 }
 0x38a   : > { %v2857_v48 = vrot.slane %v2856_v20, 2 }
 0x3ad   : > { %v3903_v15 = vpop.permute.xlu0 %3902  ;;  %v3905_v39 = vpop.permute.xlu1 %3904 }
 0x3ae   : > { %v3906_v32 = vsel %vm3881_vm10, %v3903_v15, %v3905_v39  ;;  %v7380_v15 = vld [vmem:[#allocation48_spill] sm:$0xff] }
 0x3af   : > { %v3907_v59 = vadd.f32 %v3906_v32, %v3901_v0  ;;  %v2847_v0 = vmax.f32 %v7376_v5, %v7375_v28  ;;  %v3432_v32 = vmin.f32 %v7378_v34, %v7377_v12 }
 0x3b1   : > { %3910 = vrot.lane.b32.xlu2 %v3907_v59, %s4672_s8  ;;  %3908 = vrot.lane.b32.xlu1 %v3907_v59, %s4673_s9  ;;  %v2848_v23 = vrot.slane %v2847_v0, 4  ;;  %v3433_v46 = vrot.slane %v3432_v32, 4 }
 0x3b3   : > { %v2849_v49 = vmax.f32 %v2847_v0, %v2848_v23  ;;  %v2842_v23 = vmax.f32 %v2840_v7, %v2841_v44  ;;  %v3426_v7 = vrot.slane %v3425_v36, 4  ;;  %v3434_v44 = vmin.f32 %v3432_v32, %v3433_v46 }
 0x3b5   : > { %v2850_v14 = vrot.slane %v2849_v49, 2  ;;  %v6476_v32 = vmin.f32 %v3425_v36, %v3426_v7  ;;  %v3435_v46 = vrot.slane %v3434_v44, 2  ;;  %v7400_v7 = vld [vmem:[#allocation87_spill] sm:$0xff] }
 0x3b7   : > { %7396 = vst [vmem:[#allocation30_spill] sm:$0xff] %v6476_v32 }
 0x3e3   : > { %v3885_v40 = vpop.permute.xlu2 %3884 }
 0x3fb   : > { %v3887_v8 = vpop.permute.xlu0 %3886 }
 0x3fc   : > { %v3890_v19 = vsel %vm6408_vm11, %v3885_v40, %v3887_v8  ;;  %v7381_v40 = vld [vmem:[#allocation47_spill] sm:$0xff]  ;;  %v7382_v8 = vld [vmem:[#allocation46_spill] sm:$0xff] }
 0x3fd   : > { %v6414_v31 = vadd.f32 %v3890_v19, %v3883_v6  ;;  %v7379_v6 = vld [vmem:[#allocation49_spill] sm:$0xff]  ;;  %v2861_v19 = vmax.f32 %v7382_v8, %v7381_v40 }
 0x3fe   : > { %v2868_v39 = vmax.f32 %v7380_v15, %v7379_v6 }
 0x3ff   : > { %7372 = vst [vmem:[#allocation55_spill] sm:$0xff] %v6414_v31  ;;  %3892 = vrot.lane.b32.xlu0 %v6414_v31, %s4674_s10  ;;  %3894 = vrot.lane.b32.xlu1 %v6414_v31, %s4675_s11  ;;  %v3439_v31 = vmin.f32 %v7376_v5, %v7375_v28  ;;  %v7390_v5 = vld [vmem:[#allocation10_spill] sm:$0xff]  ;;  %v2862_v29 = vrot.slane %v2861_v19, 4 }
 0x400   : > { %v2869_v41 = vrot.slane %v2868_v39, 4  ;;  %v6450_v0 = vmax.f32 %v7391_v18, %v7390_v5  ;;  %v6466_v33 = vmin.f32 %v7391_v18, %v7390_v5  ;;  %v2883_v18 = vrot.slane %v2882_v2, 4 }
 0x401   : > { %v3440_v22 = vrot.slane %v3439_v31, 4  ;;  %v3453_v5 = vmin.f32 %v7382_v8, %v7381_v40 }
 0x402   : > { %v2870_v17 = vmax.f32 %v2868_v39, %v2869_v41  ;;  %v2843_v39 = vrot.slane %v2842_v23, 2 }
 0x403   : > { %v3441_v60 = vmin.f32 %v3439_v31, %v3440_v22  ;;  %v2884_v22 = vmax.f32 %v2882_v2, %v2883_v18  ;;  %v6487_v31 = vmin.f32 %v3434_v44, %v3435_v46  ;;  %v3474_v46 = vmin.f32 %v7394_v11, %v7393_v9 }
 0x404   : > { %v3454_v8 = vrot.slane %v3453_v5, 4 }
 0x405   : > { %7398 = vst [vmem:[#allocation98_spill] sm:$0xff] %v6487_v31  ;;  %v2885_v18 = vrot.slane %v2884_v22, 2  ;;  %v3475_v11 = vrot.slane %v3474_v46, 4 }
 0x407   : > { %v2886_v9 = vmax.f32 %v2884_v22, %v2885_v18 }
 0x40b   : > { %v3911_v12 = vpop.permute.xlu2 %3910 }
 0x423   : > { %v3909_v34 = vpop.permute.xlu1 %3908 }
 0x424   : > { %v3912_v28 = vsel %vm6408_vm11, %v3909_v34, %v3911_v12  ;;  %v2863_v12 = vmax.f32 %v2861_v19, %v2862_v29  ;;  %v2889_v34 = vmax.f32 %v7303_v38, %v7309_v16  ;;  %v2896_v19 = vmax.f32 %v7315_v27, %v7318_v13 }
 0x425   : > { %v6452_v54 = vadd.f32 %v3912_v28, %v3907_v59  ;;  %v6462_v59 = vmin.f32 %v7388_v47, %v7387_v63  ;;  %v6471_v28 = vmax.f32 %v2833_v21, %v2834_v4  ;;  %v6473_v63 = vmax.f32 %v2849_v49, %v2850_v14 }
 0x426   : > { %v3448_v47 = vmin.f32 %v3446_v1, %v3447_v61  ;;  %v6480_v29 = vmax.f32 %v2842_v23, %v2843_v39  ;;  %v2864_v4 = vrot.slane %v2863_v12, 2  ;;  %v2890_v21 = vrot.slane %v2889_v34, 4  ;;  %v7399_v23 = vld [vmem:[#allocation88_spill] sm:$0xff] }
 0x427   : > { %7392 = vst [vmem:[#allocation84_spill] sm:$0xff] %v6452_v54  ;;  %3916 = vrot.lane.b32.xlu0 %v6452_v54, %s4675_s11  ;;  %3914 = vrot.lane.b32.xlu2 %v6452_v54, %s4674_s10  ;;  %v2858_v54 = vmax.f32 %v2856_v20, %v2857_v48  ;;  %v3442_v48 = vrot.slane %v3441_v60, 2  ;;  %v2878_v61 = vrot.slane %v2877_v58, 2  ;;  %v3460_v1 = vmin.f32 %v7380_v15, %v7379_v6 }
 0x428   : > { %7395 = vst [vmem:[#allocation76_spill] sm:$0xff] %v6462_v59  ;;  %v2871_v59 = vrot.slane %v2870_v17, 2  ;;  %v3449_v49 = vrot.slane %v3448_v47, 2  ;;  %v2897_v36 = vrot.slane %v2896_v19, 4  ;;  %v2910_v39 = vmax.f32 %v7400_v7, %v7399_v23 }
 0x429   : > { %7397 = vst [vmem:[#allocation40_spill] sm:$0xff] %v6480_v29  ;;  %v2859_v14 = vrot.slane %v2858_v54, 1  ;;  %v2865_v41 = vmax.f32 %v2863_v12, %v2864_v4  ;;  %v2891_v32 = vmax.f32 %v2889_v34, %v2890_v21  ;;  %v2904_v29 = vrot.slane %v2903_v35, 4 }
 0x42a   : > { %v2872_v20 = vmax.f32 %v2870_v17, %v2871_v59  ;;  %v3467_v6 = vmin.f32 %v7386_v53, %v7385_v43  ;;  %v6497_v42 = vmin.f32 %v3441_v60, %v3442_v48  ;;  %v2879_v17 = vmax.f32 %v2877_v58, %v2878_v61 }
 0x42b   : > { %v6495_v15 = vmax.f32 %v2858_v54, %v2859_v14  ;;  %v3461_v2 = vrot.slane %v3460_v1, 4  ;;  %v3450_v59 = vmin.f32 %v3448_v47, %v3449_v49  ;;  %v2898_v31 = vmax.f32 %v2896_v19, %v2897_v36 }
 0x42c   : > { %7402 = vst [vmem:[#allocation25_spill] sm:$0xff] %v6497_v42  ;;  %v2873_v44 = vrot.slane %v2872_v20, 1  ;;  %v2911_v40 = vrot.slane %v2910_v39, 4  ;;  %v3481_v12 = vmin.f32 %v7303_v38, %v7309_v16  ;;  %v2866_v34 = vrot.slane %v2865_v41, 1 }
 0x42d   : > { %7401 = vst [vmem:[#allocation99_spill] sm:$0xff] %v6495_v15  ;;  %v2892_v43 = vrot.slane %v2891_v32, 2  ;;  %v2905_v53 = vmax.f32 %v2903_v35, %v2904_v29  ;;  %v3468_v54 = vrot.slane %v3467_v6, 4  ;;  %v2880_v58 = vrot.slane %v2879_v17, 1 }
 0x42e   : > { %v3462_v4 = vmin.f32 %v3460_v1, %v3461_v2  ;;  %v3488_v47 = vmin.f32 %v7315_v27, %v7318_v13  ;;  %v3451_v21 = vrot.slane %v3450_v59, 1  ;;  %v2874_v14 = vmax.f32 %v2872_v20, %v2873_v44 }
 0x42f   : > { %v2899_v19 = vrot.slane %v2898_v31, 2  ;;  %v2912_v48 = vmax.f32 %v2910_v39, %v2911_v40  ;;  %v3455_v61 = vmin.f32 %v3453_v5, %v3454_v8  ;;  %v3482_v49 = vrot.slane %v3481_v12, 4 }
 0x430   : > { %v2867_v38 = vmax.f32 %v2865_v41, %v2866_v34  ;;  %v2893_v16 = vmax.f32 %v2891_v32, %v2892_v43  ;;  %v2906_v36 = vrot.slane %v2905_v53, 2  ;;  %v3469_v29 = vmin.f32 %v3467_v6, %v3468_v54  ;;  %v7404_v43 = vld [vmem:[#allocation63_spill] sm:$0xff]  ;;  %v7405_v54 = vld [vmem:[#allocation41_spill] sm:$0xff] }
 0x431   : > { %v2881_v35 = vmax.f32 %v2879_v17, %v2880_v58  ;;  %v3463_v15 = vrot.slane %v3462_v4, 2  ;;  %v3489_v60 = vrot.slane %v3488_v47, 4  ;;  %v3495_v1 = vmin.f32 %v7321_v10, %v5731_v50 }
 0x432   : > { %v2887_v2 = vrot.slane %v2886_v9, 1  ;;  %v3233_v27 = vsel %vm3205_vm3, %v2874_v14, %v2867_v38  ;;  %v3476_v13 = vmin.f32 %v3474_v46, %v3475_v11  ;;  %v3502_v20 = vmin.f32 %v7400_v7, %v7399_v23  ;;  %v7406_v14 = vld [vmem:[#allocation38_spill] sm:$0xff] }
 0x433   : > { %v2900_v22 = vmax.f32 %v2898_v31, %v2899_v19  ;;  %v2913_v5 = vrot.slane %v2912_v48, 2  ;;  %v3456_v39 = vrot.slane %v3455_v61, 2  ;;  %v3483_v41 = vmin.f32 %v3481_v12, %v3482_v49  ;;  %v7407_v11 = vld [vmem:[#allocation34_spill] sm:$0xff] }
 0x434   : > { %v6511_v32 = vmin.f32 %v3450_v59, %v3451_v21  ;;  %v2894_v6 = vrot.slane %v2893_v16, 1  ;;  %v2907_v17 = vmax.f32 %v2905_v53, %v2906_v36  ;;  %v3470_v44 = vrot.slane %v3469_v29, 2 }
 0x435   : > { %v3234_v18 = vsel %vm3207_vm4, %v2881_v35, %v3233_v27  ;;  %v3464_v40 = vmin.f32 %v3462_v4, %v3463_v15  ;;  %v3490_v50 = vmin.f32 %v3488_v47, %v3489_v60  ;;  %v3496_v10 = vrot.slane %v3495_v1, 4  ;;  %v7408_v47 = vld [vmem:[#allocation64_spill] sm:$0xff] }
 0x436   : > { %7403 = vst [vmem:[#allocation28_spill] sm:$0xff] %v6511_v32  ;;  %v2888_v8 = vmax.f32 %v2886_v9, %v2887_v2  ;;  %v3477_v34 = vrot.slane %v3476_v13, 2  ;;  %v3503_v46 = vrot.slane %v3502_v20, 4  ;;  %v2924_v23 = vmax.f32 %v7405_v54, %v7404_v43 }
 0x437   : > { %v2901_v31 = vrot.slane %v2900_v22, 1  ;;  %v2914_v7 = vmax.f32 %v2912_v48, %v2913_v5  ;;  %v3457_v58 = vmin.f32 %v3455_v61, %v3456_v39  ;;  %v3484_v12 = vrot.slane %v3483_v41, 2 }
 0x438   : > { %v2908_v59 = vrot.slane %v2907_v17, 1  ;;  %v3235_v21 = vsel %vm3209_vm5, %v2888_v8, %v3234_v18  ;;  %v3471_v53 = vmin.f32 %v3469_v29, %v3470_v44  ;;  %v2917_v19 = vmax.f32 %v7407_v11, %v7406_v14 }
 0x439   : > { %v3465_v15 = vrot.slane %v3464_v40, 1  ;;  %v3491_v60 = vrot.slane %v3490_v50, 2  ;;  %v3497_v4 = vmin.f32 %v3495_v1, %v3496_v10  ;;  %v2931_v9 = vmax.f32 %v7408_v47, %v5924_v3 }
 0x43a   : > { %v2895_v49 = vmax.f32 %v2893_v16, %v2894_v6  ;;  %v3478_v38 = vmin.f32 %v3476_v13, %v3477_v34  ;;  %v3504_v36 = vmin.f32 %v3502_v20, %v3503_v46  ;;  %v2925_v35 = vrot.slane %v2924_v23, 4  ;;  %v7410_v13 = vld [vmem:[#allocation66_spill] sm:$0xff]  ;;  %v7411_v20 = vld [vmem:[#allocation65_spill] sm:$0xff] }
 0x43b   : > { %v2902_v48 = vmax.f32 %v2900_v22, %v2901_v31  ;;  %v2915_v61 = vrot.slane %v2914_v7, 1  ;;  %v3458_v2 = vrot.slane %v3457_v58, 1  ;;  %v3485_v27 = vmin.f32 %v3483_v41, %v3484_v12  ;;  %v7415_v12 = vld [vmem:[#allocation43_spill] sm:$0xff] }
 0x43c   : > { %v6521_v5 = vmax.f32 %v2907_v17, %v2908_v59  ;;  %v3236_v29 = vsel %vm3211_vm6, %v2895_v49, %v3235_v21  ;;  %v3472_v39 = vrot.slane %v3471_v53, 1  ;;  %v2918_v44 = vrot.slane %v2917_v19, 4  ;;  %v7416_v59 = vld [vmem:[#allocation36_spill] sm:$0xff] }
 0x43d   : > { %v3466_v18 = vmin.f32 %v3464_v40, %v3465_v15  ;;  %v3492_v8 = vmin.f32 %v3490_v50, %v3491_v60  ;;  %v3498_v1 = vrot.slane %v3497_v4, 2  ;;  %v2932_v10 = vrot.slane %v2931_v9, 4  ;;  %v7414_v40 = vld [vmem:[#allocation77_spill] sm:$0xff] }
 0x43e   : > { %7409 = vst [vmem:[#allocation33_spill] sm:$0xff] %v6521_v5  ;;  %v3479_v32 = vrot.slane %v3478_v38, 1  ;;  %v3505_v42 = vrot.slane %v3504_v36, 2  ;;  %v2926_v16 = vmax.f32 %v2924_v23, %v2925_v35  ;;  %v2938_v6 = vmax.f32 %v7411_v20, %v7410_v13 }
 0x43f   : > { %v6526_v22 = vmax.f32 %v2914_v7, %v2915_v61  ;;  %v6529_v41 = vsel %vm3213_vm7, %v2902_v48, %v3236_v29  ;;  %v3459_v17 = vmin.f32 %v3457_v58, %v3458_v2  ;;  %v3486_v34 = vrot.slane %v3485_v27, 1  ;;  %v7417_v58 = vld [vmem:[#allocation80_spill] sm:$0xff]  ;;  %v7419_v2 = vld [vmem:[#allocation81_spill] sm:$0xff] }
 0x440   : > { %7413 = vst [vmem:[#allocation22_spill] sm:$0xff] %v6529_v41  ;;  %v3473_v46 = vmin.f32 %v3471_v53, %v3472_v39  ;;  %v2919_v31 = vmax.f32 %v2917_v19, %v2918_v44  ;;  %v2945_v50 = vmax.f32 %v7414_v40, %v6009_v26  ;;  %v2952_v21 = vmax.f32 %v7416_v59, %v7415_v12  ;;  %v7418_v19 = vld [vmem:[#allocation16_spill] sm:$0xff] }
 0x441   : > { %7412 = vst [vmem:[#allocation19_spill] sm:$0xff] %v6526_v22  ;;  %v3493_v15 = vrot.slane %v3492_v8, 1  ;;  %v3499_v23 = vmin.f32 %v3497_v4, %v3498_v1  ;;  %v3818_v60 = vsel %vm3205_vm3, %v3466_v18, %v3459_v17  ;;  %v2933_v49 = vmax.f32 %v2931_v9, %v2932_v10 }
 0x442   : > { %v3480_v7 = vmin.f32 %v3478_v38, %v3479_v32  ;;  %v3506_v35 = vmin.f32 %v3504_v36, %v3505_v42  ;;  %v2927_v61 = vrot.slane %v2926_v16, 2  ;;  %v2939_v48 = vrot.slane %v2938_v6, 4 }
 0x443   : > { %v3487_v29 = vmin.f32 %v3485_v27, %v3486_v34  ;;  %v2959_v53 = vmax.f32 %v7417_v58, %v6060_v24  ;;  %v2966_v39 = vmax.f32 %v7419_v2, %v7418_v19  ;;  %v3516_v44 = vmin.f32 %v7405_v54, %v7404_v43 }
 0x444   : > { %v3819_v22 = vsel %vm3207_vm4, %v3473_v46, %v3818_v60  ;;  %v2920_v4 = vrot.slane %v2919_v31, 2  ;;  %v2946_v1 = vrot.slane %v2945_v50, 4  ;;  %v2953_v18 = vrot.slane %v2952_v21, 4 }
 0x445   : > { %v3494_v9 = vmin.f32 %v3492_v8, %v3493_v15  ;;  %v3500_v32 = vrot.slane %v3499_v23, 1  ;;  %v2934_v42 = vrot.slane %v2933_v49, 2  ;;  %v3509_v38 = vmin.f32 %v7407_v11, %v7406_v14 }
 0x446   : > { %v3507_v36 = vrot.slane %v3506_v35, 1  ;;  %v2928_v27 = vmax.f32 %v2926_v16, %v2927_v61  ;;  %v2940_v10 = vmax.f32 %v2938_v6, %v2939_v48  ;;  %v3523_v17 = vmin.f32 %v7408_v47, %v5924_v3 }
 0x447   : > { %v3820_v34 = vsel %vm3209_vm5, %v3480_v7, %v3819_v22  ;;  %v2960_v43 = vrot.slane %v2959_v53, 4  ;;  %v2967_v54 = vrot.slane %v2966_v39, 4  ;;  %v3517_v46 = vrot.slane %v3516_v44, 4 }
 0x448   : > { %v2921_v60 = vmax.f32 %v2919_v31, %v2920_v4  ;;  %v2947_v5 = vmax.f32 %v2945_v50, %v2946_v1  ;;  %v2954_v41 = vmax.f32 %v2952_v21, %v2953_v18  ;;  %v3530_v8 = vmin.f32 %v7411_v20, %v7410_v13 }
 0x449   : > { %v6550_v15 = vmin.f32 %v3499_v23, %v3500_v32  ;;  %v2935_v14 = vmax.f32 %v2933_v49, %v2934_v42  ;;  %v3510_v11 = vrot.slane %v3509_v38, 4  ;;  %v3537_v16 = vmin.f32 %v7414_v40, %v6009_v26 }
 0x44a   : > { %v3821_v3 = vsel %vm3211_vm6, %v3487_v29, %v3820_v34  ;;  %v2929_v47 = vrot.slane %v2928_v27, 1  ;;  %v2941_v6 = vrot.slane %v2940_v10, 2  ;;  %v3524_v22 = vrot.slane %v3523_v17, 4 }
 0x44b   : > { %v2961_v7 = vmax.f32 %v2959_v53, %v2960_v43  ;;  %v2968_v61 = vmax.f32 %v2966_v39, %v2967_v54  ;;  %v3518_v31 = vmin.f32 %v3516_v44, %v3517_v46  ;;  %v3544_v50 = vmin.f32 %v7416_v59, %v7415_v12 }
 0x44c   : > { %v2922_v21 = vrot.slane %v2921_v60, 1  ;;  %v2948_v13 = vrot.slane %v2947_v5, 2  ;;  %v2955_v20 = vrot.slane %v2954_v41, 2  ;;  %v3531_v23 = vrot.slane %v3530_v8, 4 }
 0x44d   : > { %v6557_v49 = vmin.f32 %v3506_v35, %v3507_v36  ;;  %v2936_v48 = vrot.slane %v2935_v14, 1  ;;  %v3511_v4 = vmin.f32 %v3509_v38, %v3510_v11  ;;  %v3538_v26 = vrot.slane %v3537_v16, 4 }
 0x44e   : > { %v2930_v40 = vmax.f32 %v2928_v27, %v2929_v47  ;;  %v2942_v29 = vmax.f32 %v2940_v10, %v2941_v6  ;;  %v3525_v1 = vmin.f32 %v3523_v17, %v3524_v22  ;;  %v3551_v53 = vmin.f32 %v7417_v58, %v6060_v24 }
 0x44f   : > { %7420 = vst [vmem:[#allocation26_spill] sm:$0xff] %v6557_v49  ;;  %v2962_v39 = vrot.slane %v2961_v7, 2  ;;  %v2969_v44 = vrot.slane %v2968_v61, 2  ;;  %v3519_v18 = vrot.slane %v3518_v31, 2  ;;  %v3545_v32 = vrot.slane %v3544_v50, 4 }
 0x450   : > { %v2923_v12 = vmax.f32 %v2921_v60, %v2922_v21  ;;  %v2949_v59 = vmax.f32 %v2947_v5, %v2948_v13  ;;  %v2956_v42 = vmax.f32 %v2954_v41, %v2955_v20  ;;  %v3532_v34 = vmin.f32 %v3530_v8, %v3531_v23 }
 0x451   : > { %v2937_v43 = vmax.f32 %v2935_v14, %v2936_v48  ;;  %v3512_v35 = vrot.slane %v3511_v4, 2  ;;  %v3539_v36 = vmin.f32 %v3537_v16, %v3538_v26  ;;  %v3558_v38 = vmin.f32 %v7419_v2, %v7418_v19 }
 0x452   : > { %v2943_v27 = vrot.slane %v2942_v29, 1  ;;  %v3240_v10 = vsel %vm3205_vm3, %v2930_v40, %v2923_v12  ;;  %v3526_v17 = vrot.slane %v3525_v1, 2  ;;  %v3552_v54 = vrot.slane %v3551_v53, 4 }
 0x453   : > { %v2963_v24 = vmax.f32 %v2961_v7, %v2962_v39  ;;  %v2970_v58 = vmax.f32 %v2968_v61, %v2969_v44  ;;  %v3520_v46 = vmin.f32 %v3518_v31, %v3519_v18  ;;  %v3546_v11 = vmin.f32 %v3544_v50, %v3545_v32 }
 0x454   : > { %v6565_v60 = vsel %vm3213_vm7, %v3494_v9, %v3821_v3  ;;  %v2950_v5 = vrot.slane %v2949_v59, 1  ;;  %v2957_v41 = vrot.slane %v2956_v42, 1  ;;  %v3533_v8 = vrot.slane %v3532_v34, 2 }
 0x455   : > { %v3241_v14 = vsel %vm3207_vm4, %v2937_v43, %v3240_v10  ;;  %v3513_v16 = vmin.f32 %v3511_v4, %v3512_v35  ;;  %v3540_v47 = vrot.slane %v3539_v36, 2  ;;  %v3559_v19 = vrot.slane %v3558_v38, 4 }
 0x456   : > { %v2944_v2 = vmax.f32 %v2942_v29, %v2943_v27  ;;  %v3527_v6 = vmin.f32 %v3525_v1, %v3526_v17  ;;  %v3553_v22 = vmin.f32 %v3551_v53, %v3552_v54  ;;  %v3036_v7 = vmax.f32 %v6153_v62, %v6160_v45 }
 0x457   : > { %v2964_v61 = vrot.slane %v2963_v24, 1  ;;  %v2971_v31 = vrot.slane %v2970_v58, 1  ;;  %v3521_v50 = vrot.slane %v3520_v46, 1  ;;  %v3547_v21 = vrot.slane %v3546_v11, 2 }
 0x458   : > { %v2951_v9 = vmax.f32 %v2949_v59, %v2950_v5  ;;  %v3242_v3 = vsel %vm3209_vm5, %v2944_v2, %v3241_v14  ;;  %v3534_v13 = vmin.f32 %v3532_v34, %v3533_v8  ;;  %v3029_v20 = vmax.f32 %v6140_v56, %v6146_v25 }
 0x459   : > { %v3514_v23 = vrot.slane %v3513_v16, 1  ;;  %v3541_v48 = vmin.f32 %v3539_v36, %v3540_v47  ;;  %v3560_v4 = vmin.f32 %v3558_v38, %v3559_v19  ;;  %v3043_v26 = vmax.f32 %v6166_v51, %v6176_v52 }
 0x45a   : > { %v2958_v40 = vmax.f32 %v2956_v42, %v2957_v41  ;;  %v3528_v29 = vrot.slane %v3527_v6, 1  ;;  %v3554_v1 = vrot.slane %v3553_v22, 2  ;;  %v3037_v53 = vrot.slane %v3036_v7, 4 }
 0x45b   : > { %v6575_v39 = vmax.f32 %v2963_v24, %v2964_v61  ;;  %v6577_v44 = vmax.f32 %v2970_v58, %v2971_v31  ;;  %v3522_v18 = vmin.f32 %v3520_v46, %v3521_v50  ;;  %v3548_v32 = vmin.f32 %v3546_v11, %v3547_v21  ;;  %v7422_v61 = vld [vmem:[#allocation44_spill] sm:$0xff] }
 0x45c   : > { %v3243_v12 = vsel %vm3211_vm6, %v2951_v9, %v3242_v3  ;;  %v3535_v59 = vrot.slane %v3534_v13, 1  ;;  %v3030_v34 = vrot.slane %v3029_v20, 4  ;;  %v3050_v43 = vmax.f32 %v6186_v30, %v6195_v37  ;;  %v7423_v31 = vld [vmem:[#allocation92_spill] sm:$0xff]  ;;  %v7425_v9 = vld [vmem:[#allocation69_spill] sm:$0xff] }
 0x45d   : > { %7421 = vst [vmem:[#allocation29_spill] sm:$0xff] %v6577_v44  ;;  %v3515_v35 = vmin.f32 %v3513_v16, %v3514_v23  ;;  %v3542_v36 = vrot.slane %v3541_v48, 1  ;;  %v3561_v38 = vrot.slane %v3560_v4, 2  ;;  %v3044_v42 = vrot.slane %v3043_v26, 4  ;;  %v7424_v21 = vld [vmem:[#allocation96_spill] sm:$0xff] }
 0x45e   : > { %v3529_v27 = vmin.f32 %v3527_v6, %v3528_v29  ;;  %v3555_v10 = vmin.f32 %v3553_v22, %v3554_v1  ;;  %v3038_v17 = vmax.f32 %v3036_v7, %v3037_v53  ;;  %v3628_v54 = vmin.f32 %v6153_v62, %v6160_v45 }
 0x45f   : > { %v6585_v24 = vsel %vm3213_vm7, %v2958_v40, %v3243_v12  ;;  %v3549_v58 = vrot.slane %v3548_v32, 1  ;;  %v3825_v46 = vsel %vm3205_vm3, %v3522_v18, %v3515_v35  ;;  %v3057_v11 = vmax.f32 %v6203_v55, %v6214_v57 }
 0x460   : > { %v3536_v5 = vmin.f32 %v3534_v13, %v3535_v59  ;;  %v3031_v41 = vmax.f32 %v3029_v20, %v3030_v34  ;;  %v3051_v8 = vrot.slane %v3050_v43, 4  ;;  %v3621_v14 = vmin.f32 %v6140_v56, %v6146_v25  ;;  %v7426_v13 = vld [vmem:[#allocation85_spill] sm:$0xff]  ;;  %v7427_v56 = vld [vmem:[#allocation7_spill] sm:$0xff] }
 0x461   : > { %v3543_v16 = vmin.f32 %v3541_v48, %v3542_v36  ;;  %v3562_v47 = vmin.f32 %v3560_v4, %v3561_v38  ;;  %v3045_v19 = vmax.f32 %v3043_v26, %v3044_v42  ;;  %v3635_v62 = vmin.f32 %v6166_v51, %v6176_v52 }
 0x462   : > { %v3556_v45 = vrot.slane %v3555_v10, 1  ;;  %v3826_v2 = vsel %vm3207_vm4, %v3529_v27, %v3825_v46  ;;  %v3039_v6 = vrot.slane %v3038_v17, 2  ;;  %v3629_v22 = vrot.slane %v3628_v54, 4 }
 0x463   : > { %v3058_v7 = vrot.slane %v3057_v11, 4  ;;  %v3064_v50 = vmax.f32 %v7423_v31, %v7422_v61  ;;  %v3071_v3 = vmax.f32 %v7425_v9, %v7424_v21  ;;  %v3078_v25 = vmax.f32 %v7427_v56, %v7426_v13 }
 0x464   : > { %v6601_v20 = vmin.f32 %v3548_v32, %v3549_v58  ;;  %v3032_v23 = vrot.slane %v3031_v41, 2  ;;  %v3052_v48 = vmax.f32 %v3050_v43, %v3051_v8  ;;  %v3622_v51 = vrot.slane %v3621_v14, 4 }
 0x465   : > { %v3563_v52 = vrot.slane %v3562_v47, 1  ;;  %v3827_v4 = vsel %vm3209_vm5, %v3536_v5, %v3826_v2  ;;  %v3046_v26 = vrot.slane %v3045_v19, 2  ;;  %v3636_v40 = vrot.slane %v3635_v62, 4 }
 0x466   : > { %v6604_v29 = vmin.f32 %v3555_v10, %v3556_v45  ;;  %v3040_v1 = vmax.f32 %v3038_v17, %v3039_v6  ;;  %v3630_v53 = vmin.f32 %v3628_v54, %v3629_v22  ;;  %v3642_v18 = vmin.f32 %v6186_v30, %v6195_v37 }
 0x467   : > { %v3059_v12 = vmax.f32 %v3057_v11, %v3058_v7  ;;  %v3065_v59 = vrot.slane %v3064_v50, 4  ;;  %v3072_v34 = vrot.slane %v3071_v3, 4  ;;  %v3079_v32 = vrot.slane %v3078_v25, 4 }
 0x468   : > { %7428 = vst [vmem:[#allocation32_spill] sm:$0xff] %v6604_v29  ;;  %v3033_v35 = vmax.f32 %v3031_v41, %v3032_v23  ;;  %v3053_v36 = vrot.slane %v3052_v48, 2  ;;  %v3623_v43 = vmin.f32 %v3621_v14, %v3622_v51  ;;  %v3649_v38 = vmin.f32 %v6203_v55, %v6214_v57 }
 0x469   : > { %v6611_v42 = vsel %vm3211_vm6, %v3543_v16, %v3827_v4  ;;  %v3047_v27 = vmax.f32 %v3045_v19, %v3046_v26  ;;  %v3637_v10 = vmin.f32 %v3635_v62, %v3636_v40  ;;  %v3656_v17 = vmin.f32 %v7423_v31, %v7422_v61 }
 0x46a   : > { %v6615_v54 = vmin.f32 %v3562_v47, %v3563_v52  ;;  %v3041_v30 = vrot.slane %v3040_v1, 1  ;;  %v3631_v37 = vrot.slane %v3630_v53, 2  ;;  %v3643_v58 = vrot.slane %v3642_v18, 4 }
 0x46b   : > { %v3060_v46 = vrot.slane %v3059_v12, 2  ;;  %v3066_v11 = vmax.f32 %v3064_v50, %v3065_v59  ;;  %v3073_v5 = vmax.f32 %v3071_v3, %v3072_v34  ;;  %v3080_v41 = vmax.f32 %v3078_v25, %v3079_v32 }
 0x46c   : > { %7429 = vst [vmem:[#allocation35_spill] sm:$0xff] %v6615_v54  ;;  %v3034_v8 = vrot.slane %v3033_v35, 1  ;;  %v3054_v14 = vmax.f32 %v3052_v48, %v3053_v36  ;;  %v3624_v55 = vrot.slane %v3623_v43, 2  ;;  %v3650_v57 = vrot.slane %v3649_v38, 4 }
 0x46d   : > { %v3048_v16 = vrot.slane %v3047_v27, 1  ;;  %v3638_v45 = vrot.slane %v3637_v10, 2  ;;  %v3657_v19 = vrot.slane %v3656_v17, 4  ;;  %v3663_v62 = vmin.f32 %v7425_v9, %v7424_v21 }
 0x46e   : > { %v3042_v2 = vmax.f32 %v3040_v1, %v3041_v30  ;;  %v3632_v47 = vmin.f32 %v3630_v53, %v3631_v37  ;;  %v3644_v6 = vmin.f32 %v3642_v18, %v3643_v58  ;;  %v3670_v22 = vmin.f32 %v7427_v56, %v7426_v13  ;;  %v7430_v56 = vld [vmem:[#allocation75_spill] sm:$0xff] }
 0x46f   : > { %v3061_v7 = vmax.f32 %v3059_v12, %v3060_v46  ;;  %v3067_v61 = vrot.slane %v3066_v11, 2  ;;  %v3074_v31 = vrot.slane %v3073_v5, 2  ;;  %v3081_v50 = vrot.slane %v3080_v41, 2 }
 0x470   : > { %v3035_v3 = vmax.f32 %v3033_v35, %v3034_v8  ;;  %v3055_v25 = vrot.slane %v3054_v14, 1  ;;  %v3625_v23 = vmin.f32 %v3623_v43, %v3624_v55  ;;  %v3651_v48 = vmin.f32 %v3649_v38, %v3650_v57  ;;  %v7431_v35 = vld [vmem:[#allocation76_spill] sm:$0xff] }
 0x471   : > { %v3049_v51 = vmax.f32 %v3047_v27, %v3048_v16  ;;  %v3639_v52 = vmin.f32 %v3637_v10, %v3638_v45  ;;  %v3658_v4 = vmin.f32 %v3656_v17, %v3657_v19  ;;  %v3664_v26 = vrot.slane %v3663_v62, 4 }
 0x472   : > { %v3254_v21 = vsel %vm3205_vm3, %v3042_v2, %v3035_v3  ;;  %v3633_v9 = vrot.slane %v3632_v47, 1  ;;  %v3645_v40 = vrot.slane %v3644_v6, 2  ;;  %v3671_v1 = vrot.slane %v3670_v22, 4 }
 0x473   : > { %v3062_v53 = vrot.slane %v3061_v7, 1  ;;  %v3068_v18 = vmax.f32 %v3066_v11, %v3067_v61  ;;  %v3075_v13 = vmax.f32 %v3073_v5, %v3074_v31  ;;  %v2820_v12 = vrot.slane %v7430_v56, 4 }
 0x474   : > { %v3056_v59 = vmax.f32 %v3054_v14, %v3055_v25  ;;  %v3626_v34 = vrot.slane %v3625_v23, 1  ;;  %v3652_v32 = vrot.slane %v3651_v48, 2  ;;  %v3412_v36 = vrot.slane %v7431_v35, 4 }
 0x475   : > { %v3255_v43 = vsel %vm3207_vm4, %v3049_v51, %v3254_v21  ;;  %v3640_v38 = vrot.slane %v3639_v52, 1  ;;  %v3659_v27 = vrot.slane %v3658_v4, 2  ;;  %v3665_v10 = vmin.f32 %v3663_v62, %v3664_v26 }
 0x476   : > { %v3634_v17 = vmin.f32 %v3632_v47, %v3633_v9  ;;  %v3646_v30 = vmin.f32 %v3644_v6, %v3645_v40  ;;  %v3672_v37 = vmin.f32 %v3670_v22, %v3671_v1  ;;  %v7432_v58 = vrot.slane %v6450_v0, 4 }
 0x477   : > { %v3063_v11 = vmax.f32 %v3061_v7, %v3062_v53  ;;  %v3069_v5 = vrot.slane %v3068_v18, 1  ;;  %v3082_v8 = vmax.f32 %v3080_v41, %v3081_v50  ;;  %v2821_v14 = vmax.f32 %v7430_v56, %v2820_v12 }
 0x478   : > { %v2828_v46 = vmax.f32 %v6450_v0, %v7432_v58  ;;  %v3256_v55 = vsel %vm3209_vm5, %v3056_v59, %v3255_v43  ;;  %v3627_v57 = vmin.f32 %v3625_v23, %v3626_v34  ;;  %v3653_v16 = vmin.f32 %v3651_v48, %v3652_v32 }
 0x479   : > { %v3413_v45 = vmin.f32 %v7431_v35, %v3412_v36  ;;  %v3641_v19 = vmin.f32 %v3639_v52, %v3640_v38  ;;  %v3660_v62 = vmin.f32 %v3658_v4, %v3659_v27  ;;  %v3666_v2 = vrot.slane %v3665_v10, 2  ;;  %v7435_v36 = vld [vmem:[#allocation40_spill] sm:$0xff]  ;;  %v7436_v27 = vld [vmem:[#allocation30_spill] sm:$0xff] }
 0x47a   : > { %v2836_v47 = vrot.slane %v6471_v28, 2  ;;  %v3647_v6 = vrot.slane %v3646_v30, 1  ;;  %v3673_v22 = vrot.slane %v3672_v37, 2  ;;  %v3839_v0 = vsel %vm3205_vm3, %v3634_v17, %v3627_v57  ;;  %v7437_v17 = vld [vmem:[#allocation83_spill] sm:$0xff] }
 0x47b   : > { %v2829_v7 = vrot.slane %v2828_v46, 2  ;;  %v3076_v61 = vrot.slane %v3075_v13, 1  ;;  %v3083_v41 = vrot.slane %v3082_v8, 1  ;;  %v2822_v31 = vrot.slane %v2821_v14, 2 }
 0x47c   : > { %v7433_v50 = vrot.slane %v6466_v33, 4  ;;  %v6639_v25 = vsel %vm3213_vm7, %v6601_v20, %v6611_v42  ;;  %v3257_v23 = vsel %vm3211_vm6, %v3063_v11, %v3256_v55  ;;  %v3654_v48 = vrot.slane %v3653_v16, 1  ;;  %v7438_v11 = vld [vmem:[#allocation70_spill] sm:$0xff] }
 0x47d   : > { %v3414_v51 = vrot.slane %v3413_v45, 2  ;;  %v3661_v52 = vrot.slane %v3660_v62, 1  ;;  %v6642_v4 = vmin.f32 %v3665_v10, %v3666_v2  ;;  %v3840_v26 = vsel %vm3207_vm4, %v3641_v19, %v3839_v0 }
 0x47e   : > { %v3420_v3 = vmin.f32 %v6466_v33, %v7433_v50  ;;  %v2837_v21 = vmax.f32 %v6471_v28, %v2836_v47  ;;  %v3070_v9 = vmax.f32 %v3068_v18, %v3069_v5  ;;  %v3648_v40 = vmin.f32 %v3646_v30, %v3647_v6  ;;  %v7439_v5 = vld [vmem:[#allocation52_spill] sm:$0xff]  ;;  %v7443_v6 = vld [vmem:[#allocation61_spill] sm:$0xff]  ;;  %v7456_v28 = vld [vmem:[#allocation55_spill] sm:$0xff] }
 0x47f   : > { %v6646_v1 = vmin.f32 %v3672_v37, %v3673_v22  ;;  %v2830_v33 = vmax.f32 %v2828_v46, %v2829_v7  ;;  %v6648_v53 = vmax.f32 %v3075_v13, %v3076_v61  ;;  %v6650_v20 = vmax.f32 %v3082_v8, %v3083_v41  ;;  %v7444_v22 = vld [vmem:[#allocation93_spill] sm:$0xff]  ;;  %v7445_v7 = vld [vmem:[#allocation71_spill] sm:$0xff]  ;;  %v7446_v61 = vld [vmem:[#allocation18_spill] sm:$0xff] }
 0x480   : > { %v2823_v42 = vmax.f32 %v2821_v14, %v2822_v31  ;;  %v3421_v56 = vrot.slane %v3420_v3, 2  ;;  %v6653_v12 = vsel %vm3213_vm7, %v3070_v9, %v3257_v23  ;;  %v3655_v59 = vmin.f32 %v3653_v16, %v3654_v48  ;;  %v7441_v16 = vld [vmem:[#allocation60_spill] sm:$0xff]  ;;  %v3895_v48 = vpop.permute.xlu1 %3894 }
 0x481   : > { %7434 = vst [vmem:[#allocation39_spill] sm:$0xff] %v6650_v20  ;;  %v3841_v34 = vsel %vm3209_vm5, %v3648_v40, %v3840_v26  ;;  %v3415_v32 = vmin.f32 %v3413_v45, %v3414_v51  ;;  %v6656_v35 = vmin.f32 %v3660_v62, %v3661_v52  ;;  %v2838_v18 = vrot.slane %v2837_v21, 1  ;;  %v7442_v45 = vld [vmem:[#allocation53_spill] sm:$0xff] }
 0x482   : > { %v2845_v43 = vrot.slane %v7435_v36, 1  ;;  %v2831_v38 = vrot.slane %v2830_v33, 1  ;;  %v3428_v10 = vrot.slane %v7436_v27, 2  ;;  %v3896_v30 = vand.u32 4, %v7437_v17 }
 0x483   : > { %v6664_v37 = vsel %vm3211_vm6, %v3655_v59, %v3841_v34  ;;  %v2824_v58 = vrot.slane %v2823_v42, 1  ;;  %v3422_v46 = vmin.f32 %v3420_v3, %v3421_v56  ;;  %v3092_v8 = vmax.f32 %v7439_v5, %v7438_v11  ;;  %v3893_v3 = vpop.permute.xlu0 %3892  ;;  %v7450_v56 = vld [vmem:[#allocation90_spill] sm:$0xff] }
 0x484   : > { %v7440_v14 = vrot.slane %v6473_v63, 1  ;;  %v3416_v57 = vrot.slane %v3415_v32, 1  ;;  %v3085_v19 = vmax.f32 %v7442_v45, %v7441_v16  ;;  %v3684_v62 = vmin.f32 %v7439_v5, %v7438_v11  ;;  %v7455_v5 = vld [vmem:[#allocation94_spill] sm:$0xff] }
 0x485   : > { %v6677_v2 = vmax.f32 %v2837_v21, %v2838_v18  ;;  %v6680_v47 = vmax.f32 %v7435_v36, %v2845_v43  ;;  %v3099_v0 = vmax.f32 %v7444_v22, %v7443_v6  ;;  %v3106_v41 = vmax.f32 %v7446_v61, %v7445_v7  ;;  %v7451_v43 = vld [vmem:[#allocation21_spill] sm:$0xff] }
 0x486   : > { %v6671_v55 = vmax.f32 %v6473_v63, %v7440_v14  ;;  %v2832_v63 = vmax.f32 %v2830_v33, %v2831_v38  ;;  %v3429_v31 = vmin.f32 %v7436_v27, %v3428_v10  ;;  %v3677_v50 = vmin.f32 %v7442_v45, %v7441_v16  ;;  %v7449_v33 = vld [vmem:[#allocation72_spill] sm:$0xff]  ;;  %v7452_v38 = vld [vmem:[#allocation54_spill] sm:$0xff] }
 0x487   : > { %vm6689_vm12 = vcmp.eq.s32.totalorder %v3896_v30, 0  ;;  %v2825_v51 = vmax.f32 %v2823_v42, %v2824_v58  ;;  %v3423_v52 = vrot.slane %v3422_v46, 1  ;;  %v3093_v26 = vrot.slane %v3092_v8, 4  ;;  %v7453_v42 = vld [vmem:[#allocation89_spill] sm:$0xff]  ;;  %v7454_v58 = vld [vmem:[#allocation98_spill] sm:$0xff] }
 0x488   : > { %v3691_v21 = vmin.f32 %v7444_v22, %v7443_v6  ;;  %v3417_v9 = vmin.f32 %v3415_v32, %v3416_v57  ;;  %v3086_v40 = vrot.slane %v3085_v19, 4  ;;  %v3113_v59 = vmax.f32 %v7450_v56, %v7449_v33 }
 0x489   : > { %v3685_v34 = vrot.slane %v3684_v62, 4  ;;  %v3100_v18 = vrot.slane %v3099_v0, 4  ;;  %v3107_v36 = vrot.slane %v3106_v41, 4  ;;  %v3120_v27 = vmax.f32 %v7452_v38, %v7451_v43 }
 0x48a   : > { %v3898_v10 = vsel %vm6689_vm12, %v3893_v3, %v3895_v48  ;;  %v3227_v17 = vsel %vm3207_vm4, %v2825_v51, %v7453_v42  ;;  %v3430_v30 = vrot.slane %v3429_v31, 1  ;;  %v3678_v32 = vrot.slane %v3677_v50, 4 }
 0x48b   : > { %v3812_v14 = vsel %vm3207_vm4, %v3417_v9, %v7455_v5  ;;  %v3094_v57 = vmax.f32 %v3092_v8, %v3093_v26  ;;  %v3692_v16 = vrot.slane %v3691_v21, 4  ;;  %v3698_v45 = vmin.f32 %v7446_v61, %v7445_v7 }
 0x48c   : > { %v3087_v6 = vmax.f32 %v3085_v19, %v3086_v40  ;;  %v3114_v22 = vrot.slane %v3113_v59, 4  ;;  %v3686_v13 = vmin.f32 %v3684_v62, %v3685_v34  ;;  %v3899_v3 = vadd.f32 %v3898_v10, %v7456_v28  ;;  %v7460_v10 = vld [vmem:[#allocation91_spill] sm:$0xff] }
 0x48d   : > { %v3424_v48 = vmin.f32 %v3422_v46, %v3423_v52  ;;  %v3101_v54 = vmax.f32 %v3099_v0, %v3100_v18  ;;  %v3108_v51 = vmax.f32 %v3106_v41, %v3107_v36  ;;  %v3121_v42 = vrot.slane %v3120_v27, 4  ;;  %v3915_v41 = vpop.permute.xlu2 %3914 }
 0x48e   : > { %v6710_v11 = vsel %vm3209_vm5, %v2832_v63, %v3227_v17  ;;  %v6712_v49 = vmin.f32 %v3429_v31, %v3430_v30  ;;  %v3679_v9 = vmin.f32 %v3677_v50, %v3678_v32  ;;  %v3705_v8 = vmin.f32 %v7450_v56, %v7449_v33 }
 0x48f   : > { %v6717_v7 = vsel %vm3209_vm5, %v3424_v48, %v3812_v14  ;;  %v3095_v19 = vrot.slane %v3094_v57, 2  ;;  %v3693_v62 = vmin.f32 %v3691_v21, %v3692_v16  ;;  %v3699_v61 = vrot.slane %v3698_v45, 4  ;;  %v7458_v21 = vld [vmem:[#allocation84_spill] sm:$0xff] }
 0x490   : > { %v3088_v28 = vrot.slane %v3087_v6, 2  ;;  %v3115_v46 = vmax.f32 %v3113_v59, %v3114_v22  ;;  %v3687_v0 = vrot.slane %v3686_v13, 2  ;;  %v6719_v52 = vmul.f32 0.00012207031, %v3899_v3  ;;  %v7459_v59 = vld [vmem:[#allocation57_spill] sm:$0xff] }
 0x491   : > { %v3102_v26 = vrot.slane %v3101_v54, 2  ;;  %v3109_v31 = vrot.slane %v3108_v51, 2  ;;  %v3122_v40 = vmax.f32 %v3120_v27, %v3121_v42  ;;  %v3680_v33 = vrot.slane %v3679_v9, 2 }
 0x492   : > { %7457 = vst [vmem:[#allocation42_spill] sm:$0xff] %v6719_v52  ;;  %v3706_v56 = vrot.slane %v3705_v8, 4  ;;  %v3712_v34 = vmin.f32 %v7452_v38, %v7451_v43  ;;  %v3096_v36 = vmax.f32 %v3094_v57, %v3095_v19  ;;  %v3127_v17 = vmax.f32 %v7460_v10, %v7459_v59 }
 0x493   : > { %v3694_v30 = vrot.slane %v3693_v62, 2  ;;  %v3700_v32 = vmin.f32 %v3698_v45, %v3699_v61  ;;  %v3688_v5 = vmin.f32 %v3686_v13, %v3687_v0  ;;  %v3719_v27 = vmin.f32 %v7460_v10, %v7459_v59  ;;  %v7461_v45 = vld [vmem:[#allocation58_spill] sm:$0xff] }
 0x494   : > { %v3921_v23 = vmul.f32 %v6719_v52, %v6719_v52  ;;  %v3089_v16 = vmax.f32 %v3087_v6, %v3088_v28  ;;  %v3103_v22 = vmax.f32 %v3101_v54, %v3102_v26  ;;  %v3116_v3 = vrot.slane %v3115_v46, 2  ;;  %v7462_v13 = vld [vmem:[#allocation82_spill] sm:$0xff] }
 0x495   : > { %v3123_v43 = vrot.slane %v3122_v40, 2  ;;  %v3681_v38 = vmin.f32 %v3679_v9, %v3680_v33  ;;  %v3707_v48 = vmin.f32 %v3705_v8, %v3706_v56  ;;  %v3713_v57 = vrot.slane %v3712_v34, 4 }
 0x496   : > { %v3097_v19 = vrot.slane %v3096_v36, 1  ;;  %v3134_v61 = vmax.f32 %v7462_v13, %v7461_v45  ;;  %v3128_v0 = vrot.slane %v3127_v17, 4  ;;  %v3090_v10 = vrot.slane %v3089_v16, 1 }
 0x497   : > { %v3110_v6 = vmax.f32 %v3108_v51, %v3109_v31  ;;  %v3726_v54 = vmin.f32 %v7462_v13, %v7461_v45  ;;  %v3682_v9 = vrot.slane %v3681_v38, 1  ;;  %v3708_v8 = vrot.slane %v3707_v48, 2 }
 0x498   : > { %v3714_v28 = vmin.f32 %v3712_v34, %v3713_v57  ;;  %v3117_v51 = vmax.f32 %v3115_v46, %v3116_v3  ;;  %v7463_v46 = vrot.slane %v7454_v58, 1 }
 0x499   : > { %v3917_v63 = vpop.permute.xlu0 %3916  ;;  %v3111_v44 = vrot.slane %v3110_v6, 1  ;;  %v3727_v31 = vrot.slane %v3726_v54, 4  ;;  %v3683_v45 = vmin.f32 %v3681_v38, %v3682_v9  ;;  %v3709_v13 = vmin.f32 %v3707_v48, %v3708_v8 }
 0x49a   : > { %v3918_v50 = vsel %vm6689_vm12, %v3915_v41, %v3917_v63  ;;  %v3695_v41 = vmin.f32 %v3693_v62, %v3694_v30  ;;  %v3701_v63 = vrot.slane %v3700_v32, 2  ;;  %v3098_v62 = vmax.f32 %v3096_v36, %v3097_v19 }
 0x49b   : > { %v3919_v18 = vadd.f32 %v3918_v50, %v7458_v21  ;;  %v3689_v50 = vrot.slane %v3688_v5, 1  ;;  %v3720_v21 = vrot.slane %v3719_v27, 4  ;;  %v3135_v30 = vrot.slane %v3134_v61, 4 }
 0x49c   : > { %v3696_v33 = vrot.slane %v3695_v41, 1  ;;  %v3702_v56 = vmin.f32 %v3700_v32, %v3701_v63  ;;  %v3715_v29 = vrot.slane %v3714_v28, 2  ;;  %v3124_v32 = vmax.f32 %v3122_v40, %v3123_v43 }
 0x49d   : > { %v3920_v14 = vmul.f32 0.00012207031, %v3919_v18  ;;  %v3104_v18 = vrot.slane %v3103_v22, 1  ;;  %v3721_v20 = vmin.f32 %v3719_v27, %v3720_v21  ;;  %v3229_v27 = vsel %vm3211_vm6, %v6677_v2, %v6710_v11 }
 0x49e   : > { %v3697_v34 = vmin.f32 %v3695_v41, %v3696_v33  ;;  %v3703_v57 = vrot.slane %v3702_v56, 1  ;;  %v3728_v3 = vmin.f32 %v3726_v54, %v3727_v31  ;;  %v3112_v48 = vmax.f32 %v3110_v6, %v3111_v44 }
 0x49f   : > { %v3922_v42 = vsub.f32 %v3920_v14, %v3921_v23  ;;  %v3129_v23 = vmax.f32 %v3127_v17, %v3128_v0  ;;  %v3690_v14 = vmin.f32 %v3688_v5, %v3689_v50  ;;  %v3105_v52 = vmax.f32 %v3103_v22, %v3104_v18 }
 0x4a0   : > { %v3722_v17 = vrot.slane %v3721_v20, 2  ;;  %v3814_v22 = vsel %vm3211_vm6, %v6712_v49, %v6717_v7  ;;  %v3118_v40 = vrot.slane %v3117_v51, 1  ;;  %v3716_v41 = vmin.f32 %v3714_v28, %v3715_v29 }
 0x4a1   : > { %v3923_v59 = vmax.f32 %v3922_v42, 0.0  ;;  %v3091_v42 = vmax.f32 %v3089_v16, %v3090_v10  ;;  %v3130_v19 = vrot.slane %v3129_v23, 2  ;;  %v3846_v5 = vsel %vm3205_vm3, %v3690_v14, %v3683_v45  ;;  %v7464_v10 = vld [vmem:[#allocation25_spill] sm:$0xff] }
 0x4a2   : > { %v3438_v16 = vmin.f32 %v7454_v58, %v7463_v46  ;;  %v3710_v63 = vrot.slane %v3709_v13, 1  ;;  %v3847_v0 = vsel %vm3207_vm4, %v3697_v34, %v3846_v5  ;;  %v3704_v11 = vmin.f32 %v3702_v56, %v3703_v57 }
 0x4a3   : > { %v6736_v26 = vadd.f32 1e-05, %v3923_v59  ;;  %v3136_v59 = vmax.f32 %v3134_v61, %v3135_v30  ;;  %v3261_v36 = vsel %vm3205_vm3, %v3098_v62, %v3091_v42  ;;  %v3125_v50 = vrot.slane %v3124_v32, 1 }
 0x4a4   : > { %v3262_v43 = vsel %vm3207_vm4, %v3105_v52, %v3261_v36  ;;  %v3131_v58 = vmax.f32 %v3129_v23, %v3130_v19  ;;  %v3723_v21 = vmin.f32 %v3721_v20, %v3722_v17  ;;  %v7465_v18 = vrot.slane %v7464_v10, 1  ;;  %v3935_v36 = vld [vmem:[%s6874_s5] sm:$0x1] }
 0x4a5   : > { %4641 = vrsqrt.f32 %v6736_v26  ;;  %v3137_v61 = vrot.slane %v3136_v59, 2  ;;  %v3263_v44 = vsel %vm3209_vm5, %v3112_v48, %v3262_v43  ;;  %v3729_v7 = vrot.slane %v3728_v3, 2  ;;  %v7469_v48 = vld [vmem:[#allocation28_spill] sm:$0xff]  ;;  %v7471_v43 = vld [vmem:[#allocation33_spill] sm:$0xff] }
 0x4a6   : > { %v3445_v49 = vmin.f32 %v7464_v10, %v7465_v18  ;;  %v3230_v29 = vsel %vm3213_vm7, %v6680_v47, %v3229_v27  ;;  %v3119_v52 = vmax.f32 %v3117_v51, %v3118_v40  ;;  %v3717_v54 = vrot.slane %v3716_v41, 1  ;;  %v7468_v27 = vld [vmem:[#allocation99_spill] sm:$0xff] }
 0x4a7   : > { %v3848_v9 = vsel %vm3209_vm5, %v3704_v11, %v3847_v0  ;;  %v3815_v8 = vsel %vm3213_vm7, %v3438_v16, %v3814_v22  ;;  %v3138_v28 = vmax.f32 %v3136_v59, %v3137_v61  ;;  %v3711_v62 = vmin.f32 %v3709_v13, %v3710_v63  ;;  %v3937_v0 = vld [vmem:[%s6875_s6] sm:$0x1]  ;;  %v7472_v11 = vld [vmem:[#allocation32_spill] sm:$0xff] }
 0x4a8   : > { %v3126_v33 = vmax.f32 %v3124_v32, %v3125_v50  ;;  %v3132_v56 = vrot.slane %v3131_v58, 1  ;;  %v3264_v30 = vsel %vm3211_vm6, %v3119_v52, %v3263_v44  ;;  %v3724_v23 = vrot.slane %v3723_v21, 1  ;;  %v7476_v44 = vld [vmem:[#allocation29_spill] sm:$0xff]  ;;  %v7478_v52 = vld [vmem:[#allocation26_spill] sm:$0xff] }
 0x4a9   : > { %v3730_v14 = vmin.f32 %v3728_v3, %v3729_v7  ;;  %v3849_v42 = vsel %vm3211_vm6, %v3711_v62, %v3848_v9  ;;  %v7466_v47 = vrot.slane %v6642_v4, 1  ;;  %v3231_v45 = vsel %vm3215_vm8, %v6671_v55, %v3230_v29  ;;  %v7479_v9 = vld [vmem:[#allocation35_spill] sm:$0xff] }
 0x4aa   : > { %v3816_v13 = vsel %vm3215_vm8, %v3445_v49, %v3815_v8  ;;  %v3718_v34 = vmin.f32 %v3716_v41, %v3717_v54  ;;  %v3139_v57 = vrot.slane %v3138_v28, 1  ;;  %v3265_v59 = vsel %vm3213_vm7, %v3126_v33, %v3264_v30  ;;  %v7483_v30 = vld [vmem:[#allocation13_spill] sm:$0xff] }
 0x4ab   : > { %v4642_v38 = vpop.eup %4641  ;;  %v3669_v51 = vmin.f32 %v6642_v4, %v7466_v47  ;;  %vm3931_vm14 = vweird.f32 %v6736_v26  ;;  %v7467_v19 = vrot.slane %v6646_v1, 1  ;;  %v3843_v55 = vsel %vm3213_vm7, %v6656_v35, %v6664_v37 }
 0x4ac   : > { %v3926_v2 = vmul.f32 %v4642_v38, %v6736_v26  ;;  %vm3932_vm13 = vweird.f32 %v4642_v38  ;;  %v3133_v17 = vmax.f32 %v3131_v58, %v3132_v56  ;;  %v3850_v5 = vsel %vm3213_vm7, %v3718_v34, %v3849_v42  ;;  %v7473_v58 = vld [vmem:[#allocation42_spill] sm:$0xff]  ;;  %v7482_v56 = vld [vmem:[#allocation68_spill] sm:$0xff]  ;;  %v7485_v42 = vld [vmem:[#allocation73_spill] sm:$0xff] }
 0x4ad   : > { %v3676_v4 = vmin.f32 %v6646_v1, %v7467_v19  ;;  %vm3933_vm15 = vmor %vm3931_vm14, %vm3932_vm13  ;;  %v3232_v46 = vsel %vm3217_vm9, %v7468_v27, %v3231_v45  ;;  %v3725_v16 = vmin.f32 %v3723_v21, %v3724_v23  ;;  %v3731_v22 = vrot.slane %v3730_v14, 1  ;;  %v7470_v1 = vld [vmem:[#allocation22_spill] sm:$0xff]  ;;  %v7487_v34 = vld [vmem:[#allocation37_spill] sm:$0xff] }
 0x4ae   : > { %v3927_v6 = vmul.f32 %v4642_v38, %v3926_v2  ;;  %v3817_v26 = vsel %vm3217_vm9, %v7469_v48, %v3816_v13  ;;  %v3266_v40 = vsel %vm3215_vm8, %v3133_v17, %v3265_v59  ;;  %v3238_v41 = vsel %vm3215_vm8, %v7471_v43, %v7470_v1  ;;  %v7486_v13 = vld [vmem:[#allocation78_spill] sm:$0xff] }
 0x4af   : > { %v3140_v37 = vmax.f32 %v3138_v28, %v3139_v57  ;;  %v3851_v63 = vsel %vm3215_vm8, %v3725_v16, %v3850_v5  ;;  %v3245_v61 = vsel %vm3215_vm8, %v6575_v39, %v6585_v24  ;;  %v3259_v2 = vsel %vm3215_vm8, %v6648_v53, %v6653_v12  ;;  %v7474_v24 = vld [vmem:[#allocation19_spill] sm:$0xff] }
 0x4b0   : > { %v3928_v20 = vmul.f32 0.5, %v3927_v6  ;;  %v3830_v50 = vsel %vm3215_vm8, %v7472_v11, %v6639_v25  ;;  %v3732_v39 = vmin.f32 %v3730_v14, %v3731_v22  ;;  %v3239_v10 = vsel %vm3217_vm9, %v7474_v24, %v3238_v41  ;;  %v7477_v6 = vld [vmem:[#allocation39_spill] sm:$0xff]  ;;  %v7484_v14 = vld [vmem:[#allocation74_spill] sm:$0xff] }
 0x4b1   : > { %v3267_v49 = vsel %vm3217_vm9, %v3140_v37, %v3266_v40  ;;  %v3246_v53 = vsel %vm3217_vm9, %v7476_v44, %v3245_v61  ;;  %v3260_v29 = vsel %vm3217_vm9, %v7477_v6, %v3259_v2  ;;  %v3831_v8 = vsel %vm3217_vm9, %v7479_v9, %v3830_v50 }
 0x4b2   : > { %v3929_v31 = vsub.f32 1.5, %v3928_v20  ;;  %v3852_v25 = vsel %vm3217_vm9, %v3732_v39, %v3851_v63 }
 0x4b4   : > { %v3930_v32 = vmul.f32 %v4642_v38, %v3929_v31 }
 0x4b6   : > { %v3934_v3 = vsel %vm3933_vm15, %v4642_v38, %v3930_v32  ;;  %v3823_v38 = vsel %vm3215_vm8, %v6550_v15, %v6565_v60  ;;  %v3844_v15 = vsel %vm3215_vm8, %v3669_v51, %v3843_v55  ;;  %v7475_v60 = vmov 0  }
 0x4b7   : > { %v3936_v35 = vmul.f32 %v3935_v36, %v3934_v3  ;;  %v3824_v54 = vsel %vm3217_vm9, %v7478_v52, %v3823_v38  ;;  %v3845_v28 = vsel %vm3217_vm9, %v3676_v4, %v3844_v15 }
 0x4b9   : > { %v3938_v21 = vmul.f32 %v3936_v35, %v7473_v58  ;;  %vm3940_vm0 = vcmp.ge.f32.partialorder %v3936_v35, 0.0  ;;  %v3969_v20 = vperm.slane %v3936_v35, 0 }
 0x4ba   : > { %v3957_v18 = vsel %vm3940_vm0, 1, %v7475_v60 }
 0x4bb   : > { %v3939_v12 = vsub.f32 %v3937_v0, %v3938_v21  ;;  %v3958_v7 = vperm.slane %v3957_v18, 0 }
 0x4bd   : > { %vm6821_vm1 = vcmp.eq.s32.totalorder %v3958_v7, 1  ;;  %v3980_v33 = vperm.slane %v3939_v12, 0 }
 0x4be   : > { %v3960_v23 = vsel %vm6821_vm1, %v7483_v30, %v7482_v56  ;;  %v3961_v31 = vsel %vm6821_vm1, %v7485_v42, %v7484_v14  ;;  %v3962_v47 = vsel %vm6821_vm1, %v3232_v46, %v3817_v26  ;;  %v3963_v51 = vsel %vm6821_vm1, %v3239_v10, %v3824_v54 }
 0x4bf   : > { %v3964_v45 = vsel %vm6821_vm1, %v3246_v53, %v3831_v8  ;;  %v3965_v57 = vsel %vm6821_vm1, %v7487_v34, %v7486_v13  ;;  %v3966_v59 = vsel %vm6821_vm1, %v3260_v29, %v3845_v28  ;;  %v3967_v36 = vsel %vm6821_vm1, %v3267_v49, %v3852_v25 }
 0x4c0   : > { %v3971_v32 = vmul.f32 %v3969_v20, %v3960_v23  ;;  %v3972_v19 = vmul.f32 %v3969_v20, %v3961_v31  ;;  %v3973_v4 = vmul.f32 %v3969_v20, %v3962_v47  ;;  %v3974_v55 = vmul.f32 %v3969_v20, %v3963_v51 }
 0x4c1   : > { %v3975_v17 = vmul.f32 %v3969_v20, %v3964_v45  ;;  %v3976_v5 = vmul.f32 %v3969_v20, %v3965_v57  ;;  %v3977_v27 = vmul.f32 %v3969_v20, %v3966_v59  ;;  %v3978_v46 = vmul.f32 %v3969_v20, %v3967_v36 }
 0x4c2   : > { %v3982_v16 = vadd.f32 %v3980_v33, %v3971_v32  ;;  %v3983_v22 = vadd.f32 %v3980_v33, %v3972_v19  ;;  %v3984_v3 = vadd.f32 %v3980_v33, %v3973_v4  ;;  %v3985_v48 = vadd.f32 %v3980_v33, %v3974_v55 }
 0x4c3   : > { %v3986_v26 = vadd.f32 %v3980_v33, %v3975_v17  ;;  %v3987_v40 = vadd.f32 %v3980_v33, %v3976_v5  ;;  %v3988_v1 = vadd.f32 %v3980_v33, %v3977_v27  ;;  %v3989_v43 = vadd.f32 %v3980_v33, %v3978_v46 }
 0x4c4   : > { %vm3990_vm2 = vcmp.gt.f32.partialorder %v3982_v16, 0.0  ;;  %vm3991_vm3 = vcmp.gt.f32.partialorder %v3983_v22, 0.0  ;;  %vm3992_vm4 = vcmp.gt.f32.partialorder %v3984_v3, 0.0  ;;  %vm3993_vm5 = vcmp.gt.f32.partialorder %v3985_v48, 0.0 }
 0x4c5   : > { %vm3994_vm6 = vcmp.gt.f32.partialorder %v3986_v26, 0.0  ;;  %vm3995_vm7 = vcmp.gt.f32.partialorder %v3987_v40, 0.0  ;;  %vm3996_vm8 = vcmp.gt.f32.partialorder %v3988_v1, 0.0  ;;  %vm3997_vm9 = vcmp.gt.f32.partialorder %v3989_v43, 0.0 }
 0x4c6   : > { %v3998_v41 = vmul.f32 0.2, %v3982_v16  ;;  %v3999_v35 = vmul.f32 0.2, %v3983_v22  ;;  %v4000_v37 = vmul.f32 0.2, %v3984_v3 }
 0x4c7   : > { %v4001_v63 = vmul.f32 0.2, %v3985_v48  ;;  %v4002_v61 = vmul.f32 0.2, %v3986_v26  ;;  %v4003_v38 = vmul.f32 0.2, %v3987_v40 }
 0x4c8   : > { %v4004_v0 = vmul.f32 0.2, %v3988_v1  ;;  %v4005_v2 = vmul.f32 0.2, %v3989_v43  ;;  %v4006_v11 = vsel %vm3990_vm2, %v3982_v16, %v3998_v41  ;;  %v4007_v50 = vsel %vm3991_vm3, %v3983_v22, %v3999_v35 }
 0x4c9   : > { %v4008_v58 = vsel %vm3992_vm4, %v3984_v3, %v4000_v37  ;;  %v4009_v21 = vsel %vm3993_vm5, %v3985_v48, %v4001_v63  ;;  %v4010_v39 = vsel %vm3994_vm6, %v3986_v26, %v4002_v61  ;;  %v4011_v24 = vsel %vm3995_vm7, %v3987_v40, %v4003_v38 }
 0x4ca   : > { %v4012_v10 = vsel %vm3996_vm8, %v3988_v1, %v4004_v0  ;;  %v4013_v15 = vsel %vm3997_vm9, %v3989_v43, %v4005_v2  ;;  %v4582_v60 = vpack.c.bf16 %v4007_v50, %v4006_v11  ;;  %v4587_v18 = vpack.c.bf16 %v4009_v21, %v4008_v58 }
 0x4cb   : > { %v4592_v49 = vpack.c.bf16 %v4011_v24, %v4010_v39  ;;  %v4597_v44 = vpack.c.bf16 %v4013_v15, %v4012_v10 }
 0x4cc   : > { %4583 = vst [vmem:[%s381_s18] sm:$0xff] %v4582_v60  }
 0x4cd   : > { %4599 = vst [vmem:[%s381_s18 + $0x8] sm:$0xff] %v4587_v18  }
 0x4ce   : > { %4600 = vst [vmem:[%s381_s18 + $0x10] sm:$0xff] %v4592_v49  }
 0x4cf   : > { %4601 = vst [vmem:[%s381_s18 + $0x18] sm:$0xff] %v4597_v44  }
 0x4d0 PF: > { %s17_s26 = sadd.s32 1, %s4665_s26   ;;  %s7488_s24 = smov %s4661_s25 }
 0x4d1   : > { %p14_p5 = scmp.ge.s32.totalorder %s17_s26, 4   ;;  %s7489_s25 = smov %s7491_s27 }
 0x4d3   :  { %16 = sbr.rel (!%p14_p5) target bundleno = 2 (0x2), region = 94 }

// kernel: device_forward.5
= control target key start
LH: loop header
LB: loop body
LE: loop exit
PB: predicated region body
PF: predicated region fallthrough
CT: control target
= control target key end

     0   :  { %s2791_s24 = smov 0   ;;  %s2793_s25 = smov 0   ;;  %s3825_s0 = inlined_call_operand.vmem [shape: bf16[2,32,16,32], index: 0, kind: input, shape index: {}]   ;;  %s3826_s1 = inlined_call_operand.vmem [shape: bf16[2,32,32], index: 1, kind: input, shape index: {}]   ;;  %s3827_s2 = inlined_call_operand.vmem [shape: f32[2,32,1], index: 2, kind: input, shape index: {}]   ;;  %s3828_s3 = inlined_call_operand.vmem [shape: bf16[32,128], index: 3, kind: input, shape index: {}]   ;;  %s3829_s4 = inlined_call_operand.vmem [shape: bf16[32,128], index: 4, kind: input, shape index: {}]   ;;  %s3830_s5 = inlined_call_operand.vmem [shape: f32[1,128], index: 5, kind: input, shape index: {}]   ;;  %s3831_s6 = inlined_call_operand.vmem [shape: f32[1,128], index: 6, kind: input, shape index: {}]   ;;  %s3832_s7 = inlined_call_operand.vmem [shape: bf16[2,32,128], index: 7, kind: output, shape index: {}]  }
   0x1   :  { %s2795_s26 = smov 0  }
   0x2 LB: > { %s29_s27 = sadd.s32 1, %s2735_s25  ;;  %p2422_p0 = scmp.ge.s32.totalorder %s2739_s26, 1  ;;  %s2739_s26 = sphi %s2795_s26, %s17_s26   ;;  %s2735_s25 = sphi %s2793_s25, %s3907_s25   ;;  %s2731_s24 = sphi %s2791_s24, %s3906_s24  }
   0x3   : > { %p31_p1 = scmp.ge.s32.totalorder %s29_s27, 2  ;;  %p291_p2 = scmp.lt.s32.totalorder %s2739_s26, 3 }
   0x5   : > { %s3909_s27 = smov (%p31_p1, %s29_s27), 0  ;;  %p292_p3 = pnand %p2422_p0, %p291_p2 }
   0x7   : > { %295 = sbr.rel (%p292_p3) target bundleno = 985 (0x3d9), region = 48 }
   0xc   : > { %v2656_v0 = vld [vmem:[%s3828_s3 + $0x8] sm:$0xff]  ;;  %p347_p4 = scmp.lt.s32.totalorder %s2731_s24, 1  ;;  %v3833_v1 = vmov 0   ;;  %v2655_v2 = vld [vmem:[%s3828_s3] sm:$0xff]  ;;  %vm629_vm0 = vcmask 261120   ;;  %vm1835_vm1 = vcmask 1041409  }
   0xd   : > { %2712 = vset.pattern.permute.xlu0 %v3833_v1  ;;  %2713 = vset.pattern.permute.xlu1 %v3833_v1  ;;  %v2660_v3 = vld [vmem:[%s3829_s4 + $0x8] sm:$0xff]  ;;  %v2659_v24 = vld [vmem:[%s3829_s4] sm:$0xff]  ;;  %vm1837_vm2 = vcmask 1042434   ;;  %vm1839_vm3 = vcmask 1043459   ;;  %vm1841_vm4 = vcmask 1044484   ;;  %vm1843_vm5 = vcmask 1045509  }
   0xe   : > { %732 = vmatpush.bf16.msra.mxu0 %v2656_v0  ;;  %2672 = vmatpush.bf16.msra.mxu1 %v2656_v0  ;;  %s3911_s24 = smov (!%p347_p4, %s2731_s24), 1  ;;  %vm1845_vm6 = vcmask 1046534   ;;  %vm1847_vm7 = vcmask 1047559   ;;  %s2743_s29 = smov 1  }
   0xf   : > { %2673 = vmatpush.bf16.msra.mxu2 %v2656_v0  ;;  %2674 = vmatpush.bf16.msra.mxu3 %v2656_v0  ;;  %s2619_s9 = sshll.u32 %s3911_s24, 8  ;;  %s2621_s12 = sshll.u32 %s3911_s24, 5 }
  0x10   : > { %2714 = vset.pattern.permute.xlu2 %v3833_v1  ;;  %s2828_s15 = scalar_lea.vmem %s3825_s0, %s2619_s9  ;;  %s2833_s18 = scalar_lea.vmem %s3827_s2, %s2621_s12 }
  0x11   : > { %v2623_v4 = vld [vmem:[%s2828_s15] sm:$0xff]  ;;  %v2632_v5 = vld [vmem:[%s2828_s15 + $0x48] sm:$0xff]  ;;  %v2637_v6 = vld [vmem:[%s2828_s15 + $0x70] sm:$0xff]  ;;  %s2620_s21 = sshll.u32 %s3911_s24, 4  ;;  %s2744_s30 = smov 127  }
  0x12   : > { %733 = vmatpush.bf16.msra.mxu0 %v2655_v2  ;;  %2675 = vmatpush.bf16.msra.mxu1 %v2655_v2  ;;  %v2646_v7 = vld [vmem:[%s2828_s15 + $0xb8] sm:$0xff]  ;;  %v2840_v8 = vld [vmem:[%s2833_s18] sm:$0xff]  ;;  %v2624_v17 = vld [vmem:[%s2828_s15 + $0x8] sm:$0xff]  ;;  %s365_s28 = scalar_lea.vmem %s3826_s1, %s2620_s21  ;;  %s2745_s8 = smov 2  }
  0x13   : > { %2676 = vmatpush.bf16.msra.mxu2 %v2655_v2  ;;  %2677 = vmatpush.bf16.msra.mxu3 %v2655_v2  ;;  %v1146_v9 = vperm.slane %v2840_v8, 0  ;;  %v1119_v10 = vrot.slane %v2840_v8, 2  ;;  %v1118_v11 = vrot.slane %v2840_v8, 1  ;;  %v1120_v13 = vrot.slane %v2840_v8, 3  ;;  %v2633_v18 = vld [vmem:[%s2828_s15 + $0x50] sm:$0xff]  ;;  %v2638_v19 = vld [vmem:[%s2828_s15 + $0x78] sm:$0xff]  ;;  %s381_s20 = scalar_lea.vmem %s3832_s7, %s2620_s21 }
  0x14   : > { %v1123_v16 = vrot.slane %v2840_v8, 6  ;;  %v2647_v20 = vld [vmem:[%s2828_s15 + $0xc0] sm:$0xff]  ;;  %v1124_v22 = vrot.slane %v2840_v8, 7  ;;  %v2861_v23 = vld [vmem:[%s2833_s18 + $0x8] sm:$0xff]  ;;  %v2625_v31 = vld [vmem:[%s2828_s15 + $0x10] sm:$0xff]  ;;  %v1121_v37 = vrot.slane %v2840_v8, 4 }
  0x15   : > { %2567 = vmatmul.msk.bf16.vlgmr.msra.gmra.mxu0 %vm629_vm0, %v2623_v4  ;;  %2576 = vmatmul.msk.bf16.vlgmr.msra.gmra.mxu1 %vm629_vm0, %v2632_v5  ;;  %v1148_v12 = vperm.slane %v1119_v10, 0  ;;  %v1147_v14 = vperm.slane %v1118_v11, 0  ;;  %v1149_v15 = vperm.slane %v1120_v13, 0  ;;  %v1125_v25 = vrot.slane %v2861_v23, 1  ;;  %v2634_v32 = vld [vmem:[%s2828_s15 + $0x58] sm:$0xff]  ;;  %v2639_v33 = vld [vmem:[%s2828_s15 + $0x80] sm:$0xff] }
  0x16   : > { %937 = vmatpush.bf16.msrb.mxu1 %v2660_v3  ;;  %2581 = vmatmul.msk.bf16.vlgmr.msra.gmra.mxu2 %vm629_vm0, %v2637_v6  ;;  %v1152_v21 = vperm.slane %v1123_v16, 0  ;;  %v1153_v26 = vperm.slane %v1124_v22, 0  ;;  %v1126_v27 = vrot.slane %v2861_v23, 2  ;;  %v1128_v30 = vrot.slane %v2861_v23, 4  ;;  %v2648_v34 = vld [vmem:[%s2828_s15 + $0xc8] sm:$0xff]  ;;  %v2881_v42 = vld [vmem:[%s2833_s18 + $0x10] sm:$0xff] }
  0x17   : > { %2590 = vmatmul.msk.bf16.vlgmr.msra.gmra.mxu3 %vm629_vm0, %v2646_v7  ;;  %1179 = vperm.xlu0 %2712, %v1146_v9   ;;  %v1155_v28 = vperm.slane %v1125_v25, 0  ;;  %v1129_v36 = vrot.slane %v2861_v23, 5  ;;  %v1131_v38 = vrot.slane %v2861_v23, 7  ;;  %v1150_v40 = vperm.slane %v1121_v37, 0  ;;  %v2626_v45 = vld [vmem:[%s2828_s15 + $0x18] sm:$0xff]  ;;  %v2635_v46 = vld [vmem:[%s2828_s15 + $0x60] sm:$0xff] }
  0x18   : > { %1187 = vperm.xlu1 %2713, %v1148_v12   ;;  %v1156_v29 = vperm.slane %v1126_v27, 0  ;;  %v1158_v35 = vperm.slane %v1128_v30, 0  ;;  %v1162_v43 = vperm.slane %v2881_v42, 0  ;;  %v1133_v44 = vrot.slane %v2881_v42, 2  ;;  %v2640_v47 = vld [vmem:[%s2828_s15 + $0x88] sm:$0xff]  ;;  %v2649_v48 = vld [vmem:[%s2828_s15 + $0xd0] sm:$0xff] }
  0x19   : > { %v1159_v39 = vperm.slane %v1129_v36, 0  ;;  %1195 = vperm.xlu2 %2714, %v1150_v40   ;;  %v1161_v41 = vperm.slane %v1131_v38, 0  ;;  %v1122_v50 = vrot.slane %v2840_v8, 5  ;;  %v1134_v51 = vrot.slane %v2881_v42, 3  ;;  %v2899_v59 = vld [vmem:[%s2833_s18 + $0x18] sm:$0xff]  ;;  %v2627_v60 = vld [vmem:[%s2828_s15 + $0x20] sm:$0xff] }
  0x1a   : > { %938 = vmatpush.bf16.msrb.mxu1 %v2659_v24  ;;  %v1164_v49 = vperm.slane %v1133_v44, 0  ;;  %v1136_v53 = vrot.slane %v2881_v42, 5  ;;  %v1137_v55 = vrot.slane %v2881_v42, 6  ;;  %v1154_v57 = vperm.slane %v2861_v23, 0  ;;  %v2636_v61 = vld [vmem:[%s2828_s15 + $0x68] sm:$0xff]  ;;  %v2641_v62 = vld [vmem:[%s2828_s15 + $0x90] sm:$0xff] }
  0x1b   : > { %v1151_v52 = vperm.slane %v1122_v50, 0  ;;  %v1165_v54 = vperm.slane %v1134_v51, 0  ;;  %v2650_v63 = vld [vmem:[%s2828_s15 + $0xd8] sm:$0xff]  ;;  %v1170_v0 = vperm.slane %v2899_v59, 0  ;;  %v1127_v2 = vrot.slane %v2861_v23, 3  ;;  %v2628_v13 = vld [vmem:[%s2828_s15 + $0x28] sm:$0xff] }
  0x1c   : > { %v1167_v56 = vperm.slane %v1136_v53, 0  ;;  %v1168_v58 = vperm.slane %v1137_v55, 0  ;;  %v1139_v3 = vrot.slane %v2899_v59, 1  ;;  %v1141_v5 = vrot.slane %v2899_v59, 3  ;;  %v2651_v16 = vld [vmem:[%s2828_s15 + $0xe0] sm:$0xff]  ;;  %v2629_v24 = vld [vmem:[%s2828_s15 + $0x30] sm:$0xff] }
  0x1d   : > { %v1157_v4 = vperm.slane %v1127_v2, 0  ;;  %v1130_v7 = vrot.slane %v2861_v23, 6  ;;  %v1142_v8 = vrot.slane %v2899_v59, 4  ;;  %v1144_v12 = vrot.slane %v2899_v59, 6  ;;  %v2658_v25 = vld [vmem:[%s365_s28 + $0x8] sm:$0xff]  ;;  %v2631_v37 = vld [vmem:[%s2828_s15 + $0x40] sm:$0xff] }
  0x1e   : > { %v1171_v6 = vperm.slane %v1139_v3, 0  ;;  %v1173_v9 = vperm.slane %v1141_v5, 0  ;;  %v1135_v22 = vrot.slane %v2881_v42, 4  ;;  %v2652_v27 = vld [vmem:[%s2828_s15 + $0xe8] sm:$0xff]  ;;  %v1140_v30 = vrot.slane %v2899_v59, 2  ;;  %v2645_v40 = vld [vmem:[%s2828_s15 + $0xb0] sm:$0xff] }
  0x1f   : > { %1183 = vperm.xlu0 %2712, %v1147_v14   ;;  %v1160_v10 = vperm.slane %v1130_v7, 0  ;;  %v1174_v11 = vperm.slane %v1142_v8, 0  ;;  %v2657_v14 = vld [vmem:[%s365_s28] sm:$0xff]  ;;  %s2746_s9 = smov 126   ;;  %s2747_s10 = smov 124  }
  0x20   : > { %1191 = vperm.xlu1 %2713, %v1149_v15   ;;  %v2642_v15 = vld [vmem:[%s2828_s15 + $0x98] sm:$0xff]  ;;  %v1166_v23 = vperm.slane %v1135_v22, 0  ;;  %s2748_s11 = smov 4   ;;  %s2749_s12 = smov 8  }
  0x21   : > { %1199 = vperm.xlu2 %2714, %v1151_v52   ;;  %s2750_s13 = smov 120  }
  0x25   : > { %2568 = vmatmul.msk.bf16.gmra.mxu0 %vm629_vm0, %v2624_v17  ;;  %2577 = vmatmul.msk.bf16.gmra.mxu1 %vm629_vm0, %v2633_v18  ;;  %v1176_v17 = vperm.slane %v1144_v12, 0  ;;  %v1132_v18 = vrot.slane %v2881_v42, 1 }
  0x26   : > { %2582 = vmatmul.msk.bf16.gmra.mxu2 %vm629_vm0, %v2638_v19  ;;  %v1145_v19 = vrot.slane %v2899_v59, 7 }
  0x27   : > { %2591 = vmatmul.msk.bf16.gmra.mxu3 %vm629_vm0, %v2647_v20  ;;  %1203 = vperm.xlu0 %2712, %v1152_v21   ;;  %v1163_v20 = vperm.slane %v1132_v18, 0 }
  0x28   : > { %1207 = vperm.xlu1 %2713, %v1153_v26   ;;  %v1177_v21 = vperm.slane %v1145_v19, 0  ;;  %v2643_v26 = vld [vmem:[%s2828_s15 + $0xa0] sm:$0xff] }
  0x29   : > { %1211 = vperm.xlu2 %2714, %v1154_v57  }
  0x2f   : > { %1215 = vperm.xlu0 %2712, %v1155_v28   ;;  %v1138_v28 = vrot.slane %v2881_v42, 7 }
  0x30   : > { %1219 = vperm.xlu1 %2713, %v1156_v29  }
  0x31   : > { %1223 = vperm.xlu2 %2714, %v1157_v4   ;;  %v1169_v29 = vperm.slane %v1138_v28, 0 }
  0x35   : > { %2569 = vmatmul.msk.bf16.gmra.mxu0 %vm629_vm0, %v2625_v31  ;;  %2578 = vmatmul.msk.bf16.gmra.mxu1 %vm629_vm0, %v2634_v32  ;;  %v1172_v31 = vperm.slane %v1140_v30, 0  ;;  %v2630_v32 = vld [vmem:[%s2828_s15 + $0x38] sm:$0xff] }
  0x36   : > { %2583 = vmatmul.msk.bf16.gmra.mxu2 %vm629_vm0, %v2639_v33  ;;  %v2644_v33 = vld [vmem:[%s2828_s15 + $0xa8] sm:$0xff] }
  0x37   : > { %2592 = vmatmul.msk.bf16.gmra.mxu3 %vm629_vm0, %v2648_v34  ;;  %1227 = vperm.xlu0 %2712, %v1158_v35   ;;  %v2653_v34 = vld [vmem:[%s2828_s15 + $0xf0] sm:$0xff]  ;;  %v1143_v35 = vrot.slane %v2899_v59, 5 }
  0x38   : > { %1231 = vperm.xlu1 %2713, %v1159_v39  }
  0x39   : > { %1235 = vperm.xlu2 %2714, %v1160_v10   ;;  %v1175_v36 = vperm.slane %v1143_v35, 0 }
  0x3f   : > { %1239 = vperm.xlu0 %2712, %v1161_v41   ;;  %v2654_v41 = vld [vmem:[%s2828_s15 + $0xf8] sm:$0xff] }
  0x40   : > { %1243 = vperm.xlu1 %2713, %v1162_v43  }
  0x41   : > { %1247 = vperm.xlu2 %2714, %v1163_v20  }
  0x45   : > { %2570 = vmatmul.msk.bf16.gmra.mxu0 %vm629_vm0, %v2626_v45  ;;  %2579 = vmatmul.msk.bf16.gmra.mxu1 %vm629_vm0, %v2635_v46 }
  0x46   : > { %2584 = vmatmul.msk.bf16.gmra.mxu2 %vm629_vm0, %v2640_v47 }
  0x47   : > { %2593 = vmatmul.msk.bf16.gmra.mxu3 %vm629_vm0, %v2649_v48  ;;  %1251 = vperm.xlu0 %2712, %v1164_v49  }
  0x48   : > { %1255 = vperm.xlu1 %2713, %v1165_v54  }
  0x49   : > { %1259 = vperm.xlu2 %2714, %v1166_v23  }
  0x4f   : > { %1263 = vperm.xlu0 %2712, %v1167_v56  }
  0x50   : > { %1267 = vperm.xlu1 %2713, %v1168_v58  }
  0x51   : > { %1271 = vperm.xlu2 %2714, %v1169_v29  }
  0x55   : > { %2571 = vmatmul.msk.bf16.gmra.mxu0 %vm629_vm0, %v2627_v60  ;;  %2580 = vmatmul.msk.bf16.gmra.mxu1 %vm629_vm0, %v2636_v61 }
  0x56   : > { %2585 = vmatmul.msk.bf16.gmra.mxu2 %vm629_vm0, %v2641_v62 }
  0x57   : > { %2594 = vmatmul.msk.bf16.gmra.mxu3 %vm629_vm0, %v2650_v63  ;;  %1275 = vperm.xlu0 %2712, %v1170_v0  }
  0x58   : > { %1279 = vperm.xlu1 %2713, %v1171_v6  }
  0x59   : > { %1283 = vperm.xlu2 %2714, %v1172_v31  }
  0x5f   : > { %1287 = vperm.xlu0 %2712, %v1173_v9  }
  0x60   : > { %1291 = vperm.xlu1 %2713, %v1174_v11  }
  0x61   : > { %1295 = vperm.xlu2 %2714, %v1175_v36  }
  0x65   : > { %2572 = vmatmul.msk.bf16.gmra.mxu0 %vm629_vm0, %v2628_v13  ;;  %2615 = vmatmul.msk.bf16.vlgmr.msrb.gmra.mxu1 %vm629_vm0, %v2657_v14 }
  0x66   : > { %2586 = vmatmul.msk.bf16.gmra.mxu2 %vm629_vm0, %v2642_v15 }
  0x67   : > { %2595 = vmatmul.msk.bf16.gmra.mxu3 %vm629_vm0, %v2651_v16  ;;  %1299 = vperm.xlu0 %2712, %v1176_v17  }
  0x68   : > { %1303 = vperm.xlu1 %2713, %v1177_v21  }
  0x75   : > { %2573 = vmatmul.msk.bf16.gmra.mxu0 %vm629_vm0, %v2629_v24  ;;  %2616 = vmatmul.msk.bf16.gmra.mxu1 %vm629_vm0, %v2658_v25  ;;  %v1196_v25 = vpop.permute.xlu2 %1195 }
  0x76   : > { %2587 = vmatmul.msk.bf16.gmra.mxu2 %vm629_vm0, %v2643_v26 }
  0x77   : > { %2596 = vmatmul.msk.bf16.gmra.mxu3 %vm629_vm0, %v2652_v27 }
  0x85   : > { %2574 = vmatmul.msk.bf16.gmra.mxu0 %vm629_vm0, %v2630_v32 }
  0x86   : > { %2588 = vmatmul.msk.bf16.gmra.mxu2 %vm629_vm0, %v2644_v33 }
  0x87   : > { %2597 = vmatmul.msk.bf16.gmra.mxu3 %vm629_vm0, %v2653_v34 }
  0x89   : > { %v1180_v60 = vpop.permute.xlu0 %1179 }
  0x8a   : > { %v1188_v61 = vpop.permute.xlu1 %1187 }
  0x91   : > { %v1184_v16 = vpop.permute.xlu0 %1183 }
  0x92   : > { %v735_v38 = vpop.f32.mrf.mxu0  ;;  %v2949_v39 = vpop.f32.mrf.mxu1 }
  0x93   : > { %v1192_v20 = vpop.permute.xlu1 %1191 }
  0x95   : > { %2575 = vmatmul.msk.bf16.gmra.mxu0 %vm629_vm0, %v2631_v37 }
  0x96   : > { %2589 = vmatmul.msk.bf16.gmra.mxu2 %vm629_vm0, %v2645_v40 }
  0x97   : > { %2598 = vmatmul.msk.bf16.gmra.mxu3 %vm629_vm0, %v2654_v41 }
  0x9a   : > { %v737_v42 = vpop.f32.mrf.mxu0  ;;  %v2956_v43 = vpop.f32.mrf.mxu1 }
  0xa2   : > { %v740_v44 = vpop.f32.mrf.mxu0  ;;  %v2958_v45 = vpop.f32.mrf.mxu1 }
  0xaa   : > { %v742_v46 = vpop.f32.mrf.mxu0  ;;  %v2960_v47 = vpop.f32.mrf.mxu1 }
  0xb2   : > { %v745_v48 = vpop.f32.mrf.mxu0  ;;  %v2962_v49 = vpop.f32.mrf.mxu1 }
  0xba   : > { %v747_v50 = vpop.f32.mrf.mxu0  ;;  %v2964_v51 = vpop.f32.mrf.mxu1 }
  0xc2   : > { %v750_v52 = vpop.f32.mrf.mxu0  ;;  %v2966_v53 = vpop.f32.mrf.mxu1 }
  0xca   : > { %v752_v54 = vpop.f32.mrf.mxu0  ;;  %v2968_v55 = vpop.f32.mrf.mxu1 }
  0xd2   : > { %v755_v56 = vpop.f32.mrf.mxu0  ;;  %v2970_v57 = vpop.f32.mrf.mxu1 }
  0xda   : > { %v757_v58 = vpop.f32.mrf.mxu0  ;;  %v2972_v59 = vpop.f32.mrf.mxu1 }
  0xe2   : > { %v2974_v62 = vpop.f32.mrf.mxu1  ;;  %v760_v4 = vpop.f32.mrf.mxu0 }
  0xe3   : > { %v954_v63 = vrot.slane %v2974_v62, 1  ;;  %v955_v0 = vrot.slane %v2974_v62, 2  ;;  %v956_v2 = vrot.slane %v2974_v62, 3  ;;  %v957_v3 = vrot.slane %v2974_v62, 4 }
  0xe4   : > { %v982_v5 = vperm.slane %v2974_v62, 0  ;;  %v958_v19 = vrot.slane %v2974_v62, 5 }
  0xe5   : > { %v983_v6 = vperm.slane %v954_v63, 0  ;;  %v984_v7 = vperm.slane %v955_v0, 0  ;;  %v985_v8 = vperm.slane %v956_v2, 0  ;;  %v986_v9 = vperm.slane %v957_v3, 0 }
  0xe6   : > { %v1046_v10 = vadd.f32 %v982_v5, %v735_v38  ;;  %v1047_v11 = vadd.f32 %v982_v5, %v737_v42 }
  0xe7   : > { %v1048_v12 = vadd.f32 %v983_v6, %v740_v44  ;;  %v1049_v13 = vadd.f32 %v983_v6, %v742_v46  ;;  %v1050_v14 = vadd.f32 %v984_v7, %v745_v48  ;;  %v1051_v15 = vadd.f32 %v984_v7, %v747_v50 }
  0xe8   : > { %v1052_v17 = vadd.f32 %v985_v8, %v750_v52  ;;  %v1053_v18 = vadd.f32 %v985_v8, %v752_v54  ;;  %v1306_v21 = vmul.f32 %v1180_v60, %v1046_v10  ;;  %v1307_v22 = vmul.f32 %v1180_v60, %v1047_v11  ;;  %v2998_v8 = vpop.f32.mrf.mxu2 }
  0xe9   : > { %v1308_v23 = vmul.f32 %v1184_v16, %v1048_v12  ;;  %v1309_v24 = vmul.f32 %v1184_v16, %v1049_v13  ;;  %v1310_v26 = vmul.f32 %v1188_v61, %v1050_v14  ;;  %v2982_v27 = vmul.f32 %v1188_v61, %v1051_v15  ;;  %v1200_v12 = vpop.permute.xlu2 %1199 }
  0xea   : > { %v2984_v28 = vmul.f32 %v1192_v20, %v1052_v17  ;;  %v2986_v29 = vmul.f32 %v1192_v20, %v1053_v18  ;;  %v1054_v30 = vadd.f32 %v986_v9, %v755_v56  ;;  %v1579_v31 = vmax.f32 %v1306_v21, %v1307_v22  ;;  %v762_v42 = vpop.f32.mrf.mxu0 }
  0xeb   : > { %v1586_v32 = vmax.f32 %v1308_v23, %v1309_v24  ;;  %v1593_v33 = vmax.f32 %v1310_v26, %v2982_v27  ;;  %v1879_v35 = vmin.f32 %v1306_v21, %v1307_v22  ;;  %v1886_v36 = vmin.f32 %v1308_v23, %v1309_v24 }
  0xec   : > { %v1600_v34 = vmax.f32 %v2984_v28, %v2986_v29  ;;  %v1893_v37 = vmin.f32 %v1310_v26, %v2982_v27  ;;  %v2994_v38 = vmin.f32 %v2984_v28, %v2986_v29  ;;  %v1580_v40 = vrot.slane %v1579_v31, 4 }
  0xed   : > { %v1587_v41 = vrot.slane %v1586_v32, 4  ;;  %v987_v44 = vperm.slane %v958_v19, 0  ;;  %v1055_v46 = vadd.f32 %v986_v9, %v757_v58  ;;  %v1880_v48 = vrot.slane %v1879_v35, 4 }
  0xee   : > { %v1887_v50 = vrot.slane %v1886_v36, 4  ;;  %v2996_v52 = vmul.f32 %v1196_v25, %v1054_v30  ;;  %v1581_v54 = vmax.f32 %v1579_v31, %v1580_v40  ;;  %v1594_v60 = vrot.slane %v1593_v33, 4 }
  0xef   : > { %v1588_v56 = vmax.f32 %v1586_v32, %v1587_v41  ;;  %v1443_v61 = vmul.f32 %v1306_v21, %v1306_v21  ;;  %v1881_v63 = vmin.f32 %v1879_v35, %v1880_v48  ;;  %v1894_v0 = vrot.slane %v1893_v37, 4 }
  0xf0   : > { %v1057_v2 = vadd.f32 %v987_v44, %v762_v42  ;;  %v1582_v3 = vrot.slane %v1581_v54, 2  ;;  %v1888_v6 = vmin.f32 %v1886_v36, %v1887_v50  ;;  %v1056_v7 = vadd.f32 %v987_v44, %v760_v4 }
  0xf1   : > { %v1589_v5 = vrot.slane %v1588_v56, 2  ;;  %v1444_v10 = vmul.f32 %v1307_v22, %v1307_v22  ;;  %v1445_v58 = vmul.f32 %v1308_v23, %v1308_v23  ;;  %v1882_v9 = vrot.slane %v1881_v63, 2 }
  0xf2   : > { %v1371_v11 = vadd.f32 %v1307_v22, %v1306_v21  ;;  %v1583_v13 = vmax.f32 %v1581_v54, %v1582_v3  ;;  %v1595_v15 = vmax.f32 %v1593_v33, %v1594_v60  ;;  %v1601_v16 = vrot.slane %v1600_v34, 4 }
  0xf3   : > { %v1590_v14 = vmax.f32 %v1588_v56, %v1589_v5  ;;  %v1895_v17 = vmin.f32 %v1893_v37, %v1894_v0  ;;  %v3000_v18 = vmul.f32 %v1196_v25, %v1055_v46  ;;  %v3002_v19 = vmul.f32 %v1200_v12, %v1057_v2 }
  0xf4   : > { %v1372_v20 = vadd.f32 %v1371_v11, %v1308_v23  ;;  %v1889_v30 = vrot.slane %v1888_v6, 2  ;;  %v3004_v31 = vmul.f32 %v1200_v12, %v1056_v7  ;;  %v1446_v4 = vmul.f32 %v1309_v24, %v1309_v24 }
  0xf5   : > { %v1447_v32 = vmul.f32 %v1310_v26, %v1310_v26  ;;  %v1883_v35 = vmin.f32 %v1881_v63, %v1882_v9  ;;  %v1448_v21 = vmul.f32 %v2982_v27, %v2982_v27  ;;  %v1507_v22 = vadd.f32 %v1444_v10, %v1443_v61 }
  0xf6   : > { %v1373_v36 = vadd.f32 %v1372_v20, %v1309_v24  ;;  %v1584_v40 = vrot.slane %v1583_v13, 1  ;;  %v1591_v33 = vrot.slane %v1590_v14, 1  ;;  %v1596_v41 = vrot.slane %v1595_v15, 2 }
  0xf7   : > { %v1602_v37 = vmax.f32 %v1600_v34, %v1601_v16  ;;  %v1508_v42 = vadd.f32 %v1507_v22, %v1445_v58  ;;  %v1607_v23 = vmax.f32 %v2996_v52, %v3000_v18  ;;  %v1614_v44 = vmax.f32 %v3004_v31, %v3002_v19  ;;  %v3014_v34 = vpop.f32.mrf.mxu2 }
  0xf8   : > { %v1374_v25 = vadd.f32 %v1373_v36, %v1310_v26  ;;  %v1585_v46 = vmax.f32 %v1583_v13, %v1584_v40  ;;  %v1592_v48 = vmax.f32 %v1590_v14, %v1591_v33  ;;  %v1597_v50 = vmax.f32 %v1595_v15, %v1596_v41 }
  0xf9   : > { %v1603_v24 = vrot.slane %v1602_v37, 2  ;;  %v1509_v56 = vadd.f32 %v1508_v42, %v1446_v4  ;;  %v1608_v60 = vrot.slane %v1607_v23, 4  ;;  %v1615_v61 = vrot.slane %v1614_v44, 4 }
  0xfa   : > { %v1375_v54 = vadd.f32 %v1374_v25, %v2982_v27  ;;  %v1598_v63 = vrot.slane %v1597_v50, 1  ;;  %v1836_v26 = vsel %vm1835_vm1, %v1592_v48, %v1585_v46  ;;  %v1890_v10 = vmin.f32 %v1888_v6, %v1889_v30 }
  0xfb   : > { %v1604_v0 = vmax.f32 %v1602_v37, %v1603_v24  ;;  %v1510_v3 = vadd.f32 %v1509_v56, %v1447_v32  ;;  %v1609_v5 = vmax.f32 %v1607_v23, %v1608_v60  ;;  %v1616_v7 = vmax.f32 %v1614_v44, %v1615_v61 }
  0xfc   : > { %v3017_v2 = vadd.f32 %v1375_v54, %v2984_v28  ;;  %v1449_v27 = vmul.f32 %v2984_v28, %v2984_v28  ;;  %v1599_v58 = vmax.f32 %v1597_v50, %v1598_v63  ;;  %v1901_v14 = vrot.slane %v2994_v38, 4 }
  0xfd   : > { %v1605_v9 = vrot.slane %v1604_v0, 1  ;;  %v1511_v11 = vadd.f32 %v1510_v3, %v1448_v21  ;;  %v1610_v12 = vrot.slane %v1609_v5, 2  ;;  %v1617_v13 = vrot.slane %v1616_v7, 2 }
  0xfe   : > { %v1838_v16 = vsel %vm1837_vm2, %v1599_v58, %v1836_v26  ;;  %v1884_v36 = vrot.slane %v1883_v35, 1  ;;  %v1891_v30 = vrot.slane %v1890_v10, 1  ;;  %v1896_v28 = vrot.slane %v1895_v17, 2 }
  0xff   : > { %v1606_v15 = vmax.f32 %v1604_v0, %v1605_v9  ;;  %v3023_v20 = vadd.f32 %v1511_v11, %v1449_v27  ;;  %v1611_v4 = vmax.f32 %v1609_v5, %v1610_v12  ;;  %v1618_v32 = vmax.f32 %v1616_v7, %v1617_v13  ;;  %v3031_v24 = vpop.f32.mrf.mxu2 }
 0x100   : > { %v1892_v21 = vmin.f32 %v1890_v10, %v1891_v30  ;;  %v1897_v33 = vmin.f32 %v1895_v17, %v1896_v28  ;;  %v1902_v41 = vmin.f32 %v2994_v38, %v1901_v14  ;;  %v1907_v37 = vmin.f32 %v2996_v52, %v3000_v18  ;;  %v3047_v28 = vpop.f32.mrf.mxu3 }
 0x101   : > { %v1840_v6 = vsel %vm1839_vm3, %v1606_v15, %v1838_v16  ;;  %v1612_v22 = vrot.slane %v1611_v4, 1  ;;  %v1619_v40 = vrot.slane %v1618_v32, 1  ;;  %v1885_v23 = vmin.f32 %v1883_v35, %v1884_v36 }
 0x102   : > { %v1898_v44 = vrot.slane %v1897_v33, 1  ;;  %v1903_v46 = vrot.slane %v1902_v41, 2  ;;  %v1908_v48 = vrot.slane %v1907_v37, 4  ;;  %v1914_v50 = vmin.f32 %v3004_v31, %v3002_v19 }
 0x103   : > { %v1613_v25 = vmax.f32 %v1611_v4, %v1612_v22  ;;  %v1620_v42 = vmax.f32 %v1618_v32, %v1619_v40  ;;  %v2135_v17 = vsel %vm1835_vm1, %v1892_v21, %v1885_v23  ;;  %v765_v32 = vpop.f32.mrf.mxu0 }
 0x104   : > { %v1899_v56 = vmin.f32 %v1897_v33, %v1898_v44  ;;  %v1904_v60 = vmin.f32 %v1902_v41, %v1903_v46  ;;  %v1909_v61 = vmin.f32 %v1907_v37, %v1908_v48  ;;  %v1915_v63 = vrot.slane %v1914_v50, 4  ;;  %v1204_v41 = vpop.permute.xlu0 %1203 }
 0x105   : > { %v1842_v54 = vsel %vm1841_vm4, %v1613_v25, %v1840_v6  ;;  %v959_v6 = vrot.slane %v2974_v62, 6 }
 0x106   : > { %v1844_v38 = vsel %vm1843_vm5, %v1620_v42, %v1842_v54  ;;  %v1905_v0 = vrot.slane %v1904_v60, 1  ;;  %v1910_v35 = vrot.slane %v1909_v61, 2  ;;  %v2136_v26 = vsel %vm1837_vm2, %v1899_v56, %v2135_v17 }
 0x107   : > { %v1916_v3 = vmin.f32 %v1914_v50, %v1915_v63  ;;  %v3038_v12 = vpop.f32.mrf.mxu2  ;;  %v988_v30 = vperm.slane %v959_v6, 0 }
 0x108   : > { %v1906_v5 = vmin.f32 %v1904_v60, %v1905_v0  ;;  %v1911_v7 = vmin.f32 %v1909_v61, %v1910_v35  ;;  %v3057_v23 = vpop.f32.mrf.mxu3 }
 0x109   : > { %v1917_v10 = vrot.slane %v1916_v3, 2  ;;  %v1058_v40 = vadd.f32 %v988_v30, %v765_v32 }
 0x10a   : > { %v1912_v27 = vrot.slane %v1911_v7, 1  ;;  %v2137_v58 = vsel %vm1839_vm3, %v1906_v5, %v2136_v26 }
 0x10b   : > { %v1918_v9 = vmin.f32 %v1916_v3, %v1917_v10  ;;  %v767_v22 = vpop.f32.mrf.mxu0  ;;  %v3051_v37 = vmul.f32 %v1204_v41, %v1058_v40 }
 0x10c   : > { %v1913_v11 = vmin.f32 %v1911_v7, %v1912_v27  ;;  %v1059_v33 = vadd.f32 %v988_v30, %v767_v22  ;;  %v3088_v32 = vpop.permute.xlu0 %1215  ;;  %v1451_v30 = vmul.f32 %v2996_v52, %v2996_v52 }
 0x10d   : > { %v1919_v13 = vrot.slane %v1918_v9, 1 }
 0x10e   : > { %v2138_v14 = vsel %vm1841_vm4, %v1913_v11, %v2137_v58  ;;  %v3053_v25 = vmul.f32 %v1204_v41, %v1059_v33  ;;  %v3093_v33 = vpop.f32.mrf.mxu1 }
 0x10f   : > { %v1920_v15 = vmin.f32 %v1918_v9, %v1919_v13  ;;  %v3042_v4 = vpop.f32.mrf.mxu2  ;;  %v3075_v9 = vpop.permute.xlu1 %1207  ;;  %v1450_v13 = vmul.f32 %v2986_v29, %v2986_v29 }
 0x110   : > { %v1621_v42 = vmax.f32 %v3051_v37, %v3053_v25  ;;  %v1921_v44 = vmin.f32 %v3051_v37, %v3053_v25  ;;  %v3063_v35 = vpop.f32.mrf.mxu3 }
 0x111   : > { %v2139_v16 = vsel %vm1843_vm5, %v1920_v15, %v2138_v14  ;;  %3847 = vst [vmem:[#allocation6_spill] sm:$0xff] %v3063_v35  ;;  %v1377_v14 = vadd.f32 %v3017_v2, %v2986_v29  ;;  %v3083_v15 = vpop.permute.xlu2 %1211  ;;  %v1452_v29 = vmul.f32 %v3000_v18, %v3000_v18 }
 0x112   : > { %v1622_v46 = vrot.slane %v1621_v42, 4  ;;  %v1922_v48 = vrot.slane %v1921_v44, 4 }
 0x113   : > { %v1378_v22 = vadd.f32 %v1377_v14, %v2996_v52 }
 0x114   : > { %v1623_v50 = vmax.f32 %v1621_v42, %v1622_v46  ;;  %v1923_v54 = vmin.f32 %v1921_v44, %v1922_v48  ;;  %v961_v44 = vrot.slane %v3093_v33, 1  ;;  %v963_v46 = vrot.slane %v3093_v33, 3 }
 0x115   : > { %v1379_v2 = vadd.f32 %v1378_v22, %v3000_v18  ;;  %v964_v48 = vrot.slane %v3093_v33, 4 }
 0x116   : > { %v1624_v56 = vrot.slane %v1623_v50, 2  ;;  %v1924_v60 = vrot.slane %v1923_v54, 2  ;;  %v993_v14 = vperm.slane %v963_v46, 0 }
 0x117   : > { %v3044_v36 = vpop.f32.mrf.mxu2  ;;  %v1220_v6 = vpop.permute.xlu1 %1219  ;;  %v1380_v18 = vadd.f32 %v1379_v2, %v3004_v31 }
 0x118   : > { %v1625_v61 = vmax.f32 %v1623_v50, %v1624_v56  ;;  %v1925_v63 = vmin.f32 %v1923_v54, %v1924_v60  ;;  %v3073_v58 = vpop.f32.mrf.mxu3  ;;  %v1453_v50 = vmul.f32 %v3004_v31, %v3004_v31  ;;  %v965_v54 = vrot.slane %v3093_v33, 5  ;;  %v770_v60 = vpop.f32.mrf.mxu0 }
 0x119   : > { %3848 = vst [vmem:[#allocation7_spill] sm:$0xff] %v3073_v58  ;;  %v1224_v52 = vpop.permute.xlu2 %1223  ;;  %v966_v56 = vrot.slane %v3093_v33, 6 }
 0x11a   : > { %v1626_v0 = vrot.slane %v1625_v61, 1  ;;  %v1926_v26 = vrot.slane %v1925_v63, 1  ;;  %v995_v22 = vperm.slane %v965_v54, 0 }
 0x11c   : > { %v1627_v3 = vmax.f32 %v1625_v61, %v1626_v0  ;;  %v1927_v5 = vmin.f32 %v1925_v63, %v1926_v26  ;;  %v967_v63 = vrot.slane %v3093_v33, 7  ;;  %v1228_v26 = vpop.permute.xlu0 %1227 }
 0x11e   : > { %v3066_v7 = vsel %vm1845_vm6, %v1627_v3, %v1844_v38  ;;  %v3069_v10 = vsel %vm1845_vm6, %v1927_v5, %v2139_v16  ;;  %v1513_v38 = vadd.f32 %v3023_v20, %v1450_v13  ;;  %v962_v20 = vrot.slane %v3093_v33, 2 }
 0x11f   : > { %v3049_v21 = vpop.f32.mrf.mxu2  ;;  %v1232_v3 = vpop.permute.xlu1 %1231  ;;  %v991_v13 = vperm.slane %v961_v44, 0  ;;  %v997_v1 = vperm.slane %v967_v63, 0  ;;  %v1068_v44 = vadd.f32 %v993_v14, %v2962_v49 }
 0x120   : > { %v3086_v16 = vpop.f32.mrf.mxu3  ;;  %v1514_v40 = vadd.f32 %v1513_v38, %v1451_v30  ;;  %v992_v0 = vperm.slane %v962_v20, 0  ;;  %v994_v38 = vperm.slane %v964_v48, 0  ;;  %v1454_v30 = vmul.f32 %v3002_v19, %v3002_v19 }
 0x121   : > { %3849 = vst [vmem:[#allocation8_spill] sm:$0xff] %v3086_v16  ;;  %v3121_v20 = vadd.f32 %v991_v13, %v2949_v39  ;;  %v3126_v48 = vadd.f32 %v991_v13, %v2956_v43  ;;  %v1073_v39 = vadd.f32 %v995_v22, %v2972_v59  ;;  %v1077_v43 = vadd.f32 %v997_v1, %v3038_v12 }
 0x122   : > { %v1515_v42 = vadd.f32 %v1514_v40, %v1452_v29  ;;  %v996_v40 = vperm.slane %v966_v56, 0  ;;  %v3115_v29 = vadd.f32 %v1380_v18, %v3002_v19  ;;  %v1066_v31 = vadd.f32 %v992_v0, %v2958_v45  ;;  %v3131_v45 = vpop.f32.mrf.mxu1 }
 0x123   : > { %v1070_v19 = vadd.f32 %v994_v38, %v2966_v53  ;;  %v1071_v54 = vadd.f32 %v994_v38, %v2968_v55  ;;  %v1072_v56 = vadd.f32 %v995_v22, %v2970_v57  ;;  %v1076_v18 = vadd.f32 %v997_v1, %v3031_v24  ;;  %v1236_v53 = vpop.permute.xlu2 %1235 }
 0x124   : > { %v1516_v5 = vadd.f32 %v1515_v42, %v1453_v50  ;;  %v1067_v42 = vadd.f32 %v992_v0, %v2960_v47  ;;  %v1069_v50 = vadd.f32 %v993_v14, %v2964_v51  ;;  %v1074_v47 = vadd.f32 %v996_v40, %v2998_v8  ;;  %v772_v8 = vpop.f32.mrf.mxu0 }
 0x125   : > { %v1075_v49 = vadd.f32 %v996_v40, %v3014_v34  ;;  %v3139_v63 = vmul.f32 %v1220_v6, %v1066_v31  ;;  %v960_v51 = vrot.slane %v2974_v62, 7  ;;  %v3144_v0 = vmul.f32 %v1224_v52, %v1068_v44  ;;  %v1240_v62 = vpop.permute.xlu0 %1239 }
 0x126   : > { %v3118_v2 = vadd.f32 %v1516_v5, %v1454_v30  ;;  %v3142_v55 = vmul.f32 %v1220_v6, %v1067_v42  ;;  %v968_v57 = vrot.slane %v3131_v45, 1  ;;  %v969_v59 = vrot.slane %v3131_v45, 2 }
 0x127   : > { %v3061_v17 = vpop.f32.mrf.mxu2  ;;  %3851 = vst [vmem:[#allocation10_spill] sm:$0xff] %v3139_v63  ;;  %v3150_v34 = vmul.f32 %v1224_v52, %v1069_v50  ;;  %v970_v1 = vrot.slane %v3131_v45, 3  ;;  %v998_v24 = vperm.slane %v3131_v45, 0  ;;  %v989_v12 = vperm.slane %v960_v51, 0  ;;  %v1244_v13 = vpop.permute.xlu1 %1243 }
 0x128   : > { %v3108_v61 = vpop.f32.mrf.mxu3  ;;  %3852 = vst [vmem:[#allocation11_spill] sm:$0xff] %v3142_v55  ;;  %v3154_v6 = vmul.f32 %v1232_v3, %v1072_v56  ;;  %v3156_v14 = vmul.f32 %v1232_v3, %v1073_v39  ;;  %v3158_v38 = vmul.f32 %v1236_v53, %v1074_v47  ;;  %v3160_v30 = vmul.f32 %v1236_v53, %v1075_v49 }
 0x129   : > { %3850 = vst [vmem:[#allocation9_spill] sm:$0xff] %v3108_v61  ;;  %v3162_v22 = vmul.f32 %v1240_v62, %v1076_v18  ;;  %v974_v52 = vrot.slane %v3131_v45, 7  ;;  %v1060_v40 = vadd.f32 %v989_v12, %v770_v60  ;;  %v1061_v31 = vadd.f32 %v989_v12, %v772_v8 }
 0x12a   : > { %3853 = vst [vmem:[#allocation12_spill] sm:$0xff] %v3144_v0  ;;  %v3165_v42 = vmul.f32 %v1228_v26, %v1070_v19  ;;  %v3167_v44 = vmul.f32 %v1228_v26, %v1071_v54  ;;  %v999_v50 = vperm.slane %v968_v57, 0  ;;  %v1000_v51 = vperm.slane %v969_v59, 0 }
 0x12b   : > { %3855 = vst [vmem:[#allocation14_spill] sm:$0xff] %v3162_v22  ;;  %v1001_v56 = vperm.slane %v970_v1, 0  ;;  %v1078_v3 = vadd.f32 %v998_v24, %v3042_v4  ;;  %v1079_v39 = vadd.f32 %v998_v24, %v3044_v36  ;;  %v3172_v47 = vmul.f32 %v3075_v9, %v1061_v31 }
 0x12c   : > { %v3174_v49 = vmul.f32 %v1240_v62, %v1077_v43  ;;  %v3178_v60 = vmul.f32 %v3154_v6, %v3154_v6  ;;  %v3182_v26 = vmul.f32 %v3156_v14, %v3156_v14  ;;  %v3187_v54 = vmul.f32 %v3075_v9, %v1060_v40  ;;  %v1248_v62 = vpop.permute.xlu2 %1247 }
 0x12d   : > { %v3191_v4 = vmul.f32 %v3158_v38, %v3158_v38  ;;  %v3195_v36 = vmul.f32 %v3160_v30, %v3160_v30  ;;  %v3199_v18 = vmul.f32 %v3162_v22, %v3162_v22  ;;  %v1005_v43 = vperm.slane %v974_v52, 0 }
 0x12e   : > { %v1080_v53 = vadd.f32 %v999_v50, %v3049_v21  ;;  %v1081_v57 = vadd.f32 %v999_v50, %v3061_v17  ;;  %v1628_v59 = vmax.f32 %v3187_v54, %v3172_v47  ;;  %v3208_v24 = vmul.f32 %v1244_v13, %v1078_v3  ;;  %v775_v50 = vpop.f32.mrf.mxu0 }
 0x12f   : > { %v3071_v27 = vpop.f32.mrf.mxu2  ;;  %3856 = vst [vmem:[#allocation15_spill] sm:$0xff] %v3199_v18  ;;  %v3210_v12 = vmul.f32 %v1244_v13, %v1079_v39  ;;  %v3214_v52 = vmul.f32 %v3174_v49, %v3174_v49  ;;  %v3225_v13 = vadd.f32 %v1005_v43, %v3047_v28  ;;  %v971_v31 = vrot.slane %v3131_v45, 4 }
 0x130   : > { %v3148_v5 = vpop.f32.mrf.mxu3  ;;  %v1082_v9 = vadd.f32 %v1000_v51, %v3071_v27  ;;  %v1629_v17 = vrot.slane %v1628_v59, 4  ;;  %v1928_v27 = vmin.f32 %v3187_v54, %v3172_v47  ;;  %v3230_v3 = vmul.f32 %v1248_v62, %v1081_v57 }
 0x131   : > { %3854 = vst [vmem:[#allocation13_spill] sm:$0xff] %v3148_v5  ;;  %v1691_v28 = vmax.f32 %v3208_v24, %v3210_v12 }
 0x132   : > { %3857 = vst [vmem:[#allocation16_spill] sm:$0xff] %v3210_v12  ;;  %v1630_v39 = vmax.f32 %v1628_v59, %v1629_v17  ;;  %v3245_v59 = vadd.f32 %v1005_v43, %v3057_v23  ;;  %v3261_v23 = vmul.f32 %v3230_v3, %v3230_v3 }
 0x133   : > { %3858 = vst [vmem:[#allocation17_spill] sm:$0xff] %v3214_v52  ;;  %v1692_v43 = vrot.slane %v1691_v28, 4 }
 0x134   : > { %v1631_v16 = vrot.slane %v1630_v39, 2  ;;  %3865 = vst [vmem:[#allocation24_spill] sm:$0xff] %v3261_v23 }
 0x136   : > { %v777_v18 = vpop.f32.mrf.mxu0 }
 0x137   : > { %v3077_v11 = vpop.f32.mrf.mxu2 }
 0x138   : > { %v1083_v8 = vadd.f32 %v1000_v51, %v3077_v11  ;;  %v3218_v40 = vpop.f32.mrf.mxu3  ;;  %v1382_v11 = vadd.f32 %v3115_v29, %v3051_v37  ;;  %v1252_v51 = vpop.permute.xlu0 %1251 }
 0x139   : > { %3859 = vst [vmem:[#allocation18_spill] sm:$0xff] %v3218_v40  ;;  %v1929_v40 = vrot.slane %v1928_v27, 4  ;;  %v3232_v5 = vmul.f32 %v1252_v51, %v1082_v9  ;;  %v3249_v9 = vmul.f32 %v3208_v24, %v3208_v24 }
 0x13a   : > { %v3234_v29 = vmul.f32 %v1252_v51, %v1083_v8  ;;  %v3253_v8 = vmul.f32 %v3210_v12, %v3210_v12  ;;  %v1991_v51 = vmin.f32 %v3208_v24, %v3210_v12  ;;  %v1383_v35 = vadd.f32 %v1382_v11, %v3053_v25 }
 0x13b   : > { %v1930_v58 = vmin.f32 %v1928_v27, %v1929_v40  ;;  %3862 = vst [vmem:[#allocation21_spill] sm:$0xff] %v3249_v9 }
 0x13c   : > { %3863 = vst [vmem:[#allocation22_spill] sm:$0xff] %v3253_v8  ;;  %v3271_v40 = vmax.f32 %v3232_v5, %v3234_v29  ;;  %v3293_v9 = vmin.f32 %v3232_v5, %v3234_v29  ;;  %v1384_v12 = vadd.f32 %v1383_v35, %v3187_v54 }
 0x13f   : > { %v3095_v41 = vpop.f32.mrf.mxu2 }
 0x140   : > { %v1084_v1 = vadd.f32 %v1001_v56, %v3095_v41  ;;  %v1455_v41 = vmul.f32 %v3051_v37, %v3051_v37  ;;  %v3287_v8 = vpop.f32.mrf.mxu3 }
 0x141   : > { %3867 = vst [vmem:[#allocation26_spill] sm:$0xff] %v3287_v8 }
 0x142   : > { %v1518_v57 = vadd.f32 %v3118_v2, %v1455_v41  ;;  %v3265_v2 = vmul.f32 %v3232_v5, %v3232_v5 }
 0x144   : > { %3866 = vst [vmem:[#allocation25_spill] sm:$0xff] %v3265_v2 }
 0x147   : > { %v832_v46 = vpop.f32.mrf.mxu2 }
 0x148   : > { %v1085_v21 = vadd.f32 %v1001_v56, %v832_v46  ;;  %v1256_v46 = vpop.permute.xlu1 %1255  ;;  %v3228_v56 = vmul.f32 %v1248_v62, %v1080_v53  ;;  %v990_v53 = vperm.slane %v3093_v33, 0  ;;  %v1931_v33 = vrot.slane %v1930_v58, 2 }
 0x149   : > { %v3236_v61 = vmul.f32 %v1256_v46, %v1084_v1 }
 0x14a   : > { %v3240_v37 = vmul.f32 %v1256_v46, %v1085_v21  ;;  %v3257_v1 = vmul.f32 %v3228_v56, %v3228_v56  ;;  %v1632_v21 = vmax.f32 %v1630_v39, %v1631_v16  ;;  %v1062_v17 = vadd.f32 %v990_v53, %v775_v50 }
 0x14b   : > { %3860 = vst [vmem:[#allocation19_spill] sm:$0xff] %v3236_v61  ;;  %v1698_v27 = vmax.f32 %v3228_v56, %v3230_v3  ;;  %v1932_v50 = vmin.f32 %v1930_v58, %v1931_v33  ;;  %v1456_v46 = vmul.f32 %v3053_v25, %v3053_v25  ;;  %v1457_v39 = vmul.f32 %v3187_v54, %v3187_v54 }
 0x14c   : > { %3861 = vst [vmem:[#allocation20_spill] sm:$0xff] %v3240_v37  ;;  %v3275_v16 = vmax.f32 %v3236_v61, %v3240_v37  ;;  %v1633_v41 = vrot.slane %v1632_v21, 1  ;;  %v1693_v58 = vmax.f32 %v1691_v28, %v1692_v43  ;;  %v1998_v33 = vmin.f32 %v3228_v56, %v3230_v3 }
 0x14d   : > { %3864 = vst [vmem:[#allocation23_spill] sm:$0xff] %v3257_v1  ;;  %v1933_v23 = vrot.slane %v1932_v50, 1  ;;  %v3285_v1 = vmul.f32 %v3083_v15, %v1062_v17  ;;  %v1519_v52 = vadd.f32 %v1518_v57, %v1456_v46  ;;  %v1458_v25 = vmul.f32 %v3172_v47, %v3172_v47 }
 0x14e   : > { %v1634_v2 = vmax.f32 %v1632_v21, %v1633_v41  ;;  %v1992_v28 = vrot.slane %v1991_v51, 4  ;;  %v3304_v17 = vmin.f32 %v3236_v61, %v3240_v37  ;;  %v1002_v43 = vperm.slane %v971_v31, 0 }
 0x14f   : > { %v3184_v19 = vpop.f32.mrf.mxu2  ;;  %v1934_v21 = vmin.f32 %v1932_v50, %v1933_v23  ;;  %v1520_v41 = vadd.f32 %v1519_v52, %v1457_v39  ;;  %v1385_v57 = vadd.f32 %v1384_v12, %v3172_v47  ;;  %v1459_v54 = vmul.f32 %v3285_v1, %v3285_v1 }
 0x150   : > { %v3300_v11 = vsel %vm1847_vm7, %v1634_v2, %v3066_v7  ;;  %v1063_v46 = vadd.f32 %v990_v53, %v777_v18  ;;  %v1694_v7 = vrot.slane %v1693_v58, 2  ;;  %v1699_v2 = vrot.slane %v1698_v27, 4 }
 0x151   : > { %3868 = vst [vmem:[#allocation27_spill] sm:$0xff] %v3300_v11  ;;  %v3309_v35 = vsel %vm1847_vm7, %v1934_v21, %v3069_v10  ;;  %v1706_v23 = vrot.slane %v3271_v40, 4  ;;  %v1999_v50 = vrot.slane %v1998_v33, 4  ;;  %v3314_v11 = vpop.f32.mrf.mxu1  ;;  %v1521_v52 = vadd.f32 %v1520_v41, %v1458_v25 }
 0x152   : > { %3869 = vst [vmem:[#allocation28_spill] sm:$0xff] %v3309_v35  ;;  %v1386_v47 = vadd.f32 %v1385_v57, %v3285_v1  ;;  %v1323_v12 = vmul.f32 %v3083_v15, %v1063_v46  ;;  %v1324_v10 = vmul.f32 %v3088_v32, %v3121_v20  ;;  %v1993_v31 = vmin.f32 %v1991_v51, %v1992_v28  ;;  %v1260_v46 = vpop.permute.xlu2 %1259 }
 0x153   : > { %v1086_v18 = vadd.f32 %v1002_v43, %v3184_v19  ;;  %v1325_v39 = vmul.f32 %v3088_v32, %v3126_v48  ;;  %v1522_v35 = vadd.f32 %v1521_v52, %v1459_v54  ;;  %v1700_v25 = vmax.f32 %v1698_v27, %v1699_v2 }
 0x154   : > { %v1387_v37 = vadd.f32 %v1386_v47, %v1323_v12  ;;  %v1460_v61 = vmul.f32 %v1323_v12, %v1323_v12  ;;  %v3326_v41 = vmin.f32 %v1998_v33, %v1999_v50  ;;  %v1695_v57 = vmax.f32 %v1693_v58, %v1694_v7 }
 0x155   : > { %v1461_v51 = vmul.f32 %v1324_v10, %v1324_v10  ;;  %v1635_v19 = vmax.f32 %v3285_v1, %v1323_v12  ;;  %v1994_v32 = vrot.slane %v1993_v31, 2  ;;  %v3332_v48 = vmul.f32 %v1260_v46, %v1086_v18 }
 0x156   : > { %v1388_v20 = vadd.f32 %v1387_v37, %v1324_v10  ;;  %v1523_v28 = vadd.f32 %v1522_v35, %v1460_v61  ;;  %v1642_v54 = vmax.f32 %v1324_v10, %v1325_v39  ;;  %v1462_v33 = vmul.f32 %v1325_v39, %v1325_v39 }
 0x157   : > { %v837_v62 = vpop.f32.mrf.mxu2  ;;  %v1636_v50 = vrot.slane %v1635_v19, 4  ;;  %v1696_v7 = vrot.slane %v1695_v57, 1  ;;  %v1701_v37 = vrot.slane %v1700_v25, 2  ;;  %v1463_v35 = vmul.f32 %v3139_v63, %v3139_v63 }
 0x158   : > { %v1087_v53 = vadd.f32 %v1002_v43, %v837_v62  ;;  %v3330_v62 = vpop.f32.mrf.mxu3  ;;  %v1389_v27 = vadd.f32 %v1388_v20, %v1325_v39  ;;  %v1524_v2 = vadd.f32 %v1523_v28, %v1461_v51  ;;  %v1643_v52 = vrot.slane %v1642_v54, 4 }
 0x159   : > { %3870 = vst [vmem:[#allocation29_spill] sm:$0xff] %v3330_v62  ;;  %v1637_v18 = vmax.f32 %v1635_v19, %v1636_v50  ;;  %v1935_v19 = vmin.f32 %v3285_v1, %v1323_v12  ;;  %v1942_v62 = vmin.f32 %v1324_v10, %v1325_v39  ;;  %v1468_v10 = vmul.f32 %v3167_v44, %v3167_v44 }
 0x15a   : > { %v3334_v43 = vmul.f32 %v1260_v46, %v1087_v53  ;;  %v1390_v61 = vadd.f32 %v1389_v27, %v3139_v63  ;;  %v1525_v47 = vadd.f32 %v1524_v2, %v1462_v33  ;;  %v3341_v53 = vmax.f32 %v3271_v40, %v1706_v23 }
 0x15b   : > { %v1713_v46 = vrot.slane %v3275_v16, 4  ;;  %v1644_v51 = vmax.f32 %v1642_v54, %v1643_v52  ;;  %v1464_v27 = vmul.f32 %v3142_v55, %v3142_v55  ;;  %v1638_v21 = vrot.slane %v1637_v18, 2 }
 0x15c   : > { %v3346_v20 = vmax.f32 %v3332_v48, %v3334_v43  ;;  %v1391_v58 = vadd.f32 %v1390_v61, %v3142_v55  ;;  %v1526_v15 = vadd.f32 %v1525_v47, %v1463_v35  ;;  %v3351_v33 = vmin.f32 %v1993_v31, %v1994_v32 }
 0x15d   : > { %v972_v40 = vrot.slane %v3131_v45, 5  ;;  %v1645_v23 = vrot.slane %v1644_v51, 2  ;;  %v1465_v54 = vmul.f32 %v3144_v0, %v3144_v0  ;;  %v1639_v52 = vmax.f32 %v1637_v18, %v1638_v21 }
 0x15e   : > { %v1392_v2 = vadd.f32 %v1391_v58, %v3144_v0  ;;  %v1527_v50 = vadd.f32 %v1526_v15, %v1464_v27  ;;  %v3358_v61 = vmax.f32 %v1695_v57, %v1696_v7  ;;  %v1466_v35 = vmul.f32 %v3150_v34, %v3150_v34 }
 0x15f   : > { %v3316_v8 = vpop.f32.mrf.mxu2  ;;  %v1646_v47 = vmax.f32 %v1644_v51, %v1645_v23  ;;  %v1936_v31 = vrot.slane %v1935_v19, 4  ;;  %v1640_v55 = vrot.slane %v1639_v52, 1  ;;  %v1003_v12 = vperm.slane %v972_v40, 0 }
 0x160   : > { %v1393_v32 = vadd.f32 %v1392_v2, %v3150_v34  ;;  %v1528_v63 = vadd.f32 %v1527_v50, %v1465_v54  ;;  %v3363_v1 = vpop.f32.mrf.mxu3  ;;  %v1467_v58 = vmul.f32 %v3165_v42, %v3165_v42  ;;  %v1943_v27 = vrot.slane %v1942_v62, 4 }
 0x161   : > { %v1647_v15 = vrot.slane %v1646_v47, 1  ;;  %v1937_v21 = vmin.f32 %v1935_v19, %v1936_v31  ;;  %v1641_v18 = vmax.f32 %v1639_v52, %v1640_v55  ;;  %v1702_v51 = vmax.f32 %v1700_v25, %v1701_v37  ;;  %v1264_v55 = vpop.permute.xlu0 %1263 }
 0x162   : > { %v1394_v57 = vadd.f32 %v1393_v32, %v3165_v42  ;;  %v1529_v7 = vadd.f32 %v1528_v63, %v1466_v35  ;;  %v1944_v40 = vmin.f32 %v1942_v62, %v1943_v27  ;;  %v2001_v50 = vrot.slane %v3326_v41, 2 }
 0x163   : > { %v1648_v0 = vmax.f32 %v1646_v47, %v1647_v15  ;;  %v1938_v2 = vrot.slane %v1937_v21, 2  ;;  %v1088_v19 = vadd.f32 %v1003_v12, %v3316_v8  ;;  %v3872_v25 = vrot.slane %v3293_v9, 4 }
 0x164   : > { %v1395_v54 = vadd.f32 %v1394_v57, %v3167_v44  ;;  %v1530_v39 = vadd.f32 %v1529_v7, %v1467_v58  ;;  %v1945_v47 = vrot.slane %v1944_v40, 2  ;;  %v1708_v62 = vrot.slane %v3341_v53, 2 }
 0x165   : > { %v3374_v31 = vsel %vm1835_vm1, %v1648_v0, %v1641_v18  ;;  %v1939_v63 = vmin.f32 %v1937_v21, %v1938_v2  ;;  %v2007_v37 = vmin.f32 %v3293_v9, %v3872_v25  ;;  %v1714_v32 = vmax.f32 %v3275_v16, %v1713_v46 }
 0x166   : > { %3871 = vst [vmem:[#allocation30_spill] sm:$0xff] %v3374_v31  ;;  %v1396_v52 = vadd.f32 %v1395_v54, %v3154_v6  ;;  %v1531_v35 = vadd.f32 %v1530_v39, %v1468_v10  ;;  %v1946_v9 = vmin.f32 %v1944_v40, %v1945_v47  ;;  %v1703_v21 = vrot.slane %v1702_v51, 1 }
 0x167   : > { %v842_v28 = vpop.f32.mrf.mxu2  ;;  %v1940_v0 = vrot.slane %v1939_v63, 1  ;;  %v1996_v57 = vrot.slane %v3351_v33, 1  ;;  %v2019_v7 = vmin.f32 %v3332_v48, %v3334_v43  ;;  %v3392_v18 = vmul.f32 %v1264_v55, %v1088_v19 }
 0x168   : > { %v1089_v23 = vadd.f32 %v1003_v12, %v842_v28  ;;  %v1720_v12 = vrot.slane %v3346_v20, 4  ;;  %v1397_v58 = vadd.f32 %v1396_v52, %v3156_v14  ;;  %v1532_v15 = vadd.f32 %v1531_v35, %v3178_v60  ;;  %v3396_v2 = vpop.f32.mrf.mxu3  ;;  %v1272_v52 = vpop.permute.xlu2 %1271 }
 0x169   : > { %v2002_v16 = vmin.f32 %v3326_v41, %v2001_v50  ;;  %v1941_v27 = vmin.f32 %v1939_v63, %v1940_v0  ;;  %v1709_v54 = vmax.f32 %v3341_v53, %v1708_v62  ;;  %v2008_v60 = vrot.slane %v2007_v37, 2 }
 0x16a   : > { %v3384_v8 = vmul.f32 %v1264_v55, %v1089_v23  ;;  %v1398_v46 = vadd.f32 %v1397_v58, %v3158_v38  ;;  %v1947_v23 = vrot.slane %v1946_v9, 1  ;;  %v2013_v10 = vrot.slane %v3304_v17, 4 }
 0x16b   : > { %v1715_v40 = vrot.slane %v1714_v32, 2  ;;  %v1533_v55 = vadd.f32 %v1532_v15, %v3182_v26  ;;  %v1721_v50 = vmax.f32 %v3346_v20, %v1720_v12  ;;  %v2020_v63 = vrot.slane %v2019_v7, 4 }
 0x16c   : > { %v1726_v39 = vmax.f32 %v3392_v18, %v3384_v8  ;;  %v1399_v19 = vadd.f32 %v1398_v46, %v3160_v30  ;;  %v1948_v41 = vmin.f32 %v1946_v9, %v1947_v23  ;;  %v2026_v25 = vmin.f32 %v3392_v18, %v3384_v8 }
 0x16d   : > { %v973_v53 = vrot.slane %v3131_v45, 6  ;;  %v1704_v35 = vmax.f32 %v1702_v51, %v1703_v21  ;;  %v1997_v47 = vmin.f32 %v3351_v33, %v1996_v57  ;;  %v2003_v58 = vrot.slane %v2002_v16, 1 }
 0x16e   : > { %v1400_v62 = vadd.f32 %v1399_v19, %v3162_v22  ;;  %v3411_v0 = vsel %vm1835_vm1, %v1948_v41, %v1941_v27  ;;  %v1727_v26 = vrot.slane %v1726_v39, 4  ;;  %v3414_v15 = vmul.f32 %v1272_v52, %v3225_v13 }
 0x16f   : > { %v3379_v28 = vpop.f32.mrf.mxu2  ;;  %3873 = vst [vmem:[#allocation31_spill] sm:$0xff] %v3411_v0  ;;  %v3417_v20 = vmul.f32 %v1272_v52, %v3245_v59  ;;  %v2009_v12 = vmin.f32 %v2007_v37, %v2008_v60  ;;  %v2014_v45 = vmin.f32 %v3304_v17, %v2013_v10  ;;  %v1534_v51 = vadd.f32 %v1533_v55, %v3191_v4  ;;  %v3874_v55 = vld [vmem:[#allocation16_spill] sm:$0xff] }
 0x170   : > { %v1401_v33 = vadd.f32 %v1400_v62, %v3174_v49  ;;  %v1710_v21 = vrot.slane %v1709_v54, 1  ;;  %v2021_v57 = vmin.f32 %v2019_v7, %v2020_v63  ;;  %v2027_v46 = vrot.slane %v2026_v25, 4 }
 0x171   : > { %v1004_v27 = vperm.slane %v973_v53, 0  ;;  %v1716_v23 = vmax.f32 %v1714_v32, %v1715_v40  ;;  %v1722_v19 = vrot.slane %v1721_v50, 2  ;;  %v1856_v13 = vsel %vm1835_vm1, %v1704_v35, %v3358_v61  ;;  %v3431_v40 = vpop.f32.mrf.mxu3  ;;  %v1268_v53 = vpop.permute.xlu1 %1267 }
 0x172   : > { %v1402_v59 = vadd.f32 %v1401_v33, %v3208_v24  ;;  %v1728_v41 = vmax.f32 %v1726_v39, %v1727_v26  ;;  %v1740_v17 = vmax.f32 %v3414_v15, %v3417_v20  ;;  %v2040_v4 = vmin.f32 %v3414_v15, %v3417_v20 }
 0x173   : > { %v2010_v60 = vrot.slane %v2009_v12, 1  ;;  %v2015_v10 = vrot.slane %v2014_v45, 2  ;;  %v1535_v7 = vadd.f32 %v1534_v51, %v3195_v36  ;;  %v2022_v63 = vrot.slane %v2021_v57, 2  ;;  %v3875_v51 = vld [vmem:[#allocation15_spill] sm:$0xff] }
 0x174   : > { %v1403_v32 = vadd.f32 %v1402_v59, %v3874_v55  ;;  %v2028_v61 = vmin.f32 %v2026_v25, %v2027_v46  ;;  %v1090_v24 = vadd.f32 %v1004_v27, %v3379_v28  ;;  %v1741_v39 = vrot.slane %v1740_v17, 4 }
 0x175   : > { %v1717_v52 = vrot.slane %v1716_v23, 1  ;;  %v2004_v35 = vmin.f32 %v2002_v16, %v2003_v58  ;;  %v2041_v26 = vrot.slane %v2040_v4, 4  ;;  %v1723_v33 = vmax.f32 %v1721_v50, %v1722_v19 }
 0x176   : > { %v1404_v62 = vadd.f32 %v1403_v32, %v3228_v56  ;;  %v1729_v0 = vrot.slane %v1728_v41, 2  ;;  %v2016_v36 = vmin.f32 %v2014_v45, %v2015_v10  ;;  %v1536_v59 = vadd.f32 %v1535_v7, %v3875_v51 }
 0x177   : > { %v847_v9 = vpop.f32.mrf.mxu2  ;;  %v1742_v25 = vmax.f32 %v1740_v17, %v1741_v39  ;;  %v2011_v46 = vmin.f32 %v2009_v12, %v2010_v60  ;;  %v2023_v28 = vmin.f32 %v2021_v57, %v2022_v63  ;;  %v3439_v22 = vmul.f32 %v1268_v53, %v1090_v24  ;;  %v3876_v57 = vld [vmem:[#allocation17_spill] sm:$0xff] }
 0x178   : > { %v1091_v37 = vadd.f32 %v1004_v27, %v847_v9  ;;  %v1711_v9 = vmax.f32 %v1709_v54, %v1710_v21  ;;  %v1405_v55 = vadd.f32 %v1404_v62, %v3230_v3  ;;  %v2029_v27 = vrot.slane %v2028_v61, 2  ;;  %v3880_v62 = vld [vmem:[#allocation22_spill] sm:$0xff] }
 0x179   : > { %v1718_v16 = vmax.f32 %v1716_v23, %v1717_v52  ;;  %v2149_v56 = vsel %vm1835_vm1, %v2004_v35, %v1997_v47  ;;  %v2042_v50 = vmin.f32 %v2040_v4, %v2041_v26  ;;  %v1724_v58 = vrot.slane %v1723_v33, 1  ;;  %v3877_v4 = vld [vmem:[#allocation19_spill] sm:$0xff]  ;;  %v3453_v63 = vpop.f32.mrf.mxu3 }
 0x17a   : > { %v3435_v31 = vmul.f32 %v1268_v53, %v1091_v37  ;;  %v1406_v54 = vadd.f32 %v1405_v55, %v3232_v5  ;;  %v1857_v21 = vsel %vm1837_vm2, %v1711_v9, %v1856_v13  ;;  %v1730_v45 = vmax.f32 %v1728_v41, %v1729_v0  ;;  %v3878_v0 = vld [vmem:[#allocation21_spill] sm:$0xff] }
 0x17b   : > { %v2017_v3 = vrot.slane %v2016_v36, 1  ;;  %v1537_v37 = vadd.f32 %v1536_v59, %v3876_v57  ;;  %v1743_v17 = vrot.slane %v1742_v25, 2  ;;  %v2024_v60 = vrot.slane %v2023_v28, 1 }
 0x17c   : > { %v1733_v19 = vmax.f32 %v3439_v22, %v3435_v31  ;;  %v1407_v12 = vadd.f32 %v1406_v54, %v3234_v29  ;;  %v2030_v23 = vmin.f32 %v2028_v61, %v2029_v27  ;;  %v2033_v5 = vmin.f32 %v3439_v22, %v3435_v31  ;;  %v3879_v61 = vld [vmem:[#allocation20_spill] sm:$0xff] }
 0x17d   : > { %v2150_v47 = vsel %vm1837_vm2, %v2011_v46, %v2149_v56  ;;  %v1538_v41 = vadd.f32 %v1537_v37, %v3878_v0  ;;  %v2043_v7 = vrot.slane %v2042_v50, 2  ;;  %v1725_v32 = vmax.f32 %v1723_v33, %v1724_v58  ;;  %v3881_v33 = vld [vmem:[#allocation23_spill] sm:$0xff] }
 0x17e   : > { %v1734_v10 = vrot.slane %v1733_v19, 4  ;;  %v1408_v13 = vadd.f32 %v1407_v12, %v3877_v4  ;;  %v1731_v24 = vrot.slane %v1730_v45, 1  ;;  %v2034_v53 = vrot.slane %v2033_v5, 4 }
 0x17f   : > { %v1858_v52 = vsel %vm1839_vm3, %v1718_v16, %v1857_v21  ;;  %v1539_v26 = vadd.f32 %v1538_v41, %v3880_v62  ;;  %v1744_v9 = vmax.f32 %v1742_v25, %v1743_v17  ;;  %v2025_v51 = vmin.f32 %v2023_v28, %v2024_v60  ;;  %v3882_v25 = vld [vmem:[#allocation24_spill] sm:$0xff] }
 0x180   : > { %v1735_v39 = vmax.f32 %v1733_v19, %v1734_v10  ;;  %v1409_v35 = vadd.f32 %v1408_v13, %v3879_v61  ;;  %v2031_v59 = vrot.slane %v2030_v23, 1  ;;  %v2035_v46 = vmin.f32 %v2033_v5, %v2034_v53 }
 0x181   : > { %v2018_v27 = vmin.f32 %v2016_v36, %v2017_v3  ;;  %v1540_v54 = vadd.f32 %v1539_v26, %v3881_v33  ;;  %v2044_v58 = vmin.f32 %v2042_v50, %v2043_v7  ;;  %v1859_v19 = vsel %vm1841_vm4, %v1725_v32, %v1858_v52  ;;  %v3473_v53 = vpop.f32.mrf.mxu3  ;;  %v3885_v33 = vld [vmem:[#allocation6_spill] sm:$0xff] }
 0x182   : > { %v1736_v55 = vrot.slane %v1735_v39, 2  ;;  %v1410_v56 = vadd.f32 %v1409_v35, %v3332_v48  ;;  %v1732_v12 = vmax.f32 %v1730_v45, %v1731_v24  ;;  %v2036_v16 = vrot.slane %v2035_v46, 2  ;;  %v3883_v45 = vld [vmem:[#allocation25_spill] sm:$0xff] }
 0x183   : > { %v2151_v21 = vsel %vm1839_vm3, %v2018_v27, %v2150_v47  ;;  %v1541_v28 = vadd.f32 %v1540_v54, %v3882_v25  ;;  %v1745_v17 = vrot.slane %v1744_v9, 1  ;;  %v2032_v36 = vmin.f32 %v2030_v23, %v2031_v59 }
 0x184   : > { %v1737_v57 = vmax.f32 %v1735_v39, %v1736_v55  ;;  %v1411_v37 = vadd.f32 %v1410_v56, %v3334_v43  ;;  %v2152_v60 = vsel %vm1841_vm4, %v2025_v51, %v2151_v21  ;;  %v2037_v10 = vmin.f32 %v2035_v46, %v2036_v16  ;;  %v3887_v16 = vld [vmem:[#allocation7_spill] sm:$0xff] }
 0x185   : > { %v1480_v50 = vmul.f32 %v3234_v29, %v3234_v29  ;;  %v1542_v13 = vadd.f32 %v1541_v28, %v3883_v45  ;;  %v2045_v0 = vrot.slane %v2044_v58, 1  ;;  %v1860_v47 = vsel %vm1843_vm5, %v1732_v12, %v1859_v19 }
 0x186   : > { %v1738_v3 = vrot.slane %v1737_v57, 1  ;;  %v1412_v5 = vadd.f32 %v1411_v37, %v3392_v18  ;;  %v1481_v41 = vmul.f32 %v3877_v4, %v3877_v4  ;;  %v2038_v32 = vrot.slane %v2037_v10, 1 }
 0x187   : > { %v1543_v23 = vadd.f32 %v1542_v13, %v1480_v50  ;;  %v1746_v39 = vmax.f32 %v1744_v9, %v1745_v17  ;;  %v2153_v52 = vsel %vm1843_vm5, %v2032_v36, %v2152_v60  ;;  %v1482_v29 = vmul.f32 %v3879_v61, %v3879_v61  ;;  %v1276_v17 = vpop.permute.xlu0 %1275 }
 0x188   : > { %v1739_v7 = vmax.f32 %v1737_v57, %v1738_v3  ;;  %v1413_v24 = vadd.f32 %v1412_v5, %v3384_v8  ;;  %v2039_v62 = vmin.f32 %v2037_v10, %v2038_v32  ;;  %v2742_v26 = vmov 0.0   ;;  %v3889_v3 = vld [vmem:[#allocation8_spill] sm:$0xff] }
 0x189   : > { %387 = vst [vmem:[#allocation2] sm:$0x1] %v2742_v26  ;;  %v1544_v51 = vadd.f32 %v1543_v23, %v1481_v41  ;;  %v2046_v55 = vmin.f32 %v2044_v58, %v2045_v0  ;;  %v1483_v9 = vmul.f32 %v3332_v48, %v3332_v48  ;;  %v976_v46 = vrot.slane %v3314_v11, 2  ;;  %v3890_v0 = vld [vmem:[#allocation9_spill] sm:$0xff] }
 0x18a   : > { %v1861_v35 = vsel %vm1845_vm6, %v1739_v7, %v1860_v47  ;;  %v1414_v4 = vadd.f32 %v1413_v24, %v3439_v22  ;;  %388 = vst [vmem:[#allocation3] sm:$0x1] %v2742_v26  ;;  %v3884_v61 = vrot.slane %v3314_v11, 1  ;;  %v2154_v56 = vsel %vm1845_vm6, %v2039_v62, %v2153_v52  ;;  %v1280_v24 = vpop.permute.xlu1 %1279  ;;  %v3891_v52 = vld [vmem:[#allocation13_spill] sm:$0xff] }
 0x18b   : > { %v3481_v59 = vsel %vm1847_vm7, %v1746_v39, %v1861_v35  ;;  %v3886_v54 = vperm.slane %v3314_v11, 0  ;;  %v1545_v57 = vadd.f32 %v1544_v51, %v1482_v29  ;;  %v3494_v58 = vsel %vm1847_vm7, %v2046_v55, %v2154_v56  ;;  %v3892_v51 = vld [vmem:[#allocation18_spill] sm:$0xff]  ;;  %v1284_v55 = vpop.permute.xlu2 %1283 }
 0x18c   : > { %v1007_v27 = vperm.slane %v3884_v61, 0  ;;  %v1415_v12 = vadd.f32 %v1414_v4, %v3435_v31  ;;  %v1484_v37 = vmul.f32 %v3334_v43, %v3334_v43  ;;  %v977_v60 = vrot.slane %v3314_v11, 3 }
 0x18d   : > { %v1094_v19 = vadd.f32 %v3886_v54, %v3885_v33  ;;  %v3888_v48 = vmov %v3886_v54  ;;  %v1546_v28 = vadd.f32 %v1545_v57, %v1483_v9  ;;  %v1008_v36 = vperm.slane %v976_v46, 0  ;;  %v3893_v33 = vld [vmem:[#allocation26_spill] sm:$0xff] }
 0x18e   : > { %v1095_v21 = vadd.f32 %v3888_v48, %v3887_v16  ;;  %v1416_v25 = vadd.f32 %v1415_v12, %v3414_v15  ;;  %v1096_v10 = vadd.f32 %v1007_v27, %v3889_v3  ;;  %v1485_v50 = vmul.f32 %v3392_v18, %v3392_v18  ;;  %v887_v18 = vpop.f32.mrf.mxu3  ;;  %v3894_v48 = vld [vmem:[#allocation29_spill] sm:$0xff] }
 0x18f   : > { %v3504_v5 = vmul.f32 %v1276_v17, %v1094_v19  ;;  %v1547_v13 = vadd.f32 %v1546_v28, %v1484_v37  ;;  %v1097_v47 = vadd.f32 %v1007_v27, %v3890_v0  ;;  %v1486_v41 = vmul.f32 %v3384_v8, %v3384_v8 }
 0x190   : > { %v1417_v45 = vadd.f32 %v1416_v25, %v3417_v20  ;;  %v3510_v43 = vmul.f32 %v1276_v17, %v1095_v21  ;;  %v978_v23 = vrot.slane %v3314_v11, 4  ;;  %v1009_v39 = vperm.slane %v977_v60, 0  ;;  %v1288_v17 = vpop.permute.xlu0 %1287 }
 0x191   : > { %v1548_v32 = vadd.f32 %v1547_v13, %v1485_v50  ;;  %v1098_v29 = vadd.f32 %v1008_v36, %v3891_v52  ;;  %v3517_v35 = vmul.f32 %v1280_v24, %v1096_v10  ;;  %v1487_v62 = vmul.f32 %v3439_v22, %v3439_v22 }
 0x192   : > { %v1418_v7 = vadd.f32 %v1417_v45, %v3504_v5  ;;  %v1099_v8 = vadd.f32 %v1008_v36, %v3892_v51  ;;  %v3523_v9 = vmul.f32 %v1280_v24, %v1097_v47  ;;  %v1488_v61 = vmul.f32 %v3435_v31, %v3435_v31  ;;  %v1292_v47 = vpop.permute.xlu1 %1291 }
 0x193   : > { %v1549_v4 = vadd.f32 %v1548_v32, %v1486_v41  ;;  %v1010_v56 = vperm.slane %v978_v23, 0  ;;  %v1100_v54 = vadd.f32 %v1009_v39, %v3893_v33  ;;  %v979_v19 = vrot.slane %v3314_v11, 5 }
 0x194   : > { %v1419_v26 = vadd.f32 %v1418_v7, %v3510_v43  ;;  %v3530_v22 = vmul.f32 %v1284_v55, %v1098_v29  ;;  %v1489_v57 = vmul.f32 %v3414_v15, %v3414_v15  ;;  %v1101_v21 = vadd.f32 %v1009_v39, %v3894_v48  ;;  %v1296_v39 = vpop.permute.xlu2 %1295 }
 0x195   : > { %v1550_v27 = vadd.f32 %v1549_v4, %v1487_v62  ;;  %v3536_v37 = vmul.f32 %v1284_v55, %v1099_v8  ;;  %v1490_v25 = vmul.f32 %v3417_v20, %v3417_v20  ;;  %v1102_v60 = vadd.f32 %v1010_v56, %v3363_v1 }
 0x196   : > { %v1420_v46 = vadd.f32 %v1419_v26, %v3517_v35  ;;  %v1011_v36 = vperm.slane %v979_v19, 0  ;;  %v980_v3 = vrot.slane %v3314_v11, 6  ;;  %v3543_v10 = vmul.f32 %v1288_v17, %v1100_v54  ;;  %v890_v0 = vpop.f32.mrf.mxu3 }
 0x197   : > { %v1551_v16 = vadd.f32 %v1550_v27, %v1488_v61  ;;  %v1491_v50 = vmul.f32 %v3504_v5, %v3504_v5  ;;  %v1103_v13 = vadd.f32 %v1010_v56, %v3396_v2  ;;  %v3549_v20 = vmul.f32 %v1288_v17, %v1101_v21 }
 0x198   : > { %v1421_v12 = vadd.f32 %v1420_v46, %v3523_v9  ;;  %v1492_v1 = vmul.f32 %v3510_v43, %v3510_v43  ;;  %v3554_v32 = vmul.f32 %v1292_v47, %v1102_v60  ;;  %v1104_v24 = vadd.f32 %v1011_v36, %v3431_v40 }
 0x199   : > { %v1552_v28 = vadd.f32 %v1551_v16, %v1489_v57  ;;  %v1012_v23 = vperm.slane %v980_v3, 0  ;;  %v981_v52 = vrot.slane %v3314_v11, 7  ;;  %v1493_v2 = vmul.f32 %v3517_v35, %v3517_v35  ;;  %v1300_v57 = vpop.permute.xlu0 %1299 }
 0x19a   : > { %v1422_v31 = vadd.f32 %v1421_v12, %v3530_v22  ;;  %v3561_v26 = vmul.f32 %v1292_v47, %v1103_v13  ;;  %v1105_v4 = vadd.f32 %v1011_v36, %v3453_v63  ;;  %v1494_v51 = vmul.f32 %v3523_v9, %v3523_v9  ;;  %v1304_v3 = vpop.permute.xlu1 %1303 }
 0x19b   : > { %v1553_v45 = vadd.f32 %v1552_v28, %v1490_v25  ;;  %v1495_v55 = vmul.f32 %v3530_v22, %v3530_v22  ;;  %v3569_v11 = vmul.f32 %v1296_v39, %v1104_v24  ;;  %v1106_v46 = vadd.f32 %v1012_v23, %v3473_v53 }
 0x19c   : > { %v1423_v15 = vadd.f32 %v1422_v31, %v3536_v37  ;;  %v1013_v61 = vperm.slane %v981_v52, 0  ;;  %v1496_v63 = vmul.f32 %v3536_v37, %v3536_v37  ;;  %v3575_v33 = vmul.f32 %v1296_v39, %v1105_v4 }
 0x19d   : > { %v1554_v41 = vadd.f32 %v1553_v45, %v1491_v50  ;;  %v1107_v54 = vadd.f32 %v1012_v23, %v887_v18  ;;  %v1497_v16 = vmul.f32 %v3543_v10, %v3543_v10  ;;  %v3580_v21 = vmul.f32 %v1300_v57, %v1106_v46 }
 0x19e   : > { %v1424_v7 = vadd.f32 %v1423_v15, %v3543_v10  ;;  %v892_v48 = vpop.f32.mrf.mxu3  ;;  %v1108_v53 = vadd.f32 %v1013_v61, %v890_v0  ;;  %v1498_v28 = vmul.f32 %v3549_v20, %v3549_v20  ;;  %v1499_v15 = vmul.f32 %v3554_v32, %v3554_v32 }
 0x19f   : > { %v1555_v29 = vadd.f32 %v1554_v41, %v1492_v1  ;;  %v3585_v17 = vmul.f32 %v1300_v57, %v1107_v54  ;;  %v1109_v18 = vadd.f32 %v1013_v61, %v892_v48  ;;  %v1500_v1 = vmul.f32 %v3561_v26, %v3561_v26  ;;  %v1370_v54 = vld [vmem:[#allocation2] sm:$0x1] }
 0x1a0   : > { %v1425_v62 = vadd.f32 %v1424_v7, %v3549_v20  ;;  %v3590_v50 = vmul.f32 %v1304_v3, %v1108_v53  ;;  %v1501_v7 = vmul.f32 %v3569_v11, %v3569_v11  ;;  %v1502_v39 = vmul.f32 %v3575_v33, %v3575_v33 }
 0x1a1   : > { %v1556_v8 = vadd.f32 %v1555_v29, %v1493_v2  ;;  %v3593_v0 = vmul.f32 %v1304_v3, %v1109_v18  ;;  %v1503_v29 = vmul.f32 %v3580_v21, %v3580_v21 }
 0x1a2   : > { %v1426_v40 = vadd.f32 %v1425_v62, %v3554_v32 }
 0x1a3   : > { %v1557_v27 = vadd.f32 %v1556_v8, %v1494_v51  ;;  %v1504_v51 = vmul.f32 %v3585_v17, %v3585_v17 }
 0x1a4   : > { %v1427_v56 = vadd.f32 %v1426_v40, %v3561_v26 }
 0x1a5   : > { %v1558_v19 = vadd.f32 %v1557_v27, %v1495_v55  ;;  %v1505_v55 = vmul.f32 %v3590_v50, %v3590_v50 }
 0x1a6   : > { %v1428_v12 = vadd.f32 %v1427_v56, %v3569_v11  ;;  %v1506_v56 = vmul.f32 %v3593_v0, %v3593_v0 }
 0x1a7   : > { %v1559_v31 = vadd.f32 %v1558_v19, %v1496_v63 }
 0x1a8   : > { %v1429_v25 = vadd.f32 %v1428_v12, %v3575_v33 }
 0x1a9   : > { %v1560_v36 = vadd.f32 %v1559_v31, %v1497_v16 }
 0x1aa   : > { %v1430_v60 = vadd.f32 %v1429_v25, %v3580_v21 }
 0x1ab   : > { %v1561_v13 = vadd.f32 %v1560_v36, %v1498_v28  ;;  %v1442_v28 = vld [vmem:[#allocation3] sm:$0x1] }
 0x1ac   : > { %v1431_v45 = vadd.f32 %v1430_v60, %v3585_v17 }
 0x1ad   : > { %v1562_v41 = vadd.f32 %v1561_v13, %v1499_v15  ;;  %v2176_v15 = vlaneseq }
 0x1ae   : > { %v1432_v47 = vadd.f32 %v1431_v45, %v3590_v50 }
 0x1af   : > { %v1563_v23 = vadd.f32 %v1562_v41, %v1500_v1  ;;  %v3611_v45 = vand.u32 127, %v2176_v15  ;;  %v1670_v15 = vmax.f32 %v3154_v6, %v3156_v14 }
 0x1b0   : > { %v1433_v24 = vadd.f32 %v1432_v47, %v3593_v0 }
 0x1b1   : > { %v1564_v2 = vadd.f32 %v1563_v23, %v1501_v7  ;;  %v2182_v13 = vand.u32 1, %v3611_v45 }
 0x1b2   : > { %v1434_v52 = vrot.slane %v1433_v24, 4 }
 0x1b3   : > { %v1565_v4 = vadd.f32 %v1564_v2, %v1502_v39  ;;  %vm2183_vm8 = vcmp.eq.s32.totalorder %v2182_v13, 0  ;;  %v2190_v2 = vand.u32 2, %v3611_v45 }
 0x1b4   : > { %v1435_v62 = vadd.f32 %v1434_v52, %v1433_v24 }
 0x1b5   : > { %v1566_v40 = vadd.f32 %v1565_v4, %v1503_v29  ;;  %vm2191_vm9 = vcmp.eq.s32.totalorder %v2190_v2, 0  ;;  %v3898_v2 = vld [vmem:[#allocation14_spill] sm:$0xff] }
 0x1b6   : > { %v1436_v8 = vrot.slane %v1435_v62, 2 }
 0x1b7   : > { %v1567_v61 = vadd.f32 %v1566_v40, %v1504_v51 }
 0x1b8   : > { %v1437_v46 = vadd.f32 %v1436_v8, %v1435_v62 }
 0x1b9   : > { %v1568_v63 = vadd.f32 %v1567_v61, %v1505_v55  ;;  %v2198_v61 = vand.u32 4, %v3611_v45 }
 0x1ba   : > { %v1438_v27 = vrot.slane %v1437_v46, 1 }
 0x1bb   : > { %v1569_v12 = vadd.f32 %v1568_v63, %v1506_v56  ;;  %vm2199_vm10 = vcmp.eq.s32.totalorder %v2198_v61, 0  ;;  %v1977_v61 = vmin.f32 %v3158_v38, %v3160_v30 }
 0x1bc   : > { %v1439_v19 = vadd.f32 %v1438_v27, %v1437_v46 }
 0x1bd   : > { %v1570_v16 = vrot.slane %v1569_v12, 4 }
 0x1be   : > { %v1440_v57 = vadd.f32 %v1439_v19, %v1370_v54 }
 0x1bf   : > { %v1571_v48 = vadd.f32 %v1570_v16, %v1569_v12 }
 0x1c0   : > { %1441 = vst [vmem:[#allocation2] sm:$0x1] %v1440_v57 }
 0x1c1   : > { %v1572_v53 = vrot.slane %v1571_v48, 2 }
 0x1c3   : > { %v1573_v31 = vadd.f32 %v1572_v53, %v1571_v48  ;;  %v1754_v48 = vmax.f32 %v3517_v35, %v3523_v9  ;;  %v1747_v53 = vmax.f32 %v3504_v5, %v3510_v43 }
 0x1c5   : > { %v1574_v25 = vrot.slane %v1573_v31, 1 }
 0x1c7   : > { %v2175_v18 = vld [vmem:[#allocation2] sm:$0x1]  ;;  %v1575_v60 = vadd.f32 %v1574_v25, %v1573_v31  ;;  %v1761_v31 = vmax.f32 %v3530_v22, %v3536_v37  ;;  %v1755_v25 = vrot.slane %v1754_v48, 4 }
 0x1c8   : > { %2180 = vrot.lane.b32.xlu0 %v2175_v18, %s2743_s29  ;;  %2178 = vrot.lane.b32.xlu2 %v2175_v18, %s2744_s30 }
 0x1c9   : > { %v1576_v36 = vadd.f32 %v1575_v60, %v1442_v28  ;;  %v3895_v28 = vld [vmem:[#allocation12_spill] sm:$0xff]  ;;  %v1663_v60 = vmax.f32 %v3165_v42, %v3167_v44  ;;  %v1762_v13 = vrot.slane %v1761_v31, 4 }
 0x1cb   : > { %1577 = vst [vmem:[#allocation3] sm:$0x1] %v1576_v36  ;;  %v2047_v36 = vmin.f32 %v3504_v5, %v3510_v43  ;;  %v1970_v5 = vmin.f32 %v3154_v6, %v3156_v14  ;;  %v1756_v43 = vmax.f32 %v1754_v48, %v1755_v25  ;;  %v1671_v14 = vrot.slane %v1670_v15, 4 }
 0x1cd   : > { %v1672_v48 = vmax.f32 %v1670_v15, %v1671_v14 }
 0x1d2   : > { %v2211_v3 = vld [vmem:[#allocation3] sm:$0x1] }
 0x1d3   : > { %2212 = vrot.lane.b32.xlu1 %v2211_v3, %s2744_s30  ;;  %2214 = vrot.lane.b32.xlu2 %v2211_v3, %s2743_s29 }
 0x222   : > { %v2179_v47 = vpop.permute.xlu2 %2178 }
 0x22d   : > { %v2215_v24 = vpop.permute.xlu2 %2214 }
 0x23a   : > { %v2181_v1 = vpop.permute.xlu0 %2180 }
 0x23b   : > { %v2184_v41 = vsel %vm2183_vm8, %v2179_v47, %v2181_v1  ;;  %v1768_v47 = vmax.f32 %v3543_v10, %v3549_v20  ;;  %v2054_v1 = vmin.f32 %v3517_v35, %v3523_v9  ;;  %v3661_v9 = vmin.f32 %v3895_v28, %v3150_v34 }
 0x23c   : > { %v2185_v7 = vadd.f32 %v2184_v41, %v2175_v18  ;;  %v3632_v18 = vmax.f32 %v3895_v28, %v3150_v34  ;;  %v3896_v41 = vld [vmem:[#allocation11_spill] sm:$0xff]  ;;  %v2061_v34 = vmin.f32 %v3530_v22, %v3536_v37  ;;  %v1978_v28 = vrot.slane %v1977_v61, 4 }
 0x23d   : > { %v2068_v22 = vmin.f32 %v3543_v10, %v3549_v20  ;;  %v2206_v37 = vand.u32 8, %v3611_v45 }
 0x23e   : > { %2188 = vrot.lane.b32.xlu1 %v2185_v7, %s2745_s8  ;;  %2186 = vrot.lane.b32.xlu0 %v2185_v7, %s2746_s9 }
 0x23f   : > { %v2069_v45 = vrot.slane %v2068_v22, 4  ;;  %vm3687_vm11 = vcmp.eq.s32.totalorder %v2206_v37, 0 }
 0x245   : > { %v2213_v23 = vpop.permute.xlu1 %2212 }
 0x246   : > { %v2216_v39 = vsel %vm2183_vm8, %v2213_v23, %v2215_v24  ;;  %v1677_v23 = vmax.f32 %v3158_v38, %v3160_v30 }
 0x247   : > { %v2217_v52 = vadd.f32 %v2216_v39, %v2211_v3  ;;  %v1748_v3 = vrot.slane %v1747_v53, 4  ;;  %v1657_v39 = vrot.slane %v3632_v18, 4 }
 0x249   : > { %2218 = vrot.lane.b32.xlu2 %v2217_v52, %s2746_s9  ;;  %2220 = vrot.lane.b32.xlu0 %v2217_v52, %s2745_s8  ;;  %v1749_v6 = vmax.f32 %v1747_v53, %v1748_v3  ;;  %v2062_v3 = vrot.slane %v2061_v34, 4 }
 0x24b   : > { %v2063_v20 = vmin.f32 %v2061_v34, %v2062_v3 }
 0x2a3   : > { %v2219_v8 = vpop.permute.xlu2 %2218 }
 0x2b0   : > { %v2189_v29 = vpop.permute.xlu1 %2188  ;;  %v2187_v62 = vpop.permute.xlu0 %2186 }
 0x2b1   : > { %v2192_v4 = vsel %vm2191_vm9, %v2187_v62, %v2189_v29  ;;  %v1684_v29 = vmax.f32 %v3898_v2, %v3174_v49  ;;  %v2048_v62 = vrot.slane %v2047_v36, 4 }
 0x2b2   : > { %v2193_v51 = vadd.f32 %v2192_v4, %v2185_v7  ;;  %v3897_v7 = vld [vmem:[#allocation10_spill] sm:$0xff]  ;;  %v1963_v4 = vmin.f32 %v3165_v42, %v3167_v44  ;;  %v1957_v42 = vrot.slane %v3661_v9, 4 }
 0x2b3   : > { %v3646_v24 = vmax.f32 %v3897_v7, %v3896_v41  ;;  %v3657_v35 = vmin.f32 %v3897_v7, %v3896_v41 }
 0x2b4   : > { %2194 = vrot.lane.b32.xlu1 %v2193_v51, %s2747_s10  ;;  %2196 = vrot.lane.b32.xlu2 %v2193_v51, %s2748_s11  ;;  %v1964_v44 = vrot.slane %v1963_v4, 4 }
 0x2b6   : > { %v3681_v41 = vmin.f32 %v1963_v4, %v1964_v44 }
 0x2bb   : > { %v2221_v40 = vpop.permute.xlu0 %2220 }
 0x2bc   : > { %v2222_v55 = vsel %vm2191_vm9, %v2219_v8, %v2221_v40  ;;  %v1769_v8 = vrot.slane %v1768_v47, 4  ;;  %v2055_v40 = vrot.slane %v2054_v1, 4 }
 0x2bd   : > { %v2223_v46 = vadd.f32 %v2222_v55, %v2217_v52  ;;  %v1664_v52 = vrot.slane %v1663_v60, 4  ;;  %v1678_v55 = vrot.slane %v1677_v23, 4 }
 0x2be   : > { %v2056_v25 = vmin.f32 %v2054_v1, %v2055_v40 }
 0x2bf   : > { %2226 = vrot.lane.b32.xlu1 %v2223_v46, %s2748_s11  ;;  %2224 = vrot.lane.b32.xlu0 %v2223_v46, %s2747_s10  ;;  %v3674_v38 = vmax.f32 %v1677_v23, %v1678_v55 }
 0x30e   : > { %v2197_v27 = vpop.permute.xlu2 %2196 }
 0x326   : > { %v2195_v56 = vpop.permute.xlu1 %2194 }
 0x327   : > { %v2200_v63 = vsel %vm2199_vm10, %v2195_v56, %v2197_v27  ;;  %v1757_v27 = vrot.slane %v1756_v43, 2  ;;  %v3667_v56 = vmax.f32 %v1663_v60, %v1664_v52 }
 0x328   : > { %v3616_v54 = vadd.f32 %v2200_v63, %v2193_v51  ;;  %v1763_v51 = vmax.f32 %v1761_v31, %v1762_v13  ;;  %v1685_v63 = vrot.slane %v1684_v29, 4  ;;  %v1770_v31 = vmax.f32 %v1768_v47, %v1769_v8 }
 0x329   : > { %v1758_v60 = vmax.f32 %v1756_v43, %v1757_v27  ;;  %v1984_v47 = vmin.f32 %v3898_v2, %v3174_v49  ;;  %v1673_v43 = vrot.slane %v1672_v48, 2  ;;  %v1680_v8 = vrot.slane %v3674_v38, 2 }
 0x32a   : > { %2204 = vrot.lane.b32.xlu0 %v3616_v54, %s2749_s12  ;;  %2202 = vrot.lane.b32.xlu2 %v3616_v54, %s2750_s13  ;;  %v1764_v53 = vrot.slane %v1763_v51, 2  ;;  %v3679_v13 = vmax.f32 %v1684_v29, %v1685_v63  ;;  %v1771_v23 = vrot.slane %v1770_v31, 2 }
 0x32b   : > { %v1759_v14 = vrot.slane %v1758_v60, 1  ;;  %v1985_v40 = vrot.slane %v1984_v47, 4  ;;  %v3694_v27 = vmax.f32 %v1672_v48, %v1673_v43 }
 0x32c   : > { %v1765_v1 = vmax.f32 %v1763_v51, %v1764_v53  ;;  %v2075_v51 = vmin.f32 %v3554_v32, %v3561_v26  ;;  %v2064_v53 = vrot.slane %v2063_v20, 2 }
 0x32d   : > { %v3703_v37 = vmin.f32 %v1984_v47, %v1985_v40 }
 0x331   : > { %v2227_v19 = vpop.permute.xlu1 %2226  ;;  %v2225_v12 = vpop.permute.xlu0 %2224 }
 0x332   : > { %v2228_v57 = vsel %vm2199_vm10, %v2225_v12, %v2227_v19  ;;  %v2049_v19 = vmin.f32 %v2047_v36, %v2048_v62  ;;  %v1750_v12 = vrot.slane %v1749_v6, 2  ;;  %v3685_v62 = vmin.f32 %v1977_v61, %v1978_v28 }
 0x333   : > { %v3620_v16 = vadd.f32 %v2228_v57, %v2223_v46  ;;  %v1971_v46 = vrot.slane %v1970_v5, 4  ;;  %v1775_v57 = vmax.f32 %v3554_v32, %v3561_v26  ;;  %v1772_v61 = vmax.f32 %v1770_v31, %v1771_v23 }
 0x334   : > { %v2050_v36 = vrot.slane %v2049_v19, 2  ;;  %v1751_v15 = vmax.f32 %v1749_v6, %v1750_v12  ;;  %v1980_v63 = vrot.slane %v3685_v62, 2  ;;  %v1650_v26 = vrot.slane %v3646_v24, 4 }
 0x335   : > { %2230 = vrot.lane.b32.xlu1 %v3620_v16, %s2750_s13  ;;  %2232 = vrot.lane.b32.xlu2 %v3620_v16, %s2749_s12  ;;  %v1972_v30 = vmin.f32 %v1970_v5, %v1971_v46  ;;  %v1776_v7 = vrot.slane %v1775_v57, 4  ;;  %v2057_v5 = vrot.slane %v2056_v25, 2  ;;  %v1766_v46 = vrot.slane %v1765_v1, 1 }
 0x336   : > { %v2051_v10 = vmin.f32 %v2049_v19, %v2050_v36  ;;  %v1752_v49 = vrot.slane %v1751_v15, 1  ;;  %v1760_v19 = vmax.f32 %v1758_v60, %v1759_v14  ;;  %v2076_v36 = vrot.slane %v2075_v51, 4 }
 0x337   : > { %v1973_v52 = vrot.slane %v1972_v30, 2  ;;  %v1777_v2 = vmax.f32 %v1775_v57, %v1776_v7  ;;  %v2058_v55 = vmin.f32 %v2056_v25, %v2057_v5  ;;  %v2070_v57 = vmin.f32 %v2068_v22, %v2069_v45 }
 0x338   : > { %v2052_v12 = vrot.slane %v2051_v10, 1  ;;  %v1753_v28 = vmax.f32 %v1751_v15, %v1752_v49  ;;  %v1767_v31 = vmax.f32 %v1765_v1, %v1766_v46  ;;  %v1773_v48 = vrot.slane %v1772_v61, 1 }
 0x339   : > { %v3699_v44 = vmin.f32 %v1972_v30, %v1973_v52  ;;  %v1778_v32 = vrot.slane %v1777_v2, 2  ;;  %v2059_v25 = vrot.slane %v2058_v55, 1  ;;  %v1782_v60 = vmax.f32 %v3569_v11, %v3575_v33 }
 0x33a   : > { %v1863_v30 = vsel %vm1835_vm1, %v1760_v19, %v1753_v28  ;;  %v2082_v22 = vmin.f32 %v3569_v11, %v3575_v33  ;;  %v2053_v15 = vmin.f32 %v2051_v10, %v2052_v12  ;;  %v2065_v7 = vmin.f32 %v2063_v20, %v2064_v53 }
 0x33b   : > { %v2071_v23 = vrot.slane %v2070_v57, 2  ;;  %v1950_v5 = vrot.slane %v3657_v35, 4  ;;  %v2077_v43 = vmin.f32 %v2075_v51, %v2076_v36  ;;  %v3711_v1 = vmax.f32 %v1777_v2, %v1778_v32 }
 0x33c   : > { %v1651_v47 = vmax.f32 %v3646_v24, %v1650_v26  ;;  %v1774_v52 = vmax.f32 %v1772_v61, %v1773_v48  ;;  %v1864_v14 = vsel %vm1837_vm2, %v1767_v31, %v1863_v30  ;;  %v2060_v45 = vmin.f32 %v2058_v55, %v2059_v25 }
 0x33d   : > { %v1783_v33 = vrot.slane %v1782_v60, 4  ;;  %v2083_v10 = vrot.slane %v2082_v22, 4  ;;  %v2089_v20 = vmin.f32 %v3580_v21, %v3585_v17  ;;  %v2066_v2 = vrot.slane %v2065_v7, 1 }
 0x33e   : > { %v1658_v24 = vmax.f32 %v3632_v18, %v1657_v39  ;;  %v1951_v51 = vmin.f32 %v3657_v35, %v1950_v5  ;;  %v1780_v55 = vrot.slane %v3711_v1, 1  ;;  %v3730_v46 = vsel %vm1839_vm3, %v1774_v52, %v1864_v14 }
 0x33f   : > { %v1652_v19 = vrot.slane %v1651_v47, 2  ;;  %v1784_v12 = vmax.f32 %v1782_v60, %v1783_v33  ;;  %v2084_v53 = vmin.f32 %v2082_v22, %v2083_v10  ;;  %v2090_v18 = vrot.slane %v2089_v20, 4 }
 0x340   : > { %v2067_v39 = vmin.f32 %v2065_v7, %v2066_v2  ;;  %v1659_v35 = vrot.slane %v1658_v24, 2  ;;  %v1952_v28 = vrot.slane %v1951_v51, 2  ;;  %v2096_v25 = vmin.f32 %v3590_v50, %v3593_v0 }
 0x341   : > { %v1653_v26 = vmax.f32 %v1651_v47, %v1652_v19  ;;  %v1785_v30 = vrot.slane %v1784_v12, 2  ;;  %v2085_v22 = vrot.slane %v2084_v53, 2  ;;  %v1781_v19 = vmax.f32 %v3711_v1, %v1780_v55 }
 0x342   : > { %v1660_v7 = vmax.f32 %v1658_v24, %v1659_v35  ;;  %v1953_v5 = vmin.f32 %v1951_v51, %v1952_v28 }
 0x343   : > { %v1654_v52 = vrot.slane %v1653_v26, 1 }
 0x344   : > { %v1954_v2 = vrot.slane %v1953_v5, 1 }
 0x345   : > { %v1655_v51 = vmax.f32 %v1653_v26, %v1654_v52 }
 0x384   : > { %v2203_v29 = vpop.permute.xlu2 %2202 }
 0x39c   : > { %v2205_v6 = vpop.permute.xlu0 %2204 }
 0x39d   : > { %v2208_v34 = vsel %vm3687_vm11, %v2203_v29, %v2205_v6  ;;  %v2233_v29 = vpop.permute.xlu2 %2232 }
 0x39e   : > { %v2209_v3 = vadd.f32 %v2208_v34, %v3616_v54  ;;  %v1789_v54 = vmax.f32 %v3580_v21, %v3585_v17  ;;  %v2072_v21 = vmin.f32 %v2070_v57, %v2071_v23  ;;  %v2078_v17 = vrot.slane %v2077_v43, 2 }
 0x39f   : > { %v1796_v57 = vmax.f32 %v3590_v50, %v3593_v0  ;;  %v1666_v23 = vrot.slane %v3667_v56, 2 }
 0x3a0   : > { %v3717_v6 = vmul.f32 0.00012207031, %v2209_v3  ;;  %v1790_v61 = vrot.slane %v1789_v54, 4  ;;  %v2073_v31 = vrot.slane %v2072_v21, 1  ;;  %v2079_v48 = vmin.f32 %v2077_v43, %v2078_v17 }
 0x3a1   : > { %v2156_v3 = vsel %vm1835_vm1, %v2060_v45, %v2053_v15  ;;  %v1797_v14 = vrot.slane %v1796_v57, 4  ;;  %v1966_v15 = vrot.slane %v3681_v41, 2  ;;  %v1786_v43 = vmax.f32 %v1784_v12, %v1785_v30 }
 0x3a2   : > { %v2237_v4 = vmul.f32 %v3717_v6, %v3717_v6  ;;  %v1791_v32 = vmax.f32 %v1789_v54, %v1790_v61  ;;  %v2080_v50 = vrot.slane %v2079_v48, 1  ;;  %v2157_v0 = vsel %vm1837_vm2, %v2067_v39, %v2156_v3 }
 0x3a3   : > { %v2074_v45 = vmin.f32 %v2072_v21, %v2073_v31  ;;  %v1967_v21 = vmin.f32 %v3681_v41, %v1966_v15  ;;  %v1675_v41 = vrot.slane %v3694_v27, 1  ;;  %v3902_v31 = vld [vmem:[#allocation31_spill] sm:$0xff]  ;;  %v1987_v30 = vrot.slane %v3703_v37, 2 }
 0x3a4   : > { %v1792_v47 = vrot.slane %v1791_v32, 2  ;;  %v2081_v17 = vmin.f32 %v2079_v48, %v2080_v50 }
 0x3a5   : > { %v1676_v50 = vmax.f32 %v3694_v27, %v1675_v41  ;;  %v2251_v27 = vld [vmem:[%s3830_s5] sm:$0x1] }
 0x3a6   : > { %v3751_v24 = vmax.f32 %v1791_v32, %v1792_v47 }
 0x3a7   : > { %v2231_v11 = vpop.permute.xlu1 %2230 }
 0x3a8   : > { %v2234_v49 = vsel %vm3687_vm11, %v2231_v11, %v2233_v29  ;;  %v2097_v29 = vrot.slane %v2096_v25, 4  ;;  %v3748_v11 = vmin.f32 %v2084_v53, %v2085_v22  ;;  %v3901_v53 = vld [vmem:[#allocation30_spill] sm:$0xff]  ;;  %v1794_v32 = vrot.slane %v3751_v24, 1 }
 0x3a9   : > { %v2235_v40 = vadd.f32 %v2234_v49, %v3620_v16  ;;  %v1958_v16 = vmin.f32 %v3661_v9, %v1957_v42  ;;  %v2091_v9 = vmin.f32 %v2089_v20, %v2090_v18  ;;  %v1661_v20 = vrot.slane %v1660_v7, 1 }
 0x3aa   : > { %v1667_v49 = vmax.f32 %v3667_v56, %v1666_v23  ;;  %v2098_v61 = vmin.f32 %v2096_v25, %v2097_v29  ;;  %v2087_v12 = vrot.slane %v3748_v11, 1  ;;  %v1850_v18 = vsel %vm1837_vm2, %v1655_v51, %v3901_v53 }
 0x3ab   : > { %v2236_v34 = vmul.f32 0.00012207031, %v2235_v40  ;;  %v1959_v42 = vrot.slane %v1958_v16, 2  ;;  %v2092_v10 = vrot.slane %v2091_v9, 2  ;;  %v1798_v40 = vmax.f32 %v1796_v57, %v1797_v14 }
 0x3ac   : > { %v1662_v35 = vmax.f32 %v1660_v7, %v1661_v20  ;;  %v1668_v28 = vrot.slane %v1667_v49, 1  ;;  %v2099_v55 = vrot.slane %v2098_v61, 2  ;;  %v1968_v25 = vrot.slane %v1967_v21, 1 }
 0x3ad   : > { %v2238_v36 = vsub.f32 %v2236_v34, %v2237_v4  ;;  %v1960_v33 = vmin.f32 %v1958_v16, %v1959_v42  ;;  %v2158_v4 = vsel %vm1839_vm3, %v2074_v45, %v2157_v0  ;;  %v1787_v34 = vrot.slane %v1786_v43, 1 }
 0x3ae   : > { %v2093_v39 = vmin.f32 %v2091_v9, %v2092_v10  ;;  %v1799_v1 = vrot.slane %v1798_v40, 2  ;;  %v1851_v57 = vsel %vm1839_vm3, %v1662_v35, %v1850_v18  ;;  %v1669_v9 = vmax.f32 %v1667_v49, %v1668_v28 }
 0x3af   : > { %v2239_v60 = vmax.f32 %v2238_v36, 0.0  ;;  %v1961_v56 = vrot.slane %v1960_v33, 1  ;;  %v1955_v36 = vmin.f32 %v1953_v5, %v1954_v2  ;;  %v1975_v42 = vrot.slane %v3699_v44, 1 }
 0x3b0   : > { %v1681_v7 = vmax.f32 %v3674_v38, %v1680_v8  ;;  %v1981_v23 = vmin.f32 %v3685_v62, %v1980_v63  ;;  %v1800_v47 = vmax.f32 %v1798_v40, %v1799_v1  ;;  %v2100_v52 = vmin.f32 %v2098_v61, %v2099_v55 }
 0x3b1   : > { %v3743_v54 = vadd.f32 1e-05, %v2239_v60  ;;  %v2143_v48 = vsel %vm1837_vm2, %v1955_v36, %v3902_v31  ;;  %v1962_v3 = vmin.f32 %v1960_v33, %v1961_v56  ;;  %v1687_v60 = vrot.slane %v3679_v13, 2 }
 0x3b2   : > { %v2094_v29 = vrot.slane %v2093_v39, 1  ;;  %v1852_v0 = vsel %vm1841_vm4, %v1669_v9, %v1851_v57  ;;  %v1969_v15 = vmin.f32 %v1967_v21, %v1968_v25  ;;  %v1988_v33 = vmin.f32 %v3703_v37, %v1987_v30  ;;  %v3905_v30 = vld [vmem:[#allocation27_spill] sm:$0xff] }
 0x3b3   : > { %2715 = vrsqrt.f32 %v3743_v54  ;;  %v2144_v5 = vsel %vm1839_vm3, %v1962_v3, %v2143_v48  ;;  %v1688_v45 = vmax.f32 %v3679_v13, %v1687_v60  ;;  %v1976_v8 = vmin.f32 %v3699_v44, %v1975_v42  ;;  %v3904_v60 = vld [vmem:[#allocation28_spill] sm:$0xff] }
 0x3b4   : > { %v2145_v62 = vsel %vm1841_vm4, %v1969_v15, %v2144_v5  ;;  %v1682_v63 = vrot.slane %v1681_v7, 1  ;;  %v1982_v10 = vrot.slane %v1981_v23, 1  ;;  %v1801_v20 = vrot.slane %v1800_v47, 1 }
 0x3b5   : > { %v2101_v49 = vrot.slane %v2100_v52, 1  ;;  %vm2247_vm13 = vweird.f32 %v3743_v54  ;;  %v1788_v13 = vmax.f32 %v1786_v43, %v1787_v34  ;;  %v1866_v37 = vsel %vm1841_vm4, %v1781_v19, %v3730_v46  ;;  %v2253_v19 = vld [vmem:[%s3831_s6] sm:$0x1] }
 0x3b6   : > { %v2159_v51 = vsel %vm1841_vm4, %v2081_v17, %v2158_v4  ;;  %v1853_v44 = vsel %vm1843_vm5, %v1676_v50, %v1852_v0  ;;  %v2146_v40 = vsel %vm1843_vm5, %v1976_v8, %v2145_v62  ;;  %v1689_v61 = vrot.slane %v1688_v45, 1 }
 0x3b7   : > { %v1989_v21 = vrot.slane %v1988_v33, 1  ;;  %v1795_v18 = vmax.f32 %v3751_v24, %v1794_v32  ;;  %v1683_v56 = vmax.f32 %v1681_v7, %v1682_v63  ;;  %v1983_v35 = vmin.f32 %v1981_v23, %v1982_v10 }
 0x3b8   : > { %v2095_v43 = vmin.f32 %v2093_v39, %v2094_v29  ;;  %v1802_v34 = vmax.f32 %v1800_v47, %v1801_v20  ;;  %v2102_v46 = vmin.f32 %v2100_v52, %v2101_v49  ;;  %v1867_v24 = vsel %vm1843_vm5, %v1788_v13, %v1866_v37 }
 0x3b9   : > { %v2716_v16 = vpop.eup %2715  ;;  %v1854_v17 = vsel %vm1845_vm6, %v1683_v56, %v1853_v44  ;;  %v2147_v4 = vsel %vm1845_vm6, %v1983_v35, %v2146_v40  ;;  %v1690_v36 = vmax.f32 %v1688_v45, %v1689_v61  ;;  %v1990_v32 = vmin.f32 %v1988_v33, %v1989_v21 }
 0x3ba   : > { %v2242_v26 = vmul.f32 %v2716_v16, %v3743_v54  ;;  %vm2248_vm12 = vweird.f32 %v2716_v16  ;;  %v2088_v54 = vmin.f32 %v3748_v11, %v2087_v12  ;;  %v3903_v1 = vmov 0  }
 0x3bb   : > { %vm2249_vm14 = vmor %vm2247_vm13, %vm2248_vm12  ;;  %v1868_v39 = vsel %vm1845_vm6, %v1795_v18, %v1867_v24  ;;  %v1855_v25 = vsel %vm1847_vm7, %v1690_v36, %v1854_v17 }
 0x3bc   : > { %v2243_v22 = vmul.f32 %v2716_v16, %v2242_v26  ;;  %v2160_v12 = vsel %vm1843_vm5, %v2088_v54, %v2159_v51  ;;  %v1869_v57 = vsel %vm1847_vm7, %v1802_v34, %v1868_v39 }
 0x3bd   : > { %v2161_v41 = vsel %vm1845_vm6, %v2095_v43, %v2160_v12 }
 0x3be   : > { %v2244_v14 = vmul.f32 0.5, %v2243_v22  ;;  %v2162_v31 = vsel %vm1847_vm7, %v2102_v46, %v2161_v41 }
 0x3c0   : > { %v2245_v38 = vsub.f32 1.5, %v2244_v14 }
 0x3c2   : > { %v2246_v2 = vmul.f32 %v2716_v16, %v2245_v38 }
 0x3c4   : > { %v2250_v53 = vsel %vm2249_vm14, %v2716_v16, %v2246_v2 }
 0x3c5   : > { %v2252_v28 = vmul.f32 %v2251_v27, %v2250_v53 }
 0x3c7   : > { %v2254_v16 = vmul.f32 %v2252_v28, %v3717_v6  ;;  %vm2256_vm15 = vcmp.ge.f32.partialorder %v2252_v28, 0.0  ;;  %v2148_v6 = vsel %vm1847_vm7, %v1990_v32, %v2147_v4  ;;  %v2273_v48 = vperm.slane %v2252_v28, 0 }
 0x3c8   : > { %v2265_v11 = vsel %vm2256_vm15, 1, %v3903_v1 }
 0x3c9   : > { %v2255_v55 = vsub.f32 %v2253_v19, %v2254_v16  ;;  %v2266_v26 = vperm.slane %v2265_v11, 0 }
 0x3cb   : > { %vm2267_vm0 = vcmp.eq.s32.totalorder %v2266_v26, 1  ;;  %v2280_v3 = vperm.slane %v2255_v55, 0 }
 0x3cc   : > { %v2268_v22 = vsel %vm2267_vm0, %v3905_v30, %v3904_v60  ;;  %v2269_v9 = vsel %vm2267_vm0, %v1855_v25, %v2148_v6  ;;  %v2270_v42 = vsel %vm2267_vm0, %v3481_v59, %v3494_v58  ;;  %v2271_v7 = vsel %vm2267_vm0, %v1869_v57, %v2162_v31 }
 0x3cd   : > { %v2275_v23 = vmul.f32 %v2273_v48, %v2268_v22  ;;  %v2276_v5 = vmul.f32 %v2273_v48, %v2269_v9  ;;  %v2277_v47 = vmul.f32 %v2273_v48, %v2270_v42  ;;  %v2278_v52 = vmul.f32 %v2273_v48, %v2271_v7 }
 0x3cf   : > { %v2282_v14 = vadd.f32 %v2280_v3, %v2275_v23  ;;  %v2283_v29 = vadd.f32 %v2280_v3, %v2276_v5  ;;  %v2284_v50 = vadd.f32 %v2280_v3, %v2277_v47  ;;  %v2285_v0 = vadd.f32 %v2280_v3, %v2278_v52 }
 0x3d1   : > { %vm2286_vm1 = vcmp.gt.f32.partialorder %v2282_v14, 0.0  ;;  %vm2287_vm2 = vcmp.gt.f32.partialorder %v2283_v29, 0.0  ;;  %vm2288_vm3 = vcmp.gt.f32.partialorder %v2284_v50, 0.0  ;;  %vm2289_vm4 = vcmp.gt.f32.partialorder %v2285_v0, 0.0 }
 0x3d2   : > { %v2290_v15 = vmul.f32 0.2, %v2282_v14  ;;  %v2291_v45 = vmul.f32 0.2, %v2283_v29  ;;  %v2292_v33 = vmul.f32 0.2, %v2284_v50 }
 0x3d3   : > { %v2293_v38 = vmul.f32 0.2, %v2285_v0 }
 0x3d4   : > { %v2294_v59 = vsel %vm2286_vm1, %v2282_v14, %v2290_v15  ;;  %v2295_v58 = vsel %vm2287_vm2, %v2283_v29, %v2291_v45  ;;  %v2296_v8 = vsel %vm2288_vm3, %v2284_v50, %v2292_v33 }
 0x3d5   : > { %v2297_v62 = vsel %vm2289_vm4, %v2285_v0, %v2293_v38  ;;  %v2664_v63 = vpack.c.bf16 %v2295_v58, %v2294_v59 }
 0x3d6   : > { %v2669_v10 = vpack.c.bf16 %v2297_v62, %v2296_v8 }
 0x3d7   : > { %2665 = vst [vmem:[%s381_s20] sm:$0xff] %v2664_v63  }
 0x3d8   : > { %2671 = vst [vmem:[%s381_s20 + $0x8] sm:$0xff] %v2669_v10  }
 0x3d9 PF: > { %s17_s26 = sadd.s32 1, %s2739_s26   ;;  %s3906_s24 = smov %s2735_s25 }
 0x3da   : > { %p14_p5 = scmp.ge.s32.totalorder %s17_s26, 4   ;;  %s3907_s25 = smov %s3909_s27 }
 0x3dc   :  { %16 = sbr.rel (!%p14_p5) target bundleno = 2 (0x2), region = 94 }

// kernel: device_forward.6
= control target key start
LH: loop header
LB: loop body
LE: loop exit
PB: predicated region body
PF: predicated region fallthrough
CT: control target
= control target key end

     0   :  { %s2849_s24 = smov 0   ;;  %s2851_s25 = smov 0   ;;  %s3895_s0 = inlined_call_operand.vmem [shape: bf16[2,32,16,64], index: 0, kind: input, shape index: {}]   ;;  %s3896_s1 = inlined_call_operand.vmem [shape: bf16[2,32,64], index: 1, kind: input, shape index: {}]   ;;  %s3897_s2 = inlined_call_operand.vmem [shape: f32[2,32,1], index: 2, kind: input, shape index: {}]   ;;  %s3898_s3 = inlined_call_operand.vmem [shape: bf16[64,128], index: 3, kind: input, shape index: {}]   ;;  %s3899_s4 = inlined_call_operand.vmem [shape: bf16[64,128], index: 4, kind: input, shape index: {}]   ;;  %s3900_s5 = inlined_call_operand.vmem [shape: f32[1,128], index: 5, kind: input, shape index: {}]   ;;  %s3901_s6 = inlined_call_operand.vmem [shape: f32[1,128], index: 6, kind: input, shape index: {}]   ;;  %s3902_s7 = inlined_call_operand.vmem [shape: bf16[2,32,128], index: 7, kind: output, shape index: {}]  }
   0x1   :  { %s2853_s26 = smov 0  }
   0x2 LB: > { %s29_s27 = sadd.s32 1, %s2793_s25  ;;  %p2454_p0 = scmp.ge.s32.totalorder %s2797_s26, 1  ;;  %s2797_s26 = sphi %s2853_s26, %s17_s26   ;;  %s2793_s25 = sphi %s2851_s25, %s3977_s25   ;;  %s2789_s24 = sphi %s2849_s24, %s3976_s24  }
   0x3   : > { %p31_p1 = scmp.ge.s32.totalorder %s29_s27, 2  ;;  %p291_p2 = scmp.lt.s32.totalorder %s2797_s26, 3 }
   0x5   : > { %s3979_s27 = smov (%p31_p1, %s29_s27), 0  ;;  %p292_p3 = pnand %p2454_p0, %p291_p2 }
   0x7   : > { %295 = sbr.rel (%p292_p3) target bundleno = 992 (0x3e0), region = 48 }
   0xc   : > { %v2706_v0 = vld [vmem:[%s3898_s3 + $0x18] sm:$0xff]  ;;  %p347_p4 = scmp.lt.s32.totalorder %s2789_s24, 1  ;;  %v2705_v1 = vld [vmem:[%s3898_s3 + $0x10] sm:$0xff]  ;;  %v3903_v2 = vmov 0   ;;  %v2704_v3 = vld [vmem:[%s3898_s3 + $0x8] sm:$0xff]  ;;  %vm645_vm0 = vcmask 523264  }
   0xd   : > { %746 = vmatpush.bf16.msra.mxu0 %v2706_v0  ;;  %2724 = vmatpush.bf16.msra.mxu1 %v2706_v0  ;;  %v2703_v6 = vld [vmem:[%s3898_s3] sm:$0xff]  ;;  %v2712_v7 = vld [vmem:[%s3899_s4 + $0x18] sm:$0xff]  ;;  %v2711_v14 = vld [vmem:[%s3899_s4 + $0x10] sm:$0xff]  ;;  %vm1867_vm1 = vcmask 1041409   ;;  %vm1869_vm2 = vcmask 1042434   ;;  %vm1871_vm3 = vcmask 1043459  }
   0xe   : > { %s3981_s24 = smov (!%p347_p4, %s2789_s24), 1  ;;  %2725 = vmatpush.bf16.msra.mxu2 %v2706_v0  ;;  %2726 = vmatpush.bf16.msra.mxu3 %v2706_v0  ;;  %v2710_v27 = vld [vmem:[%s3899_s4 + $0x8] sm:$0xff]  ;;  %v2709_v42 = vld [vmem:[%s3899_s4] sm:$0xff]  ;;  %vm1873_vm4 = vcmask 1044484   ;;  %vm1875_vm5 = vcmask 1045509   ;;  %vm1877_vm6 = vcmask 1046534  }
   0xf   : > { %2770 = vset.pattern.permute.xlu0 %v3903_v2  ;;  %s2669_s9 = sshll.u32 %s3981_s24, 5  ;;  %2771 = vset.pattern.permute.xlu1 %v3903_v2  ;;  %s2667_s15 = sshll.u32 %s3981_s24, 8  ;;  %vm1879_vm7 = vcmask 1047559  }
  0x10   : > { %s2881_s12 = scalar_lea.vmem %s3897_s2, %s2669_s9  ;;  %2772 = vset.pattern.permute.xlu2 %v3903_v2  ;;  %s2898_s20 = scalar_lea.vmem %s3895_s0, %s2667_s15 }
  0x11   : > { %747 = vmatpush.bf16.msra.mxu0 %v2705_v1  ;;  %2727 = vmatpush.bf16.msra.mxu1 %v2705_v1  ;;  %v2889_v4 = vld [vmem:[%s2881_s12] sm:$0xff]  ;;  %v2680_v9 = vld [vmem:[%s2898_s20 + $0x48] sm:$0xff]  ;;  %v2685_v10 = vld [vmem:[%s2898_s20 + $0x70] sm:$0xff]  ;;  %s2668_s10 = sshll.u32 %s3981_s24, 4  ;;  %s2801_s14 = smov 1  }
  0x12   : > { %2728 = vmatpush.bf16.msra.mxu2 %v2705_v1  ;;  %2729 = vmatpush.bf16.msra.mxu3 %v2705_v1  ;;  %v1178_v5 = vperm.slane %v2889_v4, 0  ;;  %v2671_v8 = vld [vmem:[%s2898_s20] sm:$0xff]  ;;  %v2694_v11 = vld [vmem:[%s2898_s20 + $0xb8] sm:$0xff]  ;;  %v1151_v12 = vrot.slane %v2889_v4, 2  ;;  %v1150_v13 = vrot.slane %v2889_v4, 1  ;;  %v1152_v17 = vrot.slane %v2889_v4, 3  ;;  %s365_s13 = scalar_lea.vmem %s3896_s1, %s2668_s10  ;;  %s381_s9 = scalar_lea.vmem %s3902_s7, %s2668_s10 }
  0x13   : > { %v1155_v18 = vrot.slane %v2889_v4, 6  ;;  %v2672_v21 = vld [vmem:[%s2898_s20 + $0x8] sm:$0xff]  ;;  %v2681_v22 = vld [vmem:[%s2898_s20 + $0x50] sm:$0xff]  ;;  %v2686_v23 = vld [vmem:[%s2898_s20 + $0x78] sm:$0xff]  ;;  %v1156_v25 = vrot.slane %v2889_v4, 7  ;;  %v1153_v41 = vrot.slane %v2889_v4, 4 }
  0x14   : > { %1211 = vperm.xlu0 %2770, %v1178_v5   ;;  %v1180_v15 = vperm.slane %v1151_v12, 0  ;;  %v1179_v16 = vperm.slane %v1150_v13, 0  ;;  %v1181_v19 = vperm.slane %v1152_v17, 0  ;;  %v2695_v24 = vld [vmem:[%s2898_s20 + $0xc0] sm:$0xff]  ;;  %v2928_v26 = vld [vmem:[%s2881_s12 + $0x8] sm:$0xff]  ;;  %v2673_v35 = vld [vmem:[%s2898_s20 + $0x10] sm:$0xff] }
  0x15   : > { %748 = vmatpush.bf16.msra.mxu0 %v2704_v3  ;;  %2730 = vmatpush.bf16.msra.mxu1 %v2704_v3  ;;  %v1184_v20 = vperm.slane %v1155_v18, 0  ;;  %v1157_v28 = vrot.slane %v2928_v26, 1  ;;  %v1185_v29 = vperm.slane %v1156_v25, 0  ;;  %v1158_v31 = vrot.slane %v2928_v26, 2  ;;  %v2682_v36 = vld [vmem:[%s2898_s20 + $0x58] sm:$0xff]  ;;  %v2687_v37 = vld [vmem:[%s2898_s20 + $0x80] sm:$0xff] }
  0x16   : > { %2731 = vmatpush.bf16.msra.mxu2 %v2704_v3  ;;  %2732 = vmatpush.bf16.msra.mxu3 %v2704_v3  ;;  %v1160_v32 = vrot.slane %v2928_v26, 4  ;;  %v2696_v38 = vld [vmem:[%s2898_s20 + $0xc8] sm:$0xff]  ;;  %v1161_v39 = vrot.slane %v2928_v26, 5  ;;  %v1163_v40 = vrot.slane %v2928_v26, 7  ;;  %v1182_v45 = vperm.slane %v1153_v41, 0  ;;  %v2951_v46 = vld [vmem:[%s2881_s12 + $0x10] sm:$0xff] }
  0x17   : > { %1219 = vperm.xlu1 %2771, %v1180_v15   ;;  %v1187_v30 = vperm.slane %v1157_v28, 0  ;;  %v1188_v33 = vperm.slane %v1158_v31, 0  ;;  %v1165_v47 = vrot.slane %v2951_v46, 2  ;;  %v1194_v48 = vperm.slane %v2951_v46, 0  ;;  %v2674_v50 = vld [vmem:[%s2898_s20 + $0x18] sm:$0xff]  ;;  %v2683_v51 = vld [vmem:[%s2898_s20 + $0x60] sm:$0xff] }
  0x18   : > { %v1190_v34 = vperm.slane %v1160_v32, 0  ;;  %v1191_v43 = vperm.slane %v1161_v39, 0  ;;  %v1193_v44 = vperm.slane %v1163_v40, 0  ;;  %1227 = vperm.xlu2 %2772, %v1182_v45   ;;  %v2688_v52 = vld [vmem:[%s2898_s20 + $0x88] sm:$0xff]  ;;  %v2697_v53 = vld [vmem:[%s2898_s20 + $0xd0] sm:$0xff]  ;;  %v1154_v54 = vrot.slane %v2889_v4, 5 }
  0x19   : > { %749 = vmatpush.bf16.msra.mxu0 %v2703_v6  ;;  %2733 = vmatpush.bf16.msra.mxu1 %v2703_v6  ;;  %v1196_v49 = vperm.slane %v1165_v47, 0  ;;  %v1166_v55 = vrot.slane %v2951_v46, 3  ;;  %v1168_v56 = vrot.slane %v2951_v46, 5  ;;  %v1169_v60 = vrot.slane %v2951_v46, 6  ;;  %v2968_v61 = vld [vmem:[%s2881_s12 + $0x18] sm:$0xff]  ;;  %v2675_v1 = vld [vmem:[%s2898_s20 + $0x20] sm:$0xff] }
  0x1a   : > { %2734 = vmatpush.bf16.msra.mxu2 %v2703_v6  ;;  %2735 = vmatpush.bf16.msra.mxu3 %v2703_v6  ;;  %v1183_v57 = vperm.slane %v1154_v54, 0  ;;  %v1186_v62 = vperm.slane %v2928_v26, 0  ;;  %v1202_v0 = vperm.slane %v2968_v61, 0  ;;  %v2684_v3 = vld [vmem:[%s2898_s20 + $0x68] sm:$0xff]  ;;  %v2689_v4 = vld [vmem:[%s2898_s20 + $0x90] sm:$0xff]  ;;  %v2698_v5 = vld [vmem:[%s2898_s20 + $0xd8] sm:$0xff] }
  0x1b   : > { %v1197_v58 = vperm.slane %v1166_v55, 0  ;;  %v1199_v59 = vperm.slane %v1168_v56, 0  ;;  %v1200_v63 = vperm.slane %v1169_v60, 0  ;;  %v1159_v6 = vrot.slane %v2928_v26, 3  ;;  %v2676_v18 = vld [vmem:[%s2898_s20 + $0x28] sm:$0xff]  ;;  %v2677_v28 = vld [vmem:[%s2898_s20 + $0x30] sm:$0xff] }
  0x1c   : > { %2607 = vmatmul.msk.bf16.vlgmr.msra.gmra.mxu0 %vm645_vm0, %v2671_v8  ;;  %2616 = vmatmul.msk.bf16.vlgmr.msra.gmra.mxu1 %vm645_vm0, %v2680_v9  ;;  %v1173_v8 = vrot.slane %v2968_v61, 3  ;;  %v1162_v12 = vrot.slane %v2928_v26, 6  ;;  %v1174_v13 = vrot.slane %v2968_v61, 4  ;;  %v1167_v26 = vrot.slane %v2951_v46, 4  ;;  %v2700_v31 = vld [vmem:[%s2898_s20 + $0xe8] sm:$0xff]  ;;  %v2679_v41 = vld [vmem:[%s2898_s20 + $0x40] sm:$0xff] }
  0x1d   : > { %967 = vmatpush.bf16.msrb.mxu1 %v2712_v7  ;;  %2621 = vmatmul.msk.bf16.vlgmr.msra.gmra.mxu2 %vm645_vm0, %v2685_v10  ;;  %v1171_v7 = vrot.slane %v2968_v61, 1  ;;  %v1189_v9 = vperm.slane %v1159_v6, 0  ;;  %v1170_v32 = vrot.slane %v2951_v46, 7  ;;  %v1175_v39 = vrot.slane %v2968_v61, 5  ;;  %v2702_v45 = vld [vmem:[%s2898_s20 + $0xf8] sm:$0xff]  ;;  %s2802_s15 = smov 127  }
  0x1e   : > { %2630 = vmatmul.msk.bf16.vlgmr.msra.gmra.mxu3 %vm645_vm0, %v2694_v11  ;;  %1215 = vperm.xlu0 %2770, %v1179_v16   ;;  %v1205_v11 = vperm.slane %v1173_v8, 0  ;;  %v1192_v15 = vperm.slane %v1162_v12, 0  ;;  %v1206_v16 = vperm.slane %v1174_v13, 0  ;;  %s2803_s16 = smov 2   ;;  %s2804_s17 = smov 126  }
  0x1f   : > { %1223 = vperm.xlu1 %2771, %v1181_v19   ;;  %v1203_v10 = vperm.slane %v1171_v7, 0  ;;  %v2707_v19 = vld [vmem:[%s365_s13] sm:$0xff]  ;;  %v1207_v40 = vperm.slane %v1175_v39, 0  ;;  %s2805_s18 = smov 124   ;;  %s2806_s19 = smov 4  }
  0x20   : > { %1231 = vperm.xlu2 %2772, %v1183_v57   ;;  %s2808_s21 = smov 120  }
  0x21   : > { %968 = vmatpush.bf16.msrb.mxu1 %v2711_v14  ;;  %v1176_v14 = vrot.slane %v2968_v61, 6 }
  0x23   : > { %v1208_v17 = vperm.slane %v1176_v14, 0 }
  0x25   : > { %969 = vmatpush.bf16.msrb.mxu1 %v2710_v27  ;;  %v1198_v27 = vperm.slane %v1167_v26, 0 }
  0x26   : > { %1235 = vperm.xlu0 %2770, %v1184_v20   ;;  %v2690_v20 = vld [vmem:[%s2898_s20 + $0x98] sm:$0xff] }
  0x27   : > { %1239 = vperm.xlu1 %2771, %v1185_v29   ;;  %v2708_v29 = vld [vmem:[%s365_s13 + $0x8] sm:$0xff] }
  0x28   : > { %1243 = vperm.xlu2 %2772, %v1186_v62  }
  0x29   : > { %970 = vmatpush.bf16.msrb.mxu1 %v2709_v42 }
  0x2c   : > { %2608 = vmatmul.msk.bf16.gmra.mxu0 %vm645_vm0, %v2672_v21  ;;  %2617 = vmatmul.msk.bf16.gmra.mxu1 %vm645_vm0, %v2681_v22  ;;  %v2699_v21 = vld [vmem:[%s2898_s20 + $0xe0] sm:$0xff]  ;;  %v1164_v22 = vrot.slane %v2951_v46, 1 }
  0x2d   : > { %2622 = vmatmul.msk.bf16.gmra.mxu2 %vm645_vm0, %v2686_v23  ;;  %v1177_v23 = vrot.slane %v2968_v61, 7 }
  0x2e   : > { %2631 = vmatmul.msk.bf16.gmra.mxu3 %vm645_vm0, %v2695_v24  ;;  %1247 = vperm.xlu0 %2770, %v1187_v30   ;;  %v1195_v24 = vperm.slane %v1164_v22, 0  ;;  %v2691_v30 = vld [vmem:[%s2898_s20 + $0xa0] sm:$0xff] }
  0x2f   : > { %1251 = vperm.xlu1 %2771, %v1188_v33   ;;  %v1209_v25 = vperm.slane %v1177_v23, 0  ;;  %v1201_v33 = vperm.slane %v1170_v32, 0 }
  0x30   : > { %1255 = vperm.xlu2 %2772, %v1189_v9  }
  0x36   : > { %1259 = vperm.xlu0 %2770, %v1190_v34   ;;  %v1172_v34 = vrot.slane %v2968_v61, 2 }
  0x37   : > { %1263 = vperm.xlu1 %2771, %v1191_v43  }
  0x38   : > { %1267 = vperm.xlu2 %2772, %v1192_v15  }
  0x3c   : > { %2609 = vmatmul.msk.bf16.gmra.mxu0 %vm645_vm0, %v2673_v35  ;;  %2618 = vmatmul.msk.bf16.gmra.mxu1 %vm645_vm0, %v2682_v36  ;;  %v1204_v35 = vperm.slane %v1172_v34, 0  ;;  %v2678_v36 = vld [vmem:[%s2898_s20 + $0x38] sm:$0xff] }
  0x3d   : > { %2623 = vmatmul.msk.bf16.gmra.mxu2 %vm645_vm0, %v2687_v37  ;;  %v2692_v37 = vld [vmem:[%s2898_s20 + $0xa8] sm:$0xff] }
  0x3e   : > { %2632 = vmatmul.msk.bf16.gmra.mxu3 %vm645_vm0, %v2696_v38  ;;  %1271 = vperm.xlu0 %2770, %v1193_v44   ;;  %v2701_v38 = vld [vmem:[%s2898_s20 + $0xf0] sm:$0xff] }
  0x3f   : > { %1275 = vperm.xlu1 %2771, %v1194_v48   ;;  %v2693_v44 = vld [vmem:[%s2898_s20 + $0xb0] sm:$0xff]  ;;  %s2807_s20 = smov 8  }
  0x40   : > { %1279 = vperm.xlu2 %2772, %v1195_v24  }
  0x46   : > { %1283 = vperm.xlu0 %2770, %v1196_v49  }
  0x47   : > { %1287 = vperm.xlu1 %2771, %v1197_v58  }
  0x48   : > { %1291 = vperm.xlu2 %2772, %v1198_v27  }
  0x4c   : > { %2610 = vmatmul.msk.bf16.gmra.mxu0 %vm645_vm0, %v2674_v50  ;;  %2619 = vmatmul.msk.bf16.gmra.mxu1 %vm645_vm0, %v2683_v51 }
  0x4d   : > { %2624 = vmatmul.msk.bf16.gmra.mxu2 %vm645_vm0, %v2688_v52 }
  0x4e   : > { %2633 = vmatmul.msk.bf16.gmra.mxu3 %vm645_vm0, %v2697_v53  ;;  %1295 = vperm.xlu0 %2770, %v1199_v59  }
  0x4f   : > { %1299 = vperm.xlu1 %2771, %v1200_v63  }
  0x50   : > { %1303 = vperm.xlu2 %2772, %v1201_v33  }
  0x56   : > { %1307 = vperm.xlu0 %2770, %v1202_v0  }
  0x57   : > { %1311 = vperm.xlu1 %2771, %v1203_v10  }
  0x58   : > { %1315 = vperm.xlu2 %2772, %v1204_v35  }
  0x5c   : > { %2611 = vmatmul.msk.bf16.gmra.mxu0 %vm645_vm0, %v2675_v1  ;;  %2620 = vmatmul.msk.bf16.gmra.mxu1 %vm645_vm0, %v2684_v3 }
  0x5d   : > { %2625 = vmatmul.msk.bf16.gmra.mxu2 %vm645_vm0, %v2689_v4 }
  0x5e   : > { %2634 = vmatmul.msk.bf16.gmra.mxu3 %vm645_vm0, %v2698_v5  ;;  %1319 = vperm.xlu0 %2770, %v1205_v11  }
  0x5f   : > { %1323 = vperm.xlu1 %2771, %v1206_v16  }
  0x60   : > { %1327 = vperm.xlu2 %2772, %v1207_v40  }
  0x66   : > { %1331 = vperm.xlu0 %2770, %v1208_v17  }
  0x67   : > { %1335 = vperm.xlu1 %2771, %v1209_v25  }
  0x6c   : > { %2612 = vmatmul.msk.bf16.gmra.mxu0 %vm645_vm0, %v2676_v18  ;;  %2663 = vmatmul.msk.bf16.vlgmr.msrb.gmra.mxu1 %vm645_vm0, %v2707_v19 }
  0x6d   : > { %2626 = vmatmul.msk.bf16.gmra.mxu2 %vm645_vm0, %v2690_v20 }
  0x6e   : > { %2635 = vmatmul.msk.bf16.gmra.mxu3 %vm645_vm0, %v2699_v21 }
  0x7c   : > { %2613 = vmatmul.msk.bf16.gmra.mxu0 %vm645_vm0, %v2677_v28  ;;  %2664 = vmatmul.msk.bf16.gmra.mxu1 %vm645_vm0, %v2708_v29  ;;  %v1228_v29 = vpop.permute.xlu2 %1227 }
  0x7d   : > { %2627 = vmatmul.msk.bf16.gmra.mxu2 %vm645_vm0, %v2691_v30 }
  0x7e   : > { %2636 = vmatmul.msk.bf16.gmra.mxu3 %vm645_vm0, %v2700_v31 }
  0x86   : > { %v1212_v0 = vpop.permute.xlu0 %1211 }
  0x89   : > { %v1220_v1 = vpop.permute.xlu1 %1219 }
  0x8c   : > { %2614 = vmatmul.msk.bf16.gmra.mxu0 %vm645_vm0, %v2678_v36 }
  0x8d   : > { %2628 = vmatmul.msk.bf16.gmra.mxu2 %vm645_vm0, %v2692_v37 }
  0x8e   : > { %2637 = vmatmul.msk.bf16.gmra.mxu3 %vm645_vm0, %v2701_v38 }
  0x90   : > { %v1216_v20 = vpop.permute.xlu0 %1215 }
  0x91   : > { %v1224_v24 = vpop.permute.xlu1 %1223 }
  0x99   : > { %v751_v42 = vpop.f32.mrf.mxu0  ;;  %v3019_v43 = vpop.f32.mrf.mxu1 }
  0x9c   : > { %2615 = vmatmul.msk.bf16.gmra.mxu0 %vm645_vm0, %v2679_v41 }
  0x9d   : > { %2629 = vmatmul.msk.bf16.gmra.mxu2 %vm645_vm0, %v2693_v44 }
  0x9e   : > { %2638 = vmatmul.msk.bf16.gmra.mxu3 %vm645_vm0, %v2702_v45 }
  0xa1   : > { %v753_v46 = vpop.f32.mrf.mxu0  ;;  %v3026_v47 = vpop.f32.mrf.mxu1 }
  0xa9   : > { %v756_v48 = vpop.f32.mrf.mxu0  ;;  %v3028_v49 = vpop.f32.mrf.mxu1 }
  0xb1   : > { %v758_v50 = vpop.f32.mrf.mxu0  ;;  %v3030_v51 = vpop.f32.mrf.mxu1 }
  0xb9   : > { %v761_v52 = vpop.f32.mrf.mxu0  ;;  %v3032_v53 = vpop.f32.mrf.mxu1 }
  0xc1   : > { %v763_v54 = vpop.f32.mrf.mxu0  ;;  %v3034_v55 = vpop.f32.mrf.mxu1 }
  0xc9   : > { %v766_v56 = vpop.f32.mrf.mxu0  ;;  %v3036_v57 = vpop.f32.mrf.mxu1 }
  0xd1   : > { %v768_v58 = vpop.f32.mrf.mxu0  ;;  %v3038_v59 = vpop.f32.mrf.mxu1 }
  0xd9   : > { %v771_v60 = vpop.f32.mrf.mxu0  ;;  %v3040_v61 = vpop.f32.mrf.mxu1 }
  0xe1   : > { %v773_v62 = vpop.f32.mrf.mxu0  ;;  %v3042_v63 = vpop.f32.mrf.mxu1 }
  0xe9   : > { %v3044_v3 = vpop.f32.mrf.mxu1  ;;  %v776_v8 = vpop.f32.mrf.mxu0 }
  0xea   : > { %v986_v4 = vrot.slane %v3044_v3, 1  ;;  %v987_v5 = vrot.slane %v3044_v3, 2  ;;  %v988_v6 = vrot.slane %v3044_v3, 3  ;;  %v989_v7 = vrot.slane %v3044_v3, 4 }
  0xeb   : > { %v1014_v9 = vperm.slane %v3044_v3, 0  ;;  %v990_v23 = vrot.slane %v3044_v3, 5 }
  0xec   : > { %v1015_v10 = vperm.slane %v986_v4, 0  ;;  %v1016_v11 = vperm.slane %v987_v5, 0  ;;  %v1017_v12 = vperm.slane %v988_v6, 0  ;;  %v1018_v13 = vperm.slane %v989_v7, 0 }
  0xed   : > { %v1078_v14 = vadd.f32 %v1014_v9, %v751_v42  ;;  %v1079_v15 = vadd.f32 %v1014_v9, %v753_v46 }
  0xee   : > { %v1080_v16 = vadd.f32 %v1015_v10, %v756_v48  ;;  %v1081_v17 = vadd.f32 %v1015_v10, %v758_v50  ;;  %v1082_v18 = vadd.f32 %v1016_v11, %v761_v52  ;;  %v1083_v19 = vadd.f32 %v1016_v11, %v763_v54 }
  0xef   : > { %v1084_v21 = vadd.f32 %v1017_v12, %v766_v56  ;;  %v1085_v22 = vadd.f32 %v1017_v12, %v768_v58  ;;  %v1338_v25 = vmul.f32 %v1212_v0, %v1078_v14  ;;  %v1339_v26 = vmul.f32 %v1212_v0, %v1079_v15  ;;  %v3068_v12 = vpop.f32.mrf.mxu2 }
  0xf0   : > { %v1340_v27 = vmul.f32 %v1216_v20, %v1080_v16  ;;  %v1341_v28 = vmul.f32 %v1216_v20, %v1081_v17  ;;  %v1342_v30 = vmul.f32 %v1220_v1, %v1082_v18  ;;  %v3052_v31 = vmul.f32 %v1220_v1, %v1083_v19  ;;  %v1232_v16 = vpop.permute.xlu2 %1231 }
  0xf1   : > { %v3054_v32 = vmul.f32 %v1224_v24, %v1084_v21  ;;  %v3056_v33 = vmul.f32 %v1224_v24, %v1085_v22  ;;  %v1086_v34 = vadd.f32 %v1018_v13, %v771_v60  ;;  %v1611_v35 = vmax.f32 %v1338_v25, %v1339_v26  ;;  %v778_v46 = vpop.f32.mrf.mxu0 }
  0xf2   : > { %v1618_v36 = vmax.f32 %v1340_v27, %v1341_v28  ;;  %v1625_v37 = vmax.f32 %v1342_v30, %v3052_v31  ;;  %v1911_v39 = vmin.f32 %v1338_v25, %v1339_v26  ;;  %v1918_v40 = vmin.f32 %v1340_v27, %v1341_v28 }
  0xf3   : > { %v1632_v38 = vmax.f32 %v3054_v32, %v3056_v33  ;;  %v1925_v41 = vmin.f32 %v1342_v30, %v3052_v31  ;;  %v3064_v42 = vmin.f32 %v3054_v32, %v3056_v33  ;;  %v1612_v44 = vrot.slane %v1611_v35, 4 }
  0xf4   : > { %v1619_v45 = vrot.slane %v1618_v36, 4  ;;  %v1019_v48 = vperm.slane %v990_v23, 0  ;;  %v1087_v50 = vadd.f32 %v1018_v13, %v773_v62  ;;  %v1912_v52 = vrot.slane %v1911_v39, 4 }
  0xf5   : > { %v1919_v54 = vrot.slane %v1918_v40, 4  ;;  %v3066_v56 = vmul.f32 %v1228_v29, %v1086_v34  ;;  %v1613_v58 = vmax.f32 %v1611_v35, %v1612_v44  ;;  %v1626_v0 = vrot.slane %v1625_v37, 4 }
  0xf6   : > { %v1620_v60 = vmax.f32 %v1618_v36, %v1619_v45  ;;  %v1475_v1 = vmul.f32 %v1338_v25, %v1338_v25  ;;  %v1913_v4 = vmin.f32 %v1911_v39, %v1912_v52  ;;  %v1926_v5 = vrot.slane %v1925_v41, 4 }
  0xf7   : > { %v1089_v6 = vadd.f32 %v1019_v48, %v778_v46  ;;  %v1614_v7 = vrot.slane %v1613_v58, 2  ;;  %v1920_v10 = vmin.f32 %v1918_v40, %v1919_v54  ;;  %v1088_v11 = vadd.f32 %v1019_v48, %v776_v8 }
  0xf8   : > { %v1621_v9 = vrot.slane %v1620_v60, 2  ;;  %v1476_v14 = vmul.f32 %v1339_v26, %v1339_v26  ;;  %v1477_v62 = vmul.f32 %v1340_v27, %v1340_v27  ;;  %v1914_v13 = vrot.slane %v1913_v4, 2 }
  0xf9   : > { %v1403_v15 = vadd.f32 %v1339_v26, %v1338_v25  ;;  %v1615_v17 = vmax.f32 %v1613_v58, %v1614_v7  ;;  %v1627_v19 = vmax.f32 %v1625_v37, %v1626_v0  ;;  %v1633_v20 = vrot.slane %v1632_v38, 4 }
  0xfa   : > { %v1622_v18 = vmax.f32 %v1620_v60, %v1621_v9  ;;  %v1927_v21 = vmin.f32 %v1925_v41, %v1926_v5  ;;  %v3070_v22 = vmul.f32 %v1228_v29, %v1087_v50  ;;  %v3072_v23 = vmul.f32 %v1232_v16, %v1089_v6 }
  0xfb   : > { %v1404_v24 = vadd.f32 %v1403_v15, %v1340_v27  ;;  %v1921_v34 = vrot.slane %v1920_v10, 2  ;;  %v3074_v35 = vmul.f32 %v1232_v16, %v1088_v11  ;;  %v1478_v8 = vmul.f32 %v1341_v28, %v1341_v28 }
  0xfc   : > { %v1479_v36 = vmul.f32 %v1342_v30, %v1342_v30  ;;  %v1915_v39 = vmin.f32 %v1913_v4, %v1914_v13  ;;  %v1480_v25 = vmul.f32 %v3052_v31, %v3052_v31  ;;  %v1539_v26 = vadd.f32 %v1476_v14, %v1475_v1 }
  0xfd   : > { %v1405_v40 = vadd.f32 %v1404_v24, %v1341_v28  ;;  %v1616_v44 = vrot.slane %v1615_v17, 1  ;;  %v1623_v37 = vrot.slane %v1622_v18, 1  ;;  %v1628_v45 = vrot.slane %v1627_v19, 2 }
  0xfe   : > { %v1634_v41 = vmax.f32 %v1632_v38, %v1633_v20  ;;  %v1540_v46 = vadd.f32 %v1539_v26, %v1477_v62  ;;  %v1639_v27 = vmax.f32 %v3066_v56, %v3070_v22  ;;  %v1646_v48 = vmax.f32 %v3074_v35, %v3072_v23  ;;  %v3084_v38 = vpop.f32.mrf.mxu2 }
  0xff   : > { %v1406_v29 = vadd.f32 %v1405_v40, %v1342_v30  ;;  %v1617_v50 = vmax.f32 %v1615_v17, %v1616_v44  ;;  %v1624_v52 = vmax.f32 %v1622_v18, %v1623_v37  ;;  %v1629_v54 = vmax.f32 %v1627_v19, %v1628_v45 }
 0x100   : > { %v1635_v28 = vrot.slane %v1634_v41, 2  ;;  %v1541_v60 = vadd.f32 %v1540_v46, %v1478_v8  ;;  %v1640_v0 = vrot.slane %v1639_v27, 4  ;;  %v1647_v1 = vrot.slane %v1646_v48, 4 }
 0x101   : > { %v1407_v58 = vadd.f32 %v1406_v29, %v3052_v31  ;;  %v1630_v4 = vrot.slane %v1629_v54, 1  ;;  %v1868_v30 = vsel %vm1867_vm1, %v1624_v52, %v1617_v50  ;;  %v1922_v14 = vmin.f32 %v1920_v10, %v1921_v34 }
 0x102   : > { %v1636_v5 = vmax.f32 %v1634_v41, %v1635_v28  ;;  %v1542_v7 = vadd.f32 %v1541_v60, %v1479_v36  ;;  %v1641_v9 = vmax.f32 %v1639_v27, %v1640_v0  ;;  %v1648_v11 = vmax.f32 %v1646_v48, %v1647_v1 }
 0x103   : > { %v3087_v6 = vadd.f32 %v1407_v58, %v3054_v32  ;;  %v1481_v31 = vmul.f32 %v3054_v32, %v3054_v32  ;;  %v1631_v62 = vmax.f32 %v1629_v54, %v1630_v4  ;;  %v1933_v18 = vrot.slane %v3064_v42, 4 }
 0x104   : > { %v1637_v13 = vrot.slane %v1636_v5, 1  ;;  %v1543_v15 = vadd.f32 %v1542_v7, %v1480_v25  ;;  %v1642_v16 = vrot.slane %v1641_v9, 2  ;;  %v1649_v17 = vrot.slane %v1648_v11, 2 }
 0x105   : > { %v1870_v20 = vsel %vm1869_vm2, %v1631_v62, %v1868_v30  ;;  %v1916_v40 = vrot.slane %v1915_v39, 1  ;;  %v1923_v34 = vrot.slane %v1922_v14, 1  ;;  %v1928_v32 = vrot.slane %v1927_v21, 2 }
 0x106   : > { %v1638_v19 = vmax.f32 %v1636_v5, %v1637_v13  ;;  %v3093_v24 = vadd.f32 %v1543_v15, %v1481_v31  ;;  %v1643_v8 = vmax.f32 %v1641_v9, %v1642_v16  ;;  %v1650_v36 = vmax.f32 %v1648_v11, %v1649_v17  ;;  %v3101_v28 = vpop.f32.mrf.mxu2 }
 0x107   : > { %v1924_v25 = vmin.f32 %v1922_v14, %v1923_v34  ;;  %v1929_v37 = vmin.f32 %v1927_v21, %v1928_v32  ;;  %v1934_v45 = vmin.f32 %v3064_v42, %v1933_v18  ;;  %v1939_v41 = vmin.f32 %v3066_v56, %v3070_v22  ;;  %v3117_v32 = vpop.f32.mrf.mxu3 }
 0x108   : > { %v1872_v10 = vsel %vm1871_vm3, %v1638_v19, %v1870_v20  ;;  %v1644_v26 = vrot.slane %v1643_v8, 1  ;;  %v1651_v44 = vrot.slane %v1650_v36, 1  ;;  %v1917_v27 = vmin.f32 %v1915_v39, %v1916_v40 }
 0x109   : > { %v1930_v48 = vrot.slane %v1929_v37, 1  ;;  %v1935_v50 = vrot.slane %v1934_v45, 2  ;;  %v1940_v52 = vrot.slane %v1939_v41, 4  ;;  %v1946_v54 = vmin.f32 %v3074_v35, %v3072_v23 }
 0x10a   : > { %v1645_v29 = vmax.f32 %v1643_v8, %v1644_v26  ;;  %v1652_v46 = vmax.f32 %v1650_v36, %v1651_v44  ;;  %v2167_v21 = vsel %vm1867_vm1, %v1924_v25, %v1917_v27  ;;  %v781_v36 = vpop.f32.mrf.mxu0 }
 0x10b   : > { %v1931_v60 = vmin.f32 %v1929_v37, %v1930_v48  ;;  %v1936_v0 = vmin.f32 %v1934_v45, %v1935_v50  ;;  %v1941_v1 = vmin.f32 %v1939_v41, %v1940_v52  ;;  %v1947_v4 = vrot.slane %v1946_v54, 4  ;;  %v1236_v45 = vpop.permute.xlu0 %1235 }
 0x10c   : > { %v1874_v58 = vsel %vm1873_vm4, %v1645_v29, %v1872_v10  ;;  %v991_v10 = vrot.slane %v3044_v3, 6 }
 0x10d   : > { %v1876_v42 = vsel %vm1875_vm5, %v1652_v46, %v1874_v58  ;;  %v1937_v5 = vrot.slane %v1936_v0, 1  ;;  %v1942_v39 = vrot.slane %v1941_v1, 2  ;;  %v2168_v30 = vsel %vm1869_vm2, %v1931_v60, %v2167_v21 }
 0x10e   : > { %v1948_v7 = vmin.f32 %v1946_v54, %v1947_v4  ;;  %v3108_v16 = vpop.f32.mrf.mxu2  ;;  %v1020_v34 = vperm.slane %v991_v10, 0 }
 0x10f   : > { %v1938_v9 = vmin.f32 %v1936_v0, %v1937_v5  ;;  %v1943_v11 = vmin.f32 %v1941_v1, %v1942_v39  ;;  %v3127_v27 = vpop.f32.mrf.mxu3 }
 0x110   : > { %v1949_v14 = vrot.slane %v1948_v7, 2  ;;  %v1090_v44 = vadd.f32 %v1020_v34, %v781_v36 }
 0x111   : > { %v1944_v31 = vrot.slane %v1943_v11, 1  ;;  %v2169_v62 = vsel %vm1871_vm3, %v1938_v9, %v2168_v30 }
 0x112   : > { %v1950_v13 = vmin.f32 %v1948_v7, %v1949_v14  ;;  %v783_v26 = vpop.f32.mrf.mxu0  ;;  %v3121_v41 = vmul.f32 %v1236_v45, %v1090_v44 }
 0x113   : > { %v1945_v15 = vmin.f32 %v1943_v11, %v1944_v31  ;;  %v1091_v37 = vadd.f32 %v1020_v34, %v783_v26  ;;  %v3158_v36 = vpop.permute.xlu0 %1247  ;;  %v1483_v34 = vmul.f32 %v3066_v56, %v3066_v56 }
 0x114   : > { %v1951_v17 = vrot.slane %v1950_v13, 1 }
 0x115   : > { %v2170_v18 = vsel %vm1873_vm4, %v1945_v15, %v2169_v62  ;;  %v3123_v29 = vmul.f32 %v1236_v45, %v1091_v37  ;;  %v3163_v37 = vpop.f32.mrf.mxu1 }
 0x116   : > { %v1952_v19 = vmin.f32 %v1950_v13, %v1951_v17  ;;  %v3112_v8 = vpop.f32.mrf.mxu2  ;;  %v3145_v13 = vpop.permute.xlu1 %1239  ;;  %v1482_v17 = vmul.f32 %v3056_v33, %v3056_v33 }
 0x117   : > { %v1653_v46 = vmax.f32 %v3121_v41, %v3123_v29  ;;  %v1953_v48 = vmin.f32 %v3121_v41, %v3123_v29  ;;  %v3133_v39 = vpop.f32.mrf.mxu3 }
 0x118   : > { %v2171_v20 = vsel %vm1875_vm5, %v1952_v19, %v2170_v18  ;;  %3917 = vst [vmem:[#allocation6_spill] sm:$0xff] %v3133_v39  ;;  %v1409_v18 = vadd.f32 %v3087_v6, %v3056_v33  ;;  %v3153_v19 = vpop.permute.xlu2 %1243  ;;  %v1484_v33 = vmul.f32 %v3070_v22, %v3070_v22 }
 0x119   : > { %v1654_v50 = vrot.slane %v1653_v46, 4  ;;  %v1954_v52 = vrot.slane %v1953_v48, 4 }
 0x11a   : > { %v1410_v26 = vadd.f32 %v1409_v18, %v3066_v56 }
 0x11b   : > { %v1655_v54 = vmax.f32 %v1653_v46, %v1654_v50  ;;  %v1955_v58 = vmin.f32 %v1953_v48, %v1954_v52  ;;  %v993_v48 = vrot.slane %v3163_v37, 1  ;;  %v995_v50 = vrot.slane %v3163_v37, 3 }
 0x11c   : > { %v1411_v6 = vadd.f32 %v1410_v26, %v3070_v22  ;;  %v996_v52 = vrot.slane %v3163_v37, 4 }
 0x11d   : > { %v1656_v60 = vrot.slane %v1655_v54, 2  ;;  %v1956_v0 = vrot.slane %v1955_v58, 2  ;;  %v1025_v18 = vperm.slane %v995_v50, 0 }
 0x11e   : > { %v3114_v40 = vpop.f32.mrf.mxu2  ;;  %v1252_v10 = vpop.permute.xlu1 %1251  ;;  %v1412_v22 = vadd.f32 %v1411_v6, %v3074_v35 }
 0x11f   : > { %v1657_v1 = vmax.f32 %v1655_v54, %v1656_v60  ;;  %v1957_v4 = vmin.f32 %v1955_v58, %v1956_v0  ;;  %v3143_v62 = vpop.f32.mrf.mxu3  ;;  %v1485_v54 = vmul.f32 %v3074_v35, %v3074_v35  ;;  %v997_v58 = vrot.slane %v3163_v37, 5  ;;  %v786_v0 = vpop.f32.mrf.mxu0 }
 0x120   : > { %3918 = vst [vmem:[#allocation7_spill] sm:$0xff] %v3143_v62  ;;  %v1256_v56 = vpop.permute.xlu2 %1255  ;;  %v998_v60 = vrot.slane %v3163_v37, 6 }
 0x121   : > { %v1658_v5 = vrot.slane %v1657_v1, 1  ;;  %v1958_v30 = vrot.slane %v1957_v4, 1  ;;  %v1027_v26 = vperm.slane %v997_v58, 0 }
 0x123   : > { %v1659_v7 = vmax.f32 %v1657_v1, %v1658_v5  ;;  %v1959_v9 = vmin.f32 %v1957_v4, %v1958_v30  ;;  %v999_v4 = vrot.slane %v3163_v37, 7  ;;  %v1260_v30 = vpop.permute.xlu0 %1259 }
 0x125   : > { %v3136_v11 = vsel %vm1877_vm6, %v1659_v7, %v1876_v42  ;;  %v3139_v14 = vsel %vm1877_vm6, %v1959_v9, %v2171_v20  ;;  %v1545_v42 = vadd.f32 %v3093_v24, %v1482_v17  ;;  %v994_v24 = vrot.slane %v3163_v37, 2 }
 0x126   : > { %v3119_v25 = vpop.f32.mrf.mxu2  ;;  %v1264_v7 = vpop.permute.xlu1 %1263  ;;  %v1023_v17 = vperm.slane %v993_v48, 0  ;;  %v1029_v2 = vperm.slane %v999_v4, 0  ;;  %v1100_v48 = vadd.f32 %v1025_v18, %v3032_v53 }
 0x127   : > { %v3156_v20 = vpop.f32.mrf.mxu3  ;;  %v1546_v44 = vadd.f32 %v1545_v42, %v1483_v34  ;;  %v1024_v5 = vperm.slane %v994_v24, 0  ;;  %v1026_v42 = vperm.slane %v996_v52, 0  ;;  %v1486_v34 = vmul.f32 %v3072_v23, %v3072_v23 }
 0x128   : > { %3919 = vst [vmem:[#allocation8_spill] sm:$0xff] %v3156_v20  ;;  %v3191_v24 = vadd.f32 %v1023_v17, %v3019_v43  ;;  %v3196_v52 = vadd.f32 %v1023_v17, %v3026_v47  ;;  %v1105_v43 = vadd.f32 %v1027_v26, %v3042_v63  ;;  %v1109_v47 = vadd.f32 %v1029_v2, %v3108_v16 }
 0x129   : > { %v1547_v46 = vadd.f32 %v1546_v44, %v1484_v33  ;;  %v1028_v44 = vperm.slane %v998_v60, 0  ;;  %v3185_v33 = vadd.f32 %v1412_v22, %v3072_v23  ;;  %v1098_v35 = vadd.f32 %v1024_v5, %v3028_v49  ;;  %v3201_v49 = vpop.f32.mrf.mxu1 }
 0x12a   : > { %v1102_v23 = vadd.f32 %v1026_v42, %v3036_v57  ;;  %v1103_v58 = vadd.f32 %v1026_v42, %v3038_v59  ;;  %v1104_v60 = vadd.f32 %v1027_v26, %v3040_v61  ;;  %v1108_v22 = vadd.f32 %v1029_v2, %v3101_v28  ;;  %v1268_v57 = vpop.permute.xlu2 %1267 }
 0x12b   : > { %v1548_v9 = vadd.f32 %v1547_v46, %v1485_v54  ;;  %v1099_v46 = vadd.f32 %v1024_v5, %v3030_v51  ;;  %v1101_v54 = vadd.f32 %v1025_v18, %v3034_v55  ;;  %v1106_v51 = vadd.f32 %v1028_v44, %v3068_v12  ;;  %v788_v12 = vpop.f32.mrf.mxu0 }
 0x12c   : > { %v1107_v53 = vadd.f32 %v1028_v44, %v3084_v38  ;;  %v3209_v4 = vmul.f32 %v1252_v10, %v1098_v35  ;;  %v992_v55 = vrot.slane %v3044_v3, 7  ;;  %v3214_v5 = vmul.f32 %v1256_v56, %v1100_v48  ;;  %v1272_v3 = vpop.permute.xlu0 %1271 }
 0x12d   : > { %v3188_v6 = vadd.f32 %v1548_v9, %v1486_v34  ;;  %v3212_v59 = vmul.f32 %v1252_v10, %v1099_v46  ;;  %v1000_v61 = vrot.slane %v3201_v49, 1  ;;  %v1001_v63 = vrot.slane %v3201_v49, 2 }
 0x12e   : > { %v3131_v21 = vpop.f32.mrf.mxu2  ;;  %3921 = vst [vmem:[#allocation10_spill] sm:$0xff] %v3209_v4  ;;  %v3220_v38 = vmul.f32 %v1256_v56, %v1101_v54  ;;  %v1002_v2 = vrot.slane %v3201_v49, 3  ;;  %v1030_v28 = vperm.slane %v3201_v49, 0  ;;  %v1021_v16 = vperm.slane %v992_v55, 0  ;;  %v1276_v17 = vpop.permute.xlu1 %1275 }
 0x12f   : > { %v3178_v1 = vpop.f32.mrf.mxu3  ;;  %3922 = vst [vmem:[#allocation11_spill] sm:$0xff] %v3212_v59  ;;  %v3224_v10 = vmul.f32 %v1264_v7, %v1104_v60  ;;  %v3226_v18 = vmul.f32 %v1264_v7, %v1105_v43  ;;  %v3228_v42 = vmul.f32 %v1268_v57, %v1106_v51  ;;  %v3230_v34 = vmul.f32 %v1268_v57, %v1107_v53 }
 0x130   : > { %3920 = vst [vmem:[#allocation9_spill] sm:$0xff] %v3178_v1  ;;  %v3232_v26 = vmul.f32 %v1272_v3, %v1108_v22  ;;  %v1006_v56 = vrot.slane %v3201_v49, 7  ;;  %v1092_v44 = vadd.f32 %v1021_v16, %v786_v0  ;;  %v1093_v35 = vadd.f32 %v1021_v16, %v788_v12 }
 0x131   : > { %3923 = vst [vmem:[#allocation12_spill] sm:$0xff] %v3214_v5  ;;  %v3235_v46 = vmul.f32 %v1260_v30, %v1102_v23  ;;  %v3237_v48 = vmul.f32 %v1260_v30, %v1103_v58  ;;  %v1031_v54 = vperm.slane %v1000_v61, 0  ;;  %v1032_v55 = vperm.slane %v1001_v63, 0 }
 0x132   : > { %3925 = vst [vmem:[#allocation14_spill] sm:$0xff] %v3232_v26  ;;  %v1033_v60 = vperm.slane %v1002_v2, 0  ;;  %v1110_v7 = vadd.f32 %v1030_v28, %v3112_v8  ;;  %v1111_v43 = vadd.f32 %v1030_v28, %v3114_v40  ;;  %v3242_v51 = vmul.f32 %v3145_v13, %v1093_v35 }
 0x133   : > { %v3244_v53 = vmul.f32 %v1272_v3, %v1109_v47  ;;  %v3248_v0 = vmul.f32 %v3224_v10, %v3224_v10  ;;  %v3252_v30 = vmul.f32 %v3226_v18, %v3226_v18  ;;  %v3257_v58 = vmul.f32 %v3145_v13, %v1092_v44  ;;  %v1280_v3 = vpop.permute.xlu2 %1279 }
 0x134   : > { %v3261_v8 = vmul.f32 %v3228_v42, %v3228_v42  ;;  %v3265_v40 = vmul.f32 %v3230_v34, %v3230_v34  ;;  %v3269_v22 = vmul.f32 %v3232_v26, %v3232_v26  ;;  %v1037_v47 = vperm.slane %v1006_v56, 0 }
 0x135   : > { %v1112_v57 = vadd.f32 %v1031_v54, %v3119_v25  ;;  %v1113_v61 = vadd.f32 %v1031_v54, %v3131_v21  ;;  %v1660_v63 = vmax.f32 %v3257_v58, %v3242_v51  ;;  %v3278_v28 = vmul.f32 %v1276_v17, %v1110_v7  ;;  %v791_v54 = vpop.f32.mrf.mxu0 }
 0x136   : > { %v3141_v31 = vpop.f32.mrf.mxu2  ;;  %3926 = vst [vmem:[#allocation15_spill] sm:$0xff] %v3269_v22  ;;  %v3280_v16 = vmul.f32 %v1276_v17, %v1111_v43  ;;  %v3284_v56 = vmul.f32 %v3244_v53, %v3244_v53  ;;  %v3295_v17 = vadd.f32 %v1037_v47, %v3117_v32  ;;  %v1003_v35 = vrot.slane %v3201_v49, 4 }
 0x137   : > { %v3218_v9 = vpop.f32.mrf.mxu3  ;;  %v1114_v13 = vadd.f32 %v1032_v55, %v3141_v31  ;;  %v1661_v21 = vrot.slane %v1660_v63, 4  ;;  %v1960_v31 = vmin.f32 %v3257_v58, %v3242_v51  ;;  %v3300_v7 = vmul.f32 %v1280_v3, %v1113_v61 }
 0x138   : > { %3924 = vst [vmem:[#allocation13_spill] sm:$0xff] %v3218_v9  ;;  %v1723_v32 = vmax.f32 %v3278_v28, %v3280_v16 }
 0x139   : > { %3927 = vst [vmem:[#allocation16_spill] sm:$0xff] %v3280_v16  ;;  %v1662_v43 = vmax.f32 %v1660_v63, %v1661_v21  ;;  %v3315_v63 = vadd.f32 %v1037_v47, %v3127_v27  ;;  %v3331_v27 = vmul.f32 %v3300_v7, %v3300_v7 }
 0x13a   : > { %3928 = vst [vmem:[#allocation17_spill] sm:$0xff] %v3284_v56  ;;  %v1724_v47 = vrot.slane %v1723_v32, 4 }
 0x13b   : > { %v1663_v20 = vrot.slane %v1662_v43, 2  ;;  %3935 = vst [vmem:[#allocation24_spill] sm:$0xff] %v3331_v27 }
 0x13d   : > { %v793_v22 = vpop.f32.mrf.mxu0 }
 0x13e   : > { %v3147_v15 = vpop.f32.mrf.mxu2 }
 0x13f   : > { %v1115_v12 = vadd.f32 %v1032_v55, %v3147_v15  ;;  %v3288_v44 = vpop.f32.mrf.mxu3  ;;  %v1414_v15 = vadd.f32 %v3185_v33, %v3121_v41  ;;  %v1284_v55 = vpop.permute.xlu0 %1283 }
 0x140   : > { %3929 = vst [vmem:[#allocation18_spill] sm:$0xff] %v3288_v44  ;;  %v1961_v44 = vrot.slane %v1960_v31, 4  ;;  %v3302_v9 = vmul.f32 %v1284_v55, %v1114_v13  ;;  %v3319_v13 = vmul.f32 %v3278_v28, %v3278_v28 }
 0x141   : > { %v3304_v33 = vmul.f32 %v1284_v55, %v1115_v12  ;;  %v3323_v12 = vmul.f32 %v3280_v16, %v3280_v16  ;;  %v2023_v55 = vmin.f32 %v3278_v28, %v3280_v16  ;;  %v1415_v39 = vadd.f32 %v1414_v15, %v3123_v29 }
 0x142   : > { %v1962_v62 = vmin.f32 %v1960_v31, %v1961_v44  ;;  %3932 = vst [vmem:[#allocation21_spill] sm:$0xff] %v3319_v13 }
 0x143   : > { %3933 = vst [vmem:[#allocation22_spill] sm:$0xff] %v3323_v12  ;;  %v3341_v44 = vmax.f32 %v3302_v9, %v3304_v33  ;;  %v3363_v13 = vmin.f32 %v3302_v9, %v3304_v33  ;;  %v1416_v16 = vadd.f32 %v1415_v39, %v3257_v58 }
 0x146   : > { %v3165_v45 = vpop.f32.mrf.mxu2 }
 0x147   : > { %v1116_v2 = vadd.f32 %v1033_v60, %v3165_v45  ;;  %v1487_v45 = vmul.f32 %v3121_v41, %v3121_v41  ;;  %v3357_v12 = vpop.f32.mrf.mxu3 }
 0x148   : > { %3937 = vst [vmem:[#allocation26_spill] sm:$0xff] %v3357_v12 }
 0x149   : > { %v1550_v61 = vadd.f32 %v3188_v6, %v1487_v45  ;;  %v3335_v6 = vmul.f32 %v3302_v9, %v3302_v9 }
 0x14b   : > { %3936 = vst [vmem:[#allocation25_spill] sm:$0xff] %v3335_v6 }
 0x14e   : > { %v848_v50 = vpop.f32.mrf.mxu2 }
 0x14f   : > { %v1117_v25 = vadd.f32 %v1033_v60, %v848_v50  ;;  %v1288_v50 = vpop.permute.xlu1 %1287  ;;  %v3298_v60 = vmul.f32 %v1280_v3, %v1112_v57  ;;  %v1022_v57 = vperm.slane %v3163_v37, 0  ;;  %v1963_v37 = vrot.slane %v1962_v62, 2 }
 0x150   : > { %v3306_v1 = vmul.f32 %v1288_v50, %v1116_v2 }
 0x151   : > { %v3310_v41 = vmul.f32 %v1288_v50, %v1117_v25  ;;  %v3327_v2 = vmul.f32 %v3298_v60, %v3298_v60  ;;  %v1664_v25 = vmax.f32 %v1662_v43, %v1663_v20  ;;  %v1094_v21 = vadd.f32 %v1022_v57, %v791_v54 }
 0x152   : > { %3930 = vst [vmem:[#allocation19_spill] sm:$0xff] %v3306_v1  ;;  %v1730_v31 = vmax.f32 %v3298_v60, %v3300_v7  ;;  %v1964_v54 = vmin.f32 %v1962_v62, %v1963_v37  ;;  %v1488_v50 = vmul.f32 %v3123_v29, %v3123_v29  ;;  %v1489_v43 = vmul.f32 %v3257_v58, %v3257_v58 }
 0x153   : > { %3931 = vst [vmem:[#allocation20_spill] sm:$0xff] %v3310_v41  ;;  %v3345_v20 = vmax.f32 %v3306_v1, %v3310_v41  ;;  %v1665_v45 = vrot.slane %v1664_v25, 1  ;;  %v1725_v62 = vmax.f32 %v1723_v32, %v1724_v47  ;;  %v2030_v37 = vmin.f32 %v3298_v60, %v3300_v7 }
 0x154   : > { %3934 = vst [vmem:[#allocation23_spill] sm:$0xff] %v3327_v2  ;;  %v1965_v27 = vrot.slane %v1964_v54, 1  ;;  %v3355_v2 = vmul.f32 %v3153_v19, %v1094_v21  ;;  %v1551_v56 = vadd.f32 %v1550_v61, %v1488_v50  ;;  %v1490_v29 = vmul.f32 %v3242_v51, %v3242_v51 }
 0x155   : > { %v1666_v6 = vmax.f32 %v1664_v25, %v1665_v45  ;;  %v2024_v32 = vrot.slane %v2023_v55, 4  ;;  %v3374_v21 = vmin.f32 %v3306_v1, %v3310_v41  ;;  %v1034_v47 = vperm.slane %v1003_v35, 0 }
 0x156   : > { %v3254_v23 = vpop.f32.mrf.mxu2  ;;  %v1966_v25 = vmin.f32 %v1964_v54, %v1965_v27  ;;  %v1552_v45 = vadd.f32 %v1551_v56, %v1489_v43  ;;  %v1417_v61 = vadd.f32 %v1416_v16, %v3242_v51  ;;  %v1491_v58 = vmul.f32 %v3355_v2, %v3355_v2 }
 0x157   : > { %v3370_v15 = vsel %vm1879_vm7, %v1666_v6, %v3136_v11  ;;  %v1095_v50 = vadd.f32 %v1022_v57, %v793_v22  ;;  %v1726_v11 = vrot.slane %v1725_v62, 2  ;;  %v1731_v6 = vrot.slane %v1730_v31, 4 }
 0x158   : > { %3938 = vst [vmem:[#allocation27_spill] sm:$0xff] %v3370_v15  ;;  %v3379_v39 = vsel %vm1879_vm7, %v1966_v25, %v3139_v14  ;;  %v1738_v27 = vrot.slane %v3341_v44, 4  ;;  %v2031_v54 = vrot.slane %v2030_v37, 4  ;;  %v3384_v15 = vpop.f32.mrf.mxu1  ;;  %v1553_v56 = vadd.f32 %v1552_v45, %v1490_v29 }
 0x159   : > { %3939 = vst [vmem:[#allocation28_spill] sm:$0xff] %v3379_v39  ;;  %v1418_v51 = vadd.f32 %v1417_v61, %v3355_v2  ;;  %v1355_v16 = vmul.f32 %v3153_v19, %v1095_v50  ;;  %v1356_v14 = vmul.f32 %v3158_v36, %v3191_v24  ;;  %v2025_v35 = vmin.f32 %v2023_v55, %v2024_v32  ;;  %v1292_v50 = vpop.permute.xlu2 %1291 }
 0x15a   : > { %v1118_v22 = vadd.f32 %v1034_v47, %v3254_v23  ;;  %v1357_v43 = vmul.f32 %v3158_v36, %v3196_v52  ;;  %v1554_v39 = vadd.f32 %v1553_v56, %v1491_v58  ;;  %v1732_v29 = vmax.f32 %v1730_v31, %v1731_v6 }
 0x15b   : > { %v1419_v41 = vadd.f32 %v1418_v51, %v1355_v16  ;;  %v1492_v1 = vmul.f32 %v1355_v16, %v1355_v16  ;;  %v3396_v45 = vmin.f32 %v2030_v37, %v2031_v54  ;;  %v1727_v61 = vmax.f32 %v1725_v62, %v1726_v11 }
 0x15c   : > { %v1493_v55 = vmul.f32 %v1356_v14, %v1356_v14  ;;  %v1667_v23 = vmax.f32 %v3355_v2, %v1355_v16  ;;  %v2026_v36 = vrot.slane %v2025_v35, 2  ;;  %v3402_v52 = vmul.f32 %v1292_v50, %v1118_v22 }
 0x15d   : > { %v1420_v24 = vadd.f32 %v1419_v41, %v1356_v14  ;;  %v1555_v32 = vadd.f32 %v1554_v39, %v1492_v1  ;;  %v1674_v58 = vmax.f32 %v1356_v14, %v1357_v43  ;;  %v1494_v37 = vmul.f32 %v1357_v43, %v1357_v43 }
 0x15e   : > { %v853_v3 = vpop.f32.mrf.mxu2  ;;  %v1668_v54 = vrot.slane %v1667_v23, 4  ;;  %v1728_v11 = vrot.slane %v1727_v61, 1  ;;  %v1733_v41 = vrot.slane %v1732_v29, 2  ;;  %v1495_v39 = vmul.f32 %v3209_v4, %v3209_v4 }
 0x15f   : > { %v1119_v57 = vadd.f32 %v1034_v47, %v853_v3  ;;  %v3400_v3 = vpop.f32.mrf.mxu3  ;;  %v1421_v31 = vadd.f32 %v1420_v24, %v1357_v43  ;;  %v1556_v6 = vadd.f32 %v1555_v32, %v1493_v55  ;;  %v1675_v56 = vrot.slane %v1674_v58, 4 }
 0x160   : > { %3940 = vst [vmem:[#allocation29_spill] sm:$0xff] %v3400_v3  ;;  %v1669_v22 = vmax.f32 %v1667_v23, %v1668_v54  ;;  %v1967_v23 = vmin.f32 %v3355_v2, %v1355_v16  ;;  %v1974_v3 = vmin.f32 %v1356_v14, %v1357_v43  ;;  %v1500_v14 = vmul.f32 %v3237_v48, %v3237_v48 }
 0x161   : > { %v3404_v47 = vmul.f32 %v1292_v50, %v1119_v57  ;;  %v1422_v1 = vadd.f32 %v1421_v31, %v3209_v4  ;;  %v1557_v51 = vadd.f32 %v1556_v6, %v1494_v37  ;;  %v3411_v57 = vmax.f32 %v3341_v44, %v1738_v27 }
 0x162   : > { %v1745_v50 = vrot.slane %v3345_v20, 4  ;;  %v1676_v55 = vmax.f32 %v1674_v58, %v1675_v56  ;;  %v1496_v31 = vmul.f32 %v3212_v59, %v3212_v59  ;;  %v1670_v25 = vrot.slane %v1669_v22, 2 }
 0x163   : > { %v3416_v24 = vmax.f32 %v3402_v52, %v3404_v47  ;;  %v1423_v62 = vadd.f32 %v1422_v1, %v3212_v59  ;;  %v1558_v19 = vadd.f32 %v1557_v51, %v1495_v39  ;;  %v3421_v37 = vmin.f32 %v2025_v35, %v2026_v36 }
 0x164   : > { %v1004_v44 = vrot.slane %v3201_v49, 5  ;;  %v1677_v27 = vrot.slane %v1676_v55, 2  ;;  %v1497_v58 = vmul.f32 %v3214_v5, %v3214_v5  ;;  %v1671_v56 = vmax.f32 %v1669_v22, %v1670_v25 }
 0x165   : > { %v1424_v6 = vadd.f32 %v1423_v62, %v3214_v5  ;;  %v1559_v54 = vadd.f32 %v1558_v19, %v1496_v31  ;;  %v3428_v1 = vmax.f32 %v1727_v61, %v1728_v11  ;;  %v1498_v39 = vmul.f32 %v3220_v38, %v3220_v38 }
 0x166   : > { %v3386_v12 = vpop.f32.mrf.mxu2  ;;  %v1678_v51 = vmax.f32 %v1676_v55, %v1677_v27  ;;  %v1968_v35 = vrot.slane %v1967_v23, 4  ;;  %v1672_v59 = vrot.slane %v1671_v56, 1  ;;  %v1035_v16 = vperm.slane %v1004_v44, 0 }
 0x167   : > { %v1425_v36 = vadd.f32 %v1424_v6, %v3220_v38  ;;  %v1560_v4 = vadd.f32 %v1559_v54, %v1497_v58  ;;  %v3433_v2 = vpop.f32.mrf.mxu3  ;;  %v1499_v62 = vmul.f32 %v3235_v46, %v3235_v46  ;;  %v1975_v31 = vrot.slane %v1974_v3, 4 }
 0x168   : > { %v1679_v19 = vrot.slane %v1678_v51, 1  ;;  %v1969_v25 = vmin.f32 %v1967_v23, %v1968_v35  ;;  %v1673_v22 = vmax.f32 %v1671_v56, %v1672_v59  ;;  %v1734_v55 = vmax.f32 %v1732_v29, %v1733_v41  ;;  %v1296_v59 = vpop.permute.xlu0 %1295 }
 0x169   : > { %v1426_v61 = vadd.f32 %v1425_v36, %v3235_v46  ;;  %v1561_v11 = vadd.f32 %v1560_v4, %v1498_v39  ;;  %v1976_v44 = vmin.f32 %v1974_v3, %v1975_v31  ;;  %v2033_v54 = vrot.slane %v3396_v45, 2 }
 0x16a   : > { %v1680_v5 = vmax.f32 %v1678_v51, %v1679_v19  ;;  %v1970_v6 = vrot.slane %v1969_v25, 2  ;;  %v1120_v23 = vadd.f32 %v1035_v16, %v3386_v12  ;;  %v3942_v29 = vrot.slane %v3363_v13, 4 }
 0x16b   : > { %v1427_v58 = vadd.f32 %v1426_v61, %v3237_v48  ;;  %v1562_v43 = vadd.f32 %v1561_v11, %v1499_v62  ;;  %v1977_v51 = vrot.slane %v1976_v44, 2  ;;  %v1740_v3 = vrot.slane %v3411_v57, 2 }
 0x16c   : > { %v3444_v35 = vsel %vm1867_vm1, %v1680_v5, %v1673_v22  ;;  %v1971_v4 = vmin.f32 %v1969_v25, %v1970_v6  ;;  %v2039_v41 = vmin.f32 %v3363_v13, %v3942_v29  ;;  %v1746_v36 = vmax.f32 %v3345_v20, %v1745_v50 }
 0x16d   : > { %3941 = vst [vmem:[#allocation30_spill] sm:$0xff] %v3444_v35  ;;  %v1428_v56 = vadd.f32 %v1427_v58, %v3224_v10  ;;  %v1563_v39 = vadd.f32 %v1562_v43, %v1500_v14  ;;  %v1978_v13 = vmin.f32 %v1976_v44, %v1977_v51  ;;  %v1735_v25 = vrot.slane %v1734_v55, 1 }
 0x16e   : > { %v858_v32 = vpop.f32.mrf.mxu2  ;;  %v1972_v5 = vrot.slane %v1971_v4, 1  ;;  %v2028_v61 = vrot.slane %v3421_v37, 1  ;;  %v2051_v11 = vmin.f32 %v3402_v52, %v3404_v47  ;;  %v3462_v22 = vmul.f32 %v1296_v59, %v1120_v23 }
 0x16f   : > { %v1121_v27 = vadd.f32 %v1035_v16, %v858_v32  ;;  %v1752_v16 = vrot.slane %v3416_v24, 4  ;;  %v1429_v62 = vadd.f32 %v1428_v56, %v3226_v18  ;;  %v1564_v19 = vadd.f32 %v1563_v39, %v3248_v0  ;;  %v3466_v6 = vpop.f32.mrf.mxu3  ;;  %v1304_v56 = vpop.permute.xlu2 %1303 }
 0x170   : > { %v2034_v20 = vmin.f32 %v3396_v45, %v2033_v54  ;;  %v1973_v31 = vmin.f32 %v1971_v4, %v1972_v5  ;;  %v1741_v58 = vmax.f32 %v3411_v57, %v1740_v3  ;;  %v2040_v0 = vrot.slane %v2039_v41, 2 }
 0x171   : > { %v3454_v12 = vmul.f32 %v1296_v59, %v1121_v27  ;;  %v1430_v50 = vadd.f32 %v1429_v62, %v3228_v42  ;;  %v1979_v27 = vrot.slane %v1978_v13, 1  ;;  %v2045_v14 = vrot.slane %v3374_v21, 4 }
 0x172   : > { %v1747_v44 = vrot.slane %v1746_v36, 2  ;;  %v1565_v59 = vadd.f32 %v1564_v19, %v3252_v30  ;;  %v1753_v54 = vmax.f32 %v3416_v24, %v1752_v16  ;;  %v2052_v4 = vrot.slane %v2051_v11, 4 }
 0x173   : > { %v1758_v43 = vmax.f32 %v3462_v22, %v3454_v12  ;;  %v1431_v23 = vadd.f32 %v1430_v50, %v3230_v34  ;;  %v1980_v45 = vmin.f32 %v1978_v13, %v1979_v27  ;;  %v2058_v29 = vmin.f32 %v3462_v22, %v3454_v12 }
 0x174   : > { %v1005_v57 = vrot.slane %v3201_v49, 6  ;;  %v1736_v39 = vmax.f32 %v1734_v55, %v1735_v25  ;;  %v2029_v51 = vmin.f32 %v3421_v37, %v2028_v61  ;;  %v2035_v62 = vrot.slane %v2034_v20, 1 }
 0x175   : > { %v1432_v3 = vadd.f32 %v1431_v23, %v3232_v26  ;;  %v3481_v5 = vsel %vm1867_vm1, %v1980_v45, %v1973_v31  ;;  %v1759_v30 = vrot.slane %v1758_v43, 4  ;;  %v3484_v19 = vmul.f32 %v1304_v56, %v3295_v17 }
 0x176   : > { %v3449_v32 = vpop.f32.mrf.mxu2  ;;  %3943 = vst [vmem:[#allocation31_spill] sm:$0xff] %v3481_v5  ;;  %v3487_v24 = vmul.f32 %v1304_v56, %v3315_v63  ;;  %v2041_v16 = vmin.f32 %v2039_v41, %v2040_v0  ;;  %v2046_v49 = vmin.f32 %v3374_v21, %v2045_v14  ;;  %v1566_v55 = vadd.f32 %v1565_v59, %v3261_v8  ;;  %v3944_v59 = vld [vmem:[#allocation16_spill] sm:$0xff] }
 0x177   : > { %v1433_v37 = vadd.f32 %v1432_v3, %v3244_v53  ;;  %v1742_v25 = vrot.slane %v1741_v58, 1  ;;  %v2053_v61 = vmin.f32 %v2051_v11, %v2052_v4  ;;  %v2059_v50 = vrot.slane %v2058_v29, 4 }
 0x178   : > { %v1036_v31 = vperm.slane %v1005_v57, 0  ;;  %v1748_v27 = vmax.f32 %v1746_v36, %v1747_v44  ;;  %v1754_v23 = vrot.slane %v1753_v54, 2  ;;  %v1888_v17 = vsel %vm1867_vm1, %v1736_v39, %v3428_v1  ;;  %v3501_v44 = vpop.f32.mrf.mxu3  ;;  %v1300_v57 = vpop.permute.xlu1 %1299 }
 0x179   : > { %v1434_v63 = vadd.f32 %v1433_v37, %v3278_v28  ;;  %v1760_v45 = vmax.f32 %v1758_v43, %v1759_v30  ;;  %v1772_v21 = vmax.f32 %v3484_v19, %v3487_v24  ;;  %v2072_v8 = vmin.f32 %v3484_v19, %v3487_v24 }
 0x17a   : > { %v2042_v0 = vrot.slane %v2041_v16, 1  ;;  %v2047_v14 = vrot.slane %v2046_v49, 2  ;;  %v1567_v11 = vadd.f32 %v1566_v55, %v3265_v40  ;;  %v2054_v4 = vrot.slane %v2053_v61, 2  ;;  %v3945_v55 = vld [vmem:[#allocation15_spill] sm:$0xff] }
 0x17b   : > { %v1435_v36 = vadd.f32 %v1434_v63, %v3944_v59  ;;  %v2060_v1 = vmin.f32 %v2058_v29, %v2059_v50  ;;  %v1122_v28 = vadd.f32 %v1036_v31, %v3449_v32  ;;  %v1773_v43 = vrot.slane %v1772_v21, 4 }
 0x17c   : > { %v1749_v56 = vrot.slane %v1748_v27, 1  ;;  %v2036_v39 = vmin.f32 %v2034_v20, %v2035_v62  ;;  %v2073_v30 = vrot.slane %v2072_v8, 4  ;;  %v1755_v37 = vmax.f32 %v1753_v54, %v1754_v23 }
 0x17d   : > { %v1436_v3 = vadd.f32 %v1435_v36, %v3298_v60  ;;  %v1761_v5 = vrot.slane %v1760_v45, 2  ;;  %v2048_v40 = vmin.f32 %v2046_v49, %v2047_v14  ;;  %v1568_v63 = vadd.f32 %v1567_v11, %v3945_v55 }
 0x17e   : > { %v863_v13 = vpop.f32.mrf.mxu2  ;;  %v1774_v29 = vmax.f32 %v1772_v21, %v1773_v43  ;;  %v2043_v50 = vmin.f32 %v2041_v16, %v2042_v0  ;;  %v2055_v32 = vmin.f32 %v2053_v61, %v2054_v4  ;;  %v3509_v26 = vmul.f32 %v1300_v57, %v1122_v28  ;;  %v3946_v61 = vld [vmem:[#allocation17_spill] sm:$0xff] }
 0x17f   : > { %v1123_v41 = vadd.f32 %v1036_v31, %v863_v13  ;;  %v1743_v13 = vmax.f32 %v1741_v58, %v1742_v25  ;;  %v1437_v59 = vadd.f32 %v1436_v3, %v3300_v7  ;;  %v2061_v31 = vrot.slane %v2060_v1, 2  ;;  %v3950_v3 = vld [vmem:[#allocation22_spill] sm:$0xff] }
 0x180   : > { %v1750_v20 = vmax.f32 %v1748_v27, %v1749_v56  ;;  %v2181_v60 = vsel %vm1867_vm1, %v2036_v39, %v2029_v51  ;;  %v2074_v54 = vmin.f32 %v2072_v8, %v2073_v30  ;;  %v1756_v62 = vrot.slane %v1755_v37, 1  ;;  %v3947_v8 = vld [vmem:[#allocation19_spill] sm:$0xff]  ;;  %v3523_v4 = vpop.f32.mrf.mxu3 }
 0x181   : > { %v3505_v35 = vmul.f32 %v1300_v57, %v1123_v41  ;;  %v1438_v58 = vadd.f32 %v1437_v59, %v3302_v9  ;;  %v1889_v25 = vsel %vm1869_vm2, %v1743_v13, %v1888_v17  ;;  %v1762_v49 = vmax.f32 %v1760_v45, %v1761_v5  ;;  %v3948_v5 = vld [vmem:[#allocation21_spill] sm:$0xff] }
 0x182   : > { %v2049_v7 = vrot.slane %v2048_v40, 1  ;;  %v1569_v41 = vadd.f32 %v1568_v63, %v3946_v61  ;;  %v1775_v21 = vrot.slane %v1774_v29, 2  ;;  %v2056_v0 = vrot.slane %v2055_v32, 1 }
 0x183   : > { %v1765_v23 = vmax.f32 %v3509_v26, %v3505_v35  ;;  %v1439_v16 = vadd.f32 %v1438_v58, %v3304_v33  ;;  %v2062_v27 = vmin.f32 %v2060_v1, %v2061_v31  ;;  %v2065_v9 = vmin.f32 %v3509_v26, %v3505_v35  ;;  %v3949_v1 = vld [vmem:[#allocation20_spill] sm:$0xff] }
 0x184   : > { %v2182_v51 = vsel %vm1869_vm2, %v2043_v50, %v2181_v60  ;;  %v1570_v45 = vadd.f32 %v1569_v41, %v3948_v5  ;;  %v2075_v11 = vrot.slane %v2074_v54, 2  ;;  %v1757_v36 = vmax.f32 %v1755_v37, %v1756_v62  ;;  %v3951_v37 = vld [vmem:[#allocation23_spill] sm:$0xff] }
 0x185   : > { %v1766_v14 = vrot.slane %v1765_v23, 4  ;;  %v1440_v17 = vadd.f32 %v1439_v16, %v3947_v8  ;;  %v1763_v28 = vrot.slane %v1762_v49, 1  ;;  %v2066_v57 = vrot.slane %v2065_v9, 4 }
 0x186   : > { %v1890_v56 = vsel %vm1871_vm3, %v1750_v20, %v1889_v25  ;;  %v1571_v30 = vadd.f32 %v1570_v45, %v3950_v3  ;;  %v1776_v13 = vmax.f32 %v1774_v29, %v1775_v21  ;;  %v2057_v55 = vmin.f32 %v2055_v32, %v2056_v0  ;;  %v3952_v29 = vld [vmem:[#allocation24_spill] sm:$0xff] }
 0x187   : > { %v1767_v43 = vmax.f32 %v1765_v23, %v1766_v14  ;;  %v1441_v39 = vadd.f32 %v1440_v17, %v3949_v1  ;;  %v2063_v63 = vrot.slane %v2062_v27, 1  ;;  %v2067_v50 = vmin.f32 %v2065_v9, %v2066_v57 }
 0x188   : > { %v2050_v31 = vmin.f32 %v2048_v40, %v2049_v7  ;;  %v1572_v58 = vadd.f32 %v1571_v30, %v3951_v37  ;;  %v2076_v62 = vmin.f32 %v2074_v54, %v2075_v11  ;;  %v1891_v23 = vsel %vm1873_vm4, %v1757_v36, %v1890_v56  ;;  %v3543_v57 = vpop.f32.mrf.mxu3  ;;  %v3955_v37 = vld [vmem:[#allocation6_spill] sm:$0xff] }
 0x189   : > { %v1768_v59 = vrot.slane %v1767_v43, 2  ;;  %v1442_v60 = vadd.f32 %v1441_v39, %v3402_v52  ;;  %v1764_v16 = vmax.f32 %v1762_v49, %v1763_v28  ;;  %v2068_v20 = vrot.slane %v2067_v50, 2  ;;  %v3953_v49 = vld [vmem:[#allocation25_spill] sm:$0xff] }
 0x18a   : > { %v2183_v25 = vsel %vm1871_vm3, %v2050_v31, %v2182_v51  ;;  %v1573_v32 = vadd.f32 %v1572_v58, %v3952_v29  ;;  %v1777_v21 = vrot.slane %v1776_v13, 1  ;;  %v2064_v40 = vmin.f32 %v2062_v27, %v2063_v63 }
 0x18b   : > { %v1769_v61 = vmax.f32 %v1767_v43, %v1768_v59  ;;  %v1443_v41 = vadd.f32 %v1442_v60, %v3404_v47  ;;  %v2184_v0 = vsel %vm1873_vm4, %v2057_v55, %v2183_v25  ;;  %v2069_v14 = vmin.f32 %v2067_v50, %v2068_v20  ;;  %v3957_v20 = vld [vmem:[#allocation7_spill] sm:$0xff] }
 0x18c   : > { %v1512_v54 = vmul.f32 %v3304_v33, %v3304_v33  ;;  %v1574_v17 = vadd.f32 %v1573_v32, %v3953_v49  ;;  %v2077_v5 = vrot.slane %v2076_v62, 1  ;;  %v1892_v51 = vsel %vm1875_vm5, %v1764_v16, %v1891_v23 }
 0x18d   : > { %v1770_v7 = vrot.slane %v1769_v61, 1  ;;  %v1444_v9 = vadd.f32 %v1443_v41, %v3462_v22  ;;  %v1513_v45 = vmul.f32 %v3947_v8, %v3947_v8  ;;  %v2070_v36 = vrot.slane %v2069_v14, 1 }
 0x18e   : > { %v1575_v27 = vadd.f32 %v1574_v17, %v1512_v54  ;;  %v1778_v43 = vmax.f32 %v1776_v13, %v1777_v21  ;;  %v2185_v56 = vsel %vm1875_vm5, %v2064_v40, %v2184_v0  ;;  %v1514_v33 = vmul.f32 %v3949_v1, %v3949_v1  ;;  %v1308_v21 = vpop.permute.xlu0 %1307 }
 0x18f   : > { %v1771_v11 = vmax.f32 %v1769_v61, %v1770_v7  ;;  %v1445_v28 = vadd.f32 %v1444_v9, %v3454_v12  ;;  %v2071_v3 = vmin.f32 %v2069_v14, %v2070_v36  ;;  %v2800_v30 = vmov 0.0   ;;  %v3959_v7 = vld [vmem:[#allocation8_spill] sm:$0xff] }
 0x190   : > { %387 = vst [vmem:[#allocation2] sm:$0x1] %v2800_v30  ;;  %v1576_v55 = vadd.f32 %v1575_v27, %v1513_v45  ;;  %v2078_v59 = vmin.f32 %v2076_v62, %v2077_v5  ;;  %v1515_v13 = vmul.f32 %v3402_v52, %v3402_v52  ;;  %v1008_v50 = vrot.slane %v3384_v15, 2  ;;  %v3960_v5 = vld [vmem:[#allocation9_spill] sm:$0xff] }
 0x191   : > { %v1893_v39 = vsel %vm1877_vm6, %v1771_v11, %v1892_v51  ;;  %v1446_v8 = vadd.f32 %v1445_v28, %v3509_v26  ;;  %388 = vst [vmem:[#allocation3] sm:$0x1] %v2800_v30  ;;  %v3954_v1 = vrot.slane %v3384_v15, 1  ;;  %v2186_v60 = vsel %vm1877_vm6, %v2071_v3, %v2185_v56  ;;  %v1312_v28 = vpop.permute.xlu1 %1311  ;;  %v3961_v56 = vld [vmem:[#allocation13_spill] sm:$0xff] }
 0x192   : > { %v3551_v63 = vsel %vm1879_vm7, %v1778_v43, %v1893_v39  ;;  %v3956_v58 = vperm.slane %v3384_v15, 0  ;;  %v1577_v61 = vadd.f32 %v1576_v55, %v1514_v33  ;;  %v3564_v62 = vsel %vm1879_vm7, %v2078_v59, %v2186_v60  ;;  %v3962_v55 = vld [vmem:[#allocation18_spill] sm:$0xff]  ;;  %v1316_v59 = vpop.permute.xlu2 %1315 }
 0x193   : > { %v1039_v31 = vperm.slane %v3954_v1, 0  ;;  %v1447_v16 = vadd.f32 %v1446_v8, %v3505_v35  ;;  %v1516_v41 = vmul.f32 %v3404_v47, %v3404_v47  ;;  %v1009_v0 = vrot.slane %v3384_v15, 3 }
 0x194   : > { %v1126_v23 = vadd.f32 %v3956_v58, %v3955_v37  ;;  %v3958_v52 = vmov %v3956_v58  ;;  %v1578_v32 = vadd.f32 %v1577_v61, %v1515_v13  ;;  %v1040_v40 = vperm.slane %v1008_v50, 0  ;;  %v3963_v37 = vld [vmem:[#allocation26_spill] sm:$0xff] }
 0x195   : > { %v1127_v25 = vadd.f32 %v3958_v52, %v3957_v20  ;;  %v1448_v29 = vadd.f32 %v1447_v16, %v3484_v19  ;;  %v1128_v14 = vadd.f32 %v1039_v31, %v3959_v7  ;;  %v1517_v54 = vmul.f32 %v3462_v22, %v3462_v22  ;;  %v903_v22 = vpop.f32.mrf.mxu3  ;;  %v3964_v52 = vld [vmem:[#allocation29_spill] sm:$0xff] }
 0x196   : > { %v3574_v9 = vmul.f32 %v1308_v21, %v1126_v23  ;;  %v1579_v17 = vadd.f32 %v1578_v32, %v1516_v41  ;;  %v1129_v51 = vadd.f32 %v1039_v31, %v3960_v5  ;;  %v1518_v45 = vmul.f32 %v3454_v12, %v3454_v12 }
 0x197   : > { %v1449_v49 = vadd.f32 %v1448_v29, %v3487_v24  ;;  %v3580_v47 = vmul.f32 %v1308_v21, %v1127_v25  ;;  %v1010_v27 = vrot.slane %v3384_v15, 4  ;;  %v1041_v43 = vperm.slane %v1009_v0, 0  ;;  %v1320_v21 = vpop.permute.xlu0 %1319 }
 0x198   : > { %v1580_v36 = vadd.f32 %v1579_v17, %v1517_v54  ;;  %v1130_v33 = vadd.f32 %v1040_v40, %v3961_v56  ;;  %v3587_v39 = vmul.f32 %v1312_v28, %v1128_v14  ;;  %v1519_v3 = vmul.f32 %v3509_v26, %v3509_v26 }
 0x199   : > { %v1450_v11 = vadd.f32 %v1449_v49, %v3574_v9  ;;  %v1131_v12 = vadd.f32 %v1040_v40, %v3962_v55  ;;  %v3593_v13 = vmul.f32 %v1312_v28, %v1129_v51  ;;  %v1520_v1 = vmul.f32 %v3505_v35, %v3505_v35  ;;  %v1324_v51 = vpop.permute.xlu1 %1323 }
 0x19a   : > { %v1581_v8 = vadd.f32 %v1580_v36, %v1518_v45  ;;  %v1042_v60 = vperm.slane %v1010_v27, 0  ;;  %v1132_v58 = vadd.f32 %v1041_v43, %v3963_v37  ;;  %v1011_v23 = vrot.slane %v3384_v15, 5 }
 0x19b   : > { %v1451_v30 = vadd.f32 %v1450_v11, %v3580_v47  ;;  %v3600_v26 = vmul.f32 %v1316_v59, %v1130_v33  ;;  %v1521_v61 = vmul.f32 %v3484_v19, %v3484_v19  ;;  %v1133_v25 = vadd.f32 %v1041_v43, %v3964_v52  ;;  %v1328_v43 = vpop.permute.xlu2 %1327 }
 0x19c   : > { %v1582_v31 = vadd.f32 %v1581_v8, %v1519_v3  ;;  %v3606_v41 = vmul.f32 %v1316_v59, %v1131_v12  ;;  %v1522_v29 = vmul.f32 %v3487_v24, %v3487_v24  ;;  %v1134_v0 = vadd.f32 %v1042_v60, %v3433_v2 }
 0x19d   : > { %v1452_v50 = vadd.f32 %v1451_v30, %v3587_v39  ;;  %v1043_v40 = vperm.slane %v1011_v23, 0  ;;  %v1012_v7 = vrot.slane %v3384_v15, 6  ;;  %v3613_v14 = vmul.f32 %v1320_v21, %v1132_v58  ;;  %v906_v5 = vpop.f32.mrf.mxu3 }
 0x19e   : > { %v1583_v20 = vadd.f32 %v1582_v31, %v1520_v1  ;;  %v1523_v54 = vmul.f32 %v3574_v9, %v3574_v9  ;;  %v1135_v17 = vadd.f32 %v1042_v60, %v3466_v6  ;;  %v3619_v24 = vmul.f32 %v1320_v21, %v1133_v25 }
 0x19f   : > { %v1453_v16 = vadd.f32 %v1452_v50, %v3593_v13  ;;  %v1524_v2 = vmul.f32 %v3580_v47, %v3580_v47  ;;  %v3624_v36 = vmul.f32 %v1324_v51, %v1134_v0  ;;  %v1136_v28 = vadd.f32 %v1043_v40, %v3501_v44 }
 0x1a0   : > { %v1584_v32 = vadd.f32 %v1583_v20, %v1521_v61  ;;  %v1044_v27 = vperm.slane %v1012_v7, 0  ;;  %v1013_v56 = vrot.slane %v3384_v15, 7  ;;  %v1525_v6 = vmul.f32 %v3587_v39, %v3587_v39  ;;  %v1332_v61 = vpop.permute.xlu0 %1331 }
 0x1a1   : > { %v1454_v35 = vadd.f32 %v1453_v16, %v3600_v26  ;;  %v3631_v30 = vmul.f32 %v1324_v51, %v1135_v17  ;;  %v1137_v8 = vadd.f32 %v1043_v40, %v3523_v4  ;;  %v1526_v55 = vmul.f32 %v3593_v13, %v3593_v13  ;;  %v1336_v7 = vpop.permute.xlu1 %1335 }
 0x1a2   : > { %v1585_v49 = vadd.f32 %v1584_v32, %v1522_v29  ;;  %v1527_v59 = vmul.f32 %v3600_v26, %v3600_v26  ;;  %v3639_v15 = vmul.f32 %v1328_v43, %v1136_v28  ;;  %v1138_v50 = vadd.f32 %v1044_v27, %v3543_v57 }
 0x1a3   : > { %v1455_v19 = vadd.f32 %v1454_v35, %v3606_v41  ;;  %v1045_v1 = vperm.slane %v1013_v56, 0  ;;  %v1528_v4 = vmul.f32 %v3606_v41, %v3606_v41  ;;  %v3645_v37 = vmul.f32 %v1328_v43, %v1137_v8 }
 0x1a4   : > { %v1586_v45 = vadd.f32 %v1585_v49, %v1523_v54  ;;  %v1139_v58 = vadd.f32 %v1044_v27, %v903_v22  ;;  %v1529_v20 = vmul.f32 %v3613_v14, %v3613_v14  ;;  %v3650_v25 = vmul.f32 %v1332_v61, %v1138_v50 }
 0x1a5   : > { %v1456_v11 = vadd.f32 %v1455_v19, %v3613_v14  ;;  %v908_v52 = vpop.f32.mrf.mxu3  ;;  %v1140_v57 = vadd.f32 %v1045_v1, %v906_v5  ;;  %v1530_v32 = vmul.f32 %v3619_v24, %v3619_v24  ;;  %v1531_v19 = vmul.f32 %v3624_v36, %v3624_v36 }
 0x1a6   : > { %v1587_v33 = vadd.f32 %v1586_v45, %v1524_v2  ;;  %v3655_v21 = vmul.f32 %v1332_v61, %v1139_v58  ;;  %v1141_v22 = vadd.f32 %v1045_v1, %v908_v52  ;;  %v1532_v2 = vmul.f32 %v3631_v30, %v3631_v30  ;;  %v1402_v58 = vld [vmem:[#allocation2] sm:$0x1] }
 0x1a7   : > { %v1457_v3 = vadd.f32 %v1456_v11, %v3619_v24  ;;  %v3660_v54 = vmul.f32 %v1336_v7, %v1140_v57  ;;  %v1533_v11 = vmul.f32 %v3639_v15, %v3639_v15  ;;  %v1534_v43 = vmul.f32 %v3645_v37, %v3645_v37 }
 0x1a8   : > { %v1588_v12 = vadd.f32 %v1587_v33, %v1525_v6  ;;  %v3663_v5 = vmul.f32 %v1336_v7, %v1141_v22  ;;  %v1535_v33 = vmul.f32 %v3650_v25, %v3650_v25 }
 0x1a9   : > { %v1458_v44 = vadd.f32 %v1457_v3, %v3624_v36 }
 0x1aa   : > { %v1589_v31 = vadd.f32 %v1588_v12, %v1526_v55  ;;  %v1536_v55 = vmul.f32 %v3655_v21, %v3655_v21 }
 0x1ab   : > { %v1459_v60 = vadd.f32 %v1458_v44, %v3631_v30 }
 0x1ac   : > { %v1590_v23 = vadd.f32 %v1589_v31, %v1527_v59  ;;  %v1537_v59 = vmul.f32 %v3660_v54, %v3660_v54 }
 0x1ad   : > { %v1460_v16 = vadd.f32 %v1459_v60, %v3639_v15  ;;  %v1538_v60 = vmul.f32 %v3663_v5, %v3663_v5 }
 0x1ae   : > { %v1591_v35 = vadd.f32 %v1590_v23, %v1528_v4 }
 0x1af   : > { %v1461_v29 = vadd.f32 %v1460_v16, %v3645_v37 }
 0x1b0   : > { %v1592_v40 = vadd.f32 %v1591_v35, %v1529_v20 }
 0x1b1   : > { %v1462_v0 = vadd.f32 %v1461_v29, %v3650_v25 }
 0x1b2   : > { %v1593_v17 = vadd.f32 %v1592_v40, %v1530_v32  ;;  %v1474_v32 = vld [vmem:[#allocation3] sm:$0x1] }
 0x1b3   : > { %v1463_v49 = vadd.f32 %v1462_v0, %v3655_v21 }
 0x1b4   : > { %v1594_v45 = vadd.f32 %v1593_v17, %v1531_v19  ;;  %v2208_v19 = vlaneseq }
 0x1b5   : > { %v1464_v51 = vadd.f32 %v1463_v49, %v3660_v54 }
 0x1b6   : > { %v1595_v27 = vadd.f32 %v1594_v45, %v1532_v2  ;;  %v3681_v49 = vand.u32 127, %v2208_v19  ;;  %v1702_v19 = vmax.f32 %v3224_v10, %v3226_v18 }
 0x1b7   : > { %v1465_v28 = vadd.f32 %v1464_v51, %v3663_v5 }
 0x1b8   : > { %v1596_v6 = vadd.f32 %v1595_v27, %v1533_v11  ;;  %v2214_v17 = vand.u32 1, %v3681_v49 }
 0x1b9   : > { %v1466_v56 = vrot.slane %v1465_v28, 4 }
 0x1ba   : > { %v1597_v8 = vadd.f32 %v1596_v6, %v1534_v43  ;;  %vm2215_vm8 = vcmp.eq.s32.totalorder %v2214_v17, 0  ;;  %v2222_v6 = vand.u32 2, %v3681_v49 }
 0x1bb   : > { %v1467_v3 = vadd.f32 %v1466_v56, %v1465_v28 }
 0x1bc   : > { %v1598_v44 = vadd.f32 %v1597_v8, %v1535_v33  ;;  %vm2223_vm9 = vcmp.eq.s32.totalorder %v2222_v6, 0  ;;  %v3968_v6 = vld [vmem:[#allocation14_spill] sm:$0xff] }
 0x1bd   : > { %v1468_v12 = vrot.slane %v1467_v3, 2 }
 0x1be   : > { %v1599_v1 = vadd.f32 %v1598_v44, %v1536_v55 }
 0x1bf   : > { %v1469_v50 = vadd.f32 %v1468_v12, %v1467_v3 }
 0x1c0   : > { %v1600_v4 = vadd.f32 %v1599_v1, %v1537_v59  ;;  %v2230_v1 = vand.u32 4, %v3681_v49 }
 0x1c1   : > { %v1470_v31 = vrot.slane %v1469_v50, 1 }
 0x1c2   : > { %v1601_v16 = vadd.f32 %v1600_v4, %v1538_v60  ;;  %vm2231_vm10 = vcmp.eq.s32.totalorder %v2230_v1, 0  ;;  %v2009_v1 = vmin.f32 %v3228_v42, %v3230_v34 }
 0x1c3   : > { %v1471_v23 = vadd.f32 %v1470_v31, %v1469_v50 }
 0x1c4   : > { %v1602_v20 = vrot.slane %v1601_v16, 4 }
 0x1c5   : > { %v1472_v61 = vadd.f32 %v1471_v23, %v1402_v58 }
 0x1c6   : > { %v1603_v52 = vadd.f32 %v1602_v20, %v1601_v16 }
 0x1c7   : > { %1473 = vst [vmem:[#allocation2] sm:$0x1] %v1472_v61 }
 0x1c8   : > { %v1604_v57 = vrot.slane %v1603_v52, 2 }
 0x1ca   : > { %v1605_v35 = vadd.f32 %v1604_v57, %v1603_v52  ;;  %v1786_v52 = vmax.f32 %v3587_v39, %v3593_v13  ;;  %v1779_v57 = vmax.f32 %v3574_v9, %v3580_v47 }
 0x1cc   : > { %v1606_v29 = vrot.slane %v1605_v35, 1 }
 0x1ce   : > { %v2207_v22 = vld [vmem:[#allocation2] sm:$0x1]  ;;  %v1607_v0 = vadd.f32 %v1606_v29, %v1605_v35  ;;  %v1793_v35 = vmax.f32 %v3600_v26, %v3606_v41  ;;  %v1787_v29 = vrot.slane %v1786_v52, 4 }
 0x1cf   : > { %2212 = vrot.lane.b32.xlu0 %v2207_v22, %s2801_s14  ;;  %2210 = vrot.lane.b32.xlu2 %v2207_v22, %s2802_s15 }
 0x1d0   : > { %v1608_v40 = vadd.f32 %v1607_v0, %v1474_v32  ;;  %v3965_v32 = vld [vmem:[#allocation12_spill] sm:$0xff]  ;;  %v1695_v0 = vmax.f32 %v3235_v46, %v3237_v48  ;;  %v1794_v17 = vrot.slane %v1793_v35, 4 }
 0x1d2   : > { %1609 = vst [vmem:[#allocation3] sm:$0x1] %v1608_v40  ;;  %v2079_v40 = vmin.f32 %v3574_v9, %v3580_v47  ;;  %v2002_v9 = vmin.f32 %v3224_v10, %v3226_v18  ;;  %v1788_v47 = vmax.f32 %v1786_v52, %v1787_v29  ;;  %v1703_v18 = vrot.slane %v1702_v19, 4 }
 0x1d4   : > { %v1704_v52 = vmax.f32 %v1702_v19, %v1703_v18 }
 0x1d9   : > { %v2243_v7 = vld [vmem:[#allocation3] sm:$0x1] }
 0x1da   : > { %2244 = vrot.lane.b32.xlu1 %v2243_v7, %s2802_s15  ;;  %2246 = vrot.lane.b32.xlu2 %v2243_v7, %s2801_s14 }
 0x229   : > { %v2211_v51 = vpop.permute.xlu2 %2210 }
 0x234   : > { %v2247_v28 = vpop.permute.xlu2 %2246 }
 0x241   : > { %v2213_v2 = vpop.permute.xlu0 %2212 }
 0x242   : > { %v2216_v45 = vsel %vm2215_vm8, %v2211_v51, %v2213_v2  ;;  %v1800_v51 = vmax.f32 %v3613_v14, %v3619_v24  ;;  %v2086_v2 = vmin.f32 %v3587_v39, %v3593_v13  ;;  %v3731_v13 = vmin.f32 %v3965_v32, %v3220_v38 }
 0x243   : > { %v2217_v11 = vadd.f32 %v2216_v45, %v2207_v22  ;;  %v3702_v22 = vmax.f32 %v3965_v32, %v3220_v38  ;;  %v3966_v45 = vld [vmem:[#allocation11_spill] sm:$0xff]  ;;  %v2093_v38 = vmin.f32 %v3600_v26, %v3606_v41  ;;  %v2010_v32 = vrot.slane %v2009_v1, 4 }
 0x244   : > { %v2100_v26 = vmin.f32 %v3613_v14, %v3619_v24  ;;  %v2238_v41 = vand.u32 8, %v3681_v49 }
 0x245   : > { %2220 = vrot.lane.b32.xlu1 %v2217_v11, %s2803_s16  ;;  %2218 = vrot.lane.b32.xlu0 %v2217_v11, %s2804_s17 }
 0x246   : > { %v2101_v49 = vrot.slane %v2100_v26, 4  ;;  %vm3757_vm11 = vcmp.eq.s32.totalorder %v2238_v41, 0 }
 0x24c   : > { %v2245_v27 = vpop.permute.xlu1 %2244 }
 0x24d   : > { %v2248_v43 = vsel %vm2215_vm8, %v2245_v27, %v2247_v28  ;;  %v1709_v27 = vmax.f32 %v3228_v42, %v3230_v34 }
 0x24e   : > { %v2249_v56 = vadd.f32 %v2248_v43, %v2243_v7  ;;  %v1780_v7 = vrot.slane %v1779_v57, 4  ;;  %v1689_v43 = vrot.slane %v3702_v22, 4 }
 0x250   : > { %2250 = vrot.lane.b32.xlu2 %v2249_v56, %s2804_s17  ;;  %2252 = vrot.lane.b32.xlu0 %v2249_v56, %s2803_s16  ;;  %v1781_v10 = vmax.f32 %v1779_v57, %v1780_v7  ;;  %v2094_v7 = vrot.slane %v2093_v38, 4 }
 0x252   : > { %v2095_v24 = vmin.f32 %v2093_v38, %v2094_v7 }
 0x2aa   : > { %v2251_v12 = vpop.permute.xlu2 %2250 }
 0x2b7   : > { %v2221_v33 = vpop.permute.xlu1 %2220  ;;  %v2219_v3 = vpop.permute.xlu0 %2218 }
 0x2b8   : > { %v2224_v8 = vsel %vm2223_vm9, %v2219_v3, %v2221_v33  ;;  %v1716_v33 = vmax.f32 %v3968_v6, %v3244_v53  ;;  %v2080_v3 = vrot.slane %v2079_v40, 4 }
 0x2b9   : > { %v2225_v55 = vadd.f32 %v2224_v8, %v2217_v11  ;;  %v3967_v11 = vld [vmem:[#allocation10_spill] sm:$0xff]  ;;  %v1995_v8 = vmin.f32 %v3235_v46, %v3237_v48  ;;  %v1989_v46 = vrot.slane %v3731_v13, 4 }
 0x2ba   : > { %v3716_v28 = vmax.f32 %v3967_v11, %v3966_v45  ;;  %v3727_v39 = vmin.f32 %v3967_v11, %v3966_v45 }
 0x2bb   : > { %2226 = vrot.lane.b32.xlu1 %v2225_v55, %s2805_s18  ;;  %2228 = vrot.lane.b32.xlu2 %v2225_v55, %s2806_s19  ;;  %v1996_v48 = vrot.slane %v1995_v8, 4 }
 0x2bd   : > { %v3751_v45 = vmin.f32 %v1995_v8, %v1996_v48 }
 0x2c2   : > { %v2253_v44 = vpop.permute.xlu0 %2252 }
 0x2c3   : > { %v2254_v59 = vsel %vm2223_vm9, %v2251_v12, %v2253_v44  ;;  %v1801_v12 = vrot.slane %v1800_v51, 4  ;;  %v2087_v44 = vrot.slane %v2086_v2, 4 }
 0x2c4   : > { %v2255_v50 = vadd.f32 %v2254_v59, %v2249_v56  ;;  %v1696_v56 = vrot.slane %v1695_v0, 4  ;;  %v1710_v59 = vrot.slane %v1709_v27, 4 }
 0x2c5   : > { %v2088_v29 = vmin.f32 %v2086_v2, %v2087_v44 }
 0x2c6   : > { %2258 = vrot.lane.b32.xlu1 %v2255_v50, %s2806_s19  ;;  %2256 = vrot.lane.b32.xlu0 %v2255_v50, %s2805_s18  ;;  %v3744_v42 = vmax.f32 %v1709_v27, %v1710_v59 }
 0x315   : > { %v2229_v31 = vpop.permute.xlu2 %2228 }
 0x32d   : > { %v2227_v60 = vpop.permute.xlu1 %2226 }
 0x32e   : > { %v2232_v4 = vsel %vm2231_vm10, %v2227_v60, %v2229_v31  ;;  %v1789_v31 = vrot.slane %v1788_v47, 2  ;;  %v3737_v60 = vmax.f32 %v1695_v0, %v1696_v56 }
 0x32f   : > { %v3686_v58 = vadd.f32 %v2232_v4, %v2225_v55  ;;  %v1795_v55 = vmax.f32 %v1793_v35, %v1794_v17  ;;  %v1717_v4 = vrot.slane %v1716_v33, 4  ;;  %v1802_v35 = vmax.f32 %v1800_v51, %v1801_v12 }
 0x330   : > { %v1790_v0 = vmax.f32 %v1788_v47, %v1789_v31  ;;  %v2016_v51 = vmin.f32 %v3968_v6, %v3244_v53  ;;  %v1705_v47 = vrot.slane %v1704_v52, 2  ;;  %v1712_v12 = vrot.slane %v3744_v42, 2 }
 0x331   : > { %2236 = vrot.lane.b32.xlu0 %v3686_v58, %s2807_s20  ;;  %2234 = vrot.lane.b32.xlu2 %v3686_v58, %s2808_s21  ;;  %v1796_v57 = vrot.slane %v1795_v55, 2  ;;  %v3749_v17 = vmax.f32 %v1716_v33, %v1717_v4  ;;  %v1803_v27 = vrot.slane %v1802_v35, 2 }
 0x332   : > { %v1791_v18 = vrot.slane %v1790_v0, 1  ;;  %v2017_v44 = vrot.slane %v2016_v51, 4  ;;  %v3764_v31 = vmax.f32 %v1704_v52, %v1705_v47 }
 0x333   : > { %v1797_v2 = vmax.f32 %v1795_v55, %v1796_v57  ;;  %v2107_v55 = vmin.f32 %v3624_v36, %v3631_v30  ;;  %v2096_v57 = vrot.slane %v2095_v24, 2 }
 0x334   : > { %v3773_v41 = vmin.f32 %v2016_v51, %v2017_v44 }
 0x338   : > { %v2259_v23 = vpop.permute.xlu1 %2258  ;;  %v2257_v16 = vpop.permute.xlu0 %2256 }
 0x339   : > { %v2260_v61 = vsel %vm2231_vm10, %v2257_v16, %v2259_v23  ;;  %v2081_v23 = vmin.f32 %v2079_v40, %v2080_v3  ;;  %v1782_v16 = vrot.slane %v1781_v10, 2  ;;  %v3755_v3 = vmin.f32 %v2009_v1, %v2010_v32 }
 0x33a   : > { %v3690_v20 = vadd.f32 %v2260_v61, %v2255_v50  ;;  %v2003_v50 = vrot.slane %v2002_v9, 4  ;;  %v1807_v61 = vmax.f32 %v3624_v36, %v3631_v30  ;;  %v1804_v1 = vmax.f32 %v1802_v35, %v1803_v27 }
 0x33b   : > { %v2082_v40 = vrot.slane %v2081_v23, 2  ;;  %v1783_v19 = vmax.f32 %v1781_v10, %v1782_v16  ;;  %v2012_v4 = vrot.slane %v3755_v3, 2  ;;  %v1682_v30 = vrot.slane %v3716_v28, 4 }
 0x33c   : > { %2262 = vrot.lane.b32.xlu1 %v3690_v20, %s2808_s21  ;;  %2264 = vrot.lane.b32.xlu2 %v3690_v20, %s2807_s20  ;;  %v2004_v34 = vmin.f32 %v2002_v9, %v2003_v50  ;;  %v1808_v11 = vrot.slane %v1807_v61, 4  ;;  %v2089_v9 = vrot.slane %v2088_v29, 2  ;;  %v1798_v50 = vrot.slane %v1797_v2, 1 }
 0x33d   : > { %v2083_v14 = vmin.f32 %v2081_v23, %v2082_v40  ;;  %v1784_v53 = vrot.slane %v1783_v19, 1  ;;  %v1792_v23 = vmax.f32 %v1790_v0, %v1791_v18  ;;  %v2108_v40 = vrot.slane %v2107_v55, 4 }
 0x33e   : > { %v2005_v56 = vrot.slane %v2004_v34, 2  ;;  %v1809_v6 = vmax.f32 %v1807_v61, %v1808_v11  ;;  %v2090_v59 = vmin.f32 %v2088_v29, %v2089_v9  ;;  %v2102_v61 = vmin.f32 %v2100_v26, %v2101_v49 }
 0x33f   : > { %v2084_v16 = vrot.slane %v2083_v14, 1  ;;  %v1785_v32 = vmax.f32 %v1783_v19, %v1784_v53  ;;  %v1799_v35 = vmax.f32 %v1797_v2, %v1798_v50  ;;  %v1805_v52 = vrot.slane %v1804_v1, 1 }
 0x340   : > { %v3769_v48 = vmin.f32 %v2004_v34, %v2005_v56  ;;  %v1810_v36 = vrot.slane %v1809_v6, 2  ;;  %v2091_v29 = vrot.slane %v2090_v59, 1  ;;  %v1814_v0 = vmax.f32 %v3639_v15, %v3645_v37 }
 0x341   : > { %v1895_v34 = vsel %vm1867_vm1, %v1792_v23, %v1785_v32  ;;  %v2114_v26 = vmin.f32 %v3639_v15, %v3645_v37  ;;  %v2085_v19 = vmin.f32 %v2083_v14, %v2084_v16  ;;  %v2097_v11 = vmin.f32 %v2095_v24, %v2096_v57 }
 0x342   : > { %v2103_v27 = vrot.slane %v2102_v61, 2  ;;  %v1982_v9 = vrot.slane %v3727_v39, 4  ;;  %v2109_v47 = vmin.f32 %v2107_v55, %v2108_v40  ;;  %v3781_v2 = vmax.f32 %v1809_v6, %v1810_v36 }
 0x343   : > { %v1683_v51 = vmax.f32 %v3716_v28, %v1682_v30  ;;  %v1806_v56 = vmax.f32 %v1804_v1, %v1805_v52  ;;  %v1896_v18 = vsel %vm1869_vm2, %v1799_v35, %v1895_v34  ;;  %v2092_v49 = vmin.f32 %v2090_v59, %v2091_v29 }
 0x344   : > { %v1815_v37 = vrot.slane %v1814_v0, 4  ;;  %v2115_v14 = vrot.slane %v2114_v26, 4  ;;  %v2121_v24 = vmin.f32 %v3650_v25, %v3655_v21  ;;  %v2098_v6 = vrot.slane %v2097_v11, 1 }
 0x345   : > { %v1690_v28 = vmax.f32 %v3702_v22, %v1689_v43  ;;  %v1983_v55 = vmin.f32 %v3727_v39, %v1982_v9  ;;  %v1812_v59 = vrot.slane %v3781_v2, 1  ;;  %v3800_v50 = vsel %vm1871_vm3, %v1806_v56, %v1896_v18 }
 0x346   : > { %v1684_v23 = vrot.slane %v1683_v51, 2  ;;  %v1816_v16 = vmax.f32 %v1814_v0, %v1815_v37  ;;  %v2116_v57 = vmin.f32 %v2114_v26, %v2115_v14  ;;  %v2122_v22 = vrot.slane %v2121_v24, 4 }
 0x347   : > { %v2099_v43 = vmin.f32 %v2097_v11, %v2098_v6  ;;  %v1691_v39 = vrot.slane %v1690_v28, 2  ;;  %v1984_v32 = vrot.slane %v1983_v55, 2  ;;  %v2128_v29 = vmin.f32 %v3660_v54, %v3663_v5 }
 0x348   : > { %v1685_v30 = vmax.f32 %v1683_v51, %v1684_v23  ;;  %v1817_v34 = vrot.slane %v1816_v16, 2  ;;  %v2117_v26 = vrot.slane %v2116_v57, 2  ;;  %v1813_v23 = vmax.f32 %v3781_v2, %v1812_v59 }
 0x349   : > { %v1692_v11 = vmax.f32 %v1690_v28, %v1691_v39  ;;  %v1985_v9 = vmin.f32 %v1983_v55, %v1984_v32 }
 0x34a   : > { %v1686_v56 = vrot.slane %v1685_v30, 1 }
 0x34b   : > { %v1986_v6 = vrot.slane %v1985_v9, 1 }
 0x34c   : > { %v1687_v55 = vmax.f32 %v1685_v30, %v1686_v56 }
 0x38b   : > { %v2235_v33 = vpop.permute.xlu2 %2234 }
 0x3a3   : > { %v2237_v10 = vpop.permute.xlu0 %2236 }
 0x3a4   : > { %v2240_v38 = vsel %vm3757_vm11, %v2235_v33, %v2237_v10  ;;  %v2265_v33 = vpop.permute.xlu2 %2264 }
 0x3a5   : > { %v2241_v7 = vadd.f32 %v2240_v38, %v3686_v58  ;;  %v1821_v58 = vmax.f32 %v3650_v25, %v3655_v21  ;;  %v2104_v25 = vmin.f32 %v2102_v61, %v2103_v27  ;;  %v2110_v21 = vrot.slane %v2109_v47, 2 }
 0x3a6   : > { %v1828_v61 = vmax.f32 %v3660_v54, %v3663_v5  ;;  %v1698_v27 = vrot.slane %v3737_v60, 2 }
 0x3a7   : > { %v3787_v10 = vmul.f32 0.00012207031, %v2241_v7  ;;  %v1822_v1 = vrot.slane %v1821_v58, 4  ;;  %v2105_v35 = vrot.slane %v2104_v25, 1  ;;  %v2111_v52 = vmin.f32 %v2109_v47, %v2110_v21 }
 0x3a8   : > { %v2188_v7 = vsel %vm1867_vm1, %v2092_v49, %v2085_v19  ;;  %v1829_v18 = vrot.slane %v1828_v61, 4  ;;  %v1998_v19 = vrot.slane %v3751_v45, 2  ;;  %v1818_v47 = vmax.f32 %v1816_v16, %v1817_v34 }
 0x3a9   : > { %v2269_v8 = vmul.f32 %v3787_v10, %v3787_v10  ;;  %v1823_v36 = vmax.f32 %v1821_v58, %v1822_v1  ;;  %v2112_v54 = vrot.slane %v2111_v52, 1  ;;  %v2189_v5 = vsel %vm1869_vm2, %v2099_v43, %v2188_v7 }
 0x3aa   : > { %v2106_v49 = vmin.f32 %v2104_v25, %v2105_v35  ;;  %v1999_v25 = vmin.f32 %v3751_v45, %v1998_v19  ;;  %v1707_v45 = vrot.slane %v3764_v31, 1  ;;  %v3972_v35 = vld [vmem:[#allocation31_spill] sm:$0xff]  ;;  %v2019_v34 = vrot.slane %v3773_v41, 2 }
 0x3ab   : > { %v1824_v51 = vrot.slane %v1823_v36, 2  ;;  %v2113_v21 = vmin.f32 %v2111_v52, %v2112_v54 }
 0x3ac   : > { %v1708_v54 = vmax.f32 %v3764_v31, %v1707_v45  ;;  %v2283_v31 = vld [vmem:[%s3900_s5] sm:$0x1] }
 0x3ad   : > { %v3821_v28 = vmax.f32 %v1823_v36, %v1824_v51 }
 0x3ae   : > { %v2263_v15 = vpop.permute.xlu1 %2262 }
 0x3af   : > { %v2266_v53 = vsel %vm3757_vm11, %v2263_v15, %v2265_v33  ;;  %v2129_v33 = vrot.slane %v2128_v29, 4  ;;  %v3818_v15 = vmin.f32 %v2116_v57, %v2117_v26  ;;  %v3971_v57 = vld [vmem:[#allocation30_spill] sm:$0xff]  ;;  %v1826_v36 = vrot.slane %v3821_v28, 1 }
 0x3b0   : > { %v2267_v44 = vadd.f32 %v2266_v53, %v3690_v20  ;;  %v1990_v20 = vmin.f32 %v3731_v13, %v1989_v46  ;;  %v2123_v13 = vmin.f32 %v2121_v24, %v2122_v22  ;;  %v1693_v24 = vrot.slane %v1692_v11, 1 }
 0x3b1   : > { %v1699_v53 = vmax.f32 %v3737_v60, %v1698_v27  ;;  %v2130_v1 = vmin.f32 %v2128_v29, %v2129_v33  ;;  %v2119_v16 = vrot.slane %v3818_v15, 1  ;;  %v1882_v22 = vsel %vm1869_vm2, %v1687_v55, %v3971_v57 }
 0x3b2   : > { %v2268_v38 = vmul.f32 0.00012207031, %v2267_v44  ;;  %v1991_v46 = vrot.slane %v1990_v20, 2  ;;  %v2124_v14 = vrot.slane %v2123_v13, 2  ;;  %v1830_v44 = vmax.f32 %v1828_v61, %v1829_v18 }
 0x3b3   : > { %v1694_v39 = vmax.f32 %v1692_v11, %v1693_v24  ;;  %v1700_v32 = vrot.slane %v1699_v53, 1  ;;  %v2131_v59 = vrot.slane %v2130_v1, 2  ;;  %v2000_v29 = vrot.slane %v1999_v25, 1 }
 0x3b4   : > { %v2270_v40 = vsub.f32 %v2268_v38, %v2269_v8  ;;  %v1992_v37 = vmin.f32 %v1990_v20, %v1991_v46  ;;  %v2190_v8 = vsel %vm1871_vm3, %v2106_v49, %v2189_v5  ;;  %v1819_v38 = vrot.slane %v1818_v47, 1 }
 0x3b5   : > { %v2125_v43 = vmin.f32 %v2123_v13, %v2124_v14  ;;  %v1831_v2 = vrot.slane %v1830_v44, 2  ;;  %v1883_v61 = vsel %vm1871_vm3, %v1694_v39, %v1882_v22  ;;  %v1701_v13 = vmax.f32 %v1699_v53, %v1700_v32 }
 0x3b6   : > { %v2271_v0 = vmax.f32 %v2270_v40, 0.0  ;;  %v1993_v60 = vrot.slane %v1992_v37, 1  ;;  %v1987_v40 = vmin.f32 %v1985_v9, %v1986_v6  ;;  %v2007_v46 = vrot.slane %v3769_v48, 1 }
 0x3b7   : > { %v1713_v11 = vmax.f32 %v3744_v42, %v1712_v12  ;;  %v2013_v27 = vmin.f32 %v3755_v3, %v2012_v4  ;;  %v1832_v51 = vmax.f32 %v1830_v44, %v1831_v2  ;;  %v2132_v56 = vmin.f32 %v2130_v1, %v2131_v59 }
 0x3b8   : > { %v3813_v58 = vadd.f32 1e-05, %v2271_v0  ;;  %v2175_v52 = vsel %vm1869_vm2, %v1987_v40, %v3972_v35  ;;  %v1994_v7 = vmin.f32 %v1992_v37, %v1993_v60  ;;  %v1719_v0 = vrot.slane %v3749_v17, 2 }
 0x3b9   : > { %v2126_v33 = vrot.slane %v2125_v43, 1  ;;  %v1884_v5 = vsel %vm1873_vm4, %v1701_v13, %v1883_v61  ;;  %v2001_v19 = vmin.f32 %v1999_v25, %v2000_v29  ;;  %v2020_v37 = vmin.f32 %v3773_v41, %v2019_v34  ;;  %v3975_v34 = vld [vmem:[#allocation27_spill] sm:$0xff] }
 0x3ba   : > { %2773 = vrsqrt.f32 %v3813_v58  ;;  %v2176_v9 = vsel %vm1871_vm3, %v1994_v7, %v2175_v52  ;;  %v1720_v49 = vmax.f32 %v3749_v17, %v1719_v0  ;;  %v2008_v12 = vmin.f32 %v3769_v48, %v2007_v46  ;;  %v3974_v0 = vld [vmem:[#allocation28_spill] sm:$0xff] }
 0x3bb   : > { %v2177_v3 = vsel %vm1873_vm4, %v2001_v19, %v2176_v9  ;;  %v1714_v4 = vrot.slane %v1713_v11, 1  ;;  %v2014_v14 = vrot.slane %v2013_v27, 1  ;;  %v1833_v24 = vrot.slane %v1832_v51, 1 }
 0x3bc   : > { %v2133_v53 = vrot.slane %v2132_v56, 1  ;;  %vm2279_vm13 = vweird.f32 %v3813_v58  ;;  %v1820_v17 = vmax.f32 %v1818_v47, %v1819_v38  ;;  %v1898_v41 = vsel %vm1873_vm4, %v1813_v23, %v3800_v50  ;;  %v2285_v23 = vld [vmem:[%s3901_s6] sm:$0x1] }
 0x3bd   : > { %v2191_v55 = vsel %vm1873_vm4, %v2113_v21, %v2190_v8  ;;  %v1885_v48 = vsel %vm1875_vm5, %v1708_v54, %v1884_v5  ;;  %v2178_v44 = vsel %vm1875_vm5, %v2008_v12, %v2177_v3  ;;  %v1721_v1 = vrot.slane %v1720_v49, 1 }
 0x3be   : > { %v2021_v25 = vrot.slane %v2020_v37, 1  ;;  %v1827_v22 = vmax.f32 %v3821_v28, %v1826_v36  ;;  %v1715_v60 = vmax.f32 %v1713_v11, %v1714_v4  ;;  %v2015_v39 = vmin.f32 %v2013_v27, %v2014_v14 }
 0x3bf   : > { %v2127_v47 = vmin.f32 %v2125_v43, %v2126_v33  ;;  %v1834_v38 = vmax.f32 %v1832_v51, %v1833_v24  ;;  %v2134_v50 = vmin.f32 %v2132_v56, %v2133_v53  ;;  %v1899_v28 = vsel %vm1875_vm5, %v1820_v17, %v1898_v41 }
 0x3c0   : > { %v2774_v20 = vpop.eup %2773  ;;  %v1886_v21 = vsel %vm1877_vm6, %v1715_v60, %v1885_v48  ;;  %v2179_v8 = vsel %vm1877_vm6, %v2015_v39, %v2178_v44  ;;  %v1722_v40 = vmax.f32 %v1720_v49, %v1721_v1  ;;  %v2022_v36 = vmin.f32 %v2020_v37, %v2021_v25 }
 0x3c1   : > { %v2274_v30 = vmul.f32 %v2774_v20, %v3813_v58  ;;  %vm2280_vm12 = vweird.f32 %v2774_v20  ;;  %v2120_v58 = vmin.f32 %v3818_v15, %v2119_v16  ;;  %v3973_v2 = vmov 0  }
 0x3c2   : > { %vm2281_vm14 = vmor %vm2279_vm13, %vm2280_vm12  ;;  %v1900_v43 = vsel %vm1877_vm6, %v1827_v22, %v1899_v28  ;;  %v1887_v29 = vsel %vm1879_vm7, %v1722_v40, %v1886_v21 }
 0x3c3   : > { %v2275_v26 = vmul.f32 %v2774_v20, %v2274_v30  ;;  %v2192_v16 = vsel %vm1875_vm5, %v2120_v58, %v2191_v55  ;;  %v1901_v61 = vsel %vm1879_vm7, %v1834_v38, %v1900_v43 }
 0x3c4   : > { %v2193_v45 = vsel %vm1877_vm6, %v2127_v47, %v2192_v16 }
 0x3c5   : > { %v2276_v18 = vmul.f32 0.5, %v2275_v26  ;;  %v2194_v35 = vsel %vm1879_vm7, %v2134_v50, %v2193_v45 }
 0x3c7   : > { %v2277_v42 = vsub.f32 1.5, %v2276_v18 }
 0x3c9   : > { %v2278_v6 = vmul.f32 %v2774_v20, %v2277_v42 }
 0x3cb   : > { %v2282_v57 = vsel %vm2281_vm14, %v2774_v20, %v2278_v6 }
 0x3cc   : > { %v2284_v32 = vmul.f32 %v2283_v31, %v2282_v57 }
 0x3ce   : > { %v2286_v20 = vmul.f32 %v2284_v32, %v3787_v10  ;;  %vm2288_vm15 = vcmp.ge.f32.partialorder %v2284_v32, 0.0  ;;  %v2180_v10 = vsel %vm1879_vm7, %v2022_v36, %v2179_v8  ;;  %v2305_v52 = vperm.slane %v2284_v32, 0 }
 0x3cf   : > { %v2297_v15 = vsel %vm2288_vm15, 1, %v3973_v2 }
 0x3d0   : > { %v2287_v59 = vsub.f32 %v2285_v23, %v2286_v20  ;;  %v2298_v30 = vperm.slane %v2297_v15, 0 }
 0x3d2   : > { %vm2299_vm0 = vcmp.eq.s32.totalorder %v2298_v30, 1  ;;  %v2312_v7 = vperm.slane %v2287_v59, 0 }
 0x3d3   : > { %v2300_v26 = vsel %vm2299_vm0, %v3975_v34, %v3974_v0  ;;  %v2301_v13 = vsel %vm2299_vm0, %v1887_v29, %v2180_v10  ;;  %v2302_v46 = vsel %vm2299_vm0, %v3551_v63, %v3564_v62  ;;  %v2303_v11 = vsel %vm2299_vm0, %v1901_v61, %v2194_v35 }
 0x3d4   : > { %v2307_v27 = vmul.f32 %v2305_v52, %v2300_v26  ;;  %v2308_v9 = vmul.f32 %v2305_v52, %v2301_v13  ;;  %v2309_v51 = vmul.f32 %v2305_v52, %v2302_v46  ;;  %v2310_v56 = vmul.f32 %v2305_v52, %v2303_v11 }
 0x3d6   : > { %v2314_v18 = vadd.f32 %v2312_v7, %v2307_v27  ;;  %v2315_v33 = vadd.f32 %v2312_v7, %v2308_v9  ;;  %v2316_v54 = vadd.f32 %v2312_v7, %v2309_v51  ;;  %v2317_v5 = vadd.f32 %v2312_v7, %v2310_v56 }
 0x3d8   : > { %vm2318_vm1 = vcmp.gt.f32.partialorder %v2314_v18, 0.0  ;;  %vm2319_vm2 = vcmp.gt.f32.partialorder %v2315_v33, 0.0  ;;  %vm2320_vm3 = vcmp.gt.f32.partialorder %v2316_v54, 0.0  ;;  %vm2321_vm4 = vcmp.gt.f32.partialorder %v2317_v5, 0.0 }
 0x3d9   : > { %v2322_v19 = vmul.f32 0.2, %v2314_v18  ;;  %v2323_v49 = vmul.f32 0.2, %v2315_v33  ;;  %v2324_v37 = vmul.f32 0.2, %v2316_v54 }
 0x3da   : > { %v2325_v42 = vmul.f32 0.2, %v2317_v5 }
 0x3db   : > { %v2326_v63 = vsel %vm2318_vm1, %v2314_v18, %v2322_v19  ;;  %v2327_v62 = vsel %vm2319_vm2, %v2315_v33, %v2323_v49  ;;  %v2328_v12 = vsel %vm2320_vm3, %v2316_v54, %v2324_v37 }
 0x3dc   : > { %v2329_v3 = vsel %vm2321_vm4, %v2317_v5, %v2325_v42  ;;  %v2716_v4 = vpack.c.bf16 %v2327_v62, %v2326_v63 }
 0x3dd   : > { %v2721_v14 = vpack.c.bf16 %v2329_v3, %v2328_v12 }
 0x3de   : > { %2717 = vst [vmem:[%s381_s9] sm:$0xff] %v2716_v4  }
 0x3df   : > { %2723 = vst [vmem:[%s381_s9 + $0x8] sm:$0xff] %v2721_v14  }
 0x3e0 PF: > { %s17_s26 = sadd.s32 1, %s2797_s26   ;;  %s3976_s24 = smov %s2793_s25 }
 0x3e1   : > { %p14_p5 = scmp.ge.s32.totalorder %s17_s26, 4   ;;  %s3977_s25 = smov %s3979_s27 }
 0x3e3   :  { %16 = sbr.rel (!%p14_p5) target bundleno = 2 (0x2), region = 94 }

// kernel: device_forward.7
= control target key start
LH: loop header
LB: loop body
LE: loop exit
PB: predicated region body
PF: predicated region fallthrough
CT: control target
= control target key end

     0   :  { %12 = vsyncpa [#allocation7], 0  ;;  %s2565_s0 = inlined_call_operand.vmem [shape: bf16[2,16,16,64], index: 0, kind: input, shape index: {}]   ;;  %s2566_s1 = inlined_call_operand.vmem [shape: bf16[2,16,64], index: 1, kind: input, shape index: {}]   ;;  %s2567_s2 = inlined_call_operand.vmem [shape: f32[2,16,1], index: 2, kind: input, shape index: {}]   ;;  %s2568_s3 = inlined_call_operand.vmem [shape: bf16[64,128], index: 3, kind: input, shape index: {}]   ;;  %s2569_s4 = inlined_call_operand.vmem [shape: bf16[64,128], index: 4, kind: input, shape index: {}]   ;;  %s2570_s5 = inlined_call_operand.vmem [shape: f32[1,128], index: 5, kind: input, shape index: {}]   ;;  %s2571_s6 = inlined_call_operand.vmem [shape: f32[1,128], index: 6, kind: input, shape index: {}]   ;;  %s2572_s7 = inlined_call_operand.hbm [shape: f32[2,16,128], index: 7, kind: output, shape index: {}]  }
   0x1   :  { %14 = vsyncpa [#allocation7 + $0x1], 0  ;;  %s1991_s24 = smov 0   ;;  %s1993_s25 = smov 0  }
   0x2   :  { %s1995_s26 = smov 0   ;;  %s1997_s27 = smov 0  }
   0x3   :  { %s1999_s28 = smov 0   ;;  %s2001_s29 = smov 0  }
   0x4 LB: > { %s1610_s30 = sadd.s32 4294967295, %s1936_s29   ;;  %s1611_s8 = sadd.s32 4294967294, %s1936_s29   ;;  %s1936_s29 = sphi %s2001_s29, %s20_s29   ;;  %s1932_s28 = sphi %s1999_s28, %s2619_s28   ;;  %s1928_s27 = sphi %s1997_s27, %s2618_s27   ;;  %s1924_s26 = sphi %s1995_s26, %s2617_s26   ;;  %s1920_s25 = sphi %s1993_s25, %s2616_s25   ;;  %s1916_s24 = sphi %s1991_s24, %s2615_s24  }
   0x5   : > { %s32_s9 = sadd.s32 1, %s1932_s28  ;;  %s207_s10 = sadd.s32 1, %s1924_s26 }
   0x6   : > { %p34_p0 = scmp.ge.s32.totalorder %s32_s9, 2  ;;  %p217_p1 = scmp.ne.s32.totalorder %s1924_s26, %s1920_s25 }
   0x7   : > { %p218_p2 = scmp.eq.s32.totalorder %s1610_s30, 1  ;;  %p223_p3 = scmp.ne.s32.totalorder %s1920_s25, %s1916_s24 }
   0x8   : > { %s2621_s9 = smov (%p34_p0, %s32_s9), 0  ;;  %p224_p5 = scmp.eq.s32.totalorder %s1611_s8, 1 }
   0x9   : > { %p2031_p4 = por %p218_p2, %p217_p1  ;;  %s204_s12 = ssub.s32 %s1932_s28, %s2621_s9 }
   0xa   : > { %p1614_p6 = scmp.ge.s32.totalorder %s1936_s29, 1  ;;  %p205_p7 = scmp.eq.s32.totalorder %s204_s12, 0 }
   0xb   : > { %p2038_p8 = por %p224_p5, %p223_p3  ;;  %p294_p9 = scmp.lt.s32.totalorder %s1936_s29, 3 }
   0xc   : > { %s2044_s14 = scalar_select %p205_p7, %s1924_s26, %s207_s10  }
   0xd   : > { %p295_p10 = pnand %p1614_p6, %p294_p9 }
   0xf   : > { %298 = sbr.rel (%p295_p10) target bundleno = 966 (0x3c6), region = 48 }
  0x14   : > { %v1766_v0 = vld [vmem:[%s2568_s3 + $0x18] sm:$0xff]  ;;  %p350_p11 = scmp.lt.s32.totalorder %s1928_s27, 1  ;;  %v2573_v1 = vmov 0   ;;  %v1765_v2 = vld [vmem:[%s2568_s3 + $0x10] sm:$0xff]  ;;  %v1764_v3 = vld [vmem:[%s2568_s3 + $0x8] sm:$0xff]  ;;  %vm531_vm0 = vcmask 523264  }
  0x15   : > { %1853 = vset.pattern.permute.xlu0 %v2573_v1  ;;  %1854 = vset.pattern.permute.xlu1 %v2573_v1  ;;  %v1763_v7 = vld [vmem:[%s2568_s3] sm:$0xff]  ;;  %v1771_v9 = vld [vmem:[%s2569_s4 + $0x18] sm:$0xff]  ;;  %v1770_v15 = vld [vmem:[%s2569_s4 + $0x10] sm:$0xff]  ;;  %vm1176_vm1 = vcmask 1041409   ;;  %vm1178_vm2 = vcmask 1042434   ;;  %vm1180_vm3 = vcmask 1043459  }
  0x16   : > { %584 = vmatpush.bf16.msra.mxu0 %v1766_v0  ;;  %1773 = vmatpush.bf16.msra.mxu1 %v1766_v0  ;;  %s2056_s19 = scalar_select %p350_p11, %s1928_s27, 1  ;;  %v1769_v19 = vld [vmem:[%s2569_s4 + $0x8] sm:$0xff]  ;;  %v1768_v23 = vld [vmem:[%s2569_s4] sm:$0xff]  ;;  %vm1182_vm4 = vcmask 1044484   ;;  %vm1184_vm5 = vcmask 1045509   ;;  %vm1186_vm6 = vcmask 1046534  }
  0x17   : > { %1774 = vmatpush.bf16.msra.mxu2 %v1766_v0  ;;  %1775 = vmatpush.bf16.msra.mxu3 %v1766_v0  ;;  %vm1188_vm7 = vcmask 1047559   ;;  %s1942_s21 = smov 2   ;;  %s1943_s22 = smov 126  }
  0x18   : > { %s1746_s20 = sshll.u32 %s2056_s19, 4  ;;  %1855 = vset.pattern.permute.xlu2 %v2573_v1  ;;  %s1744_s10 = sshll.u32 %s2056_s19, 7 }
  0x19   : > { %s2063_s23 = scalar_lea.vmem %s2567_s2, %s1746_s20  ;;  %s2080_s18 = scalar_lea.vmem %s2565_s0, %s1744_s10 }
  0x1a   : > { %585 = vmatpush.bf16.msra.mxu0 %v1765_v2  ;;  %1776 = vmatpush.bf16.msra.mxu1 %v1765_v2  ;;  %v2070_v4 = vld [vmem:[%s2063_s23] sm:$0xff]  ;;  %v1753_v13 = vld [vmem:[%s2080_s18 + $0x30] sm:$0xff]  ;;  %v1758_v14 = vld [vmem:[%s2080_s18 + $0x58] sm:$0xff]  ;;  %s1944_s30 = smov 124   ;;  %s1945_s8 = smov 4  }
  0x1b   : > { %1777 = vmatpush.bf16.msra.mxu2 %v1765_v2  ;;  %1778 = vmatpush.bf16.msra.mxu3 %v1765_v2  ;;  %v823_v5 = vperm.slane %v2070_v4, 0  ;;  %v810_v6 = vrot.slane %v2070_v4, 2  ;;  %v809_v10 = vrot.slane %v2070_v4, 1  ;;  %v1747_v11 = vld [vmem:[%s2080_s18] sm:$0xff]  ;;  %v811_v17 = vrot.slane %v2070_v4, 3  ;;  %v806_v24 = vld [vmem:[%s2063_s23 + $0x8] sm:$0xff] }
  0x1c   : > { %v1751_v12 = vld [vmem:[%s2080_s18 + $0x20] sm:$0xff]  ;;  %v814_v20 = vrot.slane %v2070_v4, 6  ;;  %v815_v21 = vrot.slane %v2070_v4, 7  ;;  %v816_v26 = vrot.slane %v806_v24, 1  ;;  %v1748_v27 = vld [vmem:[%s2080_s18 + $0x8] sm:$0xff]  ;;  %v1754_v29 = vld [vmem:[%s2080_s18 + $0x38] sm:$0xff] }
  0x1d   : > { %v825_v8 = vperm.slane %v810_v6, 0  ;;  %840 = vperm.xlu0 %1853, %v823_v5   ;;  %v824_v16 = vperm.slane %v809_v10, 0  ;;  %v826_v18 = vperm.slane %v811_v17, 0  ;;  %v1752_v28 = vld [vmem:[%s2080_s18 + $0x28] sm:$0xff]  ;;  %v1759_v30 = vld [vmem:[%s2080_s18 + $0x60] sm:$0xff]  ;;  %v817_v32 = vrot.slane %v806_v24, 2 }
  0x1e   : > { %586 = vmatpush.bf16.msra.mxu0 %v1764_v3  ;;  %1779 = vmatpush.bf16.msra.mxu1 %v1764_v3  ;;  %v829_v22 = vperm.slane %v814_v20, 0  ;;  %v830_v25 = vperm.slane %v815_v21, 0  ;;  %v832_v31 = vperm.slane %v816_v26, 0  ;;  %v812_v33 = vrot.slane %v2070_v4, 4  ;;  %s1745_s23 = sshll.u32 %s2056_s19, 3  ;;  %v1749_v41 = vld [vmem:[%s2080_s18 + $0x10] sm:$0xff] }
  0x1f   : > { %1780 = vmatpush.bf16.msra.mxu2 %v1764_v3  ;;  %1781 = vmatpush.bf16.msra.mxu3 %v1764_v3  ;;  %v833_v34 = vperm.slane %v817_v32, 0  ;;  %v819_v35 = vrot.slane %v806_v24, 4  ;;  %v820_v37 = vrot.slane %v806_v24, 5  ;;  %s368_s20 = scalar_lea.vmem %s2566_s1, %s1745_s23  ;;  %v822_v40 = vrot.slane %v806_v24, 7  ;;  %v1755_v43 = vld [vmem:[%s2080_s18 + $0x40] sm:$0xff]  ;;  %v1760_v44 = vld [vmem:[%s2080_s18 + $0x68] sm:$0xff] }
  0x20   : > { %848 = vperm.xlu1 %1854, %v825_v8   ;;  %v827_v36 = vperm.slane %v812_v33, 0  ;;  %v1767_v42 = vld [vmem:[%s368_s20] sm:$0xff]  ;;  %v813_v45 = vrot.slane %v2070_v4, 5  ;;  %v831_v48 = vperm.slane %v806_v24, 0  ;;  %v818_v49 = vrot.slane %v806_v24, 3  ;;  %v1750_v50 = vld [vmem:[%s2080_s18 + $0x18] sm:$0xff] }
  0x21   : > { %v835_v38 = vperm.slane %v819_v35, 0  ;;  %v836_v39 = vperm.slane %v820_v37, 0  ;;  %v838_v46 = vperm.slane %v822_v40, 0  ;;  %v1756_v51 = vld [vmem:[%s2080_s18 + $0x48] sm:$0xff]  ;;  %v1761_v52 = vld [vmem:[%s2080_s18 + $0x70] sm:$0xff]  ;;  %v821_v54 = vrot.slane %v806_v24, 6 }
  0x22   : > { %587 = vmatpush.bf16.msra.mxu0 %v1763_v7  ;;  %1782 = vmatpush.bf16.msra.mxu1 %v1763_v7  ;;  %v828_v47 = vperm.slane %v813_v45, 0  ;;  %v834_v53 = vperm.slane %v818_v49, 0  ;;  %v1757_v56 = vld [vmem:[%s2080_s18 + $0x50] sm:$0xff]  ;;  %v1762_v57 = vld [vmem:[%s2080_s18 + $0x78] sm:$0xff]  ;;  %s1940_s19 = smov 1   ;;  %s1941_s18 = smov 127  }
  0x23   : > { %1783 = vmatpush.bf16.msra.mxu2 %v1763_v7  ;;  %1784 = vmatpush.bf16.msra.mxu3 %v1763_v7  ;;  %v837_v55 = vperm.slane %v821_v54, 0  ;;  %s1946_s10 = smov 8   ;;  %s1947_s12 = smov 120  }
  0x24   : > { %856 = vperm.xlu2 %1855, %v827_v36   ;;  %s1948_s15 = smov 16   ;;  %s1949_s23 = smov 112  }
  0x25   : > { %1702 = vmatmul.msk.bf16.vlgmr.msra.gmra.mxu0 %vm531_vm0, %v1747_v11  ;;  %1706 = vmatmul.msk.bf16.vlgmr.msra.gmra.mxu1 %vm531_vm0, %v1751_v12  ;;  %s346_s20 = sand.u32 1, %s1920_s25  }
  0x26   : > { %715 = vmatpush.bf16.msrb.mxu1 %v1771_v9  ;;  %1708 = vmatmul.msk.bf16.vlgmr.msra.gmra.mxu2 %vm531_vm0, %v1753_v13  ;;  %s1476_s16 = scalar_lea.sflag [#allocation7], %s346_s20 }
  0x27   : > { %1713 = vmatmul.msk.bf16.vlgmr.msra.gmra.mxu3 %vm531_vm0, %v1758_v14  ;;  %844 = vperm.xlu0 %1853, %v824_v16  }
  0x28   : > { %852 = vperm.xlu1 %1854, %v826_v18  }
  0x2a   : > { %716 = vmatpush.bf16.msrb.mxu1 %v1770_v15 }
  0x2c   : > { %860 = vperm.xlu2 %1855, %v828_v47  }
  0x2e   : > { %717 = vmatpush.bf16.msrb.mxu1 %v1769_v19 }
  0x2f   : > { %864 = vperm.xlu0 %1853, %v829_v22  }
  0x30   : > { %868 = vperm.xlu1 %1854, %v830_v25  }
  0x32   : > { %718 = vmatpush.bf16.msrb.mxu1 %v1768_v23 }
  0x34   : > { %872 = vperm.xlu2 %1855, %v831_v48  }
  0x35   : > { %1703 = vmatmul.msk.bf16.gmra.mxu0 %vm531_vm0, %v1748_v27  ;;  %1707 = vmatmul.msk.bf16.gmra.mxu1 %vm531_vm0, %v1752_v28 }
  0x36   : > { %1709 = vmatmul.msk.bf16.gmra.mxu2 %vm531_vm0, %v1754_v29 }
  0x37   : > { %1714 = vmatmul.msk.bf16.gmra.mxu3 %vm531_vm0, %v1759_v30  ;;  %876 = vperm.xlu0 %1853, %v832_v31  }
  0x38   : > { %880 = vperm.xlu1 %1854, %v833_v34  }
  0x3c   : > { %884 = vperm.xlu2 %1855, %v834_v53  }
  0x3f   : > { %888 = vperm.xlu0 %1853, %v835_v38  }
  0x40   : > { %892 = vperm.xlu1 %1854, %v836_v39  }
  0x44   : > { %896 = vperm.xlu2 %1855, %v837_v55  }
  0x45   : > { %1704 = vmatmul.msk.bf16.gmra.mxu0 %vm531_vm0, %v1749_v41  ;;  %1738 = vmatmul.msk.bf16.vlgmr.msrb.gmra.mxu1 %vm531_vm0, %v1767_v42 }
  0x46   : > { %1710 = vmatmul.msk.bf16.gmra.mxu2 %vm531_vm0, %v1755_v43 }
  0x47   : > { %1715 = vmatmul.msk.bf16.gmra.mxu3 %vm531_vm0, %v1760_v44  ;;  %900 = vperm.xlu0 %1853, %v838_v46  }
  0x55   : > { %1705 = vmatmul.msk.bf16.gmra.mxu0 %vm531_vm0, %v1750_v50 }
  0x56   : > { %1711 = vmatmul.msk.bf16.gmra.mxu2 %vm531_vm0, %v1756_v51 }
  0x57   : > { %1716 = vmatmul.msk.bf16.gmra.mxu3 %vm531_vm0, %v1761_v52 }
  0x66   : > { %1712 = vmatmul.msk.bf16.gmra.mxu2 %vm531_vm0, %v1757_v56 }
  0x67   : > { %1717 = vmatmul.msk.bf16.gmra.mxu3 %vm531_vm0, %v1762_v57 }
  0x7e   : > { %v2148_v11 = vpop.permute.xlu2 %856 }
  0x86   : > { %v861_v39 = vpop.permute.xlu2 %860 }
  0x8f   : > { %v841_v4 = vpop.permute.xlu0 %840 }
  0x92   : > { %v2144_v5 = vpop.permute.xlu1 %848 }
  0x99   : > { %v845_v10 = vpop.permute.xlu0 %844 }
  0x9a   : > { %v2150_v12 = vpop.permute.xlu1 %852 }
  0xa1   : > { %v865_v38 = vpop.permute.xlu0 %864 }
  0xa2   : > { %v589_v58 = vpop.f32.mrf.mxu0  ;;  %v2138_v59 = vpop.f32.mrf.mxu1 }
  0xa3   : > { %v869_v44 = vpop.permute.xlu1 %868 }
  0xa9   : > { %v619_v60 = vpop.f32.mrf.mxu2 }
  0xaa   : > { %v591_v61 = vpop.f32.mrf.mxu0  ;;  %v2140_v62 = vpop.f32.mrf.mxu1 }
  0xab   : > { %v2142_v2 = vpop.f32.mrf.mxu3 }
  0xb1   : > { %v621_v3 = vpop.f32.mrf.mxu2 }
  0xb2   : > { %v594_v63 = vpop.f32.mrf.mxu0  ;;  %v614_v0 = vpop.f32.mrf.mxu1 }
  0xb3   : > { %v2146_v8 = vpop.f32.mrf.mxu3 }
  0xb9   : > { %v624_v9 = vpop.f32.mrf.mxu2 }
  0xba   : > { %v596_v6 = vpop.f32.mrf.mxu0  ;;  %v616_v7 = vpop.f32.mrf.mxu1 }
  0xbb   : > { %v2161_v32 = vpop.f32.mrf.mxu3 }
  0xc1   : > { %v626_v33 = vpop.f32.mrf.mxu2 }
  0xc2   : > { %v599_v13 = vpop.f32.mrf.mxu0  ;;  %v2152_v14 = vpop.f32.mrf.mxu1 }
  0xc3   : > { %v727_v15 = vrot.slane %v2152_v14, 1  ;;  %v730_v16 = vrot.slane %v2152_v14, 4  ;;  %v731_v17 = vrot.slane %v2152_v14, 5  ;;  %v732_v18 = vrot.slane %v2152_v14, 6 }
  0xc4   : > { %v733_v19 = vrot.slane %v2152_v14, 7  ;;  %v741_v20 = vperm.slane %v2152_v14, 0  ;;  %v728_v21 = vrot.slane %v2152_v14, 2 }
  0xc5   : > { %v742_v22 = vperm.slane %v727_v15, 0  ;;  %v746_v23 = vperm.slane %v731_v17, 0  ;;  %v747_v24 = vperm.slane %v732_v18, 0  ;;  %v745_v28 = vperm.slane %v730_v16, 0 }
  0xc6   : > { %v748_v25 = vperm.slane %v733_v19, 0  ;;  %v773_v26 = vadd.f32 %v741_v20, %v589_v58  ;;  %v774_v27 = vadd.f32 %v741_v20, %v591_v61  ;;  %v743_v31 = vperm.slane %v728_v21, 0 }
  0xc7   : > { %v775_v29 = vadd.f32 %v742_v22, %v594_v63  ;;  %v776_v30 = vadd.f32 %v742_v22, %v596_v6  ;;  %v783_v34 = vadd.f32 %v746_v23, %v614_v0  ;;  %v784_v35 = vadd.f32 %v746_v23, %v616_v7 }
  0xc8   : > { %v785_v36 = vadd.f32 %v747_v24, %v619_v60  ;;  %v786_v37 = vadd.f32 %v747_v24, %v621_v3  ;;  %v787_v40 = vadd.f32 %v748_v25, %v624_v9  ;;  %v788_v41 = vadd.f32 %v748_v25, %v626_v33  ;;  %v2215_v33 = vpop.permute.xlu2 %872 }
  0xc9   : > { %v903_v42 = vmul.f32 %v841_v4, %v773_v26  ;;  %v904_v43 = vmul.f32 %v841_v4, %v774_v27  ;;  %v905_v45 = vmul.f32 %v845_v10, %v775_v29  ;;  %v2163_v46 = vmul.f32 %v861_v39, %v783_v34  ;;  %v2212_v27 = vpop.permute.xlu0 %876 }
  0xca   : > { %v2165_v47 = vmul.f32 %v861_v39, %v784_v35  ;;  %v2167_v48 = vmul.f32 %v865_v38, %v785_v36  ;;  %v2169_v49 = vmul.f32 %v865_v38, %v786_v37  ;;  %v2171_v50 = vmul.f32 %v869_v44, %v787_v40  ;;  %v601_v53 = vpop.f32.mrf.mxu0  ;;  %v629_v38 = vpop.f32.mrf.mxu2 }
  0xcb   : > { %v2173_v51 = vmul.f32 %v869_v44, %v788_v41  ;;  %v1048_v52 = vmax.f32 %v903_v42, %v904_v43  ;;  %v1202_v55 = vmin.f32 %v903_v42, %v904_v43  ;;  %v777_v57 = vadd.f32 %v743_v31, %v599_v13 }
  0xcc   : > { %v2177_v54 = vmax.f32 %v2163_v46, %v2165_v47  ;;  %v2181_v56 = vmin.f32 %v2163_v46, %v2165_v47  ;;  %v2185_v58 = vmax.f32 %v2167_v48, %v2169_v49  ;;  %v2193_v61 = vmin.f32 %v2167_v48, %v2169_v49 }
  0xcd   : > { %v2189_v60 = vmax.f32 %v2171_v50, %v2173_v51  ;;  %v2197_v63 = vmin.f32 %v2171_v50, %v2173_v51  ;;  %v778_v0 = vadd.f32 %v743_v31, %v601_v53  ;;  %v906_v3 = vmul.f32 %v845_v10, %v776_v30 }
  0xce   : > { %2584 = vst [vmem:[#allocation9_spill] sm:$0xff] %v2185_v58  ;;  %v2200_v4 = vadd.f32 %v745_v28, %v2138_v59  ;;  %v2203_v6 = vadd.f32 %v745_v28, %v2140_v62  ;;  %v907_v7 = vmul.f32 %v2144_v5, %v777_v57  ;;  %v936_v9 = vadd.f32 %v904_v43, %v903_v42  ;;  %v651_v59 = vpop.f32.mrf.mxu3 }
  0xcf   : > { %2585 = vst [vmem:[#allocation10_spill] sm:$0xff] %v2189_v60  ;;  %v2207_v13 = vmul.f32 %v2144_v5, %v778_v0  ;;  %v976_v15 = vmul.f32 %v903_v42, %v903_v42  ;;  %v977_v16 = vmul.f32 %v904_v43, %v904_v43  ;;  %v978_v17 = vmul.f32 %v905_v45, %v905_v45  ;;  %v2217_v43 = vpop.f32.mrf.mxu1 }
  0xd0   : > { %2586 = vst [vmem:[#allocation11_spill] sm:$0xff] %v2193_v61  ;;  %v937_v10 = vadd.f32 %v936_v9, %v905_v45  ;;  %v1049_v20 = vrot.slane %v1048_v52, 4  ;;  %v979_v21 = vmul.f32 %v906_v3, %v906_v3  ;;  %v1055_v62 = vmax.f32 %v905_v45, %v906_v3 }
  0xd1   : > { %2587 = vst [vmem:[#allocation12_spill] sm:$0xff] %v2197_v63  ;;  %v1008_v22 = vadd.f32 %v977_v16, %v976_v15  ;;  %v1062_v23 = vmax.f32 %v907_v7, %v2207_v13  ;;  %v1203_v26 = vrot.slane %v1202_v55, 4  ;;  %v1209_v5 = vmin.f32 %v905_v45, %v906_v3 }
  0xd2   : > { %v938_v24 = vadd.f32 %v937_v10, %v906_v3  ;;  %v1050_v25 = vmax.f32 %v1048_v52, %v1049_v20  ;;  %v1056_v29 = vrot.slane %v1055_v62, 4  ;;  %v1216_v31 = vmin.f32 %v907_v7, %v2207_v13 }
  0xd3   : > { %v1009_v28 = vadd.f32 %v1008_v22, %v978_v17  ;;  %v1063_v30 = vrot.slane %v1062_v23, 4  ;;  %v980_v34 = vmul.f32 %v907_v7, %v907_v7  ;;  %v1204_v36 = vmin.f32 %v1202_v55, %v1203_v26 }
  0xd4   : > { %v1051_v35 = vrot.slane %v1050_v25, 2  ;;  %v1210_v37 = vrot.slane %v1209_v5, 4  ;;  %v1057_v40 = vmax.f32 %v1055_v62, %v1056_v29  ;;  %v1217_v42 = vrot.slane %v1216_v31, 4 }
  0xd5   : > { %v1010_v39 = vadd.f32 %v1009_v28, %v979_v21  ;;  %v1064_v41 = vmax.f32 %v1062_v23, %v1063_v30  ;;  %v981_v44 = vmul.f32 %v2207_v13, %v2207_v13  ;;  %v1205_v52 = vrot.slane %v1204_v36, 2 }
  0xd6   : > { %v1052_v45 = vmax.f32 %v1050_v25, %v1051_v35  ;;  %v1211_v53 = vmin.f32 %v1209_v5, %v1210_v37  ;;  %v939_v57 = vadd.f32 %v938_v24, %v907_v7  ;;  %v1058_v0 = vrot.slane %v1057_v40, 2  ;;  %v654_v25 = vpop.f32.mrf.mxu3  ;;  %v889_v37 = vpop.permute.xlu0 %888 }
  0xd7   : > { %v1065_v3 = vrot.slane %v1064_v41, 2  ;;  %v1218_v9 = vmin.f32 %v1216_v31, %v1217_v42  ;;  %v1206_v15 = vmin.f32 %v1204_v36, %v1205_v52  ;;  %v737_v17 = vrot.slane %v2217_v43, 4 }
  0xd8   : > { %v1053_v55 = vrot.slane %v1052_v45, 1  ;;  %v1212_v16 = vrot.slane %v1211_v53, 2  ;;  %v1011_v10 = vadd.f32 %v1010_v39, %v980_v34  ;;  %v1059_v20 = vmax.f32 %v1057_v40, %v1058_v0  ;;  %v2224_v34 = vpop.permute.xlu1 %880  ;;  %v885_v0 = vpop.permute.xlu2 %884 }
  0xd9   : > { %v1066_v21 = vmax.f32 %v1064_v41, %v1065_v3  ;;  %v1219_v22 = vrot.slane %v1218_v9, 2  ;;  %v1207_v23 = vrot.slane %v1206_v15, 1  ;;  %v753_v28 = vperm.slane %v737_v17, 0 }
  0xda   : > { %v1054_v62 = vmax.f32 %v1052_v45, %v1053_v55  ;;  %v1213_v26 = vmin.f32 %v1211_v53, %v1212_v16  ;;  %v1060_v29 = vrot.slane %v1059_v20, 1  ;;  %v736_v24 = vrot.slane %v2217_v43, 3 }
  0xdb   : > { %v1067_v5 = vrot.slane %v1066_v21, 1  ;;  %v1220_v7 = vmin.f32 %v1218_v9, %v1219_v22  ;;  %v1208_v30 = vmin.f32 %v1206_v15, %v1207_v23  ;;  %v797_v35 = vadd.f32 %v753_v28, %v2161_v32  ;;  %v631_v15 = vpop.f32.mrf.mxu2 }
  0xdc   : > { %v1214_v31 = vrot.slane %v1213_v26, 1  ;;  %v798_v36 = vadd.f32 %v753_v28, %v651_v59  ;;  %v1061_v39 = vmax.f32 %v1059_v20, %v1060_v29  ;;  %v752_v42 = vperm.slane %v736_v24, 0 }
  0xdd   : > { %v1068_v40 = vmax.f32 %v1066_v21, %v1067_v5  ;;  %v1221_v41 = vrot.slane %v1220_v7, 1  ;;  %v2226_v52 = vmul.f32 %v889_v37, %v797_v35  ;;  %v749_v3 = vperm.slane %v2217_v43, 0 }
  0xde   : > { %v1215_v45 = vmin.f32 %v1213_v26, %v1214_v31  ;;  %v2228_v53 = vmul.f32 %v889_v37, %v798_v36  ;;  %v1177_v9 = vsel %vm1176_vm1, %v1061_v39, %v1054_v62  ;;  %v795_v32 = vadd.f32 %v752_v42, %v2142_v2 }
  0xdf   : > { %v1222_v55 = vmin.f32 %v1220_v7, %v1221_v41  ;;  %v796_v59 = vadd.f32 %v752_v42, %v2146_v8  ;;  %v2235_v16 = vsel %vm1178_vm2, %v1068_v40, %v1177_v9  ;;  %v789_v8 = vadd.f32 %v749_v3, %v629_v38  ;;  %v656_v40 = vpop.f32.mrf.mxu3  ;;  %v604_v42 = vpop.f32.mrf.mxu0 }
  0xe0   : > { %v1330_v17 = vsel %vm1176_vm1, %v1215_v45, %v1208_v30  ;;  %v1132_v20 = vmax.f32 %v2226_v52, %v2228_v53  ;;  %v1286_v21 = vmin.f32 %v2226_v52, %v2228_v53  ;;  %v2245_v62 = vmul.f32 %v885_v0, %v795_v32  ;;  %v893_v9 = vpop.permute.xlu1 %892 }
  0xe1   : > { %v2243_v22 = vsel %vm1178_vm2, %v1222_v55, %v1330_v17  ;;  %v2247_v2 = vmul.f32 %v885_v0, %v796_v59  ;;  %v790_v28 = vadd.f32 %v749_v3, %v631_v15  ;;  %v738_v29 = vrot.slane %v2217_v43, 5 }
  0xe2   : > { %v1133_v23 = vrot.slane %v1132_v20, 4  ;;  %v1287_v26 = vrot.slane %v1286_v21, 4  ;;  %v2257_v31 = vadd.f32 %v939_v57, %v2207_v13  ;;  %v2259_v35 = vadd.f32 %v1011_v10, %v981_v44 }
  0xe3   : > { %v1125_v24 = vmax.f32 %v2245_v62, %v2247_v2  ;;  %v1279_v30 = vmin.f32 %v2245_v62, %v2247_v2  ;;  %v2262_v38 = vmul.f32 %v2215_v33, %v789_v8  ;;  %v2265_v36 = vmul.f32 %v2215_v33, %v790_v28 }
  0xe4   : > { %v754_v41 = vperm.slane %v738_v29, 0  ;;  %v729_v45 = vrot.slane %v2152_v14, 3  ;;  %v2268_v0 = vmax.f32 %v1132_v20, %v1133_v23  ;;  %v2270_v3 = vmin.f32 %v1286_v21, %v1287_v26 }
  0xe5   : > { %v1126_v37 = vrot.slane %v1125_v24, 4  ;;  %v1280_v39 = vrot.slane %v1279_v30, 4  ;;  %v2274_v13 = vmul.f32 %v2245_v62, %v2245_v62  ;;  %v2278_v44 = vmul.f32 %v2247_v2, %v2247_v2 }
  0xe6   : > { %v1104_v10 = vmax.f32 %v2262_v38, %v2265_v36  ;;  %v1258_v14 = vmin.f32 %v2262_v38, %v2265_v36  ;;  %v800_v55 = vadd.f32 %v754_v41, %v656_v40  ;;  %v799_v32 = vadd.f32 %v754_v41, %v654_v25 }
  0xe7   : > { %v1127_v33 = vmax.f32 %v1125_v24, %v1126_v37  ;;  %v1281_v57 = vmin.f32 %v1279_v30, %v1280_v39  ;;  %v744_v59 = vperm.slane %v729_v45, 0  ;;  %v734_v15 = vrot.slane %v2217_v43, 1  ;;  %v606_v7 = vpop.f32.mrf.mxu0 }
  0xe8   : > { %v1105_v21 = vrot.slane %v1104_v10, 4  ;;  %v1259_v8 = vrot.slane %v1258_v14, 4  ;;  %v2286_v26 = vmul.f32 %v893_v9, %v799_v32  ;;  %v2288_v28 = vmul.f32 %v893_v9, %v800_v55  ;;  %v634_v32 = vpop.f32.mrf.mxu2 }
  0xe9   : > { %v1128_v17 = vrot.slane %v1127_v33, 2  ;;  %v1282_v20 = vrot.slane %v1281_v57, 2  ;;  %v779_v29 = vadd.f32 %v744_v59, %v604_v42  ;;  %v2293_v40 = vmul.f32 %v2262_v38, %v2262_v38 }
  0xea   : > { %2588 = vst [vmem:[#allocation13_spill] sm:$0xff] %v2286_v26  ;;  %v1106_v37 = vmax.f32 %v1104_v10, %v1105_v21  ;;  %v1260_v39 = vmin.f32 %v1258_v14, %v1259_v8  ;;  %v1139_v41 = vmax.f32 %v2286_v26, %v2288_v28  ;;  %v1293_v45 = vmin.f32 %v2286_v26, %v2288_v28 }
  0xeb   : > { %2589 = vst [vmem:[#allocation14_spill] sm:$0xff] %v2288_v28  ;;  %v1129_v24 = vmax.f32 %v1127_v33, %v1128_v17  ;;  %v1283_v30 = vmin.f32 %v1281_v57, %v1282_v20  ;;  %v2299_v33 = vperm.slane %v734_v15, 0  ;;  %v2303_v57 = vmul.f32 %v2265_v36, %v2265_v36 }
  0xec   : > { %v1107_v55 = vrot.slane %v1106_v37, 2  ;;  %v1261_v42 = vrot.slane %v1260_v39, 2  ;;  %v1140_v10 = vrot.slane %v1139_v41, 4  ;;  %v1294_v14 = vrot.slane %v1293_v45, 4 }
  0xed   : > { %v1130_v9 = vrot.slane %v1129_v24, 1  ;;  %v909_v17 = vmul.f32 %v2150_v12, %v779_v29  ;;  %v1284_v20 = vrot.slane %v1283_v30, 1  ;;  %v791_v1 = vadd.f32 %v2299_v33, %v634_v32 }
  0xee   : > { %v1108_v21 = vmax.f32 %v1106_v37, %v1107_v55  ;;  %v1262_v8 = vmin.f32 %v1260_v39, %v1261_v42  ;;  %v2309_v5 = vmul.f32 %v2286_v26, %v2286_v26  ;;  %v2313_v15 = vmul.f32 %v2288_v28, %v2288_v28  ;;  %v659_v42 = vpop.f32.mrf.mxu3 }
  0xef   : > { %v1141_v25 = vmax.f32 %v1139_v41, %v1140_v10  ;;  %v1295_v23 = vmin.f32 %v1293_v45, %v1294_v14  ;;  %v2315_v19 = vmax.f32 %v1129_v24, %v1130_v9  ;;  %v982_v29 = vmul.f32 %v909_v17, %v909_v17 }
  0xf0   : > { %2590 = vst [vmem:[#allocation15_spill] sm:$0xff] %v2309_v5  ;;  %v1109_v18 = vrot.slane %v1108_v21, 1  ;;  %v739_v37 = vrot.slane %v2217_v43, 6  ;;  %v1263_v39 = vrot.slane %v1262_v8, 1  ;;  %v780_v63 = vadd.f32 %v744_v59, %v606_v7 }
  0xf1   : > { %2591 = vst [vmem:[#allocation16_spill] sm:$0xff] %v2313_v15  ;;  %v1142_v55 = vrot.slane %v1141_v25, 2  ;;  %v1296_v32 = vrot.slane %v1295_v23, 2  ;;  %v2318_v61 = vmin.f32 %v1283_v30, %v1284_v20  ;;  %v941_v5 = vadd.f32 %v2257_v31, %v909_v17  ;;  %v2333_v30 = vpop.permute.xlu2 %896 }
  0xf2   : > { %2592 = vst [vmem:[#allocation17_spill] sm:$0xff] %v2315_v19  ;;  %v2322_v28 = vmul.f32 %v2212_v27, %v791_v1  ;;  %v2324_v41 = vperm.slane %v739_v37, 0  ;;  %v910_v9 = vmul.f32 %v2150_v12, %v780_v63  ;;  %v911_v10 = vmul.f32 %v2148_v11, %v2200_v4  ;;  %v636_v19 = vpop.f32.mrf.mxu2 }
  0xf3   : > { %2593 = vst [vmem:[#allocation18_spill] sm:$0xff] %v2318_v61  ;;  %v1143_v24 = vmax.f32 %v1141_v25, %v1142_v55  ;;  %v1297_v45 = vmin.f32 %v1295_v23, %v1296_v32  ;;  %v2329_v14 = vmax.f32 %v1108_v21, %v1109_v18  ;;  %v1013_v7 = vadd.f32 %v2259_v35, %v982_v29 }
  0xf4   : > { %v801_v59 = vadd.f32 %v2324_v41, %v659_v42  ;;  %v912_v1 = vmul.f32 %v2148_v11, %v2203_v6  ;;  %v2337_v31 = vmin.f32 %v1262_v8, %v1263_v39  ;;  %v942_v23 = vadd.f32 %v941_v5, %v910_v9 }
  0xf5   : > { %v1144_v25 = vrot.slane %v1143_v24, 1  ;;  %v983_v20 = vmul.f32 %v910_v9, %v910_v9  ;;  %v1298_v12 = vrot.slane %v1297_v45, 1  ;;  %v2341_v63 = vmul.f32 %v2322_v28, %v2322_v28 }
  0xf6   : > { %v986_v4 = vmul.f32 %v2163_v46, %v2163_v46  ;;  %v987_v18 = vmul.f32 %v2165_v47, %v2165_v47  ;;  %v2348_v35 = vmul.f32 %v2333_v30, %v801_v59  ;;  %v943_v11 = vadd.f32 %v942_v23, %v911_v10 }
  0xf7   : > { %v984_v6 = vmul.f32 %v911_v10, %v911_v10  ;;  %v1014_v21 = vadd.f32 %v1013_v7, %v983_v20  ;;  %v985_v8 = vmul.f32 %v912_v1, %v912_v1  ;;  %v1069_v5 = vmax.f32 %v909_v17, %v910_v9 }
  0xf8   : > { %v1076_v29 = vmax.f32 %v911_v10, %v912_v1  ;;  %v2594_v37 = vrot.slane %v2177_v54, 4  ;;  %v2353_v55 = vmax.f32 %v1143_v24, %v1144_v25  ;;  %v944_v32 = vadd.f32 %v943_v11, %v912_v1 }
  0xf9   : > { %v988_v42 = vmul.f32 %v2167_v48, %v2167_v48  ;;  %v1015_v61 = vadd.f32 %v1014_v21, %v984_v6  ;;  %v2357_v59 = vmin.f32 %v1297_v45, %v1298_v12  ;;  %v1070_v23 = vrot.slane %v1069_v5, 4 }
  0xfa   : > { %v1085_v39 = vmax.f32 %v2177_v54, %v2594_v37  ;;  %2595 = vst [vmem:[#allocation19_spill] sm:$0xff] %v2353_v55  ;;  %v1077_v15 = vrot.slane %v1076_v29, 4  ;;  %v945_v20 = vadd.f32 %v944_v32, %v2163_v46  ;;  %v1223_v26 = vmin.f32 %v909_v17, %v910_v9 }
  0xfb   : > { %2596 = vst [vmem:[#allocation20_spill] sm:$0xff] %v2357_v59  ;;  %v1016_v60 = vadd.f32 %v1015_v61, %v985_v8  ;;  %v1230_v58 = vmin.f32 %v911_v10, %v912_v1  ;;  %v1071_v54 = vmax.f32 %v1069_v5, %v1070_v23  ;;  %v2597_v11 = vrot.slane %v2181_v56, 4 }
  0xfc   : > { %v1086_v7 = vrot.slane %v1085_v39, 2  ;;  %v1078_v24 = vmax.f32 %v1076_v29, %v1077_v15  ;;  %v946_v45 = vadd.f32 %v945_v20, %v2165_v47  ;;  %v1224_v21 = vrot.slane %v1223_v26, 4 }
  0xfd   : > { %v1239_v6 = vmin.f32 %v2181_v56, %v2597_v11  ;;  %v1017_v12 = vadd.f32 %v1016_v60, %v986_v4  ;;  %v1231_v37 = vrot.slane %v1230_v58, 4  ;;  %v1072_v59 = vrot.slane %v1071_v54, 2 }
  0xfe   : > { %v1087_v25 = vmax.f32 %v1085_v39, %v1086_v7  ;;  %v1079_v55 = vrot.slane %v1078_v24, 2  ;;  %v947_v17 = vadd.f32 %v946_v45, %v2167_v48  ;;  %v1225_v10 = vmin.f32 %v1223_v26, %v1224_v21 }
  0xff   : > { %v1240_v61 = vrot.slane %v1239_v6, 2  ;;  %v1018_v9 = vadd.f32 %v1017_v12, %v987_v18  ;;  %v1232_v15 = vmin.f32 %v1230_v58, %v1231_v37  ;;  %v1073_v1 = vmax.f32 %v1071_v54, %v1072_v59  ;;  %v639_v58 = vpop.f32.mrf.mxu2  ;;  %v661_v54 = vpop.f32.mrf.mxu3 }
 0x100   : > { %v1088_v46 = vrot.slane %v1087_v25, 1  ;;  %v1080_v8 = vmax.f32 %v1078_v24, %v1079_v55  ;;  %v1226_v56 = vrot.slane %v1225_v10, 2  ;;  %v792_v47 = vadd.f32 %v2299_v33, %v636_v19 }
 0x101   : > { %v1241_v5 = vmin.f32 %v1239_v6, %v1240_v61  ;;  %v1019_v29 = vadd.f32 %v1018_v9, %v988_v42  ;;  %v1233_v39 = vrot.slane %v1232_v15, 2  ;;  %v1074_v60 = vrot.slane %v1073_v1, 1 }
 0x102   : > { %v1081_v4 = vrot.slane %v1080_v8, 1  ;;  %v948_v23 = vadd.f32 %v947_v17, %v2169_v49  ;;  %v1089_v7 = vmax.f32 %v1087_v25, %v1088_v46  ;;  %v1227_v20 = vmin.f32 %v1225_v10, %v1226_v56 }
 0x103   : > { %v1242_v32 = vrot.slane %v1241_v5, 1  ;;  %v1234_v48 = vmin.f32 %v1232_v15, %v1233_v39  ;;  %v922_v26 = vmul.f32 %v2212_v27, %v792_v47  ;;  %v1075_v18 = vmax.f32 %v1073_v1, %v1074_v60 }
 0x104   : > { %v1082_v55 = vmax.f32 %v1080_v8, %v1081_v4  ;;  %v949_v59 = vadd.f32 %v948_v23, %v2171_v50  ;;  %v989_v42 = vmul.f32 %v2169_v49, %v2169_v49  ;;  %v1228_v19 = vrot.slane %v1227_v20, 1 }
 0x105   : > { %v1235_v33 = vrot.slane %v1234_v48, 1  ;;  %v1243_v24 = vmin.f32 %v1241_v5, %v1242_v32  ;;  %v990_v11 = vmul.f32 %v2171_v50, %v2171_v50  ;;  %v1181_v25 = vsel %vm1180_vm3, %v1075_v18, %v2235_v16 }
 0x106   : > { %v950_v27 = vadd.f32 %v949_v59, %v2173_v51  ;;  %v991_v6 = vmul.f32 %v2173_v51, %v2173_v51  ;;  %v1020_v45 = vadd.f32 %v1019_v29, %v989_v42  ;;  %v1183_v12 = vsel %vm1182_vm4, %v1082_v55, %v1181_v25 }
 0x107   : > { %v1229_v21 = vmin.f32 %v1227_v20, %v1228_v19  ;;  %v1236_v49 = vmin.f32 %v1234_v48, %v1235_v33  ;;  %v1111_v37 = vmax.f32 %v2322_v28, %v922_v26  ;;  %v2381_v46 = vsel %vm1184_vm5, %v1089_v7, %v1183_v12  ;;  %v641_v7 = vpop.f32.mrf.mxu2 }
 0x108   : > { %v951_v50 = vadd.f32 %v950_v27, %v2262_v38  ;;  %v1021_v61 = vadd.f32 %v1020_v45, %v990_v11  ;;  %v1265_v16 = vmin.f32 %v2322_v28, %v922_v26  ;;  %v802_v51 = vadd.f32 %v2324_v41, %v661_v54 }
 0x109   : > { %v1332_v17 = vsel %vm1180_vm3, %v1229_v21, %v2243_v22  ;;  %v1112_v9 = vrot.slane %v1111_v37, 4  ;;  %v735_v10 = vrot.slane %v2217_v43, 2  ;;  %v740_v60 = vrot.slane %v2217_v43, 7 }
 0x10a   : > { %v1333_v15 = vsel %vm1182_vm4, %v1236_v49, %v1332_v17  ;;  %v952_v1 = vadd.f32 %v951_v50, %v2265_v36  ;;  %v1022_v8 = vadd.f32 %v1021_v61, %v991_v6  ;;  %v1266_v5 = vrot.slane %v1265_v16, 4 }
 0x10b   : > { %v2392_v29 = vsel %vm1184_vm5, %v1243_v24, %v1333_v15  ;;  %v1113_v38 = vmax.f32 %v1111_v37, %v1112_v9  ;;  %v2395_v56 = vmul.f32 %v2333_v30, %v802_v51  ;;  %v751_v39 = vperm.slane %v735_v10, 0 }
 0x10c   : > { %v953_v22 = vadd.f32 %v952_v1, %v2322_v28  ;;  %v1023_v41 = vadd.f32 %v1022_v8, %v2293_v40  ;;  %v1267_v47 = vmin.f32 %v1265_v16, %v1266_v5  ;;  %v995_v4 = vmul.f32 %v922_v26, %v922_v26  ;;  %v664_v28 = vpop.f32.mrf.mxu3 }
 0x10d   : > { %v1114_v32 = vrot.slane %v1113_v38, 2  ;;  %v1146_v36 = vmax.f32 %v2348_v35, %v2395_v56  ;;  %v1300_v23 = vmin.f32 %v2348_v35, %v2395_v56  ;;  %v793_v18 = vadd.f32 %v751_v39, %v639_v58 }
 0x10e   : > { %v954_v20 = vadd.f32 %v953_v22, %v922_v26  ;;  %v1024_v30 = vadd.f32 %v1023_v41, %v2303_v57  ;;  %v1268_v48 = vrot.slane %v1267_v47, 2  ;;  %v756_v42 = vperm.slane %v740_v60, 0 }
 0x10f   : > { %v1115_v55 = vmax.f32 %v1113_v38, %v1114_v32  ;;  %v1147_v40 = vrot.slane %v1146_v36, 4  ;;  %v1301_v59 = vrot.slane %v1300_v23, 4  ;;  %v923_v19 = vmul.f32 %v2224_v34, %v793_v18 }
 0x110   : > { %v1025_v43 = vadd.f32 %v1024_v30, %v2341_v63  ;;  %v1269_v54 = vmin.f32 %v1267_v47, %v1268_v48  ;;  %v794_v33 = vadd.f32 %v751_v39, %v641_v7  ;;  %v803_v27 = vadd.f32 %v756_v42, %v664_v28  ;;  %v901_v63 = vpop.permute.xlu0 %900 }
 0x111   : > { %v1116_v24 = vrot.slane %v1115_v55, 1  ;;  %v1148_v11 = vmax.f32 %v1146_v36, %v1147_v40  ;;  %v1302_v25 = vmin.f32 %v1300_v23, %v1301_v59  ;;  %v955_v57 = vadd.f32 %v954_v20, %v923_v19 }
 0x112   : > { %v1026_v26 = vadd.f32 %v1025_v43, %v995_v4  ;;  %v1270_v6 = vrot.slane %v1269_v54, 1  ;;  %v996_v45 = vmul.f32 %v923_v19, %v923_v19  ;;  %v2409_v58 = vmul.f32 %v2348_v35, %v2348_v35 }
 0x113   : > { %v1117_v12 = vmax.f32 %v1115_v55, %v1116_v24  ;;  %v1149_v21 = vrot.slane %v1148_v11, 2  ;;  %v1303_v49 = vrot.slane %v1302_v25, 2  ;;  %v2413_v50 = vmul.f32 %v2395_v56, %v2395_v56 }
 0x114   : > { %v1271_v37 = vmin.f32 %v1269_v54, %v1270_v6  ;;  %v1027_v61 = vadd.f32 %v1026_v26, %v996_v45  ;;  %v924_v16 = vmul.f32 %v2224_v34, %v794_v33  ;;  %v2420_v10 = vmul.f32 %v901_v63, %v803_v27  ;;  %v666_v32 = vpop.f32.mrf.mxu3  ;;  %v2600_v27 = vld [vmem:[#allocation9_spill] sm:$0xff] }
 0x115   : > { %v2418_v17 = vsel %vm1176_vm1, %v1117_v12, %v2329_v14  ;;  %v1150_v9 = vmax.f32 %v1148_v11, %v1149_v21  ;;  %v1304_v51 = vmin.f32 %v1302_v25, %v1303_v49  ;;  %v1000_v5 = vmul.f32 %v2226_v52, %v2226_v52  ;;  %v2602_v21 = vld [vmem:[#allocation13_spill] sm:$0xff] }
 0x116   : > { %v2424_v15 = vsel %vm1176_vm1, %v1271_v37, %v2337_v31  ;;  %v956_v1 = vadd.f32 %v955_v57, %v924_v16  ;;  %v997_v8 = vmul.f32 %v924_v16, %v924_v16  ;;  %v1118_v34 = vmax.f32 %v923_v19, %v924_v16 }
 0x117   : > { %v1151_v38 = vrot.slane %v1150_v9, 1  ;;  %v1305_v39 = vrot.slane %v1304_v51, 1  ;;  %v2598_v22 = vrot.slane %v2268_v0, 2  ;;  %v1272_v60 = vmin.f32 %v923_v19, %v924_v16  ;;  %v2603_v16 = vld [vmem:[#allocation10_spill] sm:$0xff] }
 0x118   : > { %v957_v41 = vadd.f32 %v956_v1, %v2245_v62  ;;  %v1028_v47 = vadd.f32 %v1027_v61, %v997_v8  ;;  %v2599_v4 = vrot.slane %v2270_v3, 2  ;;  %v2437_v36 = vmul.f32 %v2420_v10, %v2420_v10  ;;  %v2604_v1 = vld [vmem:[#allocation14_spill] sm:$0xff] }
 0x119   : > { %v1136_v14 = vmax.f32 %v2268_v0, %v2598_v22  ;;  %v1001_v23 = vmul.f32 %v2228_v53, %v2228_v53  ;;  %v1119_v7 = vrot.slane %v1118_v34, 4  ;;  %v1273_v30 = vrot.slane %v1272_v60, 4 }
 0x11a   : > { %v1290_v31 = vmin.f32 %v2270_v3, %v2599_v4  ;;  %v958_v0 = vadd.f32 %v957_v41, %v2247_v2  ;;  %v1029_v62 = vadd.f32 %v1028_v47, %v2274_v13  ;;  %v1152_v18 = vmax.f32 %v1150_v9, %v1151_v38  ;;  %v2606_v4 = vld [vmem:[#allocation16_spill] sm:$0xff] }
 0x11b   : > { %v1137_v20 = vrot.slane %v1136_v14, 1  ;;  %v1120_v28 = vmax.f32 %v1118_v34, %v1119_v7  ;;  %v804_v55 = vadd.f32 %v756_v42, %v666_v32  ;;  %v2443_v3 = vmin.f32 %v1304_v51, %v1305_v39 }
 0x11c   : > { %v1291_v48 = vrot.slane %v1290_v31, 1  ;;  %v959_v40 = vadd.f32 %v958_v0, %v2226_v52  ;;  %v1030_v59 = vadd.f32 %v1029_v62, %v2278_v44  ;;  %v1274_v43 = vmin.f32 %v1272_v60, %v1273_v30  ;;  %v2607_v62 = vld [vmem:[#allocation17_spill] sm:$0xff] }
 0x11d   : > { %v1939_v54 = vmov 0.0   ;;  %v1121_v19 = vrot.slane %v1120_v28, 2  ;;  %v1138_v33 = vmax.f32 %v1136_v14, %v1137_v20  ;;  %v934_v2 = vmul.f32 %v901_v63, %v804_v55 }
 0x11e   : > { %385 = vst [vmem:[#allocation2] sm:$0x1] %v1939_v54  ;;  %v1292_v24 = vmin.f32 %v1290_v31, %v1291_v48  ;;  %v960_v13 = vadd.f32 %v959_v40, %v2228_v53  ;;  %v1031_v11 = vadd.f32 %v1030_v59, %v1000_v5  ;;  %v1275_v25 = vrot.slane %v1274_v43, 2  ;;  %v2605_v5 = vld [vmem:[#allocation15_spill] sm:$0xff]  ;;  %v2608_v40 = vld [vmem:[#allocation18_spill] sm:$0xff] }
 0x11f   : > { %386 = vst [vmem:[#allocation3] sm:$0x1] %v1939_v54  ;;  %v2601_v42 = vrot.slane %v2600_v27, 4  ;;  %v1122_v6 = vmax.f32 %v1120_v28, %v1121_v19  ;;  %v1007_v52 = vmul.f32 %v934_v2, %v934_v2  ;;  %v1153_v44 = vmax.f32 %v2420_v10, %v934_v2 }
 0x120   : > { %v1307_v57 = vmin.f32 %v2420_v10, %v934_v2  ;;  %v1032_v45 = vadd.f32 %v1031_v11, %v1001_v23  ;;  %v1276_v12 = vmin.f32 %v1274_v43, %v1275_v25  ;;  %v961_v49 = vadd.f32 %v960_v13, %v2602_v21  ;;  %v2609_v11 = vld [vmem:[#allocation19_spill] sm:$0xff] }
 0x121   : > { %v1092_v26 = vmax.f32 %v2600_v27, %v2601_v42  ;;  %v1123_v37 = vrot.slane %v1122_v6, 1  ;;  %v1154_v53 = vrot.slane %v1153_v44, 4  ;;  %v1098_v9 = vrot.slane %v2603_v16, 4  ;;  %v2610_v27 = vld [vmem:[#allocation20_spill] sm:$0xff] }
 0x122   : > { %v1308_v61 = vrot.slane %v1307_v57, 4  ;;  %v1277_v51 = vrot.slane %v1276_v12, 1  ;;  %v962_v8 = vadd.f32 %v961_v49, %v2604_v1  ;;  %v1033_v38 = vadd.f32 %v1032_v45, %v2605_v5 }
 0x123   : > { %v1093_v63 = vrot.slane %v1092_v26, 2  ;;  %v1124_v34 = vmax.f32 %v1122_v6, %v1123_v37  ;;  %v1155_v22 = vmax.f32 %v1153_v44, %v1154_v53  ;;  %v1099_v41 = vmax.f32 %v2603_v16, %v1098_v9 }
 0x124   : > { %v1309_v14 = vmin.f32 %v1307_v57, %v1308_v61  ;;  %v1278_v47 = vmin.f32 %v1276_v12, %v1277_v51  ;;  %v963_v60 = vadd.f32 %v962_v8, %v2348_v35  ;;  %v1034_v31 = vadd.f32 %v1033_v38, %v2606_v4  ;;  %v2611_v57 = vld [vmem:[#allocation11_spill] sm:$0xff] }
 0x125   : > { %v1094_v39 = vmax.f32 %v1092_v26, %v1093_v63  ;;  %v1191_v23 = vsel %vm1178_vm2, %v1124_v34, %v2418_v17  ;;  %v1156_v7 = vrot.slane %v1155_v22, 2  ;;  %v1100_v0 = vrot.slane %v1099_v41, 2  ;;  %v2613_v63 = vld [vmem:[#allocation12_spill] sm:$0xff] }
 0x126   : > { %v1310_v20 = vrot.slane %v1309_v14, 2  ;;  %v1192_v30 = vsel %vm1180_vm3, %v2607_v62, %v1191_v23  ;;  %v1338_v48 = vsel %vm1178_vm2, %v1278_v47, %v2424_v15  ;;  %v964_v28 = vadd.f32 %v963_v60, %v2395_v56  ;;  %v935_v4 = vld [vmem:[#allocation2] sm:$0x1] }
 0x127   : > { %v1095_v32 = vrot.slane %v1094_v39, 1  ;;  %v1035_v35 = vadd.f32 %v1034_v31, %v2409_v58  ;;  %v1193_v55 = vsel %vm1182_vm4, %v1138_v33, %v1192_v30  ;;  %v1339_v59 = vsel %vm1180_vm3, %v2608_v40, %v1338_v48 }
 0x128   : > { %v1157_v43 = vmax.f32 %v1155_v22, %v1156_v7  ;;  %v1311_v17 = vmin.f32 %v1309_v14, %v1310_v20  ;;  %v1340_v54 = vsel %vm1182_vm4, %v1292_v24, %v1339_v59  ;;  %v965_v19 = vadd.f32 %v964_v28, %v2420_v10  ;;  %v975_v20 = vld [vmem:[#allocation3] sm:$0x1] }
 0x129   : > { %v1036_v13 = vadd.f32 %v1035_v35, %v2413_v50  ;;  %v1194_v15 = vsel %vm1184_vm5, %v2609_v11, %v1193_v55  ;;  %v1341_v33 = vsel %vm1184_vm5, %v2610_v27, %v1340_v54  ;;  %v1096_v6 = vmax.f32 %v1094_v39, %v1095_v32 }
 0x12a   : > { %v1158_v25 = vrot.slane %v1157_v43, 1  ;;  %v1195_v56 = vsel %vm1186_vm6, %v1152_v18, %v1194_v15  ;;  %v1312_v58 = vrot.slane %v1311_v17, 1  ;;  %v966_v42 = vadd.f32 %v965_v19, %v934_v2 }
 0x12b   : > { %v1037_v26 = vadd.f32 %v1036_v13, %v2437_v36  ;;  %v1342_v24 = vsel %vm1186_vm6, %v2443_v3, %v1341_v33  ;;  %v1101_v50 = vmax.f32 %v1099_v41, %v1100_v0  ;;  %v2612_v45 = vrot.slane %v2611_v57, 4 }
 0x12c   : > { %v1159_v10 = vmax.f32 %v1157_v43, %v1158_v25  ;;  %v1313_v44 = vmin.f32 %v1311_v17, %v1312_v58  ;;  %v967_v21 = vrot.slane %v966_v42, 4  ;;  %v1187_v49 = vsel %vm1186_vm6, %v1096_v6, %v2381_v46 }
 0x12d   : > { %v1246_v12 = vmin.f32 %v2611_v57, %v2612_v45  ;;  %v1038_v18 = vadd.f32 %v1037_v26, %v1007_v52  ;;  %v1252_v2 = vrot.slane %v2613_v63, 4  ;;  %v1102_v37 = vrot.slane %v1101_v50, 1 }
 0x12e   : > { %v2489_v36 = vsel %vm1188_vm7, %v1159_v10, %v1195_v56  ;;  %v2492_v3 = vsel %vm1188_vm7, %v1313_v44, %v1342_v24  ;;  %v968_v61 = vadd.f32 %v967_v21, %v966_v42 }
 0x12f   : > { %v1247_v53 = vrot.slane %v1246_v12, 2  ;;  %v1039_v16 = vrot.slane %v1038_v18, 4  ;;  %v1253_v9 = vmin.f32 %v2613_v63, %v1252_v2  ;;  %v1103_v51 = vmax.f32 %v1101_v50, %v1102_v37 }
 0x130   : > { %v969_v52 = vrot.slane %v968_v61, 2 }
 0x131   : > { %v1248_v1 = vmin.f32 %v1246_v12, %v1247_v53  ;;  %v1040_v8 = vadd.f32 %v1039_v16, %v1038_v18  ;;  %v1254_v5 = vrot.slane %v1253_v9, 2  ;;  %v2496_v46 = vsel %vm1188_vm7, %v1103_v51, %v1187_v49 }
 0x132   : > { %v970_v39 = vadd.f32 %v969_v52, %v968_v61 }
 0x133   : > { %v1249_v38 = vrot.slane %v1248_v1, 1  ;;  %v1041_v34 = vrot.slane %v1040_v8, 2  ;;  %v1255_v22 = vmin.f32 %v1253_v9, %v1254_v5 }
 0x134   : > { %v971_v41 = vrot.slane %v970_v39, 1 }
 0x135   : > { %v1250_v14 = vmin.f32 %v1248_v1, %v1249_v38  ;;  %v1042_v47 = vadd.f32 %v1041_v34, %v1040_v8  ;;  %v1256_v60 = vrot.slane %v1255_v22, 1 }
 0x136   : > { %v972_v32 = vadd.f32 %v971_v41, %v970_v39 }
 0x137   : > { %v1335_v31 = vsel %vm1186_vm6, %v1250_v14, %v2392_v29  ;;  %v1043_v23 = vrot.slane %v1042_v47, 1  ;;  %v1257_v7 = vmin.f32 %v1255_v22, %v1256_v60  ;;  %v1353_v29 = vlaneseq }
 0x138   : > { %v973_v0 = vadd.f32 %v972_v32, %v935_v4 }
 0x139   : > { %v1044_v62 = vadd.f32 %v1043_v23, %v1042_v47  ;;  %v2501_v30 = vsel %vm1188_vm7, %v1257_v7, %v1335_v31  ;;  %v2503_v55 = vand.u32 127, %v1353_v29 }
 0x13a   : > { %974 = vst [vmem:[#allocation2] sm:$0x1] %v973_v0 }
 0x13b   : > { %v1045_v48 = vadd.f32 %v1044_v62, %v975_v20  ;;  %v1359_v40 = vand.u32 1, %v2503_v55  ;;  %v1367_v25 = vand.u32 2, %v2503_v55  ;;  %v1375_v10 = vand.u32 4, %v2503_v55 }
 0x13c   : > { %v1383_v63 = vand.u32 8, %v2503_v55  ;;  %v1391_v52 = vand.u32 16, %v2503_v55 }
 0x13d   : > { %1046 = vst [vmem:[#allocation3] sm:$0x1] %v1045_v48  ;;  %vm1360_vm8 = vcmp.eq.s32.totalorder %v1359_v40, 0  ;;  %vm1368_vm9 = vcmp.eq.s32.totalorder %v1367_v25, 0  ;;  %vm1376_vm10 = vcmp.eq.s32.totalorder %v1375_v10, 0 }
 0x13e   : > { %vm1384_vm11 = vcmp.eq.s32.totalorder %v1383_v63, 0  ;;  %vm1392_vm12 = vcmp.eq.s32.totalorder %v1391_v52, 0  ;;  %v1444_v40 = vld [vmem:[%s2571_s6] sm:$0x1] }
 0x141   : > { %v1352_v28 = vld [vmem:[#allocation2] sm:$0x1] }
 0x142   : > { %1357 = vrot.lane.b32.xlu2 %v1352_v28, %s1940_s19  ;;  %1355 = vrot.lane.b32.xlu1 %v1352_v28, %s1941_s18 }
 0x144   : > { %v1396_v35 = vld [vmem:[#allocation3] sm:$0x1] }
 0x145   : > { %1397 = vrot.lane.b32.xlu0 %v1396_v35, %s1941_s18 }
 0x14a   : > { %1399 = vrot.lane.b32.xlu1 %v1396_v35, %s1940_s19 }
 0x19c   : > { %v1358_v59 = vpop.permute.xlu2 %1357 }
 0x1b4   : > { %v1356_v43 = vpop.permute.xlu1 %1355 }
 0x1b5   : > { %v1361_v17 = vsel %vm1360_vm8, %v1356_v43, %v1358_v59  ;;  %v2614_v43 = vmov 0  }
 0x1b6   : > { %v1362_v54 = vadd.f32 %v1361_v17, %v1352_v28  ;;  %v1442_v28 = vld [vmem:[%s2570_s5] sm:$0x1] }
 0x1b7   : > { %v1398_v19 = vpop.permute.xlu0 %1397 }
 0x1b8   : > { %1365 = vrot.lane.b32.xlu0 %v1362_v54, %s1942_s21  ;;  %1363 = vrot.lane.b32.xlu2 %v1362_v54, %s1943_s22 }
 0x1bc   : > { %v1400_v13 = vpop.permute.xlu1 %1399 }
 0x1bd   : > { %v1401_v11 = vsel %vm1360_vm8, %v1398_v19, %v1400_v13 }
 0x1be   : > { %v1402_v15 = vadd.f32 %v1401_v11, %v1396_v35 }
 0x1c0   : > { %1405 = vrot.lane.b32.xlu2 %v1402_v15, %s1942_s21  ;;  %1403 = vrot.lane.b32.xlu1 %v1402_v15, %s1943_s22  ;;  %s1615_s21 = sshll.u32 %s346_s20, 4  ;;  %s1772_s22 = sshll.u32 %s1928_s27, 4 }
 0x212   : > { %v1364_v56 = vpop.permute.xlu2 %1363 }
 0x21a   : > { %v1406_v42 = vpop.permute.xlu2 %1405 }
 0x22a   : > { %v1366_v58 = vpop.permute.xlu0 %1365 }
 0x22b   : > { %v1369_v27 = vsel %vm1368_vm9, %v1364_v56, %v1366_v58 }
 0x22c   : > { %v1370_v33 = vadd.f32 %v1369_v27, %v1362_v54 }
 0x22e   : > { %1371 = vrot.lane.b32.xlu0 %v1370_v33, %s1944_s30  ;;  %1373 = vrot.lane.b32.xlu1 %v1370_v33, %s1945_s8 }
 0x232   : > { %v1404_v26 = vpop.permute.xlu1 %1403 }
 0x233   : > { %v1407_v24 = vsel %vm1368_vm9, %v1404_v26, %v1406_v42 }
 0x234   : > { %v1408_v6 = vadd.f32 %v1407_v24, %v1402_v15 }
 0x236   : > { %1411 = vrot.lane.b32.xlu0 %v1408_v6, %s1945_s8  ;;  %1409 = vrot.lane.b32.xlu2 %v1408_v6, %s1944_s30 }
 0x290   : > { %v1410_v12 = vpop.permute.xlu2 %1409 }
 0x2a0   : > { %v1372_v44 = vpop.permute.xlu0 %1371  ;;  %v1374_v50 = vpop.permute.xlu1 %1373 }
 0x2a1   : > { %v1377_v57 = vsel %vm1376_vm10, %v1372_v44, %v1374_v50 }
 0x2a2   : > { %v1378_v45 = vadd.f32 %v1377_v57, %v1370_v33 }
 0x2a4   : > { %1381 = vrot.lane.b32.xlu2 %v1378_v45, %s1946_s10  ;;  %1379 = vrot.lane.b32.xlu1 %v1378_v45, %s1947_s12 }
 0x2a8   : > { %v1412_v21 = vpop.permute.xlu0 %1411 }
 0x2a9   : > { %v1413_v18 = vsel %vm1376_vm10, %v1410_v12, %v1412_v21 }
 0x2aa   : > { %v1414_v49 = vadd.f32 %v1413_v18, %v1408_v6 }
 0x2ac   : > { %1415 = vrot.lane.b32.xlu0 %v1414_v49, %s1947_s12  ;;  %1417 = vrot.lane.b32.xlu1 %v1414_v49, %s1946_s10  ;;  %s1487_s12 = scalar_lea.hbm %s2572_s7, %s1772_s22  ;;  %s1878_s22 = scalar_lea.hbm %s2572_s7, 32 }
 0x2fe   : > { %v1382_v2 = vpop.permute.xlu2 %1381 }
 0x316   : > { %v1380_v37 = vpop.permute.xlu1 %1379 }
 0x317   : > { %v1385_v53 = vsel %vm1384_vm11, %v1380_v37, %v1382_v2 }
 0x318   : > { %v1386_v61 = vadd.f32 %v1385_v53, %v1378_v45 }
 0x31a   : > { %1389 = vrot.lane.b32.xlu0 %v1386_v61, %s1948_s15  ;;  %1387 = vrot.lane.b32.xlu2 %v1386_v61, %s1949_s23 }
 0x31e   : > { %v1416_v16 = vpop.permute.xlu0 %1415  ;;  %v1418_v9 = vpop.permute.xlu1 %1417 }
 0x31f   : > { %v1419_v51 = vsel %vm1384_vm11, %v1416_v16, %v1418_v9 }
 0x320   : > { %v1420_v1 = vadd.f32 %v1419_v51, %v1414_v49 }
 0x322   : > { %1423 = vrot.lane.b32.xlu2 %v1420_v1, %s1948_s15  ;;  %1421 = vrot.lane.b32.xlu1 %v1420_v1, %s1949_s23  ;;  %s348_s15 = scalar_lea.vmem [#allocation6], %s1615_s21  ;;  %s1490_s23 = sshll.u32 %s1487_s12, 4  ;;  %s1491_s23 = int_to_ptr.hbm [resolvable:$true] %s1490_s23 }
 0x323   : > { %s1488_s27 = sshll.u32 %s348_s15, 4  ;;  %s1872_s17 = sshra.s32 %s1491_s23, 4  ;;  %s1489_s27 = int_to_ptr.vmem [resolvable:$true] %s1488_s27  ;;  %s1873_s17 = int_to_ptr.hbm [resolvable:$true] %s1872_s17 }
 0x324   : > { %s1874_s19 = scalar_lea.hbm %s1873_s17, 16  ;;  %p1879_p1 = scmp.lt.s32.totalorder %s1873_s17, %s2572_s7 }
 0x325   : > { %p1875_p12 = scmp.ne.s32.totalorder %s1873_s17, %s1874_s19  ;;  %p1880_p2 = scmp.lt.s32.totalorder %s1878_s22, %s1874_s19 }
 0x327   : > { %p1876_p13 = pnand %p1875_p12, %p2031_p4  ;;  %p1881_p3 = por %p1880_p2, %p1879_p1 }
 0x329   : > { %p1877_p0 = pneg %p1876_p13 }
 0x32b   : > { %p1882_p5 = pnand %p1881_p3, %p1877_p0 }
 0x374   : > { %v1388_v8 = vpop.permute.xlu2 %1387 }
 0x37c   : > { %v1424_v34 = vpop.permute.xlu2 %1423 }
 0x38c   : > { %v1390_v5 = vpop.permute.xlu0 %1389 }
 0x38d   : > { %v1393_v38 = vsel %vm1392_vm12, %v1388_v8, %v1390_v5 }
 0x38e   : > { %v1394_v39 = vadd.f32 %v1393_v38, %v1386_v61 }
 0x390   : > { %v1395_v22 = vmul.f32 0.00012207031, %v1394_v39 }
 0x392   : > { %v1428_v60 = vmul.f32 %v1395_v22, %v1395_v22 }
 0x394   : > { %v1422_v14 = vpop.permute.xlu1 %1421 }
 0x395   : > { %v1425_v41 = vsel %vm1392_vm12, %v1422_v14, %v1424_v34 }
 0x396   : > { %v1426_v47 = vadd.f32 %v1425_v41, %v1420_v1 }
 0x398   : > { %v1427_v4 = vmul.f32 0.00012207031, %v1426_v47 }
 0x39a   : > { %v1429_v31 = vsub.f32 %v1427_v4, %v1428_v60 }
 0x39c   : > { %v1430_v32 = vmax.f32 %v1429_v31, 0.0 }
 0x39e   : > { %v1431_v23 = vadd.f32 1e-05, %v1430_v32 }
 0x3a0   : > { %1856 = vrsqrt.f32 %v1431_v23  ;;  %vm1438_vm14 = vweird.f32 %v1431_v23 }
 0x3a6   : > { %v1857_v7 = vpop.eup %1856 }
 0x3a7   : > { %v1433_v20 = vmul.f32 %v1857_v7, %v1431_v23  ;;  %vm1439_vm13 = vweird.f32 %v1857_v7 }
 0x3a8   : > { %vm1440_vm15 = vmor %vm1438_vm14, %vm1439_vm13 }
 0x3a9   : > { %v1434_v0 = vmul.f32 %v1857_v7, %v1433_v20 }
 0x3ab   : > { %v1435_v62 = vmul.f32 0.5, %v1434_v0 }
 0x3ad   : > { %v1436_v48 = vsub.f32 1.5, %v1435_v62 }
 0x3af   : > { %v1437_v35 = vmul.f32 %v1857_v7, %v1436_v48 }
 0x3b1   : > { %v1441_v29 = vsel %vm1440_vm15, %v1857_v7, %v1437_v35 }
 0x3b2   : > { %v1443_v55 = vmul.f32 %v1442_v28, %v1441_v29 }
 0x3b4   : > { %v1445_v59 = vmul.f32 %v1443_v55, %v1395_v22  ;;  %vm1447_vm0 = vcmp.ge.f32.partialorder %v1443_v55, 0.0  ;;  %v1458_v13 = vperm.slane %v1443_v55, 0 }
 0x3b5   : > { %v1452_v17 = vsel %vm1447_vm0, 1, %v2614_v43 }
 0x3b6   : > { %v1453_v54 = vperm.slane %v1452_v17, 0  ;;  %v1446_v19 = vsub.f32 %v1444_v40, %v1445_v59 }
 0x3b8   : > { %vm1454_vm1 = vcmp.eq.s32.totalorder %v1453_v54, 1  ;;  %v1463_v58 = vperm.slane %v1446_v19, 0 }
 0x3b9   : > { %v1455_v11 = vsel %vm1454_vm1, %v2496_v46, %v2501_v30  ;;  %v1456_v15 = vsel %vm1454_vm1, %v2489_v36, %v2492_v3 }
 0x3ba   : > { %v1460_v25 = vmul.f32 %v1458_v13, %v1455_v11  ;;  %v1461_v56 = vmul.f32 %v1458_v13, %v1456_v15 }
 0x3bc   : > { %v1465_v27 = vadd.f32 %v1463_v58, %v1460_v25  ;;  %v1466_v33 = vadd.f32 %v1463_v58, %v1461_v56 }
 0x3be   : > { %vm1467_vm2 = vcmp.gt.f32.partialorder %v1465_v27, 0.0  ;;  %vm1468_vm3 = vcmp.gt.f32.partialorder %v1466_v33, 0.0  ;;  %v1469_v46 = vmul.f32 0.2, %v1465_v27  ;;  %v1470_v30 = vmul.f32 0.2, %v1466_v33 }
 0x3c0   : > { %v1471_v36 = vsel %vm1467_vm2, %v1465_v27, %v1469_v46  ;;  %v1472_v3 = vsel %vm1468_vm3, %v1466_v33, %v1470_v30 }
 0x3c1   : > { %1473 = vst [vmem:[%s348_s15] sm:$0xff] %v1471_v36 }
 0x3c2   : > { %1474 = vst [vmem:[%s348_s15 + $0x8] sm:$0xff] %v1472_v3 }
 0x3c3   : > { %1885 = shalt.err (!%p1882_p5)
}
 0x3c4   : > { %s1950_s20 = smov 128  }
 0x3c5   : > { %1785 = dma.vmem_to_hbm [thread:$0]  (%p2031_p4), %s1489_s27, 256, %s1491_s23, %s1476_s16, %s1950_s20, %s1950_s20, %s1946_s10  }
 0x3c6 PF: > { %p1791_p6 = scmp.ge.s32.totalorder %s1936_s29, 2  ;;  %s1505_s12 = sand.u32 1, %s1916_s24  }
 0x3c7   : > { %s1506_s15 = scalar_lea.sflag [#allocation7], %s1505_s12 }
 0x3c8   : > { %p1788_p7 = pnand %p1791_p6, %p2038_p8 }
 0x3ca   : > { %p1789_p9 = pneg %p1788_p7 }
 0x3cc   : > { %1911 = dma.done.wait (%p1789_p9), %s1506_s15, 256  }
 0x3cd   : > { %1913 = vsyncadd (%p1789_p9), %s1506_s15, 4294967040  ;;  %s20_s29 = sadd.s32 1, %s1936_s29   ;;  %s2615_s24 = smov %s1920_s25 }
 0x3ce   : > { %p17_p10 = scmp.ge.s32.totalorder %s20_s29, 4   ;;  %s2616_s25 = smov %s1924_s26 }
 0x3cf   : > { %s2617_s26 = smov %s2044_s14  ;;  %s2618_s27 = smov %s1932_s28 }
 0x3d0   : > { %s2619_s28 = smov %s2621_s9  ;;  %19 = sbr.rel (!%p17_p10) target bundleno = 4 (0x4), region = 99 }
 0x3d5   :  { %1512 = vsyncpa [#allocation7], 1 }
 0x3d6   :  { %1514 = vsyncpa [#allocation7 + $0x1], 1 }

</bundles_post_ra>
